<compile_context>
chip_gen: v6e
topology: v6e:2x2x1
jax: 0.10.0
libtpu: 0.0.40
codegen_flags: <defaults>
</compile_context>

<pallas_src>
import functools

import jax
import jax.numpy as jnp
from jax.experimental import pallas as pl
from jax.experimental.pallas import tpu as pltpu


def _layer_norm(t, gamma, beta, eps=1e-12):
    # Matches the repo's LayerNorm: mean / biased variance over d_model, eps=1e-12.
    mean = jnp.mean(t, axis=-1, keepdims=True)
    var = jnp.mean(jnp.square(t - mean), axis=-1, keepdims=True)  # unbiased=False
    return gamma * ((t - mean) * jax.lax.rsqrt(var + eps)) + beta


def encoder_layer_kernel(x_ref, bias_ref,
                         wqkv_ref, bqkv_ref, wc_ref, bc_ref,
                         g1_ref, be1_ref,
                         w1_ref, b1_ref, w2_ref, b2_ref,
                         g2_ref, be2_ref,
                         o_ref, *, n_head, dot_dtype):
    bb, S, D = x_ref.shape                      # one grid step == `bb` batch elements
    dh = D // n_head
    M = bb * S                                  # folded rows: fills the 256-wide MXU

    x = x_ref[...].astype(jnp.float32).reshape(M, D)     # residual path stays f32 (free reshape)
    bias = bias_ref[...].astype(jnp.float32)              # [bb, S, S] additive mask bias

    # ---- fused Q/K/V projection: one [M, D] x [D, 3D] MXU dot --------------------------
    # (softmax 1/sqrt(dh) scale is already folded into the Q half of wqkv/bqkv)
    qkv = jnp.dot(x.astype(dot_dtype), wqkv_ref[...],
                  preferred_element_type=jnp.float32) + bqkv_ref[...]   # [M, 3D], f32 acc

    # ---- multi-head attention, no stack/concat relayouts -------------------------------
    attn = jnp.zeros((M, D), jnp.float32)
    for h in range(n_head):                     # static loop, n_head = 4
        c = h * dh
        # lane slices + leading-dim split (free): [bb, S, dh]
        qh = qkv[:, c:c + dh].reshape(bb, S, dh).astype(dot_dtype)
        kh = qkv[:, D + c:D + c + dh].reshape(bb, S, dh).astype(dot_dtype)
        vh = qkv[:, 2 * D + c:2 * D + c + dh].reshape(bb, S, dh).astype(dot_dtype)

        s = jnp.einsum("bqd,bkd->bqk", qh, kh,
                       preferred_element_type=jnp.float32) + bias       # [bb, S, S]
        s = s - jnp.max(s, axis=-1, keepdims=True)
        p = jnp.exp(s)
        p = p * pl.reciprocal(jnp.sum(p, axis=-1, keepdims=True), approx=True)  # EUP slot

        ctx = jnp.einsum("bqk,bkd->bqd", p.astype(dot_dtype), vh,
                         preferred_element_type=jnp.float32)            # [bb, S, dh]
        # accumulate output projection head-by-head: ctx_h @ wc[h*dh:(h+1)*dh, :]
        attn = attn + jnp.dot(ctx.reshape(M, dh).astype(dot_dtype), wc_ref[h],
                              preferred_element_type=jnp.float32)
    attn = attn + bc_ref[...]

    # dropout1 == identity (inference)
    x1 = _layer_norm(attn + x, g1_ref[...], be1_ref[...])

    # ---- position-wise feed forward (M = bb*S rows) -------------------------------------
    h1 = jnp.dot(x1.astype(dot_dtype), w1_ref[...],
                 preferred_element_type=jnp.float32) + b1_ref[...]
    h1 = jnp.maximum(h1, 0.0)
    # ffn internal dropout == identity (inference)
    h2 = jnp.dot(h1.astype(dot_dtype), w2_ref[...],
                 preferred_element_type=jnp.float32) + b2_ref[...]

    # dropout2 == identity (inference)
    x2 = _layer_norm(h2 + x1, g2_ref[...], be2_ref[...])
    o_ref[...] = x2.reshape(bb, S, D).astype(o_ref.dtype)


def _vmem_limit_bytes(bb, S, D, H, dot_dtype):
    """Scoped-VMEM budget: double-buffered act blocks + single-buffered weights + temps."""
    f32 = 4
    wsz = jnp.dtype(dot_dtype).itemsize
    io_blocks = 2 * f32 * bb * (2 * S * D + S * S)            # x, out, bias (double-buffered)
    weights = wsz * (4 * D * D + 2 * D * H)                   # wqkv, wc, w1, w2 (Buffered(1))
    vectors = 2 * f32 * (9 * D + H)                           # biases + LN params
    scratch = f32 * bb * S * (3 * D + 2 * S + 4 * D + 2 * H)  # qkv, scores/probs, acts, ffn
    est = io_blocks + weights + vectors + 2 * scratch         # 2x slack for relayouts/spills
    try:
        cap = int(pltpu.get_tpu_info().vmem_capacity_bytes)
    except Exception:
        cap = 64 * 2 ** 20                                    # conservative (v7x-sized) fallback
    ceiling = (3 * cap) // 4                                  # ~48 MiB on v7x, ~96 MiB on v5e/v6e
    return int(min(ceiling, max(32 * 2 ** 20, 2 * est)))


def encoder_layer(x, mask, params, *, n_head, dot_dtype=jnp.bfloat16, batch_block=2):
    B, S, D = x.shape
    H = params["w1"].shape[1]
    assert D % n_head == 0
    dh = D // n_head
    if B % batch_block != 0:
        batch_block = 1
    bb = batch_block

    scale = 1.0 / (dh ** 0.5)
    # Fused QKV weights with the softmax scale folded into the Q half; matmul weights are
    # cast to dot_dtype (bf16 default on all generations); bias/LN params stay f32.
    wqkv = jnp.concatenate([params["wq"] * scale, params["wk"], params["wv"]],
                           axis=1).astype(dot_dtype)
    bqkv = jnp.concatenate([params["bq"] * scale, params["bk"], params["bv"]],
                           axis=1).astype(jnp.float32)
    f32 = lambda a: a.astype(jnp.float32)
    wc_r = params["wc"].reshape(n_head, dh, D).astype(dot_dtype)   # per-head out-proj blocks
    weight_args = [wqkv, bqkv, wc_r, f32(params["bc"]),
                   f32(params["g1"]), f32(params["be1"]),
                   params["w1"].astype(dot_dtype), f32(params["b1"]),
                   params["w2"].astype(dot_dtype), f32(params["b2"]),
                   f32(params["g2"]), f32(params["be2"])]

    # additive attention bias: 0 where mask != 0, -1e4 where mask == 0
    bias = jnp.where(mask == 0, jnp.float32(-10000.0), jnp.float32(0.0))

    def weight_spec(shape):
        n = len(shape)
        return pl.BlockSpec(shape, lambda b, _n=n: (0,) * _n,
                            pipeline_mode=pl.Buffered(1))   # constant index -> single buffer

    grid_spec = pltpu.PrefetchScalarGridSpec(
        num_scalar_prefetch=0,
        grid=(B // bb,),
        in_specs=[pl.BlockSpec((bb, S, D), lambda b: (b, 0, 0)),
                  pl.BlockSpec((bb, S, S), lambda b: (b, 0, 0))]
                 + [weight_spec(a.shape) for a in weight_args],
        out_specs=pl.BlockSpec((bb, S, D), lambda b: (b, 0, 0)),
    )

    return pl.pallas_call(
        functools.partial(encoder_layer_kernel, n_head=n_head, dot_dtype=dot_dtype),
        out_shape=jax.ShapeDtypeStruct((B, S, D), x.dtype),
        grid_spec=grid_spec,
        compiler_params=pltpu.CompilerParams(
            dimension_semantics=("parallel",),    # batch-block axis -> both TCs on v7x
            vmem_limit_bytes=_vmem_limit_bytes(bb, S, D, H, dot_dtype)),
    )(x, bias, *weight_args)


def encoder_layer_reference(x, mask, params, *, n_head):
    """Pure-JAX reference mirroring the PyTorch module (HIGHEST matmul precision)."""
    B, S, D = x.shape
    dh = D // n_head
    prec = jax.lax.Precision.HIGHEST

    def lin(t, w, b):
        return jnp.einsum("bsd,de->bse", t, w, precision=prec) + b

    q = lin(x, params["wq"], params["bq"])
    k = lin(x, params["wk"], params["bk"])
    v = lin(x, params["wv"], params["bv"])
    split = lambda t: t.reshape(B, S, n_head, dh).transpose(0, 2, 1, 3)
    qh, kh, vh = split(q), split(k), split(v)
    score = jnp.einsum("bhqd,bhkd->bhqk", qh, kh, precision=prec) / jnp.sqrt(jnp.float32(dh))
    score = jnp.where(mask[:, None, :, :] == 0, -10000.0, score)
    p = jax.nn.softmax(score, axis=-1)
    o = jnp.einsum("bhqk,bhkd->bhqd", p, vh, precision=prec)
    o = o.transpose(0, 2, 1, 3).reshape(B, S, D)
    attn = lin(o, params["wc"], params["bc"])

    def ln(t, g, b):
        m = jnp.mean(t, axis=-1, keepdims=True)
        var = jnp.mean((t - m) ** 2, axis=-1, keepdims=True)
        return g * ((t - m) / jnp.sqrt(var + 1e-12)) + b

    x1 = ln(attn + x, params["g1"], params["be1"])
    h = jax.nn.relu(lin(x1, params["w1"], params["b1"]))
    h = lin(h, params["w2"], params["b2"])
    return ln(h + x1, params["g2"], params["be2"])


def make_params(key, d_model, ffn_hidden):
    ks = jax.random.split(key, 8)
    s = 0.02
    return {
        "wq": jax.random.normal(ks[0], (d_model, d_model), jnp.float32) * s,
        "wk": jax.random.normal(ks[1], (d_model, d_model), jnp.float32) * s,
        "wv": jax.random.normal(ks[2], (d_model, d_model), jnp.float32) * s,
        "wc": jax.random.normal(ks[3], (d_model, d_model), jnp.float32) * s,
        "bq": jax.random.normal(ks[4], (1, d_model), jnp.float32) * s,
        "bk": jax.random.normal(ks[5], (1, d_model), jnp.float32) * s,
        "bv": jax.random.normal(ks[6], (1, d_model), jnp.float32) * s,
        "bc": jnp.zeros((1, d_model), jnp.float32),
        "g1": jnp.ones((1, d_model), jnp.float32),
        "be1": jnp.zeros((1, d_model), jnp.float32),
        "w1": jax.random.normal(ks[7], (d_model, ffn_hidden), jnp.float32) * s,
        "b1": jnp.zeros((1, ffn_hidden), jnp.float32),
        "w2": jax.random.normal(ks[0], (ffn_hidden, d_model), jnp.float32) * s,
        "b2": jnp.zeros((1, d_model), jnp.float32),
        "g2": jnp.ones((1, d_model), jnp.float32),
        "be2": jnp.zeros((1, d_model), jnp.float32),
    }


if __name__ == "__main__":
    # Small but TPU-aligned shapes: S, D multiples of (8,128); dh = 32.
    # B=4 with batch_block=2 -> M=256 matmuls and a grid of 2 (both v7x TCs busy).
    B, S, D, n_head, ffn_hidden = 4, 128, 128, 4, 256

    key = jax.random.PRNGKey(0)
    kx, kp = jax.random.split(key)
    x = jax.random.normal(kx, (B, S, D), jnp.float32)

    # padding mask: per-batch valid key lengths (last positions masked out)
    valid_len = jnp.array([S, S - 32, S - 64, S])
    col = jnp.arange(S)[None, None, :]                    # [1, 1, S]
    mask = (col < valid_len[:, None, None]).astype(jnp.float32)
    mask = jnp.broadcast_to(mask, (B, S, S))              # [B, S, S]

    params = make_params(kp, D, ffn_hidden)
    ref = encoder_layer_reference(x, mask, params, n_head=n_head)

    # f32 MXU inputs (bit-closest path).
    out_f32 = jax.block_until_ready(
        encoder_layer(x, mask, params, n_head=n_head, dot_dtype=jnp.float32))
    assert out_f32.shape == (B, S, D)
    assert jnp.allclose(out_f32, ref, rtol=5e-3, atol=5e-3), "f32 kernel mismatch vs reference"

    # bf16 MXU inputs (default; f32 accumulation / softmax / LayerNorm / residuals).
    out_bf16 = jax.block_until_ready(encoder_layer(x, mask, params, n_head=n_head))
    assert out_bf16.shape == (B, S, D)
    assert jnp.allclose(out_bf16, ref, rtol=5e-2, atol=5e-2), "bf16 kernel mismatch vs reference"

    print("KERNEL_OK")
</pallas_src>

<mosaic_0001>
module attributes {stable_mosaic.version = 11 : i64} {
  func.func @encoder_layer_kernel(%arg0: i32, %arg1: memref<2x128x128xf32, #tpu.memory_space<vmem>>, %arg2: memref<2x128x128xf32, #tpu.memory_space<vmem>>, %arg3: memref<128x384xf32, #tpu.memory_space<vmem>>, %arg4: memref<1x384xf32, #tpu.memory_space<vmem>>, %arg5: memref<4x32x128xf32, #tpu.memory_space<vmem>>, %arg6: memref<1x128xf32, #tpu.memory_space<vmem>>, %arg7: memref<1x128xf32, #tpu.memory_space<vmem>>, %arg8: memref<1x128xf32, #tpu.memory_space<vmem>>, %arg9: memref<128x256xf32, #tpu.memory_space<vmem>>, %arg10: memref<1x256xf32, #tpu.memory_space<vmem>>, %arg11: memref<256x128xf32, #tpu.memory_space<vmem>>, %arg12: memref<1x128xf32, #tpu.memory_space<vmem>>, %arg13: memref<1x128xf32, #tpu.memory_space<vmem>>, %arg14: memref<1x128xf32, #tpu.memory_space<vmem>>, %arg15: memref<2x128x128xf32, #tpu.memory_space<vmem>>) attributes {dimension_semantics = [#tpu.dimension_semantics<parallel>], iteration_bounds = array<i64: 2>, scalar_prefetch = 0 : i64, scratch_operands = 0 : i64, tpu.core_type = #tpu.core_type<tc>, window_params = [{transform_indices = @transform_0, window_bounds = array<i64: 2, 128, 128>}, {transform_indices = @transform_1, window_bounds = array<i64: 2, 128, 128>}, {pipeline_mode = #tpu.pipeline_mode<synchronous>, transform_indices = @transform_2, window_bounds = array<i64: 128, 384>}, {pipeline_mode = #tpu.pipeline_mode<synchronous>, transform_indices = @transform_3, window_bounds = array<i64: 1, 384>}, {pipeline_mode = #tpu.pipeline_mode<synchronous>, transform_indices = @transform_4, window_bounds = array<i64: 4, 32, 128>}, {pipeline_mode = #tpu.pipeline_mode<synchronous>, transform_indices = @transform_5, window_bounds = array<i64: 1, 128>}, {pipeline_mode = #tpu.pipeline_mode<synchronous>, transform_indices = @transform_6, window_bounds = array<i64: 1, 128>}, {pipeline_mode = #tpu.pipeline_mode<synchronous>, transform_indices = @transform_7, window_bounds = array<i64: 1, 128>}, {pipeline_mode = #tpu.pipeline_mode<synchronous>, transform_indices = @transform_8, window_bounds = array<i64: 128, 256>}, {pipeline_mode = #tpu.pipeline_mode<synchronous>, transform_indices = @transform_9, window_bounds = array<i64: 1, 256>}, {pipeline_mode = #tpu.pipeline_mode<synchronous>, transform_indices = @transform_10, window_bounds = array<i64: 256, 128>}, {pipeline_mode = #tpu.pipeline_mode<synchronous>, transform_indices = @transform_11, window_bounds = array<i64: 1, 128>}, {pipeline_mode = #tpu.pipeline_mode<synchronous>, transform_indices = @transform_12, window_bounds = array<i64: 1, 128>}, {pipeline_mode = #tpu.pipeline_mode<synchronous>, transform_indices = @transform_13, window_bounds = array<i64: 1, 128>}, {transform_indices = @transform_14, window_bounds = array<i64: 2, 128, 128>}]} {
    %c0 = arith.constant 0 : index
    %c0_0 = arith.constant 0 : index
    %c0_1 = arith.constant 0 : index
    %0 = vector.load %arg1[%c0, %c0_0, %c0_1] : memref<2x128x128xf32, #tpu.memory_space<vmem>>, vector<2x128x128xf32>
    %1 = vector.shape_cast %0 : vector<2x128x128xf32> to vector<256x128xf32>
    %c0_2 = arith.constant 0 : index
    %c0_3 = arith.constant 0 : index
    %c0_4 = arith.constant 0 : index
    %2 = vector.load %arg2[%c0_2, %c0_3, %c0_4] : memref<2x128x128xf32, #tpu.memory_space<vmem>>, vector<2x128x128xf32>
    %c0_5 = arith.constant 0 : index
    %c0_6 = arith.constant 0 : index
    %3 = vector.load %arg3[%c0_5, %c0_6] : memref<128x384xf32, #tpu.memory_space<vmem>>, vector<128x384xf32>
    %cst = arith.constant dense<0.000000e+00> : vector<256x384xf32>
    %4 = tpu.matmul %1, %3, %cst {dimension_numbers = #tpu.dot_dimension_numbers<[1], [0], [0], [1], [0, 0, 1, 1], [], []>} : vector<256x128xf32>, vector<128x384xf32>, vector<256x384xf32> -> vector<256x384xf32>
    %c0_7 = arith.constant 0 : index
    %c0_8 = arith.constant 0 : index
    %5 = vector.load %arg4[%c0_7, %c0_8] : memref<1x384xf32, #tpu.memory_space<vmem>>, vector<1x384xf32>
    %6 = vector.broadcast %5 : vector<1x384xf32> to vector<256x384xf32>
    %7 = arith.addf %4, %6 : vector<256x384xf32>
    %cst_9 = arith.constant 0.000000e+00 : f32
    %8 = vector.broadcast %cst_9 : f32 to vector<256x128xf32>
    %9 = vector.extract_strided_slice %7 {offsets = [0, 0], sizes = [256, 32], strides = [1, 1]} : vector<256x384xf32> to vector<256x32xf32>
    %10 = vector.shape_cast %9 : vector<256x32xf32> to vector<2x128x32xf32>
    %11 = vector.extract_strided_slice %7 {offsets = [0, 128], sizes = [256, 32], strides = [1, 1]} : vector<256x384xf32> to vector<256x32xf32>
    %12 = vector.shape_cast %11 : vector<256x32xf32> to vector<2x128x32xf32>
    %13 = vector.extract_strided_slice %7 {offsets = [0, 256], sizes = [256, 32], strides = [1, 1]} : vector<256x384xf32> to vector<256x32xf32>
    %14 = vector.shape_cast %13 : vector<256x32xf32> to vector<2x128x32xf32>
    "tpu.trace_start"() <{level = 10 : i32, message = "bqd,bkd->bqk"}> : () -> ()
    %cst_10 = arith.constant dense<0.000000e+00> : vector<2x128x128xf32>
    %15 = tpu.matmul %10, %12, %cst_10 {dimension_numbers = #tpu.dot_dimension_numbers<[2], [2], [1], [1], [0, 0, 0, 1, 1, 1], [0], [0]>} : vector<2x128x32xf32>, vector<2x128x32xf32>, vector<2x128x128xf32> -> vector<2x128x128xf32>
    "tpu.trace_stop"() : () -> ()
    %16 = arith.addf %15, %2 : vector<2x128x128xf32>
    %cst_11 = arith.constant dense<0xFF800000> : vector<2x128xf32>
    %17 = vector.multi_reduction <maximumf>, %16, %cst_11 [2] : vector<2x128x128xf32> to vector<2x128xf32>
    %18 = vector.shape_cast %17 : vector<2x128xf32> to vector<2x128x1xf32>
    %19 = vector.broadcast %18 : vector<2x128x1xf32> to vector<2x128x128xf32>
    %20 = arith.subf %16, %19 : vector<2x128x128xf32>
    %21 = math.exp %20 : vector<2x128x128xf32>
    %cst_12 = arith.constant dense<0.000000e+00> : vector<2x128xf32>
    %22 = vector.multi_reduction <add>, %21, %cst_12 [2] : vector<2x128x128xf32> to vector<2x128xf32>
    %23 = vector.shape_cast %22 : vector<2x128xf32> to vector<2x128x1xf32>
    %24 = tpu.reciprocal %23 {approx = true} : vector<2x128x1xf32> -> vector<2x128x1xf32>
    %25 = vector.broadcast %24 : vector<2x128x1xf32> to vector<2x128x128xf32>
    %26 = arith.mulf %21, %25 : vector<2x128x128xf32>
    "tpu.trace_start"() <{level = 10 : i32, message = "bqk,bkd->bqd"}> : () -> ()
    %cst_13 = arith.constant dense<0.000000e+00> : vector<2x128x32xf32>
    %27 = tpu.matmul %26, %14, %cst_13 {dimension_numbers = #tpu.dot_dimension_numbers<[2], [1], [1], [2], [0, 0, 0, 1, 1, 2], [0], [0]>} : vector<2x128x128xf32>, vector<2x128x32xf32>, vector<2x128x32xf32> -> vector<2x128x32xf32>
    "tpu.trace_stop"() : () -> ()
    %28 = vector.shape_cast %27 : vector<2x128x32xf32> to vector<256x32xf32>
    %c0_14 = arith.constant 0 : index
    %c0_15 = arith.constant 0 : index
    %c0_16 = arith.constant 0 : index
    %29 = vector.load %arg5[%c0_14, %c0_15, %c0_16] : memref<4x32x128xf32, #tpu.memory_space<vmem>>, vector<1x32x128xf32>
    %30 = vector.shape_cast %29 : vector<1x32x128xf32> to vector<32x128xf32>
    %cst_17 = arith.constant dense<0.000000e+00> : vector<256x128xf32>
    %31 = tpu.matmul %28, %30, %cst_17 {dimension_numbers = #tpu.dot_dimension_numbers<[1], [0], [0], [1], [0, 0, 1, 1], [], []>} : vector<256x32xf32>, vector<32x128xf32>, vector<256x128xf32> -> vector<256x128xf32>
    %32 = arith.addf %8, %31 : vector<256x128xf32>
    %33 = vector.extract_strided_slice %7 {offsets = [0, 32], sizes = [256, 32], strides = [1, 1]} : vector<256x384xf32> to vector<256x32xf32>
    %34 = vector.shape_cast %33 : vector<256x32xf32> to vector<2x128x32xf32>
    %35 = vector.extract_strided_slice %7 {offsets = [0, 160], sizes = [256, 32], strides = [1, 1]} : vector<256x384xf32> to vector<256x32xf32>
    %36 = vector.shape_cast %35 : vector<256x32xf32> to vector<2x128x32xf32>
    %37 = vector.extract_strided_slice %7 {offsets = [0, 288], sizes = [256, 32], strides = [1, 1]} : vector<256x384xf32> to vector<256x32xf32>
    %38 = vector.shape_cast %37 : vector<256x32xf32> to vector<2x128x32xf32>
    "tpu.trace_start"() <{level = 10 : i32, message = "bqd,bkd->bqk"}> : () -> ()
    %cst_18 = arith.constant dense<0.000000e+00> : vector<2x128x128xf32>
    %39 = tpu.matmul %34, %36, %cst_18 {dimension_numbers = #tpu.dot_dimension_numbers<[2], [2], [1], [1], [0, 0, 0, 1, 1, 1], [0], [0]>} : vector<2x128x32xf32>, vector<2x128x32xf32>, vector<2x128x128xf32> -> vector<2x128x128xf32>
    "tpu.trace_stop"() : () -> ()
    %40 = arith.addf %39, %2 : vector<2x128x128xf32>
    %cst_19 = arith.constant dense<0xFF800000> : vector<2x128xf32>
    %41 = vector.multi_reduction <maximumf>, %40, %cst_19 [2] : vector<2x128x128xf32> to vector<2x128xf32>
    %42 = vector.shape_cast %41 : vector<2x128xf32> to vector<2x128x1xf32>
    %43 = vector.broadcast %42 : vector<2x128x1xf32> to vector<2x128x128xf32>
    %44 = arith.subf %40, %43 : vector<2x128x128xf32>
    %45 = math.exp %44 : vector<2x128x128xf32>
    %cst_20 = arith.constant dense<0.000000e+00> : vector<2x128xf32>
    %46 = vector.multi_reduction <add>, %45, %cst_20 [2] : vector<2x128x128xf32> to vector<2x128xf32>
    %47 = vector.shape_cast %46 : vector<2x128xf32> to vector<2x128x1xf32>
    %48 = tpu.reciprocal %47 {approx = true} : vector<2x128x1xf32> -> vector<2x128x1xf32>
    %49 = vector.broadcast %48 : vector<2x128x1xf32> to vector<2x128x128xf32>
    %50 = arith.mulf %45, %49 : vector<2x128x128xf32>
    "tpu.trace_start"() <{level = 10 : i32, message = "bqk,bkd->bqd"}> : () -> ()
    %cst_21 = arith.constant dense<0.000000e+00> : vector<2x128x32xf32>
    %51 = tpu.matmul %50, %38, %cst_21 {dimension_numbers = #tpu.dot_dimension_numbers<[2], [1], [1], [2], [0, 0, 0, 1, 1, 2], [0], [0]>} : vector<2x128x128xf32>, vector<2x128x32xf32>, vector<2x128x32xf32> -> vector<2x128x32xf32>
    "tpu.trace_stop"() : () -> ()
    %52 = vector.shape_cast %51 : vector<2x128x32xf32> to vector<256x32xf32>
    %c1 = arith.constant 1 : index
    %c0_22 = arith.constant 0 : index
    %c0_23 = arith.constant 0 : index
    %53 = vector.load %arg5[%c1, %c0_22, %c0_23] : memref<4x32x128xf32, #tpu.memory_space<vmem>>, vector<1x32x128xf32>
    %54 = vector.shape_cast %53 : vector<1x32x128xf32> to vector<32x128xf32>
    %cst_24 = arith.constant dense<0.000000e+00> : vector<256x128xf32>
    %55 = tpu.matmul %52, %54, %cst_24 {dimension_numbers = #tpu.dot_dimension_numbers<[1], [0], [0], [1], [0, 0, 1, 1], [], []>} : vector<256x32xf32>, vector<32x128xf32>, vector<256x128xf32> -> vector<256x128xf32>
    %56 = arith.addf %32, %55 : vector<256x128xf32>
    %57 = vector.extract_strided_slice %7 {offsets = [0, 64], sizes = [256, 32], strides = [1, 1]} : vector<256x384xf32> to vector<256x32xf32>
    %58 = vector.shape_cast %57 : vector<256x32xf32> to vector<2x128x32xf32>
    %59 = vector.extract_strided_slice %7 {offsets = [0, 192], sizes = [256, 32], strides = [1, 1]} : vector<256x384xf32> to vector<256x32xf32>
    %60 = vector.shape_cast %59 : vector<256x32xf32> to vector<2x128x32xf32>
    %61 = vector.extract_strided_slice %7 {offsets = [0, 320], sizes = [256, 32], strides = [1, 1]} : vector<256x384xf32> to vector<256x32xf32>
    %62 = vector.shape_cast %61 : vector<256x32xf32> to vector<2x128x32xf32>
    "tpu.trace_start"() <{level = 10 : i32, message = "bqd,bkd->bqk"}> : () -> ()
    %cst_25 = arith.constant dense<0.000000e+00> : vector<2x128x128xf32>
    %63 = tpu.matmul %58, %60, %cst_25 {dimension_numbers = #tpu.dot_dimension_numbers<[2], [2], [1], [1], [0, 0, 0, 1, 1, 1], [0], [0]>} : vector<2x128x32xf32>, vector<2x128x32xf32>, vector<2x128x128xf32> -> vector<2x128x128xf32>
    "tpu.trace_stop"() : () -> ()
    %64 = arith.addf %63, %2 : vector<2x128x128xf32>
    %cst_26 = arith.constant dense<0xFF800000> : vector<2x128xf32>
    %65 = vector.multi_reduction <maximumf>, %64, %cst_26 [2] : vector<2x128x128xf32> to vector<2x128xf32>
    %66 = vector.shape_cast %65 : vector<2x128xf32> to vector<2x128x1xf32>
    %67 = vector.broadcast %66 : vector<2x128x1xf32> to vector<2x128x128xf32>
    %68 = arith.subf %64, %67 : vector<2x128x128xf32>
    %69 = math.exp %68 : vector<2x128x128xf32>
    %cst_27 = arith.constant dense<0.000000e+00> : vector<2x128xf32>
    %70 = vector.multi_reduction <add>, %69, %cst_27 [2] : vector<2x128x128xf32> to vector<2x128xf32>
    %71 = vector.shape_cast %70 : vector<2x128xf32> to vector<2x128x1xf32>
    %72 = tpu.reciprocal %71 {approx = true} : vector<2x128x1xf32> -> vector<2x128x1xf32>
    %73 = vector.broadcast %72 : vector<2x128x1xf32> to vector<2x128x128xf32>
    %74 = arith.mulf %69, %73 : vector<2x128x128xf32>
    "tpu.trace_start"() <{level = 10 : i32, message = "bqk,bkd->bqd"}> : () -> ()
    %cst_28 = arith.constant dense<0.000000e+00> : vector<2x128x32xf32>
    %75 = tpu.matmul %74, %62, %cst_28 {dimension_numbers = #tpu.dot_dimension_numbers<[2], [1], [1], [2], [0, 0, 0, 1, 1, 2], [0], [0]>} : vector<2x128x128xf32>, vector<2x128x32xf32>, vector<2x128x32xf32> -> vector<2x128x32xf32>
    "tpu.trace_stop"() : () -> ()
    %76 = vector.shape_cast %75 : vector<2x128x32xf32> to vector<256x32xf32>
    %c2 = arith.constant 2 : index
    %c0_29 = arith.constant 0 : index
    %c0_30 = arith.constant 0 : index
    %77 = vector.load %arg5[%c2, %c0_29, %c0_30] : memref<4x32x128xf32, #tpu.memory_space<vmem>>, vector<1x32x128xf32>
    %78 = vector.shape_cast %77 : vector<1x32x128xf32> to vector<32x128xf32>
    %cst_31 = arith.constant dense<0.000000e+00> : vector<256x128xf32>
    %79 = tpu.matmul %76, %78, %cst_31 {dimension_numbers = #tpu.dot_dimension_numbers<[1], [0], [0], [1], [0, 0, 1, 1], [], []>} : vector<256x32xf32>, vector<32x128xf32>, vector<256x128xf32> -> vector<256x128xf32>
    %80 = arith.addf %56, %79 : vector<256x128xf32>
    %81 = vector.extract_strided_slice %7 {offsets = [0, 96], sizes = [256, 32], strides = [1, 1]} : vector<256x384xf32> to vector<256x32xf32>
    %82 = vector.shape_cast %81 : vector<256x32xf32> to vector<2x128x32xf32>
    %83 = vector.extract_strided_slice %7 {offsets = [0, 224], sizes = [256, 32], strides = [1, 1]} : vector<256x384xf32> to vector<256x32xf32>
    %84 = vector.shape_cast %83 : vector<256x32xf32> to vector<2x128x32xf32>
    %85 = vector.extract_strided_slice %7 {offsets = [0, 352], sizes = [256, 32], strides = [1, 1]} : vector<256x384xf32> to vector<256x32xf32>
    %86 = vector.shape_cast %85 : vector<256x32xf32> to vector<2x128x32xf32>
    "tpu.trace_start"() <{level = 10 : i32, message = "bqd,bkd->bqk"}> : () -> ()
    %cst_32 = arith.constant dense<0.000000e+00> : vector<2x128x128xf32>
    %87 = tpu.matmul %82, %84, %cst_32 {dimension_numbers = #tpu.dot_dimension_numbers<[2], [2], [1], [1], [0, 0, 0, 1, 1, 1], [0], [0]>} : vector<2x128x32xf32>, vector<2x128x32xf32>, vector<2x128x128xf32> -> vector<2x128x128xf32>
    "tpu.trace_stop"() : () -> ()
    %88 = arith.addf %87, %2 : vector<2x128x128xf32>
    %cst_33 = arith.constant dense<0xFF800000> : vector<2x128xf32>
    %89 = vector.multi_reduction <maximumf>, %88, %cst_33 [2] : vector<2x128x128xf32> to vector<2x128xf32>
    %90 = vector.shape_cast %89 : vector<2x128xf32> to vector<2x128x1xf32>
    %91 = vector.broadcast %90 : vector<2x128x1xf32> to vector<2x128x128xf32>
    %92 = arith.subf %88, %91 : vector<2x128x128xf32>
    %93 = math.exp %92 : vector<2x128x128xf32>
    %cst_34 = arith.constant dense<0.000000e+00> : vector<2x128xf32>
    %94 = vector.multi_reduction <add>, %93, %cst_34 [2] : vector<2x128x128xf32> to vector<2x128xf32>
    %95 = vector.shape_cast %94 : vector<2x128xf32> to vector<2x128x1xf32>
    %96 = tpu.reciprocal %95 {approx = true} : vector<2x128x1xf32> -> vector<2x128x1xf32>
    %97 = vector.broadcast %96 : vector<2x128x1xf32> to vector<2x128x128xf32>
    %98 = arith.mulf %93, %97 : vector<2x128x128xf32>
    "tpu.trace_start"() <{level = 10 : i32, message = "bqk,bkd->bqd"}> : () -> ()
    %cst_35 = arith.constant dense<0.000000e+00> : vector<2x128x32xf32>
    %99 = tpu.matmul %98, %86, %cst_35 {dimension_numbers = #tpu.dot_dimension_numbers<[2], [1], [1], [2], [0, 0, 0, 1, 1, 2], [0], [0]>} : vector<2x128x128xf32>, vector<2x128x32xf32>, vector<2x128x32xf32> -> vector<2x128x32xf32>
    "tpu.trace_stop"() : () -> ()
    %100 = vector.shape_cast %99 : vector<2x128x32xf32> to vector<256x32xf32>
    %c3 = arith.constant 3 : index
    %c0_36 = arith.constant 0 : index
    %c0_37 = arith.constant 0 : index
    %101 = vector.load %arg5[%c3, %c0_36, %c0_37] : memref<4x32x128xf32, #tpu.memory_space<vmem>>, vector<1x32x128xf32>
    %102 = vector.shape_cast %101 : vector<1x32x128xf32> to vector<32x128xf32>
    %cst_38 = arith.constant dense<0.000000e+00> : vector<256x128xf32>
    %103 = tpu.matmul %100, %102, %cst_38 {dimension_numbers = #tpu.dot_dimension_numbers<[1], [0], [0], [1], [0, 0, 1, 1], [], []>} : vector<256x32xf32>, vector<32x128xf32>, vector<256x128xf32> -> vector<256x128xf32>
    %104 = arith.addf %80, %103 : vector<256x128xf32>
    %c0_39 = arith.constant 0 : index
    %c0_40 = arith.constant 0 : index
    %105 = vector.load %arg6[%c0_39, %c0_40] : memref<1x128xf32, #tpu.memory_space<vmem>>, vector<1x128xf32>
    %106 = vector.broadcast %105 : vector<1x128xf32> to vector<256x128xf32>
    %107 = arith.addf %104, %106 : vector<256x128xf32>
    %108 = arith.addf %107, %1 : vector<256x128xf32>
    %c0_41 = arith.constant 0 : index
    %c0_42 = arith.constant 0 : index
    %109 = vector.load %arg7[%c0_41, %c0_42] : memref<1x128xf32, #tpu.memory_space<vmem>>, vector<1x128xf32>
    %c0_43 = arith.constant 0 : index
    %c0_44 = arith.constant 0 : index
    %110 = vector.load %arg8[%c0_43, %c0_44] : memref<1x128xf32, #tpu.memory_space<vmem>>, vector<1x128xf32>
    %cst_45 = arith.constant dense<0.000000e+00> : vector<256xf32>
    %111 = vector.multi_reduction <add>, %108, %cst_45 [1] : vector<256x128xf32> to vector<256xf32>
    %112 = vector.shape_cast %111 : vector<256xf32> to vector<256x1xf32>
    %cst_46 = arith.constant 1.280000e+02 : f32
    %113 = vector.broadcast %cst_46 : f32 to vector<256x1xf32>
    %114 = arith.divf %112, %113 : vector<256x1xf32>
    %115 = vector.broadcast %114 : vector<256x1xf32> to vector<256x128xf32>
    %116 = arith.subf %108, %115 : vector<256x128xf32>
    %117 = arith.mulf %116, %116 : vector<256x128xf32>
    %cst_47 = arith.constant dense<0.000000e+00> : vector<256xf32>
    %118 = vector.multi_reduction <add>, %117, %cst_47 [1] : vector<256x128xf32> to vector<256xf32>
    %119 = vector.shape_cast %118 : vector<256xf32> to vector<256x1xf32>
    %cst_48 = arith.constant 1.280000e+02 : f32
    %120 = vector.broadcast %cst_48 : f32 to vector<256x1xf32>
    %121 = arith.divf %119, %120 : vector<256x1xf32>
    %122 = vector.broadcast %114 : vector<256x1xf32> to vector<256x128xf32>
    %123 = arith.subf %108, %122 : vector<256x128xf32>
    %cst_49 = arith.constant 9.99999996E-13 : f32
    %124 = vector.broadcast %cst_49 : f32 to vector<256x1xf32>
    %125 = arith.addf %121, %124 : vector<256x1xf32>
    %126 = math.rsqrt %125 : vector<256x1xf32>
    %127 = vector.broadcast %126 : vector<256x1xf32> to vector<256x128xf32>
    %128 = arith.mulf %123, %127 : vector<256x128xf32>
    %129 = vector.broadcast %109 : vector<1x128xf32> to vector<256x128xf32>
    %130 = arith.mulf %129, %128 : vector<256x128xf32>
    %131 = vector.broadcast %110 : vector<1x128xf32> to vector<256x128xf32>
    %132 = arith.addf %130, %131 : vector<256x128xf32>
    %c0_50 = arith.constant 0 : index
    %c0_51 = arith.constant 0 : index
    %133 = vector.load %arg9[%c0_50, %c0_51] : memref<128x256xf32, #tpu.memory_space<vmem>>, vector<128x256xf32>
    %cst_52 = arith.constant dense<0.000000e+00> : vector<256x256xf32>
    %134 = tpu.matmul %132, %133, %cst_52 {dimension_numbers = #tpu.dot_dimension_numbers<[1], [0], [0], [1], [0, 0, 1, 1], [], []>} : vector<256x128xf32>, vector<128x256xf32>, vector<256x256xf32> -> vector<256x256xf32>
    %c0_53 = arith.constant 0 : index
    %c0_54 = arith.constant 0 : index
    %135 = vector.load %arg10[%c0_53, %c0_54] : memref<1x256xf32, #tpu.memory_space<vmem>>, vector<1x256xf32>
    %136 = vector.broadcast %135 : vector<1x256xf32> to vector<256x256xf32>
    %137 = arith.addf %134, %136 : vector<256x256xf32>
    %cst_55 = arith.constant 0.000000e+00 : f32
    %138 = vector.broadcast %cst_55 : f32 to vector<256x256xf32>
    %139 = arith.maximumf %137, %138 : vector<256x256xf32>
    %c0_56 = arith.constant 0 : index
    %c0_57 = arith.constant 0 : index
    %140 = vector.load %arg11[%c0_56, %c0_57] : memref<256x128xf32, #tpu.memory_space<vmem>>, vector<256x128xf32>
    %cst_58 = arith.constant dense<0.000000e+00> : vector<256x128xf32>
    %141 = tpu.matmul %139, %140, %cst_58 {dimension_numbers = #tpu.dot_dimension_numbers<[1], [0], [0], [1], [0, 0, 1, 1], [], []>} : vector<256x256xf32>, vector<256x128xf32>, vector<256x128xf32> -> vector<256x128xf32>
    %c0_59 = arith.constant 0 : index
    %c0_60 = arith.constant 0 : index
    %142 = vector.load %arg12[%c0_59, %c0_60] : memref<1x128xf32, #tpu.memory_space<vmem>>, vector<1x128xf32>
    %143 = vector.broadcast %142 : vector<1x128xf32> to vector<256x128xf32>
    %144 = arith.addf %141, %143 : vector<256x128xf32>
    %145 = arith.addf %144, %132 : vector<256x128xf32>
    %c0_61 = arith.constant 0 : index
    %c0_62 = arith.constant 0 : index
    %146 = vector.load %arg13[%c0_61, %c0_62] : memref<1x128xf32, #tpu.memory_space<vmem>>, vector<1x128xf32>
    %c0_63 = arith.constant 0 : index
    %c0_64 = arith.constant 0 : index
    %147 = vector.load %arg14[%c0_63, %c0_64] : memref<1x128xf32, #tpu.memory_space<vmem>>, vector<1x128xf32>
    %cst_65 = arith.constant dense<0.000000e+00> : vector<256xf32>
    %148 = vector.multi_reduction <add>, %145, %cst_65 [1] : vector<256x128xf32> to vector<256xf32>
    %149 = vector.shape_cast %148 : vector<256xf32> to vector<256x1xf32>
    %cst_66 = arith.constant 1.280000e+02 : f32
    %150 = vector.broadcast %cst_66 : f32 to vector<256x1xf32>
    %151 = arith.divf %149, %150 : vector<256x1xf32>
    %152 = vector.broadcast %151 : vector<256x1xf32> to vector<256x128xf32>
    %153 = arith.subf %145, %152 : vector<256x128xf32>
    %154 = arith.mulf %153, %153 : vector<256x128xf32>
    %cst_67 = arith.constant dense<0.000000e+00> : vector<256xf32>
    %155 = vector.multi_reduction <add>, %154, %cst_67 [1] : vector<256x128xf32> to vector<256xf32>
    %156 = vector.shape_cast %155 : vector<256xf32> to vector<256x1xf32>
    %cst_68 = arith.constant 1.280000e+02 : f32
    %157 = vector.broadcast %cst_68 : f32 to vector<256x1xf32>
    %158 = arith.divf %156, %157 : vector<256x1xf32>
    %159 = vector.broadcast %151 : vector<256x1xf32> to vector<256x128xf32>
    %160 = arith.subf %145, %159 : vector<256x128xf32>
    %cst_69 = arith.constant 9.99999996E-13 : f32
    %161 = vector.broadcast %cst_69 : f32 to vector<256x1xf32>
    %162 = arith.addf %158, %161 : vector<256x1xf32>
    %163 = math.rsqrt %162 : vector<256x1xf32>
    %164 = vector.broadcast %163 : vector<256x1xf32> to vector<256x128xf32>
    %165 = arith.mulf %160, %164 : vector<256x128xf32>
    %166 = vector.broadcast %146 : vector<1x128xf32> to vector<256x128xf32>
    %167 = arith.mulf %166, %165 : vector<256x128xf32>
    %168 = vector.broadcast %147 : vector<1x128xf32> to vector<256x128xf32>
    %169 = arith.addf %167, %168 : vector<256x128xf32>
    %170 = vector.shape_cast %169 : vector<256x128xf32> to vector<2x128x128xf32>
    %c0_70 = arith.constant 0 : index
    %c0_71 = arith.constant 0 : index
    %c0_72 = arith.constant 0 : index
    %171 = vector.load %arg15[%c0_70, %c0_71, %c0_72] : memref<2x128x128xf32, #tpu.memory_space<vmem>>, vector<2x128x128xf32>
    tpu.vector_store %arg15[%c0_70, %c0_71, %c0_72], %170 {strides = array<i32>} : memref<2x128x128xf32, #tpu.memory_space<vmem>>, vector<2x128x128xf32>,
    return
  }
  func.func @transform_0(%arg0: i32) -> (i32, i32, i32) {
    %c0_i32 = arith.constant 0 : i32
    %c0_i32_0 = arith.constant 0 : i32
    %c0_i32_1 = arith.constant 0 : i32
    return %arg0, %c0_i32, %c0_i32_0 : i32, i32, i32
  }
  func.func @transform_1(%arg0: i32) -> (i32, i32, i32) {
    %c0_i32 = arith.constant 0 : i32
    %c0_i32_0 = arith.constant 0 : i32
    %c0_i32_1 = arith.constant 0 : i32
    return %arg0, %c0_i32, %c0_i32_0 : i32, i32, i32
  }
  func.func @transform_2(%arg0: i32) -> (i32, i32) {
    %c0_i32 = arith.constant 0 : i32
    %c0_i32_0 = arith.constant 0 : i32
    %c0_i32_1 = arith.constant 0 : i32
    return %c0_i32, %c0_i32_0 : i32, i32
  }
  func.func @transform_3(%arg0: i32) -> (i32, i32) {
    %c0_i32 = arith.constant 0 : i32
    %c0_i32_0 = arith.constant 0 : i32
    %c0_i32_1 = arith.constant 0 : i32
    return %c0_i32, %c0_i32_0 : i32, i32
  }
  func.func @transform_4(%arg0: i32) -> (i32, i32, i32) {
    %c0_i32 = arith.constant 0 : i32
    %c0_i32_0 = arith.constant 0 : i32
    %c0_i32_1 = arith.constant 0 : i32
    %c0_i32_2 = arith.constant 0 : i32
    return %c0_i32, %c0_i32_0, %c0_i32_1 : i32, i32, i32
  }
  func.func @transform_5(%arg0: i32) -> (i32, i32) {
    %c0_i32 = arith.constant 0 : i32
    %c0_i32_0 = arith.constant 0 : i32
    %c0_i32_1 = arith.constant 0 : i32
    return %c0_i32, %c0_i32_0 : i32, i32
  }
  func.func @transform_6(%arg0: i32) -> (i32, i32) {
    %c0_i32 = arith.constant 0 : i32
    %c0_i32_0 = arith.constant 0 : i32
    %c0_i32_1 = arith.constant 0 : i32
    return %c0_i32, %c0_i32_0 : i32, i32
  }
  func.func @transform_7(%arg0: i32) -> (i32, i32) {
    %c0_i32 = arith.constant 0 : i32
    %c0_i32_0 = arith.constant 0 : i32
    %c0_i32_1 = arith.constant 0 : i32
    return %c0_i32, %c0_i32_0 : i32, i32
  }
  func.func @transform_8(%arg0: i32) -> (i32, i32) {
    %c0_i32 = arith.constant 0 : i32
    %c0_i32_0 = arith.constant 0 : i32
    %c0_i32_1 = arith.constant 0 : i32
    return %c0_i32, %c0_i32_0 : i32, i32
  }
  func.func @transform_9(%arg0: i32) -> (i32, i32) {
    %c0_i32 = arith.constant 0 : i32
    %c0_i32_0 = arith.constant 0 : i32
    %c0_i32_1 = arith.constant 0 : i32
    return %c0_i32, %c0_i32_0 : i32, i32
  }
  func.func @transform_10(%arg0: i32) -> (i32, i32) {
    %c0_i32 = arith.constant 0 : i32
    %c0_i32_0 = arith.constant 0 : i32
    %c0_i32_1 = arith.constant 0 : i32
    return %c0_i32, %c0_i32_0 : i32, i32
  }
  func.func @transform_11(%arg0: i32) -> (i32, i32) {
    %c0_i32 = arith.constant 0 : i32
    %c0_i32_0 = arith.constant 0 : i32
    %c0_i32_1 = arith.constant 0 : i32
    return %c0_i32, %c0_i32_0 : i32, i32
  }
  func.func @transform_12(%arg0: i32) -> (i32, i32) {
    %c0_i32 = arith.constant 0 : i32
    %c0_i32_0 = arith.constant 0 : i32
    %c0_i32_1 = arith.constant 0 : i32
    return %c0_i32, %c0_i32_0 : i32, i32
  }
  func.func @transform_13(%arg0: i32) -> (i32, i32) {
    %c0_i32 = arith.constant 0 : i32
    %c0_i32_0 = arith.constant 0 : i32
    %c0_i32_1 = arith.constant 0 : i32
    return %c0_i32, %c0_i32_0 : i32, i32
  }
  func.func @transform_14(%arg0: i32) -> (i32, i32, i32) {
    %c0_i32 = arith.constant 0 : i32
    %c0_i32_0 = arith.constant 0 : i32
    %c0_i32_1 = arith.constant 0 : i32
    return %arg0, %c0_i32, %c0_i32_0 : i32, i32, i32
  }
}

</mosaic_0001>

<bundles_post_ra>
// kernel: tpu_custom_call.1
= control target key start
LH: loop header
LB: loop body
LE: loop exit
PB: predicated region body
PF: predicated region fallthrough
CT: control target
= control target key end

     0   :  { %s17891_s0 = inlined_call_operand.hbm [shape: f32[4,128,128], index: 0, kind: input, shape index: {}]   ;;  %s17892_s1 = inlined_call_operand.hbm [shape: f32[4,128,128], index: 1, kind: input, shape index: {}]   ;;  %s17893_s2 = inlined_call_operand.hbm [shape: f32[128,384], index: 2, kind: input, shape index: {}]   ;;  %s17894_s3 = inlined_call_operand.vmem [shape: f32[1,384], index: 3, kind: input, shape index: {}]   ;;  %s17895_s4 = inlined_call_operand.hbm [shape: f32[4,32,128], index: 4, kind: input, shape index: {}]   ;;  %s17896_s5 = inlined_call_operand.vmem [shape: f32[1,128], index: 5, kind: input, shape index: {}]   ;;  %s17897_s6 = inlined_call_operand.vmem [shape: f32[1,128], index: 6, kind: input, shape index: {}]   ;;  %s17898_s7 = inlined_call_operand.vmem [shape: f32[1,128], index: 7, kind: input, shape index: {}]   ;;  %s17899_s8 = inlined_call_operand.hbm [shape: f32[128,256], index: 8, kind: input, shape index: {}]   ;;  %s17900_s9 = inlined_call_operand.vmem [shape: f32[1,256], index: 9, kind: input, shape index: {}]   ;;  %s17901_s10 = inlined_call_operand.hbm [shape: f32[256,128], index: 10, kind: input, shape index: {}]   ;;  %s17902_s11 = inlined_call_operand.vmem [shape: f32[1,128], index: 11, kind: input, shape index: {}]   ;;  %s17903_s12 = inlined_call_operand.vmem [shape: f32[1,128], index: 12, kind: input, shape index: {}]   ;;  %s17904_s13 = inlined_call_operand.vmem [shape: f32[1,128], index: 13, kind: input, shape index: {}]   ;;  %s17905_s14 = inlined_call_operand.hbm [shape: f32[4,128,128], index: 14, kind: output, shape index: {}]  }
   0x1   :  { %18150 = sst [smem:[#allocation183_spill]] %s17893_s2 }
   0x2   :  { %18151 = sst [smem:[#allocation184_spill]] %s17895_s4 }
   0x3   :  { %18152 = sst [smem:[#allocation185_spill]] %s17899_s8 }
   0x4   :  { %18153 = sst [smem:[#allocation186_spill]] %s17901_s10 }
   0x5   :  { %18154 = sst [smem:[#allocation187_spill]] %s17905_s14 }
   0x6   :  { %19 = vsyncpa [#allocation3], 0 }
   0x7   :  { %21 = vsyncpa [#allocation3 + $0x1], 0 }
   0x8   :  { %22 = vsyncpa [#allocation6], 0 }
   0x9   :  { %24 = vsyncpa [#allocation6 + $0x1], 0 }
   0xa   :  { %25 = vsyncpa [#allocation9], 0 }
   0xb   :  { %26 = vsyncpa [#allocation12], 0 }
   0xc   :  { %27 = vsyncpa [#allocation4], 0 }
   0xd   :  { %29 = vsyncpa [#allocation4 + $0x1], 0  ;;  %s12647_s29 = smov 0   ;;  %s12649_s30 = smov 0  }
   0xe   :  { %s12651_s15 = smov 0   ;;  %s12653_s16 = smov 0  }
   0xf LB: > { %18155 = sst [smem:[#allocation20_spill]] %s12539_s29  ;;  %s12668_s17 = sadd.s32 4294967295, %s12551_s16   ;;  %s12551_s16 = sphi %s12653_s16, %s18839_s16   ;;  %s12547_s15 = sphi %s12651_s15, %s18844_s15   ;;  %s12543_s30 = sphi %s12649_s30, %s18843_s30   ;;  %s12539_s29 = sphi %s12647_s29, %s18842_s29  }
  0x10   : > { %18156 = sst [smem:[#allocation21_spill]] %s12547_s15  ;;  %s9094_s18 = sadd.s32 4294967294, %s12551_s16  }
  0x11   : > { %p55_p0 = scmp.ne.s32.totalorder %s12543_s30, %s12539_s29  ;;  %p17907_p1 = scmp.eq.s32.totalorder %s12668_s17, 0 }
  0x12   : > { %p363_p3 = scmp.eq.s32.totalorder %s9094_s18, 1  ;;  %p9095_p5 = scmp.ge.s32.totalorder %s12551_s16, 1 }
  0x13   : > { %p12677_p4 = por %p17907_p1, %p55_p0  ;;  %p370_p7 = scmp.lt.s32.totalorder %s12551_s16, 3 }
  0x14   : > { %p12682_p6 = por %p363_p3, %p55_p0  ;;  %s12553_s22 = smov [#allocation7]  }
  0x15   : > { %s18157_s19 = scalar_select %p12677_p4, 1, 0 }
  0x16   : > { %s18158_s20 = scalar_select %p12682_p6, 1, 0 }
  0x17   : > { %p12687_p8 = pnand %p9095_p5, %p370_p7  ;;  %s382_s23 = sshll.u32 %s12553_s22, 4  ;;  %s383_s23 = int_to_ptr.vmem [resolvable:$true] %s382_s23 }
  0x18   : > { %18159 = sst [smem:[#allocation22_spill]] %s18158_s20  ;;  %s12554_s25 = smov [#allocation8]  }
  0x19   : > { %p11477_p9 = pneg %p12687_p8  ;;  %s398_s26 = sshll.u32 %s12554_s25, 4  ;;  %s399_s26 = int_to_ptr.vmem [resolvable:$true] %s398_s26 }
  0x1a   : > { %s12322_s27 = scalar_lea.vmem %s383_s23, 6144  ;;  %p12330_p5 = scmp.lt.s32.totalorder %s383_s23, %s383_s23 }
  0x1b   : > { %p12696_p11 = pnand %p11477_p9, %p17907_p1  ;;  %p12323_p13 = scmp.ne.s32.totalorder %s383_s23, %s12322_s27 }
  0x1c   : > { %p12331_p7 = scmp.lt.s32.totalorder %s12322_s27, %s12322_s27 }
  0x1d   : > { %p12313_p12 = pneg %p12696_p11 }
  0x1e   : > { %p12332_p10 = por %p12331_p7, %p12330_p5 }
  0x1f   : > { %p12325_p0 = pnand %p12323_p13, %p12313_p12 }
  0x21   : > { %p12326_p3 = pneg %p12325_p0 }
  0x23   : > { %p12333_p9 = pnand %p12332_p10, %p12326_p3 }
  0x25   : > { %12336 = shalt.err (!%p12333_p9)
}
  0x26   : > { %s12555_s28 = smov 384   ;;  %s12556_s18 = smov 24  }
  0x27   : > { %s18162_s2 = sld [smem:[#allocation183_spill]]  ;;  %s12348_s20 = scalar_lea.vmem %s399_s26, 2048 }
  0x28   : > { %p12349_p1 = scmp.ne.s32.totalorder %s399_s26, %s12348_s20  ;;  %p12356_p2 = scmp.lt.s32.totalorder %s399_s26, %s399_s26 }
  0x29   : > { %p12357_p6 = scmp.lt.s32.totalorder %s12348_s20, %s12348_s20 }
  0x2a   : > { %p12351_p13 = pnand %p12349_p1, %p12313_p12 }
  0x2b   : > { %p12358_p5 = por %p12357_p6, %p12356_p2 }
  0x2c   : > { %p12352_p0 = pneg %p12351_p13 }
  0x2d   : > { %11480 = dma.hbm_to_vmem [thread:$0]  (!%p12696_p11), %s18162_s2, 6144, %s383_s23, [#allocation6], %s12555_s28, %s12555_s28, %s12556_s18  }
  0x2e   : > { %p12359_p10 = pnand %p12358_p5, %p12352_p0 }
  0x30   : > { %12362 = shalt.err (!%p12359_p10)
}
  0x31   : > { %s17909_s27 = smov 128   ;;  %s17911_s29 = smov 8  }
  0x32   : > { %s18163_s4 = sld [smem:[#allocation184_spill]]  ;;  %s12559_s18 = smov [#allocation10]  }
  0x33   : > { %s420_s22 = sshll.u32 %s12559_s18, 4  ;;  %s421_s22 = int_to_ptr.vmem [resolvable:$true] %s420_s22 }
  0x34   : > { %s12374_s25 = scalar_lea.vmem %s421_s22, 4096  ;;  %p12382_p3 = scmp.lt.s32.totalorder %s421_s22, %s421_s22 }
  0x35   : > { %p12375_p1 = scmp.ne.s32.totalorder %s421_s22, %s12374_s25  ;;  %p12383_p7 = scmp.lt.s32.totalorder %s12374_s25, %s12374_s25 }
  0x37   : > { %p12377_p2 = pnand %p12375_p1, %p12313_p12  ;;  %p12384_p9 = por %p12383_p7, %p12382_p3 }
  0x38   : > { %11483 = dma.hbm_to_vmem [thread:$0]  (!%p12696_p11), %s18163_s4, 2048, %s399_s26, [#allocation9], %s17909_s27, %s17909_s27, %s17911_s29  }
  0x39   : > { %p12378_p6 = pneg %p12377_p2 }
  0x3b   : > { %p12385_p13 = pnand %p12384_p9, %p12378_p6 }
  0x3d   : > { %12388 = shalt.err (!%p12385_p13)
}
  0x3e   : > { %s12560_s20 = smov 256   ;;  %s12561_s2 = smov 16  }
  0x3f   : > { %s18164_s8 = sld [smem:[#allocation185_spill]]  ;;  %s12562_s28 = smov [#allocation11]  }
  0x40   : > { %s436_s18 = sshll.u32 %s12562_s28, 4  ;;  %s437_s18 = int_to_ptr.vmem [resolvable:$true] %s436_s18 }
  0x41   : > { %s12400_s27 = scalar_lea.vmem %s437_s18, 4096  ;;  %p12408_p1 = scmp.lt.s32.totalorder %s437_s18, %s437_s18 }
  0x42   : > { %p12401_p0 = scmp.ne.s32.totalorder %s437_s18, %s12400_s27  ;;  %p12409_p2 = scmp.lt.s32.totalorder %s12400_s27, %s12400_s27 }
  0x44   : > { %p12403_p5 = pnand %p12401_p0, %p12313_p12  ;;  %p12410_p6 = por %p12409_p2, %p12408_p1 }
  0x45   : > { %11486 = dma.hbm_to_vmem [thread:$0]  (!%p12696_p11), %s18164_s8, 4096, %s421_s22, [#allocation9], %s12560_s20, %s12560_s20, %s12561_s2  }
  0x46   : > { %p12404_p10 = pneg %p12403_p5 }
  0x48   : > { %p12411_p3 = pnand %p12410_p6, %p12404_p10 }
  0x4a   : > { %12414 = shalt.err (!%p12411_p3)
}
  0x4b   : > { %s18165_s25 = smov 128   ;;  %s18166_s10 = sld [smem:[#allocation186_spill]] }
  0x4c   : > { %s12741_s27 = sadd.s32 1, %s12551_s16   ;;  %s42_s24 = sadd.s32 1, %s12547_s15 }
  0x4d   : > { %18167 = sst [smem:[#allocation23_spill]] %s12741_s27  ;;  %s39_s20 = ssub.s32 %s12551_s16, %s12741_s27 }
  0x4e   : > { %p49_p12 = scmp.ne.s32.totalorder %s12547_s15, %s12543_s30  ;;  %p40_p7 = scmp.eq.s32.totalorder %s39_s20, 0 }
  0x4f   : > { %p50_p9 = scmp.eq.s32.totalorder %s12551_s16, 0  ;;  %p18168_p13 = scmp.eq.s32.totalorder %s12668_s17, 1 }
  0x50   : > { %p11505_p5 = scmp.lt.s32.totalorder %s12551_s16, 2  ;;  %s459_s28 = sand.u32 1, %s12547_s15  }
  0x51   : > { %11489 = dma.hbm_to_vmem [thread:$0]  (!%p12696_p11), %s18166_s10, 4096, %s437_s18, [#allocation12], %s18165_s25, %s18165_s25, %s17911_s29  }
  0x52   : > { %p12751_p0 = por %p18168_p13, %p49_p12  ;;  %p51_p10 = por %p50_p9, %p49_p12 }
  0x53   : > { %s12757_s23 = scalar_select %p40_p7, %s12547_s15, %s42_s24  }
  0x54   : > { %s18169_s26 = scalar_select %p12751_p0, 1, 0 }
  0x55   : > { %18171 = sst [smem:[#allocation25_spill]] %s12757_s23  ;;  %s9101_s2 = sshll.u32 %s459_s28, 8 }
  0x56   : > { %18170 = sst [smem:[#allocation24_spill]] %s18169_s26  ;;  %s9514_s18 = sshll.u32 %s12551_s16, 12 }
  0x57   : > { %s12764_s4 = scalar_lea.hbm %s17891_s0, %s9514_s18  ;;  %s463_s20 = scalar_lea.vmem [#allocation2], %s9101_s2 }
  0x58   : > { %s471_s8 = sshll.u32 %s463_s20, 4  ;;  %p12768_p11 = pnand %p11505_p5, %p51_p10  ;;  %s12766_s8 = int_to_ptr.vmem [resolvable:$true] %s471_s8 }
  0x59   : > { %s12775_s15 = scalar_lea.hbm %s17892_s1, %s9514_s18  ;;  %s485_s29 = scalar_lea.vmem [#allocation5], %s9101_s2 }
  0x5a   : > { %s12777_s22 = sshll.u32 %s485_s29, 4  ;;  %s12779_s27 = scalar_lea.sflag [#allocation3], %s459_s28  ;;  %s12810_s22 = int_to_ptr.vmem [resolvable:$true] %s12777_s22 }
  0x5b   : > { %s12415_s14 = scalar_lea.hbm %s12764_s4, 4096  ;;  %p12417_p2 = pneg %p12768_p11 }
  0x5c   : > { %p12416_p1 = scmp.ne.s32.totalorder %s12764_s4, %s12415_s14  ;;  %s12420_s23 = scalar_lea.hbm %s17891_s0, 8192 }
  0x5d   : > { %p12421_p12 = scmp.lt.s32.totalorder %s12764_s4, %s17891_s0  ;;  %p12422_p7 = scmp.lt.s32.totalorder %s12420_s23, %s12415_s14 }
  0x5e   : > { %p12418_p6 = pnand %p12417_p2, %p12416_p1 }
  0x5f   : > { %p12423_p9 = por %p12422_p7, %p12421_p12 }
  0x60   : > { %p12419_p3 = pneg %p12418_p6 }
  0x62   : > { %p12424_p13 = pnand %p12423_p9, %p12419_p3 }
  0x64   : > { %12427 = shalt.err (!%p12424_p13)
}
  0x65   : > { %s12428_s28 = scalar_lea.vmem %s12766_s8, 4096  ;;  %s12563_s26 = smov [#allocation2]  }
  0x66   : > { %p12429_p5 = scmp.ne.s32.totalorder %s12766_s8, %s12428_s28  ;;  %s12433_s2 = sshll.u32 %s12563_s26, 4  ;;  %s12434_s2 = int_to_ptr.vmem [resolvable:$false] %s12433_s2 }
  0x67   : > { %s12435_s29 = scalar_lea.vmem %s12434_s2, 8192  ;;  %p12436_p6 = scmp.lt.s32.totalorder %s12766_s8, %s12434_s2 }
  0x68   : > { %p12431_p10 = pnand %p12429_p5, %p12417_p2  ;;  %p12437_p0 = scmp.lt.s32.totalorder %s12435_s29, %s12428_s28 }
  0x6a   : > { %p12432_p1 = pneg %p12431_p10  ;;  %p12438_p4 = por %p12437_p0, %p12436_p6 }
  0x6c   : > { %p12439_p12 = pnand %p12438_p4, %p12432_p1 }
  0x6e   : > { %12442 = shalt.err (!%p12439_p12)
}
  0x6f   : > { %s18173_s14 = smov 8   ;;  %s481_s20 = sand.u32 1, %s12551_s16  }
  0x70   : > { %11493 = dma.hbm_to_vmem [thread:$0]  (!%p12768_p11), %s12764_s4, 4096, %s12766_s8, %s12779_s27, %s18165_s25, %s18165_s25, %s18173_s14  }
  0x71   : > { %s482_s23 = scalar_lea.sflag [#allocation6], %s481_s20  ;;  %s12443_s24 = scalar_lea.hbm %s12775_s15, 4096 }
  0x72   : > { %p12444_p4 = scmp.ne.s32.totalorder %s12775_s15, %s12443_s24  ;;  %s12448_s26 = scalar_lea.hbm %s17892_s1, 8192 }
  0x73   : > { %p12449_p7 = scmp.lt.s32.totalorder %s12775_s15, %s17892_s1  ;;  %p12450_p9 = scmp.lt.s32.totalorder %s12448_s26, %s12443_s24 }
  0x74   : > { %p12446_p0 = pnand %p12444_p4, %p12417_p2 }
  0x75   : > { %p12451_p13 = por %p12450_p9, %p12449_p7 }
  0x76   : > { %p12447_p3 = pneg %p12446_p0 }
  0x78   : > { %p12452_p5 = pnand %p12451_p13, %p12447_p3 }
  0x7a   : > { %12455 = shalt.err (!%p12452_p5)
}
  0x7b   : > { %s12456_s4 = scalar_lea.vmem %s12810_s22, 4096  ;;  %s12564_s8 = smov [#allocation5]  }
  0x7c   : > { %p12457_p10 = scmp.ne.s32.totalorder %s12810_s22, %s12456_s4  ;;  %s12461_s27 = sshll.u32 %s12564_s8, 4  ;;  %s12462_s27 = int_to_ptr.vmem [resolvable:$false] %s12461_s27 }
  0x7d   : > { %s12463_s20 = scalar_lea.vmem %s12462_s27, 8192  ;;  %p12464_p12 = scmp.lt.s32.totalorder %s12810_s22, %s12462_s27 }
  0x7e   : > { %p12459_p1 = pnand %p12457_p10, %p12417_p2  ;;  %p12465_p4 = scmp.lt.s32.totalorder %s12463_s20, %s12456_s4 }
  0x80   : > { %p12460_p6 = pneg %p12459_p1  ;;  %p12466_p0 = por %p12465_p4, %p12464_p12 }
  0x82   : > { %p12467_p7 = pnand %p12466_p0, %p12460_p6 }
  0x84   : > { %12470 = shalt.err (!%p12467_p7)
}
  0x85   : > { %11496 = dma.hbm_to_vmem [thread:$0]  (!%p12768_p11), %s12775_s15, 4096, %s12810_s22, %s482_s23, %s18165_s25, %s18165_s25, %s18173_s14  }
  0x86   : > { %505 = sbr.rel (%p12687_p8) target bundleno = 5696 (0x1640), region = 76 }
  0x8b   : > { %s12841_s24 = sand.u32 1, %s12543_s30   ;;  %p18174_p2 = scmp.ne.s32.totalorder %s18157_s19, 0 }
  0x8c   : > { %s12844_s18 = sshll.u32 %s12841_s24, 8  ;;  %s508_s28 = scalar_lea.sflag [#allocation3], %s12841_s24 }
  0x8d   : > { %s12848_s10 = scalar_lea.vmem [#allocation2], %s12844_s18 }
  0x8e   : > { %12514 = dma.done.wait (%p18174_p2), %s508_s28, 4096  }
  0x8f   : > { %12516 = vsyncadd (%p18174_p2), %s508_s28, 4294963200  ;;  %s516_s15 = sand.u32 1, %s12668_s17   ;;  %s12856_s25 = scalar_lea.vmem [#allocation5], %s12844_s18 }
  0x90   : > { %s517_s21 = scalar_lea.sflag [#allocation6], %s516_s15 }
  0x91   : > { %12518 = dma.done.wait (%p18174_p2), %s517_s21, 4096  }
  0x92   : > { %12520 = vsyncadd (%p18174_p2), %s517_s21, 4294963200  ;;  %p18175_p8 = scmp.eq.s32.totalorder %s12668_s17, 0 }
  0x94   : > { %12522 = dma.done.wait (%p18175_p8), [#allocation6], 6144   ;;  %p18176_p11 = pmov %p18175_p8 }
  0x95   : > { %p18177_p3 = pmov %p18175_p8 }
  0x96   : > { %12524 = vsyncadd (%p18176_p11), [#allocation6], 4294961152 }
  0x97   : > { %12526 = dma.done.wait (%p18177_p3), [#allocation9], 6144   ;;  %p18178_p9 = pmov %p18177_p3 }
  0x98   : > { %p18179_p13 = pmov %p18177_p3 }
  0x99   : > { %12528 = vsyncadd (%p18178_p9), [#allocation9], 4294961152 }
  0x9a   : > { %12530 = dma.done.wait (%p18179_p13), [#allocation12], 4096   ;;  %p18180_p5 = pmov %p18177_p3 }
  0x9b   : > { %v17923_v0 = vmov 0.0   ;;  %v699_v1 = vld [vmem:[#allocation7 + $0x170] sm:$0xff]  ;;  %v698_v2 = vld [vmem:[#allocation7 + $0x168] sm:$0xff]  ;;  %v696_v3 = vld [vmem:[#allocation7 + $0x158] sm:$0xff]  ;;  %vm1200_vm0 = vcmask 261120   ;;  %s12566_s14 = smov 96  }
  0x9c   : > { %12532 = vsyncadd (%p18180_p5), [#allocation12], 4294963200  ;;  %782 = vmatprep.mubr.f32.mxu0 %v17923_v0  ;;  %718 = vmatprep.subr.mxu0 %v699_v1  ;;  %v695_v4 = vld [vmem:[#allocation7 + $0x150] sm:$0xff]  ;;  %v700_v5 = vld [vmem:[#allocation7 + $0x178] sm:$0xff]  ;;  %s12567_s23 = smov 64   ;;  %s12568_s26 = smov 32  }
  0x9d   : > { %719 = vmatpush1.msra.mxu0 %v698_v2  ;;  %v693_v6 = vld [vmem:[#allocation7 + $0x140] sm:$0xff]  ;;  %10223 = vmatprep.subr.mxu1 %v700_v5  ;;  %v692_v8 = vld [vmem:[#allocation7 + $0x138] sm:$0xff]  ;;  %v694_v9 = vld [vmem:[#allocation7 + $0x148] sm:$0xff]  ;;  %s18833_s8 = sld [smem:[#allocation187_spill]]  ;;  %s8946_s20 = scalar_lea.sflag [#allocation4], %s12841_s24 }
  0x9e   : > { %v697_v7 = vld [vmem:[#allocation7 + $0x160] sm:$0xff]  ;;  %720 = vmatprep.subr.mxu0 %v696_v3  ;;  %10224 = vmatpush3.msra.mxu1 %v700_v5  ;;  %v690_v10 = vld [vmem:[#allocation7 + $0x128] sm:$0xff]  ;;  %v691_v12 = vld [vmem:[#allocation7 + $0x130] sm:$0xff] }
  0x9f   : > { %721 = vmatpush1.msra.mxu0 %v695_v4  ;;  %10225 = vmatprep.subr.mxu1 %v697_v7  ;;  %v689_v11 = vld [vmem:[#allocation7 + $0x120] sm:$0xff]  ;;  %v687_v13 = vld [vmem:[#allocation7 + $0x110] sm:$0xff]  ;;  %v686_v14 = vld [vmem:[#allocation7 + $0x108] sm:$0xff] }
  0xa0   : > { %722 = vmatprep.subr.mxu0 %v693_v6  ;;  %10226 = vmatpush3.msra.mxu1 %v697_v7  ;;  %v688_v15 = vld [vmem:[#allocation7 + $0x118] sm:$0xff]  ;;  %v683_v17 = vld [vmem:[#allocation7 + $0xf0] sm:$0xff]  ;;  %v685_v18 = vld [vmem:[#allocation7 + $0x100] sm:$0xff] }
  0xa1   : > { %723 = vmatpush1.msra.mxu0 %v692_v8  ;;  %10227 = vmatprep.subr.mxu1 %v694_v9  ;;  %v684_v16 = vld [vmem:[#allocation7 + $0xf8] sm:$0xff]  ;;  %v681_v19 = vld [vmem:[#allocation7 + $0xe0] sm:$0xff]  ;;  %v682_v21 = vld [vmem:[#allocation7 + $0xe8] sm:$0xff] }
  0xa2   : > { %724 = vmatprep.subr.mxu0 %v690_v10  ;;  %10228 = vmatpush3.msra.mxu1 %v694_v9  ;;  %v680_v20 = vld [vmem:[#allocation7 + $0xd8] sm:$0xff]  ;;  %v678_v22 = vld [vmem:[#allocation7 + $0xc8] sm:$0xff]  ;;  %v677_v23 = vld [vmem:[#allocation7 + $0xc0] sm:$0xff] }
  0xa3   : > { %725 = vmatpush1.msra.mxu0 %v689_v11  ;;  %10229 = vmatprep.subr.mxu1 %v691_v12  ;;  %v679_v24 = vld [vmem:[#allocation7 + $0xd0] sm:$0xff]  ;;  %v674_v26 = vld [vmem:[#allocation7 + $0xa8] sm:$0xff]  ;;  %v676_v27 = vld [vmem:[#allocation7 + $0xb8] sm:$0xff] }
  0xa4   : > { %726 = vmatprep.subr.mxu0 %v687_v13  ;;  %10230 = vmatpush3.msra.mxu1 %v691_v12  ;;  %v675_v25 = vld [vmem:[#allocation7 + $0xb0] sm:$0xff]  ;;  %v672_v28 = vld [vmem:[#allocation7 + $0x98] sm:$0xff]  ;;  %v673_v30 = vld [vmem:[#allocation7 + $0xa0] sm:$0xff] }
  0xa5   : > { %727 = vmatpush1.msra.mxu0 %v686_v14  ;;  %10231 = vmatprep.subr.mxu1 %v688_v15  ;;  %v671_v29 = vld [vmem:[#allocation7 + $0x90] sm:$0xff]  ;;  %v669_v31 = vld [vmem:[#allocation7 + $0x80] sm:$0xff]  ;;  %v668_v32 = vld [vmem:[#allocation7 + $0x78] sm:$0xff] }
  0xa6   : > { %728 = vmatprep.subr.mxu0 %v684_v16  ;;  %10232 = vmatpush3.msra.mxu1 %v688_v15  ;;  %v670_v33 = vld [vmem:[#allocation7 + $0x88] sm:$0xff]  ;;  %v665_v35 = vld [vmem:[#allocation7 + $0x60] sm:$0xff]  ;;  %v667_v36 = vld [vmem:[#allocation7 + $0x70] sm:$0xff] }
  0xa7   : > { %729 = vmatpush1.msra.mxu0 %v683_v17  ;;  %10233 = vmatprep.subr.mxu1 %v685_v18  ;;  %v666_v34 = vld [vmem:[#allocation7 + $0x68] sm:$0xff]  ;;  %v663_v37 = vld [vmem:[#allocation7 + $0x50] sm:$0xff]  ;;  %v664_v39 = vld [vmem:[#allocation7 + $0x58] sm:$0xff] }
  0xa8   : > { %730 = vmatprep.subr.mxu0 %v681_v19  ;;  %10234 = vmatpush3.msra.mxu1 %v685_v18  ;;  %v662_v38 = vld [vmem:[#allocation7 + $0x48] sm:$0xff]  ;;  %v660_v40 = vld [vmem:[#allocation7 + $0x38] sm:$0xff]  ;;  %v659_v41 = vld [vmem:[#allocation7 + $0x30] sm:$0xff]  ;;  %v703_v18 = vlaneseq }
  0xa9   : > { %731 = vmatpush1.msra.mxu0 %v680_v20  ;;  %10235 = vmatprep.subr.mxu1 %v682_v21  ;;  %v661_v42 = vld [vmem:[#allocation7 + $0x40] sm:$0xff]  ;;  %v656_v44 = vld [vmem:[#allocation7 + $0x18] sm:$0xff]  ;;  %v658_v45 = vld [vmem:[#allocation7 + $0x28] sm:$0xff] }
  0xaa   : > { %732 = vmatprep.subr.mxu0 %v678_v22  ;;  %10236 = vmatpush3.msra.mxu1 %v682_v21  ;;  %v657_v43 = vld [vmem:[#allocation7 + $0x20] sm:$0xff]  ;;  %v654_v46 = vld [vmem:[#allocation7 + $0x8] sm:$0xff]  ;;  %v655_v48 = vld [vmem:[#allocation7 + $0x10] sm:$0xff]  ;;  %v12938_v19 = vshrl.u32 %v703_v18, 7 }
  0xab   : > { %733 = vmatpush1.msra.mxu0 %v677_v23  ;;  %10237 = vmatprep.subr.mxu1 %v679_v24  ;;  %v653_v47 = vld [vmem:[#allocation7] sm:$0xff]  ;;  %v590_v50 = vld [vmem:[%s12848_s10 + $0x8] sm:$0xff]  ;;  %v591_v51 = vld [vmem:[%s12848_s10 + $0x10] sm:$0xff] }
  0xac   : > { %734 = vmatprep.subr.mxu0 %v675_v25  ;;  %10238 = vmatpush3.msra.mxu1 %v679_v24  ;;  %v589_v49 = vld [vmem:[%s12848_s10] sm:$0xff]  ;;  %v592_v52 = vld [vmem:[%s12848_s10 + $0x18] sm:$0xff]  ;;  %v594_v54 = vld [vmem:[%s12848_s10 + $0x28] sm:$0xff]  ;;  %18181 = vst [vmem:[#allocation26_spill] sm:$0xff] %v12938_v19  ;;  %v17922_v20 = vsub.s32 0, %v12938_v19  ;;  %v17921_v22 = vsub.s32 1, %v12938_v19 }
  0xad   : > { %735 = vmatpush1.msra.mxu0 %v674_v26  ;;  %10239 = vmatprep.subr.mxu1 %v676_v27  ;;  %v593_v53 = vld [vmem:[%s12848_s10 + $0x20] sm:$0xff]  ;;  %v595_v55 = vld [vmem:[%s12848_s10 + $0x30] sm:$0xff]  ;;  %v596_v56 = vld [vmem:[%s12848_s10 + $0x38] sm:$0xff] }
  0xae   : > { %736 = vmatprep.subr.mxu0 %v672_v28  ;;  %10240 = vmatpush3.msra.mxu1 %v676_v27  ;;  %v597_v57 = vld [vmem:[%s12848_s10 + $0x40] sm:$0xff]  ;;  %v598_v58 = vld [vmem:[%s12848_s10 + $0x48] sm:$0xff]  ;;  %v599_v59 = vld [vmem:[%s12848_s10 + $0x50] sm:$0xff] }
  0xaf   : > { %737 = vmatpush1.msra.mxu0 %v671_v29  ;;  %10241 = vmatprep.subr.mxu1 %v673_v30  ;;  %v600_v60 = vld [vmem:[%s12848_s10 + $0x58] sm:$0xff]  ;;  %v601_v61 = vld [vmem:[%s12848_s10 + $0x60] sm:$0xff]  ;;  %v602_v62 = vld [vmem:[%s12848_s10 + $0x68] sm:$0xff] }
  0xb0   : > { %738 = vmatprep.subr.mxu0 %v669_v31  ;;  %10242 = vmatpush3.msra.mxu1 %v673_v30  ;;  %v603_v63 = vld [vmem:[%s12848_s10 + $0x70] sm:$0xff]  ;;  %v604_v1 = vld [vmem:[%s12848_s10 + $0x78] sm:$0xff]  ;;  %v605_v2 = vld [vmem:[%s12848_s10 + $0x80] sm:$0xff] }
  0xb1   : > { %739 = vmatpush1.msra.mxu0 %v668_v32  ;;  %10243 = vmatprep.subr.mxu1 %v670_v33  ;;  %v606_v3 = vld [vmem:[%s12848_s10 + $0x88] sm:$0xff]  ;;  %v607_v4 = vld [vmem:[%s12848_s10 + $0x90] sm:$0xff]  ;;  %v608_v5 = vld [vmem:[%s12848_s10 + $0x98] sm:$0xff] }
  0xb2   : > { %740 = vmatprep.subr.mxu0 %v666_v34  ;;  %10244 = vmatpush3.msra.mxu1 %v670_v33  ;;  %v609_v6 = vld [vmem:[%s12848_s10 + $0xa0] sm:$0xff]  ;;  %v610_v7 = vld [vmem:[%s12848_s10 + $0xa8] sm:$0xff]  ;;  %v611_v8 = vld [vmem:[%s12848_s10 + $0xb0] sm:$0xff] }
  0xb3   : > { %741 = vmatpush1.msra.mxu0 %v665_v35  ;;  %10245 = vmatprep.subr.mxu1 %v667_v36  ;;  %v612_v9 = vld [vmem:[%s12848_s10 + $0xb8] sm:$0xff]  ;;  %v613_v10 = vld [vmem:[%s12848_s10 + $0xc0] sm:$0xff]  ;;  %v614_v11 = vld [vmem:[%s12848_s10 + $0xc8] sm:$0xff] }
  0xb4   : > { %742 = vmatprep.subr.mxu0 %v663_v37  ;;  %10246 = vmatpush3.msra.mxu1 %v667_v36  ;;  %v615_v12 = vld [vmem:[%s12848_s10 + $0xd0] sm:$0xff]  ;;  %v616_v13 = vld [vmem:[%s12848_s10 + $0xd8] sm:$0xff]  ;;  %v617_v14 = vld [vmem:[%s12848_s10 + $0xe0] sm:$0xff] }
  0xb5   : > { %743 = vmatpush1.msra.mxu0 %v662_v38  ;;  %10247 = vmatprep.subr.mxu1 %v664_v39  ;;  %v618_v15 = vld [vmem:[%s12848_s10 + $0xe8] sm:$0xff]  ;;  %v619_v16 = vld [vmem:[%s12848_s10 + $0xf0] sm:$0xff]  ;;  %v620_v17 = vld [vmem:[%s12848_s10 + $0xf8] sm:$0xff] }
  0xb6   : > { %744 = vmatprep.subr.mxu0 %v660_v40  ;;  %10248 = vmatpush3.msra.mxu1 %v664_v39  ;;  %v701_v21 = vld [vmem:[%s17894_s3] sm:$0x7] }
  0xb7   : > { %745 = vmatpush1.msra.mxu0 %v659_v41  ;;  %10249 = vmatprep.subr.mxu1 %v661_v42  ;;  %v12947_v23 = vrot.slane %v701_v21, %v17922_v20  ;;  %v12951_v24 = vrot.slane %v701_v21, %v17921_v22 }
  0xb8   : > { %746 = vmatprep.subr.mxu0 %v657_v43  ;;  %10250 = vmatpush3.msra.mxu1 %v661_v42 }
  0xb9   : > { %747 = vmatpush1.msra.mxu0 %v656_v44  ;;  %10251 = vmatprep.subr.mxu1 %v658_v45 }
  0xba   : > { %748 = vmatprep.subr.mxu0 %v654_v46  ;;  %10252 = vmatpush3.msra.mxu1 %v658_v45 }
  0xbb   : > { %749 = vmatpush1.msra.mxu0 %v653_v47  ;;  %10253 = vmatprep.subr.mxu1 %v655_v48  ;;  %v713_v47 = vsub.s32 2, %v12938_v19 }
  0xbc   : > { %783 = vmatmul.mubr.f32.vlgmr.msra.gmra.mxu0 %v589_v49  ;;  %10254 = vmatpush3.msra.mxu1 %v655_v48 }
  0xbd   : > { %788 = vmatprep.mubr.f32.mxu0 %v17923_v0  ;;  %10255 = vmatprep.mubr.f32.mxu1 %v589_v49 }
  0xbe   : > { %10256 = vmatmul.mubr.f32.vlgmr.msra.gmra.mxu1 %v590_v50 }
  0xbf   : > { %10258 = vmatprep.mubr.f32.mxu1 %v591_v51 }
  0xc0   : > { %789 = vmatmul.mubr.f32.gmra.mxu0 %v590_v50 }
  0xc1   : > { %794 = vmatprep.mubr.f32.mxu0 %v17923_v0 }
  0xc2   : > { %10259 = vmatmul.mubr.f32.gmra.mxu1 %v592_v52 }
  0xc3   : > { %10261 = vmatprep.mubr.f32.mxu1 %v593_v53 }
  0xc4   : > { %795 = vmatmul.mubr.f32.gmra.mxu0 %v591_v51 }
  0xc5   : > { %800 = vmatprep.mubr.f32.mxu0 %v17923_v0 }
  0xc6   : > { %10262 = vmatmul.mubr.f32.gmra.mxu1 %v594_v54 }
  0xc7   : > { %10264 = vmatprep.mubr.f32.mxu1 %v595_v55 }
  0xc8   : > { %801 = vmatmul.mubr.f32.gmra.mxu0 %v592_v52 }
  0xc9   : > { %806 = vmatprep.mubr.f32.mxu0 %v17923_v0 }
  0xca   : > { %10265 = vmatmul.mubr.f32.gmra.mxu1 %v596_v56 }
  0xcb   : > { %10267 = vmatprep.mubr.f32.mxu1 %v597_v57 }
  0xcc   : > { %807 = vmatmul.mubr.f32.gmra.mxu0 %v593_v53  ;;  %v13004_v53 = vrot.slane %v701_v21, %v713_v47 }
  0xcd   : > { %812 = vmatprep.mubr.f32.mxu0 %v17923_v0 }
  0xce   : > { %10268 = vmatmul.mubr.f32.gmra.mxu1 %v598_v58  ;;  %18188 = vst [vmem:[#allocation33_spill] sm:$0xff] %v13004_v53 }
  0xcf   : > { %10270 = vmatprep.mubr.f32.mxu1 %v599_v59 }
  0xd0   : > { %813 = vmatmul.mubr.f32.gmra.mxu0 %v594_v54 }
  0xd1   : > { %818 = vmatprep.mubr.f32.mxu0 %v17923_v0 }
  0xd2   : > { %10271 = vmatmul.mubr.f32.gmra.mxu1 %v600_v60 }
  0xd3   : > { %10273 = vmatprep.mubr.f32.mxu1 %v601_v61 }
  0xd4   : > { %819 = vmatmul.mubr.f32.gmra.mxu0 %v595_v55 }
  0xd5   : > { %824 = vmatprep.mubr.f32.mxu0 %v17923_v0 }
  0xd6   : > { %10274 = vmatmul.mubr.f32.gmra.mxu1 %v602_v62 }
  0xd7   : > { %10276 = vmatprep.mubr.f32.mxu1 %v603_v63 }
  0xd8   : > { %825 = vmatmul.mubr.f32.gmra.mxu0 %v596_v56 }
  0xd9   : > { %830 = vmatprep.mubr.f32.mxu0 %v17923_v0 }
  0xda   : > { %10277 = vmatmul.mubr.f32.gmra.mxu1 %v604_v1 }
  0xdb   : > { %10279 = vmatprep.mubr.f32.mxu1 %v605_v2 }
  0xdc   : > { %831 = vmatmul.mubr.f32.gmra.mxu0 %v597_v57 }
  0xdd   : > { %836 = vmatprep.mubr.f32.mxu0 %v17923_v0 }
  0xde   : > { %10280 = vmatmul.mubr.f32.gmra.mxu1 %v606_v3 }
  0xdf   : > { %10282 = vmatprep.mubr.f32.mxu1 %v607_v4 }
  0xe0   : > { %837 = vmatmul.mubr.f32.gmra.mxu0 %v598_v58 }
  0xe1   : > { %842 = vmatprep.mubr.f32.mxu0 %v17923_v0 }
  0xe2   : > { %10283 = vmatmul.mubr.f32.gmra.mxu1 %v608_v5 }
  0xe3   : > { %10285 = vmatprep.mubr.f32.mxu1 %v609_v6 }
  0xe4   : > { %843 = vmatmul.mubr.f32.gmra.mxu0 %v599_v59 }
  0xe5   : > { %848 = vmatprep.mubr.f32.mxu0 %v17923_v0 }
  0xe6   : > { %10286 = vmatmul.mubr.f32.gmra.mxu1 %v610_v7 }
  0xe7   : > { %10288 = vmatprep.mubr.f32.mxu1 %v611_v8 }
  0xe8   : > { %849 = vmatmul.mubr.f32.gmra.mxu0 %v600_v60 }
  0xe9   : > { %854 = vmatprep.mubr.f32.mxu0 %v17923_v0 }
  0xea   : > { %10289 = vmatmul.mubr.f32.gmra.mxu1 %v612_v9 }
  0xeb   : > { %10291 = vmatprep.mubr.f32.mxu1 %v613_v10 }
  0xec   : > { %855 = vmatmul.mubr.f32.gmra.mxu0 %v601_v61 }
  0xed   : > { %860 = vmatprep.mubr.f32.mxu0 %v17923_v0 }
  0xee   : > { %10292 = vmatmul.mubr.f32.gmra.mxu1 %v614_v11 }
  0xef   : > { %10294 = vmatprep.mubr.f32.mxu1 %v615_v12 }
  0xf0   : > { %861 = vmatmul.mubr.f32.gmra.mxu0 %v602_v62 }
  0xf1   : > { %866 = vmatprep.mubr.f32.mxu0 %v17923_v0 }
  0xf2   : > { %10295 = vmatmul.mubr.f32.gmra.mxu1 %v616_v13 }
  0xf3   : > { %10297 = vmatprep.mubr.f32.mxu1 %v617_v14 }
  0xf4   : > { %867 = vmatmul.mubr.f32.gmra.mxu0 %v603_v63 }
  0xf5   : > { %872 = vmatprep.mubr.f32.mxu0 %v17923_v0 }
  0xf6   : > { %10298 = vmatmul.mubr.f32.gmra.mxu1 %v618_v15 }
  0xf7   : > { %10300 = vmatprep.mubr.f32.mxu1 %v619_v16 }
  0xf8   : > { %873 = vmatmul.mubr.f32.gmra.mxu0 %v604_v1 }
  0xf9   : > { %878 = vmatprep.mubr.f32.mxu0 %v17923_v0 }
  0xfa   : > { %10301 = vmatmul.mubr.f32.gmra.mxu1 %v620_v17 }
  0xfc   : > { %879 = vmatmul.mubr.f32.gmra.mxu0 %v605_v2 }
  0xfd   : > { %884 = vmatprep.mubr.f32.mxu0 %v17923_v0 }
 0x100   : > { %885 = vmatmul.mubr.f32.gmra.mxu0 %v606_v3 }
 0x101   : > { %890 = vmatprep.mubr.f32.mxu0 %v17923_v0 }
 0x104   : > { %891 = vmatmul.mubr.f32.gmra.mxu0 %v607_v4 }
 0x105   : > { %896 = vmatprep.mubr.f32.mxu0 %v17923_v0 }
 0x108   : > { %897 = vmatmul.mubr.f32.gmra.mxu0 %v608_v5 }
 0x109   : > { %902 = vmatprep.mubr.f32.mxu0 %v17923_v0 }
 0x10c   : > { %903 = vmatmul.mubr.f32.gmra.mxu0 %v609_v6 }
 0x10d   : > { %908 = vmatprep.mubr.f32.mxu0 %v17923_v0 }
 0x110   : > { %909 = vmatmul.mubr.f32.gmra.mxu0 %v610_v7 }
 0x111   : > { %914 = vmatprep.mubr.f32.mxu0 %v17923_v0 }
 0x114   : > { %915 = vmatmul.mubr.f32.gmra.mxu0 %v611_v8 }
 0x115   : > { %920 = vmatprep.mubr.f32.mxu0 %v17923_v0 }
 0x118   : > { %921 = vmatmul.mubr.f32.gmra.mxu0 %v612_v9 }
 0x119   : > { %926 = vmatprep.mubr.f32.mxu0 %v17923_v0 }
 0x11c   : > { %927 = vmatmul.mubr.f32.gmra.mxu0 %v613_v10 }
 0x11d   : > { %932 = vmatprep.mubr.f32.mxu0 %v17923_v0 }
 0x120   : > { %933 = vmatmul.mubr.f32.gmra.mxu0 %v614_v11 }
 0x121   : > { %938 = vmatprep.mubr.f32.mxu0 %v17923_v0 }
 0x124   : > { %939 = vmatmul.mubr.f32.gmra.mxu0 %v615_v12 }
 0x125   : > { %944 = vmatprep.mubr.f32.mxu0 %v17923_v0 }
 0x128   : > { %945 = vmatmul.mubr.f32.gmra.mxu0 %v616_v13 }
 0x129   : > { %950 = vmatprep.mubr.f32.mxu0 %v17923_v0 }
 0x12c   : > { %951 = vmatmul.mubr.f32.gmra.mxu0 %v617_v14 }
 0x12d   : > { %956 = vmatprep.mubr.f32.mxu0 %v17923_v0 }
 0x130   : > { %957 = vmatmul.mubr.f32.gmra.mxu0 %v618_v15 }
 0x131   : > { %962 = vmatprep.mubr.f32.mxu0 %v17923_v0 }
 0x134   : > { %963 = vmatmul.mubr.f32.gmra.mxu0 %v619_v16 }
 0x135   : > { %968 = vmatprep.mubr.f32.mxu0 %v17923_v0 }
 0x138   : > { %969 = vmatmul.mubr.f32.gmra.mxu0 %v620_v17 }
 0x17c   : > { %v784_v25 = vpop.f32.mrf.mxu0 }
 0x17d   : > { %v12954_v26 = vadd.f32 %v784_v25, %v12947_v23 }
 0x17e   : > { %v786_v27 = vpop.f32.mrf.mxu0  ;;  %v12956_v28 = vpop.f32.mrf.mxu1 }
 0x17f   : > { %18182 = vst [vmem:[#allocation27_spill] sm:$0xff] %v12954_v26  ;;  %v12959_v29 = vadd.f32 %v786_v27, %v12951_v24  ;;  %2265 = vrot.lane.b32.xlu1 %v12954_v26, %s12566_s14  ;;  %10335 = vmatprep.mubr.msk.f32.mxu1 %vm1200_vm0, %v12954_v26 }
 0x180   : > { %v790_v30 = vpop.f32.mrf.mxu0  ;;  %v12965_v31 = vpop.f32.mrf.mxu1 }
 0x181   : > { %18183 = vst [vmem:[#allocation28_spill] sm:$0xff] %v12959_v29  ;;  %v12968_v32 = vadd.f32 %v790_v30, %v12947_v23  ;;  %2297 = vrot.lane.b32.xlu0 %v12959_v29, %s12566_s14 }
 0x182   : > { %v792_v33 = vpop.f32.mrf.mxu0  ;;  %v12972_v34 = vpop.f32.mrf.mxu1 }
 0x183   : > { %18184 = vst [vmem:[#allocation29_spill] sm:$0xff] %v12968_v32  ;;  %v12981_v39 = vadd.f32 %v792_v33, %v12951_v24 }
 0x184   : > { %v796_v35 = vpop.f32.mrf.mxu0  ;;  %v12974_v36 = vpop.f32.mrf.mxu1 }
 0x185   : > { %2267 = vrot.lane.b32.xlu0 %v12968_v32, %s12566_s14  ;;  %18185 = vst [vmem:[#allocation30_spill] sm:$0xff] %v12981_v39  ;;  %v12986_v42 = vadd.f32 %v796_v35, %v12947_v23 }
 0x186   : > { %v798_v37 = vpop.f32.mrf.mxu0  ;;  %v12978_v38 = vpop.f32.mrf.mxu1 }
 0x187   : > { %18186 = vst [vmem:[#allocation31_spill] sm:$0xff] %v12986_v42  ;;  %v13000_v50 = vadd.f32 %v798_v37, %v12951_v24 }
 0x188   : > { %v802_v40 = vpop.f32.mrf.mxu0  ;;  %v12983_v41 = vpop.f32.mrf.mxu1 }
 0x189   : > { %2299 = vrot.lane.b32.xlu0 %v12981_v39, %s12566_s14  ;;  %18187 = vst [vmem:[#allocation32_spill] sm:$0xff] %v13000_v50  ;;  %v13012_v57 = vadd.f32 %v802_v40, %v12947_v23 }
 0x18a   : > { %v804_v43 = vpop.f32.mrf.mxu0  ;;  %v12990_v44 = vpop.f32.mrf.mxu1 }
 0x18b   : > { %18190 = vst [vmem:[#allocation35_spill] sm:$0xff] %v13012_v57  ;;  %v13024_v63 = vadd.f32 %v804_v43, %v12951_v24 }
 0x18c   : > { %v808_v45 = vpop.f32.mrf.mxu0  ;;  %v12992_v46 = vpop.f32.mrf.mxu1 }
 0x18d   : > { %2269 = vrot.lane.b32.xlu0 %v12986_v42, %s12566_s14  ;;  %18192 = vst [vmem:[#allocation37_spill] sm:$0xff] %v13024_v63  ;;  %v13034_v5 = vadd.f32 %v808_v45, %v12947_v23 }
 0x18e   : > { %v810_v48 = vpop.f32.mrf.mxu0  ;;  %v12997_v49 = vpop.f32.mrf.mxu1 }
 0x18f   : > { %18194 = vst [vmem:[#allocation39_spill] sm:$0xff] %v13034_v5  ;;  %v13044_v10 = vadd.f32 %v810_v48, %v12951_v24 }
 0x190   : > { %v814_v51 = vpop.f32.mrf.mxu0  ;;  %v13002_v52 = vpop.f32.mrf.mxu1 }
 0x191   : > { %v13007_v54 = vadd.f32 %v814_v51, %v12947_v23  ;;  %2301 = vrot.lane.b32.xlu0 %v13000_v50, %s12566_s14  ;;  %18196 = vst [vmem:[#allocation41_spill] sm:$0xff] %v13044_v10 }
 0x192   : > { %v816_v55 = vpop.f32.mrf.mxu0  ;;  %v10272_v56 = vpop.f32.mrf.mxu1 }
 0x193   : > { %18189 = vst [vmem:[#allocation34_spill] sm:$0xff] %v13007_v54  ;;  %2275 = vrot.lane.b32.xlu1 %v13007_v54, %s12566_s14  ;;  %v13017_v58 = vadd.f32 %v10272_v56, %v13004_v53  ;;  %v13054_v14 = vadd.f32 %v816_v55, %v12951_v24 }
 0x194   : > { %v820_v59 = vpop.f32.mrf.mxu0  ;;  %v13019_v60 = vpop.f32.mrf.mxu1 }
 0x195   : > { %18191 = vst [vmem:[#allocation36_spill] sm:$0xff] %v13017_v58  ;;  %2271 = vrot.lane.b32.xlu0 %v13012_v57, %s12566_s14  ;;  %v13027_v1 = vadd.f32 %v820_v59, %v12947_v23  ;;  %18198 = vst [vmem:[#allocation43_spill] sm:$0xff] %v13054_v14 }
 0x196   : > { %v822_v61 = vpop.f32.mrf.mxu0  ;;  %v10275_v62 = vpop.f32.mrf.mxu1 }
 0x197   : > { %18193 = vst [vmem:[#allocation38_spill] sm:$0xff] %v13027_v1  ;;  %3137 = vrot.lane.b32.xlu1 %v13017_v58, %s12566_s14  ;;  %v13039_v6 = vadd.f32 %v10275_v62, %v13004_v53  ;;  %v13064_v18 = vadd.f32 %v822_v61, %v12951_v24 }
 0x198   : > { %v826_v2 = vpop.f32.mrf.mxu0  ;;  %v1101_v3 = vpop.f32.mrf.mxu1 }
 0x199   : > { %2303 = vrot.lane.b32.xlu0 %v13024_v63, %s12566_s14  ;;  %18195 = vst [vmem:[#allocation40_spill] sm:$0xff] %v13039_v6  ;;  %18200 = vst [vmem:[#allocation45_spill] sm:$0xff] %v13064_v18  ;;  %v13074_v30 = vadd.f32 %v1101_v3, %v13004_v53  ;;  %v13086_v40 = vadd.f32 %v826_v2, %v12947_v23 }
 0x19a   : > { %v828_v4 = vpop.f32.mrf.mxu0  ;;  %v10278_v8 = vpop.f32.mrf.mxu1 }
 0x19b   : > { %2277 = vrot.lane.b32.xlu1 %v13027_v1, %s12566_s14  ;;  %v13049_v11 = vadd.f32 %v10278_v8, %v13004_v53  ;;  %18202 = vst [vmem:[#allocation47_spill] sm:$0xff] %v13074_v30  ;;  %18204 = vst [vmem:[#allocation49_spill] sm:$0xff] %v13086_v40  ;;  %v13096_v48 = vadd.f32 %v828_v4, %v12951_v24 }
 0x19c   : > { %v832_v7 = vpop.f32.mrf.mxu0  ;;  %v1111_v55 = vpop.f32.mrf.mxu1 }
 0x19d   : > { %2273 = vrot.lane.b32.xlu0 %v13034_v5, %s12566_s14  ;;  %18197 = vst [vmem:[#allocation42_spill] sm:$0xff] %v13049_v11  ;;  %18206 = vst [vmem:[#allocation51_spill] sm:$0xff] %v13096_v48  ;;  %v13106_v61 = vadd.f32 %v1111_v55, %v13004_v53  ;;  %v13115_v3 = vadd.f32 %v832_v7, %v12947_v23 }
 0x19e   : > { %v834_v9 = vpop.f32.mrf.mxu0 }
 0x19f   : > { %3141 = vrot.lane.b32.xlu1 %v13039_v6, %s12566_s14  ;;  %v13059_v16 = vadd.f32 %v834_v9, %v12951_v24  ;;  %18208 = vst [vmem:[#allocation53_spill] sm:$0xff] %v13106_v61  ;;  %18209 = vst [vmem:[#allocation54_spill] sm:$0xff] %v13115_v3 }
 0x1a0   : > { %v838_v12 = vpop.f32.mrf.mxu0 }
 0x1a1   : > { %2305 = vrot.lane.b32.xlu0 %v13044_v10, %s12566_s14  ;;  %18199 = vst [vmem:[#allocation44_spill] sm:$0xff] %v13059_v16  ;;  %v13069_v25 = vadd.f32 %v838_v12, %v12947_v23 }
 0x1a2   : > { %v840_v13 = vpop.f32.mrf.mxu0 }
 0x1a3   : > { %3145 = vrot.lane.b32.xlu1 %v13049_v11, %s12566_s14  ;;  %18201 = vst [vmem:[#allocation46_spill] sm:$0xff] %v13069_v25 }
 0x1a4   : > { %v844_v15 = vpop.f32.mrf.mxu0 }
 0x1a5   : > { %2307 = vrot.lane.b32.xlu0 %v13054_v14, %s12566_s14  ;;  %v13081_v35 = vadd.f32 %v844_v15, %v12947_v23  ;;  %v13135_v15 = vadd.f32 %v840_v13, %v12951_v24 }
 0x1a6   : > { %v846_v17 = vpop.f32.mrf.mxu0 }
 0x1a7   : > { %2313 = vrot.lane.b32.xlu1 %v13059_v16, %s12566_s14  ;;  %18203 = vst [vmem:[#allocation48_spill] sm:$0xff] %v13081_v35  ;;  %18213 = vst [vmem:[#allocation58_spill] sm:$0xff] %v13135_v15 }
 0x1a8   : > { %v850_v21 = vpop.f32.mrf.mxu0 }
 0x1a9   : > { %2309 = vrot.lane.b32.xlu0 %v13064_v18, %s12566_s14 }
 0x1aa   : > { %v852_v27 = vpop.f32.mrf.mxu0 }
 0x1ab   : > { %2283 = vrot.lane.b32.xlu1 %v13069_v25, %s12566_s14  ;;  %v13183_v22 = vadd.f32 %v852_v27, %v12951_v24 }
 0x1ac   : > { %v13078_v33 = vpop.f32.mrf.mxu0 }
 0x1ad   : > { %3139 = vrot.lane.b32.xlu0 %v13074_v30, %s12566_s14  ;;  %18221 = vst [vmem:[#allocation66_spill] sm:$0xff] %v13183_v22 }
 0x1ae   : > { %v858_v37 = vpop.f32.mrf.mxu0 }
 0x1af   : > { %2285 = vrot.lane.b32.xlu1 %v13081_v35, %s12566_s14 }
 0x1b0   : > { %v862_v43 = vpop.f32.mrf.mxu0 }
 0x1b1   : > { %v13091_v45 = vadd.f32 %v862_v43, %v12947_v23  ;;  %2279 = vrot.lane.b32.xlu0 %v13086_v40, %s12566_s14 }
 0x1b2   : > { %v864_v47 = vpop.f32.mrf.mxu0 }
 0x1b3   : > { %18205 = vst [vmem:[#allocation50_spill] sm:$0xff] %v13091_v45  ;;  %2291 = vrot.lane.b32.xlu1 %v13091_v45, %s12566_s14  ;;  %v13145_v55 = vadd.f32 %v864_v47, %v12951_v24 }
 0x1b4   : > { %v868_v51 = vpop.f32.mrf.mxu0 }
 0x1b5   : > { %v13101_v56 = vadd.f32 %v868_v51, %v12947_v23  ;;  %2311 = vrot.lane.b32.xlu0 %v13096_v48, %s12566_s14  ;;  %18215 = vst [vmem:[#allocation60_spill] sm:$0xff] %v13145_v55 }
 0x1b6   : > { %v870_v59 = vpop.f32.mrf.mxu0 }
 0x1b7   : > { %18207 = vst [vmem:[#allocation52_spill] sm:$0xff] %v13101_v56  ;;  %2293 = vrot.lane.b32.xlu1 %v13101_v56, %s12566_s14  ;;  %v13121_v9 = vadd.f32 %v870_v59, %v12951_v24 }
 0x1b8   : > { %v13110_v62 = vpop.f32.mrf.mxu0 }
 0x1b9   : > { %3143 = vrot.lane.b32.xlu0 %v13106_v61, %s12566_s14  ;;  %18211 = vst [vmem:[#allocation56_spill] sm:$0xff] %v13121_v9 }
 0x1ba   : > { %v876_v2 = vpop.f32.mrf.mxu0 }
 0x1bb   : > { %v13118_v4 = vadd.f32 %v876_v2, %v12951_v24  ;;  %v13159_v2 = vadd.f32 %v846_v17, %v12951_v24  ;;  %v13175_v17 = vadd.f32 %v850_v21, %v12947_v23 }
 0x1bc   : > { %v880_v8 = vpop.f32.mrf.mxu0 }
 0x1bd   : > { %18210 = vst [vmem:[#allocation55_spill] sm:$0xff] %v13118_v4  ;;  %v13124_v12 = vadd.f32 %v880_v8, %v12947_v23  ;;  %10303 = vmatprep.subr.msk.mxu1 %vm1200_vm0, %v13118_v4  ;;  %2281 = vrot.lane.b32.xlu0 %v13115_v3, %s12566_s14  ;;  %18217 = vst [vmem:[#allocation62_spill] sm:$0xff] %v13159_v2  ;;  %v13166_v8 = vadd.f32 %v858_v37, %v12951_v24 }
 0x1be   : > { %2327 = vrot.lane.b32.xlu1 %v13118_v4, %s12566_s14  ;;  %v882_v7 = vpop.f32.mrf.mxu0  ;;  %10304 = vmatpush3.xpose.msk.msra.mxu1 %vm1200_vm0, %v13118_v4  ;;  %18219 = vst [vmem:[#allocation64_spill] sm:$0xff] %v13175_v17 }
 0x1bf   : > { %18212 = vst [vmem:[#allocation57_spill] sm:$0xff] %v13124_v12  ;;  %v13138_v43 = vadd.f32 %v882_v7, %v12951_v24  ;;  %10305 = vmatprep.subr.msk.mxu1 %vm1200_vm0, %v13121_v9  ;;  %10391 = vmatprep.mubr.msk.f32.mxu0 %vm1200_vm0, %v13124_v12  ;;  %18218 = vst [vmem:[#allocation63_spill] sm:$0xff] %v13166_v8 }
 0x1c0   : > { %v886_v51 = vpop.f32.mrf.mxu0 }
 0x1c1   : > { %18214 = vst [vmem:[#allocation59_spill] sm:$0xff] %v13138_v43  ;;  %2315 = vrot.lane.b32.xlu0 %v13135_v15, %s12566_s14  ;;  %v13150_v59 = vadd.f32 %v886_v51, %v12947_v23 }
 0x1c2   : > { %2570 = vrot.lane.b32.xlu1 %v13138_v43, %s12566_s14  ;;  %v13154_v13 = vpop.f32.mrf.mxu0  ;;  %10306 = vmatpush3.xpose.msk.msra.mxu1 %vm1200_vm0, %v13121_v9 }
 0x1c3   : > { %18216 = vst [vmem:[#allocation61_spill] sm:$0xff] %v13150_v59  ;;  %10307 = vmatprep.subr.msk.mxu1 %vm1200_vm0, %v13145_v55 }
 0x1c4   : > { %v13163_v47 = vpop.f32.mrf.mxu0 }
 0x1c5   : > { %2317 = vrot.lane.b32.xlu0 %v13159_v2, %s12566_s14 }
 0x1c6   : > { %2540 = vrot.lane.b32.xlu1 %v13150_v59, %s12566_s14  ;;  %v894_v7 = vpop.f32.mrf.mxu0  ;;  %10308 = vmatpush3.xpose.msk.msra.mxu1 %vm1200_vm0, %v13145_v55 }
 0x1c7   : > { %v13178_v51 = vadd.f32 %v894_v7, %v12951_v24  ;;  %10309 = vmatprep.subr.msk.mxu1 %vm1200_vm0, %v13166_v8 }
 0x1c8   : > { %v898_v37 = vpop.f32.mrf.mxu0 }
 0x1c9   : > { %18220 = vst [vmem:[#allocation65_spill] sm:$0xff] %v13178_v51  ;;  %2287 = vrot.lane.b32.xlu0 %v13175_v17, %s12566_s14  ;;  %v13188_v20 = vadd.f32 %v898_v37, %v12947_v23  ;;  %v13208_v37 = vadd.f32 %v13078_v33, %v12947_v23 }
 0x1ca   : > { %2574 = vrot.lane.b32.xlu1 %v13178_v51, %s12566_s14  ;;  %v13192_v21 = vpop.f32.mrf.mxu0  ;;  %10310 = vmatpush3.xpose.msk.msra.mxu1 %vm1200_vm0, %v13166_v8 }
 0x1cb   : > { %18222 = vst [vmem:[#allocation67_spill] sm:$0xff] %v13188_v20  ;;  %10311 = vmatprep.subr.msk.mxu1 %vm1200_vm0, %v13183_v22  ;;  %18223 = vst [vmem:[#allocation68_spill] sm:$0xff] %v13208_v37 }
 0x1cc   : > { %v13198_v7 = vpop.f32.mrf.mxu0 }
 0x1cd   : > { %2319 = vrot.lane.b32.xlu0 %v13183_v22, %s12566_s14 }
 0x1ce   : > { %2544 = vrot.lane.b32.xlu1 %v13188_v20, %s12566_s14  ;;  %v906_v27 = vpop.f32.mrf.mxu0  ;;  %10312 = vmatpush3.xpose.msk.msra.mxu1 %vm1200_vm0, %v13183_v22 }
 0x1cf   : > { %v13211_v0 = vadd.f32 %v906_v27, %v12951_v24  ;;  %10313 = vmatprep.subr.msk.mxu1 %vm1200_vm0, %v13159_v2 }
 0x1d0   : > { %v910_v19 = vpop.f32.mrf.mxu0 }
 0x1d1   : > { %18224 = vst [vmem:[#allocation69_spill] sm:$0xff] %v13211_v0  ;;  %2289 = vrot.lane.b32.xlu0 %v13208_v37, %s12566_s14  ;;  %v13218_v26 = vadd.f32 %v910_v19, %v12947_v23 }
 0x1d2   : > { %2578 = vrot.lane.b32.xlu1 %v13211_v0, %s12566_s14  ;;  %v13222_v22 = vpop.f32.mrf.mxu0  ;;  %10314 = vmatpush3.xpose.msk.msra.mxu1 %vm1200_vm0, %v13159_v2 }
 0x1d3   : > { %18225 = vst [vmem:[#allocation70_spill] sm:$0xff] %v13218_v26  ;;  %10315 = vmatprep.subr.msk.mxu1 %vm1200_vm0, %v13135_v15 }
 0x1d4   : > { %v13228_v33 = vpop.f32.mrf.mxu0 }
 0x1d5   : > { %2321 = vrot.lane.b32.xlu0 %v13166_v8, %s12566_s14 }
 0x1d6   : > { %2548 = vrot.lane.b32.xlu1 %v13218_v26, %s12566_s14  ;;  %v918_v19 = vpop.f32.mrf.mxu0  ;;  %10316 = vmatpush3.xpose.msk.msra.mxu1 %vm1200_vm0, %v13135_v15 }
 0x1d7   : > { %v13237_v27 = vadd.f32 %v918_v19, %v12951_v24  ;;  %10317 = vmatprep.subr.msk.mxu1 %vm1200_vm0, %v13059_v16 }
 0x1d8   : > { %v922_v2 = vpop.f32.mrf.mxu0 }
 0x1d9   : > { %18226 = vst [vmem:[#allocation71_spill] sm:$0xff] %v13237_v27  ;;  %2323 = vrot.lane.b32.xlu0 %v13145_v55, %s12566_s14  ;;  %v13244_v4 = vadd.f32 %v922_v2, %v12947_v23 }
 0x1da   : > { %2582 = vrot.lane.b32.xlu1 %v13237_v27, %s12566_s14  ;;  %v924_v8 = vpop.f32.mrf.mxu0  ;;  %10318 = vmatpush3.xpose.msk.msra.mxu1 %vm1200_vm0, %v13059_v16  ;;  %v13265_v16 = vadd.f32 %v13110_v62, %v12947_v23  ;;  %v13279_v62 = vadd.f32 %v12997_v49, %v13004_v53 }
 0x1db   : > { %18227 = vst [vmem:[#allocation72_spill] sm:$0xff] %v13244_v4  ;;  %10319 = vmatprep.subr.msk.mxu1 %vm1200_vm0, %v13096_v48  ;;  %v13257_v15 = vadd.f32 %v924_v8, %v12951_v24 }
 0x1dc   : > { %v13252_v19 = vpop.f32.mrf.mxu0  ;;  %18229 = vst [vmem:[#allocation74_spill] sm:$0xff] %v13265_v16  ;;  %18230 = vst [vmem:[#allocation75_spill] sm:$0xff] %v13279_v62 }
 0x1dd   : > { %2325 = vrot.lane.b32.xlu0 %v13121_v9, %s12566_s14  ;;  %18228 = vst [vmem:[#allocation73_spill] sm:$0xff] %v13257_v15 }
 0x1de   : > { %2552 = vrot.lane.b32.xlu1 %v13244_v4, %s12566_s14  ;;  %v930_v2 = vpop.f32.mrf.mxu0  ;;  %10320 = vmatpush3.xpose.msk.msra.mxu1 %vm1200_vm0, %v13096_v48 }
 0x1df   : > { %10321 = vmatprep.subr.msk.mxu1 %vm1200_vm0, %v13064_v18  ;;  %v13296_v49 = vadd.f32 %v930_v2, %v12951_v24 }
 0x1e0   : > { %v934_v55 = vpop.f32.mrf.mxu0 }
 0x1e1   : > { %2295 = vrot.lane.b32.xlu0 %v13265_v16, %s12566_s14  ;;  %18232 = vst [vmem:[#allocation77_spill] sm:$0xff] %v13296_v49  ;;  %v13311_v2 = vadd.f32 %v934_v55, %v12947_v23 }
 0x1e2   : > { %2584 = vrot.lane.b32.xlu1 %v13257_v15, %s12566_s14  ;;  %v936_v8 = vpop.f32.mrf.mxu0  ;;  %10322 = vmatpush3.xpose.msk.msra.mxu1 %vm1200_vm0, %v13064_v18  ;;  %v13291_v18 = vadd.f32 %v13154_v13, %v12951_v24  ;;  %v13306_v13 = vadd.f32 %v13163_v47, %v12947_v23  ;;  %v13323_v47 = vadd.f32 %v13192_v21, %v12951_v24 }
 0x1e3   : > { %10323 = vmatprep.subr.msk.mxu1 %vm1200_vm0, %v13054_v14  ;;  %18234 = vst [vmem:[#allocation79_spill] sm:$0xff] %v13311_v2  ;;  %v13328_v55 = vadd.f32 %v936_v8, %v12951_v24  ;;  %v13338_v21 = vadd.f32 %v13198_v7, %v12947_v23  ;;  %v13357_v7 = vadd.f32 %v13222_v22, %v12951_v24 }
 0x1e4   : > { %v13281_v48 = vpop.f32.mrf.mxu0  ;;  %18231 = vst [vmem:[#allocation76_spill] sm:$0xff] %v13291_v18  ;;  %18233 = vst [vmem:[#allocation78_spill] sm:$0xff] %v13306_v13  ;;  %v13374_v22 = vadd.f32 %v13228_v33, %v12947_v23 }
 0x1e5   : > { %2538 = vrot.lane.b32.xlu0 %v13124_v12, %s12566_s14  ;;  %18235 = vst [vmem:[#allocation80_spill] sm:$0xff] %v13323_v47  ;;  %18236 = vst [vmem:[#allocation81_spill] sm:$0xff] %v13328_v55 }
 0x1e6   : > { %3133 = vrot.lane.b32.xlu1 %v13279_v62, %s12566_s14  ;;  %v942_v9 = vpop.f32.mrf.mxu0  ;;  %10324 = vmatpush3.xpose.msk.msra.mxu1 %vm1200_vm0, %v13054_v14  ;;  %18237 = vst [vmem:[#allocation82_spill] sm:$0xff] %v13338_v21  ;;  %18240 = vst [vmem:[#allocation85_spill] sm:$0xff] %v13357_v7 }
 0x1e7   : > { %10325 = vmatprep.subr.msk.mxu1 %vm1200_vm0, %v13044_v10  ;;  %18243 = vst [vmem:[#allocation88_spill] sm:$0xff] %v13374_v22 }
 0x1e8   : > { %v946_v4 = vpop.f32.mrf.mxu0 }
 0x1e9   : > { %2572 = vrot.lane.b32.xlu0 %v13291_v18, %s12566_s14 }
 0x1ea   : > { %2586 = vrot.lane.b32.xlu1 %v13296_v49, %s12566_s14  ;;  %v948_v12 = vpop.f32.mrf.mxu0  ;;  %10326 = vmatpush3.xpose.msk.msra.mxu1 %vm1200_vm0, %v13044_v10 }
 0x1eb   : > { %10327 = vmatprep.subr.msk.mxu1 %vm1200_vm0, %v13024_v63 }
 0x1ec   : > { %v13313_v14 = vpop.f32.mrf.mxu0 }
 0x1ed   : > { %2542 = vrot.lane.b32.xlu0 %v13306_v13, %s12566_s14  ;;  %v13383_v13 = vadd.f32 %v948_v12, %v12951_v24 }
 0x1ee   : > { %2556 = vrot.lane.b32.xlu1 %v13311_v2, %s12566_s14  ;;  %v954_v26 = vpop.f32.mrf.mxu0  ;;  %10328 = vmatpush3.xpose.msk.msra.mxu1 %vm1200_vm0, %v13024_v63  ;;  %v13345_v63 = vadd.f32 %v942_v9, %v12951_v24  ;;  %v13364_v9 = vadd.f32 %v946_v4, %v12947_v23 }
 0x1ef   : > { %10329 = vmatprep.subr.msk.mxu1 %vm1200_vm0, %v13000_v50  ;;  %18245 = vst [vmem:[#allocation90_spill] sm:$0xff] %v13383_v13 }
 0x1f0   : > { %v958_v10 = vpop.f32.mrf.mxu0  ;;  %18239 = vst [vmem:[#allocation84_spill] sm:$0xff] %v13345_v63  ;;  %18242 = vst [vmem:[#allocation87_spill] sm:$0xff] %v13364_v9 }
 0x1f1   : > { %2576 = vrot.lane.b32.xlu0 %v13323_v47, %s12566_s14 }
 0x1f2   : > { %2588 = vrot.lane.b32.xlu1 %v13328_v55, %s12566_s14  ;;  %v960_v2 = vpop.f32.mrf.mxu0  ;;  %10330 = vmatpush3.xpose.msk.msra.mxu1 %vm1200_vm0, %v13000_v50 }
 0x1f3   : > { %10331 = vmatprep.subr.msk.mxu1 %vm1200_vm0, %v12981_v39  ;;  %v13342_v8 = vpop.permute.xlu0 %2297  ;;  %v13419_v33 = vadd.f32 %v960_v2, %v12951_v24 }
 0x1f4   : > { %18238 = vst [vmem:[#allocation83_spill] sm:$0xff] %v13342_v8  ;;  %v13347_v20 = vpop.f32.mrf.mxu0 }
 0x1f5   : > { %2546 = vrot.lane.b32.xlu0 %v13338_v21, %s12566_s14  ;;  %18249 = vst [vmem:[#allocation94_spill] sm:$0xff] %v13419_v33 }
 0x1f6   : > { %2590 = vrot.lane.b32.xlu1 %v13345_v63, %s12566_s14  ;;  %v966_v50 = vpop.f32.mrf.mxu0  ;;  %10332 = vmatpush3.xpose.msk.msra.mxu1 %vm1200_vm0, %v12981_v39 }
 0x1f7   : > { %v13359_v8 = vpop.permute.xlu0 %2267  ;;  %10333 = vmatprep.subr.msk.mxu1 %vm1200_vm0, %v12959_v29 }
 0x1f8   : > { %18241 = vst [vmem:[#allocation86_spill] sm:$0xff] %v13359_v8  ;;  %v970_v21 = vpop.f32.mrf.mxu0 }
 0x1f9   : > { %2580 = vrot.lane.b32.xlu0 %v13357_v7, %s12566_s14 }
 0x1fa   : > { %2560 = vrot.lane.b32.xlu1 %v13364_v9, %s12566_s14  ;;  %v972_v39 = vpop.f32.mrf.mxu0  ;;  %10334 = vmatpush3.xpose.msk.msra.mxu1 %vm1200_vm0, %v12959_v29  ;;  %v13390_v29 = vadd.f32 %v966_v50, %v12951_v24  ;;  %v13407_v50 = vadd.f32 %v954_v26, %v12951_v24 }
 0x1fb   : > { %v13377_v8 = vadd.f32 %v972_v39, %v12951_v24  ;;  %v13379_v4 = vpop.permute.xlu0 %2299  ;;  %10415 = vmatprep.subr.mxu1 %v13049_v11  ;;  %v13398_v39 = vadd.f32 %v13252_v19, %v12947_v23  ;;  %v13428_v19 = vadd.f32 %v13019_v60, %v13004_v53  ;;  %v13437_v24 = vadd.f32 %v958_v10, %v12947_v23 }
 0x1fc   : > { %18246 = vst [vmem:[#allocation91_spill] sm:$0xff] %v13390_v29  ;;  %18248 = vst [vmem:[#allocation93_spill] sm:$0xff] %v13407_v50  ;;  %v13457_v10 = vadd.f32 %v13281_v48, %v12947_v23  ;;  %v13479_v48 = vadd.f32 %v13002_v52, %v13004_v53 }
 0x1fd   : > { %18244 = vst [vmem:[#allocation89_spill] sm:$0xff] %v13377_v8  ;;  %10359 = vmatprep.subr.msk.mxu0 %vm1200_vm0, %v13377_v8  ;;  %2550 = vrot.lane.b32.xlu0 %v13374_v22, %s12566_s14  ;;  %18247 = vst [vmem:[#allocation92_spill] sm:$0xff] %v13398_v39 }
 0x1fe   : > { %2592 = vrot.lane.b32.xlu1 %v13383_v13, %s12566_s14  ;;  %10336 = vmatmul.mubr.msk.f32.vlgmr.msra.gmra.mxu1 %vm1200_vm0, %v12968_v32  ;;  %18250 = vst [vmem:[#allocation95_spill] sm:$0xff] %v13428_v19  ;;  %18251 = vst [vmem:[#allocation96_spill] sm:$0xff] %v13437_v24 }
 0x1ff   : > { %10338 = vmatprep.mubr.msk.f32.mxu1 %vm1200_vm0, %v12986_v42  ;;  %10360 = vmatpush3.xpose.msk.msra.mxu0 %vm1200_vm0, %v13377_v8  ;;  %v13404_v12 = vpop.permute.xlu0 %2269  ;;  %18252 = vst [vmem:[#allocation97_spill] sm:$0xff] %v13457_v10  ;;  %18253 = vst [vmem:[#allocation98_spill] sm:$0xff] %v13479_v48 }
 0x200   : > { %10416 = vmatpush3.msra.mxu1 %v13049_v11  ;;  %10361 = vmatprep.subr.msk.mxu0 %vm1200_vm0, %v13390_v29  ;;  %v13430_v11 = vpop.permute.xlu1 %2265 }
 0x201   : > { %10417 = vmatprep.subr.mxu1 %v13106_v61  ;;  %2554 = vrot.lane.b32.xlu0 %v13398_v39, %s12566_s14 }
 0x202   : > { %10418 = vmatpush3.msra.mxu1 %v13106_v61  ;;  %2594 = vrot.lane.b32.xlu1 %v13407_v50, %s12566_s14 }
 0x203   : > { %10339 = vmatmul.mubr.msk.f32.gmra.mxu1 %vm1200_vm0, %v13012_v57  ;;  %10419 = vmatprep.subr.mxu1 %v13039_v6  ;;  %v13424_v26 = vpop.permute.xlu0 %2301 }
 0x204   : > { %10341 = vmatprep.mubr.msk.f32.mxu1 %vm1200_vm0, %v13034_v5  ;;  %10362 = vmatpush3.xpose.msk.msra.mxu0 %vm1200_vm0, %v13390_v29 }
 0x205   : > { %10420 = vmatpush3.msra.mxu1 %v13039_v6  ;;  %10363 = vmatprep.subr.msk.mxu0 %vm1200_vm0, %v13419_v33  ;;  %v13450_v2 = vpop.permute.xlu1 %2275 }
 0x206   : > { %10421 = vmatprep.subr.mxu1 %v13074_v30  ;;  %3135 = vrot.lane.b32.xlu0 %v13428_v19, %s12566_s14 }
 0x207   : > { %10422 = vmatpush3.msra.mxu1 %v13074_v30  ;;  %2564 = vrot.lane.b32.xlu1 %v13437_v24, %s12566_s14  ;;  %v13448_v60 = vpop.permute.xlu0 %2271 }
 0x208   : > { %10342 = vmatmul.mubr.msk.f32.gmra.mxu1 %vm1200_vm0, %v13007_v54  ;;  %10423 = vmatprep.subr.mxu1 %v13017_v58 }
 0x209   : > { %10344 = vmatprep.mubr.msk.f32.mxu1 %vm1200_vm0, %v13027_v1  ;;  %10364 = vmatpush3.xpose.msk.msra.mxu0 %vm1200_vm0, %v13419_v33  ;;  %v13485_v30 = vpop.permute.xlu1 %3137 }
 0x20a   : > { %10424 = vmatpush3.msra.mxu1 %v13017_v58  ;;  %10365 = vmatprep.subr.msk.mxu0 %vm1200_vm0, %v13407_v50  ;;  %v13483_v58 = vadd.f32 %v13313_v14, %v12947_v23  ;;  %v13501_v14 = vadd.f32 %v12990_v44, %v13004_v53  ;;  %v13518_v44 = vadd.f32 %v13347_v20, %v12947_v23 }
 0x20b   : > { %10425 = vmatprep.subr.mxu1 %v13428_v19  ;;  %2558 = vrot.lane.b32.xlu0 %v13457_v10, %s12566_s14  ;;  %v13469_v6 = vpop.permute.xlu0 %2303 }
 0x20c   : > { %10426 = vmatpush3.msra.mxu1 %v13428_v19  ;;  %2596 = vrot.lane.b32.xlu1 %v13419_v33, %s12566_s14  ;;  %18254 = vst [vmem:[#allocation99_spill] sm:$0xff] %v13483_v58  ;;  %v13492_v19 = vadd.f32 %v970_v21, %v12947_v23  ;;  %18256 = vst [vmem:[#allocation101_spill] sm:$0xff] %v13501_v14  ;;  %v13514_v21 = vadd.f32 %v12992_v46, %v13004_v53 }
 0x20d   : > { %10345 = vmatmul.mubr.msk.f32.gmra.mxu1 %vm1200_vm0, %v13086_v40  ;;  %10427 = vmatprep.subr.mxu1 %v13279_v62  ;;  %18258 = vst [vmem:[#allocation103_spill] sm:$0xff] %v13518_v44  ;;  %v13526_v61 = vpop.permute.xlu1 %2277  ;;  %v13533_v46 = vadd.f32 %v12978_v38, %v13004_v53  ;;  %v13546_v23 = vadd.f32 %v12983_v41, %v13004_v53 }
 0x20e   : > { %10347 = vmatprep.mubr.msk.f32.mxu1 %vm1200_vm0, %v13115_v3  ;;  %10366 = vmatpush3.xpose.msk.msra.mxu0 %vm1200_vm0, %v13407_v50  ;;  %18255 = vst [vmem:[#allocation100_spill] sm:$0xff] %v13492_v19  ;;  %18257 = vst [vmem:[#allocation102_spill] sm:$0xff] %v13514_v21  ;;  %v13557_v38 = vadd.f32 %v12972_v34, %v13004_v53  ;;  %v13572_v34 = vadd.f32 %v12974_v36, %v13004_v53 }
 0x20f   : > { %10428 = vmatpush3.msra.mxu1 %v13279_v62  ;;  %10367 = vmatprep.subr.msk.mxu0 %vm1200_vm0, %v13383_v13  ;;  %v13497_v52 = vpop.permute.xlu0 %2273  ;;  %18259 = vst [vmem:[#allocation104_spill] sm:$0xff] %v13533_v46  ;;  %18260 = vst [vmem:[#allocation105_spill] sm:$0xff] %v13546_v23 }
 0x210   : > { %10429 = vmatprep.subr.mxu1 %v13479_v48  ;;  %2562 = vrot.lane.b32.xlu0 %v13483_v58, %s12566_s14  ;;  %18261 = vst [vmem:[#allocation106_spill] sm:$0xff] %v13557_v38  ;;  %18262 = vst [vmem:[#allocation107_spill] sm:$0xff] %v13572_v34 }
 0x211   : > { %10430 = vmatpush3.msra.mxu1 %v13479_v48  ;;  %2568 = vrot.lane.b32.xlu1 %v13492_v19, %s12566_s14 }
 0x212   : > { %10348 = vmatmul.mubr.msk.f32.gmra.mxu1 %vm1200_vm0, %v13069_v25  ;;  %10431 = vmatprep.subr.mxu1 %v13501_v14  ;;  %v13599_v25 = vadd.f32 %v12965_v31, %v13004_v53 }
 0x213   : > { %10350 = vmatprep.mubr.msk.f32.mxu1 %vm1200_vm0, %v13081_v35  ;;  %10368 = vmatpush3.xpose.msk.msra.mxu0 %vm1200_vm0, %v13383_v13  ;;  %v13524_v62 = vpop.permute.xlu0 %2305 }
 0x214   : > { %10432 = vmatpush3.msra.mxu1 %v13501_v14  ;;  %10369 = vmatprep.subr.msk.mxu0 %vm1200_vm0, %v13345_v63  ;;  %18266 = vst [vmem:[#allocation111_spill] sm:$0xff] %v13599_v25 }
 0x215   : > { %10433 = vmatprep.subr.mxu1 %v13514_v21  ;;  %2566 = vrot.lane.b32.xlu0 %v13518_v44, %s12566_s14 }
 0x216   : > { %10434 = vmatpush3.msra.mxu1 %v13514_v21  ;;  %v18282_v21 = vld [vmem:[#allocation82_spill] sm:$0xff] }
 0x217   : > { %10351 = vmatmul.mubr.msk.f32.gmra.mxu1 %vm1200_vm0, %v13175_v17  ;;  %10435 = vmatprep.subr.mxu1 %v13533_v46  ;;  %v13542_v20 = vpop.permute.xlu0 %2307  ;;  %v13559_v17 = vpop.permute.xlu1 %3141 }
 0x218   : > { %10353 = vmatprep.mubr.msk.f32.mxu1 %vm1200_vm0, %v13208_v37  ;;  %10370 = vmatpush3.xpose.msk.msra.mxu0 %vm1200_vm0, %v13345_v63  ;;  %v13578_v37 = vpop.f32.mrf.mxu1 }
 0x219   : > { %10436 = vmatpush3.msra.mxu1 %v13533_v46  ;;  %10371 = vmatprep.subr.msk.mxu0 %vm1200_vm0, %v13328_v55  ;;  %18263 = vst [vmem:[#allocation108_spill] sm:$0xff] %v13578_v37  ;;  %v18283_v46 = vld [vmem:[#allocation70_spill] sm:$0xff]  ;;  %v643_v37 = vld [vmem:[%s12856_s25 + $0xb0] sm:$0xff] }
 0x21a   : > { %10437 = vmatprep.subr.mxu1 %v13546_v23  ;;  %2598 = vrot.lane.b32.xlu0 %v13390_v29, %s12566_s14 }
 0x21b   : > { %10438 = vmatpush3.msra.mxu1 %v13546_v23  ;;  %v13565_v41 = vpop.permute.xlu0 %2309  ;;  %v13594_v35 = vpop.permute.xlu1 %3145  ;;  %v18280_v23 = vld [vmem:[#allocation78_spill] sm:$0xff] }
 0x21c   : > { %10354 = vmatmul.mubr.msk.f32.gmra.mxu1 %vm1200_vm0, %v13091_v45  ;;  %10439 = vmatprep.subr.mxu1 %v13557_v38  ;;  %v13585_v45 = vadd.f32 %v12956_v28, %v13004_v53 }
 0x21d   : > { %10356 = vmatprep.mubr.msk.f32.mxu1 %vm1200_vm0, %v13101_v56  ;;  %10372 = vmatpush3.xpose.msk.msra.mxu0 %vm1200_vm0, %v13328_v55  ;;  %v13592_v56 = vpop.f32.mrf.mxu1 }
 0x21e   : > { %10440 = vmatpush3.msra.mxu1 %v13557_v38  ;;  %10373 = vmatprep.subr.msk.mxu0 %vm1200_vm0, %v13296_v49  ;;  %18264 = vst [vmem:[#allocation109_spill] sm:$0xff] %v13585_v45  ;;  %18265 = vst [vmem:[#allocation110_spill] sm:$0xff] %v13592_v56  ;;  %v18281_v38 = vld [vmem:[#allocation67_spill] sm:$0xff] }
 0x21f   : > { %10441 = vmatprep.subr.mxu1 %v13572_v34  ;;  %2600 = vrot.lane.b32.xlu0 %v13377_v8, %s12566_s14  ;;  %v13590_v36 = vpop.permute.xlu0 %3139  ;;  %v13604_v28 = vpop.f32.mrf.mxu1 }
 0x220   : > { %10442 = vmatpush3.msra.mxu1 %v13572_v34  ;;  %18267 = vst [vmem:[#allocation112_spill] sm:$0xff] %v13604_v28  ;;  %v13619_v40 = vpop.permute.xlu1 %2313 }
 0x221   : > { %10357 = vmatmul.mubr.msk.f32.gmra.mxu1 %vm1200_vm0, %v13265_v16  ;;  %10443 = vmatprep.subr.mxu1 %v13585_v45  ;;  %v13614_v31 = vpop.f32.mrf.mxu1 }
 0x222   : > { %10374 = vmatpush3.xpose.msk.msra.mxu0 %vm1200_vm0, %v13296_v49  ;;  %10444 = vmatpush3.msra.mxu1 %v13585_v45  ;;  %18268 = vst [vmem:[#allocation113_spill] sm:$0xff] %v13614_v31 }
 0x223   : > { %10375 = vmatprep.subr.msk.mxu0 %vm1200_vm0, %v13257_v15  ;;  %10445 = vmatprep.subr.mxu1 %v13599_v25  ;;  %v13612_v3 = vpop.permute.xlu0 %2279  ;;  %v13617_v16 = vpop.f32.mrf.mxu1 }
 0x224   : > { %10446 = vmatpush3.msra.mxu1 %v13599_v25  ;;  %18269 = vst [vmem:[#allocation114_spill] sm:$0xff] %v13617_v16 }
 0x225   : > { %v13627_v54 = vpop.f32.mrf.mxu1 }
 0x226   : > { %10376 = vmatpush3.xpose.msk.msra.mxu0 %vm1200_vm0, %v13257_v15  ;;  %18270 = vst [vmem:[#allocation115_spill] sm:$0xff] %v13627_v54  ;;  %v13639_v15 = vpop.permute.xlu1 %2283 }
 0x227   : > { %10377 = vmatprep.subr.msk.mxu0 %vm1200_vm0, %v13237_v27  ;;  %v13625_v1 = vpop.permute.xlu0 %2311  ;;  %v13629_v5 = vpop.f32.mrf.mxu1 }
 0x228   : > { %18271 = vst [vmem:[#allocation116_spill] sm:$0xff] %v13629_v5 }
 0x229   : > { %v13637_v42 = vpop.f32.mrf.mxu1 }
 0x22a   : > { %10378 = vmatpush3.xpose.msk.msra.mxu0 %vm1200_vm0, %v13237_v27  ;;  %18272 = vst [vmem:[#allocation117_spill] sm:$0xff] %v13637_v42  ;;  %v13653_v63 = vpop.permute.xlu1 %2285 }
 0x22b   : > { %10379 = vmatprep.subr.msk.mxu0 %vm1200_vm0, %v13357_v7  ;;  %v13635_v57 = vpop.permute.xlu0 %3143  ;;  %v13641_v32 = vpop.f32.mrf.mxu1 }
 0x22c   : > { %18273 = vst [vmem:[#allocation118_spill] sm:$0xff] %v13641_v32 }
 0x22d   : > { %v13649_v27 = vpop.f32.mrf.mxu1 }
 0x22e   : > { %10380 = vmatpush3.xpose.msk.msra.mxu0 %vm1200_vm0, %v13357_v7  ;;  %18274 = vst [vmem:[#allocation119_spill] sm:$0xff] %v13649_v27  ;;  %v13663_v33 = vpop.permute.xlu1 %2291 }
 0x22f   : > { %10381 = vmatprep.subr.msk.mxu0 %vm1200_vm0, %v13211_v0  ;;  %v13647_v49 = vpop.permute.xlu0 %2281  ;;  %v13651_v55 = vpop.f32.mrf.mxu1 }
 0x230   : > { %18275 = vst [vmem:[#allocation120_spill] sm:$0xff] %v13651_v55 }
 0x231   : > { %v13659_v50 = vpop.f32.mrf.mxu1 }
 0x232   : > { %10382 = vmatpush3.xpose.msk.msra.mxu0 %vm1200_vm0, %v13211_v0  ;;  %18276 = vst [vmem:[#allocation121_spill] sm:$0xff] %v13659_v50  ;;  %v13680_v45 = vpop.permute.xlu1 %2293  ;;  %v651_v50 = vld [vmem:[%s12856_s25 + $0xf0] sm:$0xff] }
 0x233   : > { %10383 = vmatprep.subr.msk.mxu0 %vm1200_vm0, %v13323_v47  ;;  %v2316_v13 = vpop.permute.xlu0 %2315  ;;  %v13661_v7 = vpop.f32.mrf.mxu1 }
 0x234   : > { %18277 = vst [vmem:[#allocation122_spill] sm:$0xff] %v13661_v7 }
 0x235   : > { %v13669_v8 = vpop.f32.mrf.mxu1 }
 0x236   : > { %10384 = vmatpush3.xpose.msk.msra.mxu0 %vm1200_vm0, %v13323_v47  ;;  %18278 = vst [vmem:[#allocation123_spill] sm:$0xff] %v13669_v8 }
 0x237   : > { %10385 = vmatprep.subr.msk.mxu0 %vm1200_vm0, %v13178_v51  ;;  %v2318_v29 = vpop.permute.xlu0 %2317  ;;  %v10302_v0 = vpop.f32.mrf.mxu1 }
 0x238   : > { %v13674_v25 = vadd.f32 %v10302_v0, %v13004_v53 }
 0x23a   : > { %10386 = vmatpush3.xpose.msk.msra.mxu0 %vm1200_vm0, %v13178_v51  ;;  %18279 = vst [vmem:[#allocation124_spill] sm:$0xff] %v13674_v25  ;;  %10471 = vmatprep.subr.mxu1 %v13674_v25  ;;  %v2328_v51 = vpop.permute.xlu1 %2327 }
 0x23b   : > { %10387 = vmatprep.subr.msk.mxu0 %vm1200_vm0, %v13291_v18  ;;  %v13678_v34 = vpop.permute.xlu0 %2287 }
 0x23e   : > { %10388 = vmatpush3.xpose.msk.msra.mxu0 %vm1200_vm0, %v13291_v18 }
 0x23f   : > { %10389 = vmatprep.subr.msk.mxu0 %vm1200_vm0, %v13138_v43  ;;  %v2320_v47 = vpop.permute.xlu0 %2319 }
 0x242   : > { %10390 = vmatpush3.xpose.msk.msra.mxu0 %vm1200_vm0, %v13138_v43 }
 0x243   : > { %10527 = vmatprep.subr.msk.mxu0 %vm1200_vm0, %v2328_v51  ;;  %v13690_v0 = vpop.permute.xlu0 %2289 }
 0x245   : > { %10392 = vmatmul.mubr.msk.f32.vlgmr.msra.gmra.mxu0 %vm1200_vm0, %v13150_v59 }
 0x246   : > { %10394 = vmatprep.mubr.msk.f32.mxu0 %vm1200_vm0, %v18280_v23  ;;  %10528 = vmatpush3.xpose.msk.msra.mxu0 %vm1200_vm0, %v2328_v51  ;;  %v18284_v23 = vld [vmem:[#allocation72_spill] sm:$0xff]  ;;  %v18285_v51 = vld [vmem:[#allocation79_spill] sm:$0xff] }
 0x247   : > { %v2322_v18 = vpop.permute.xlu0 %2321 }
 0x249   : > { %10395 = vmatmul.mubr.msk.f32.gmra.mxu0 %vm1200_vm0, %v18281_v38 }
 0x24a   : > { %10397 = vmatprep.mubr.msk.f32.mxu0 %vm1200_vm0, %v18282_v21  ;;  %v13931_v21 = vld [vmem:[%s12856_s25 + $0x68] sm:$0xff] }
 0x24b   : > { %v2324_v43 = vpop.permute.xlu0 %2323 }
 0x24d   : > { %10398 = vmatmul.mubr.msk.f32.gmra.mxu0 %vm1200_vm0, %v18283_v46 }
 0x24e   : > { %10400 = vmatprep.mubr.msk.f32.mxu0 %vm1200_vm0, %v13374_v22  ;;  %v13925_v22 = vld [vmem:[%s12856_s25 + $0x50] sm:$0xff] }
 0x24f   : > { %v2326_v59 = vpop.permute.xlu0 %2325 }
 0x250   : > { %10529 = vmatprep.subr.msk.mxu0 %vm1200_vm0, %v2326_v59 }
 0x251   : > { %10401 = vmatmul.mubr.msk.f32.gmra.mxu0 %vm1200_vm0, %v18284_v23 }
 0x252   : > { %10403 = vmatprep.mubr.msk.f32.mxu0 %vm1200_vm0, %v13398_v39  ;;  %10530 = vmatpush3.xpose.msk.msra.mxu0 %vm1200_vm0, %v2326_v59  ;;  %v13734_v59 = vpop.permute.xlu1 %2570 }
 0x253   : > { %10531 = vmatprep.subr.msk.mxu0 %vm1200_vm0, %v2324_v43  ;;  %18286 = vst [vmem:[#allocation125_spill] sm:$0xff] %v13734_v59  ;;  %v637_v59 = vld [vmem:[%s12856_s25 + $0x80] sm:$0xff] }
 0x255   : > { %10404 = vmatmul.mubr.msk.f32.gmra.mxu0 %vm1200_vm0, %v18285_v51 }
 0x256   : > { %10406 = vmatprep.mubr.msk.f32.mxu0 %vm1200_vm0, %v13457_v10  ;;  %10532 = vmatpush3.xpose.msk.msra.mxu0 %vm1200_vm0, %v2324_v43  ;;  %v13730_v43 = vpop.permute.xlu0 %2295  ;;  %v13911_v10 = vld [vmem:[%s12856_s25 + $0x40] sm:$0xff] }
 0x257   : > { %10533 = vmatprep.subr.msk.mxu0 %vm1200_vm0, %v2322_v18 }
 0x259   : > { %10407 = vmatmul.mubr.msk.f32.gmra.mxu0 %vm1200_vm0, %v13364_v9 }
 0x25a   : > { %10409 = vmatprep.mubr.msk.f32.mxu0 %vm1200_vm0, %v13483_v58  ;;  %10534 = vmatpush3.xpose.msk.msra.mxu0 %vm1200_vm0, %v2322_v18  ;;  %v13740_v18 = vpop.permute.xlu0 %2538  ;;  %v18302_v58 = vld [vmem:[#allocation86_spill] sm:$0xff] }
 0x25b   : > { %10535 = vmatprep.subr.msk.mxu0 %vm1200_vm0, %v2320_v47  ;;  %18287 = vst [vmem:[#allocation126_spill] sm:$0xff] %v13740_v18  ;;  %v641_v18 = vld [vmem:[%s12856_s25 + $0xa0] sm:$0xff] }
 0x25d   : > { %10410 = vmatmul.mubr.msk.f32.gmra.mxu0 %vm1200_vm0, %v13437_v24  ;;  %v18299_v24 = vld [vmem:[#allocation83_spill] sm:$0xff] }
 0x25e   : > { %10412 = vmatprep.mubr.msk.f32.mxu0 %vm1200_vm0, %v13518_v44  ;;  %10536 = vmatpush3.xpose.msk.msra.mxu0 %vm1200_vm0, %v2320_v47  ;;  %v13745_v47 = vpop.permute.xlu1 %2540 }
 0x25f   : > { %10537 = vmatprep.subr.msk.mxu0 %vm1200_vm0, %v2318_v29  ;;  %18288 = vst [vmem:[#allocation127_spill] sm:$0xff] %v13745_v47 }
 0x261   : > { %10413 = vmatmul.mubr.msk.f32.gmra.mxu0 %vm1200_vm0, %v13492_v19 }
 0x262   : > { %10559 = vmatprep.mubr.msk.f32.mxu0 %vm1200_vm0, %v13430_v11  ;;  %10538 = vmatpush3.xpose.msk.msra.mxu0 %vm1200_vm0, %v2318_v29  ;;  %v13751_v11 = vpop.permute.xlu0 %2572  ;;  %v13753_v29 = vpop.permute.xlu1 %2574 }
 0x263   : > { %10539 = vmatprep.subr.msk.mxu0 %vm1200_vm0, %v2316_v13  ;;  %18289 = vst [vmem:[#allocation128_spill] sm:$0xff] %v13751_v11  ;;  %18290 = vst [vmem:[#allocation129_spill] sm:$0xff] %v13753_v29 }
 0x266   : > { %10540 = vmatpush3.xpose.msk.msra.mxu0 %vm1200_vm0, %v2316_v13  ;;  %v13759_v13 = vpop.permute.xlu0 %2542 }
 0x267   : > { %10541 = vmatprep.subr.msk.mxu0 %vm1200_vm0, %v13619_v40  ;;  %18291 = vst [vmem:[#allocation130_spill] sm:$0xff] %v13759_v13 }
 0x26a   : > { %10542 = vmatpush3.xpose.msk.msra.mxu0 %vm1200_vm0, %v13619_v40  ;;  %v13765_v40 = vpop.permute.xlu1 %2544 }
 0x26b   : > { %10543 = vmatprep.subr.msk.mxu0 %vm1200_vm0, %v13625_v1  ;;  %18292 = vst [vmem:[#allocation131_spill] sm:$0xff] %v13765_v40 }
 0x26e   : > { %10544 = vmatpush3.xpose.msk.msra.mxu0 %vm1200_vm0, %v13625_v1  ;;  %v13771_v1 = vpop.permute.xlu0 %2576  ;;  %v13773_v19 = vpop.permute.xlu1 %2578 }
 0x26f   : > { %10545 = vmatprep.subr.msk.mxu0 %vm1200_vm0, %v13565_v41  ;;  %18293 = vst [vmem:[#allocation132_spill] sm:$0xff] %v13771_v1  ;;  %18294 = vst [vmem:[#allocation133_spill] sm:$0xff] %v13773_v19  ;;  %v640_v1 = vld [vmem:[%s12856_s25 + $0x98] sm:$0xff]  ;;  %v639_v19 = vld [vmem:[%s12856_s25 + $0x90] sm:$0xff] }
 0x272   : > { %10546 = vmatpush3.xpose.msk.msra.mxu0 %vm1200_vm0, %v13565_v41  ;;  %v13779_v41 = vpop.permute.xlu0 %2546 }
 0x273   : > { %10547 = vmatprep.subr.msk.mxu0 %vm1200_vm0, %v13542_v20  ;;  %18295 = vst [vmem:[#allocation134_spill] sm:$0xff] %v13779_v41  ;;  %v13953_v41 = vld [vmem:[%s12856_s25 + $0x70] sm:$0xff] }
 0x276   : > { %10548 = vmatpush3.xpose.msk.msra.mxu0 %vm1200_vm0, %v13542_v20  ;;  %v13785_v20 = vpop.permute.xlu1 %2548 }
 0x277   : > { %10549 = vmatprep.subr.msk.mxu0 %vm1200_vm0, %v13524_v62  ;;  %18296 = vst [vmem:[#allocation135_spill] sm:$0xff] %v13785_v20 }
 0x27a   : > { %10550 = vmatpush3.xpose.msk.msra.mxu0 %vm1200_vm0, %v13524_v62  ;;  %v13791_v62 = vpop.permute.xlu0 %2580  ;;  %v13793_v44 = vpop.permute.xlu1 %2582 }
 0x27b   : > { %10551 = vmatprep.subr.msk.mxu0 %vm1200_vm0, %v13469_v6  ;;  %18297 = vst [vmem:[#allocation136_spill] sm:$0xff] %v13791_v62  ;;  %18298 = vst [vmem:[#allocation137_spill] sm:$0xff] %v13793_v44 }
 0x27e   : > { %10552 = vmatpush3.xpose.msk.msra.mxu0 %vm1200_vm0, %v13469_v6  ;;  %v13799_v6 = vpop.permute.xlu0 %2550 }
 0x27f   : > { %10553 = vmatprep.subr.msk.mxu0 %vm1200_vm0, %v13424_v26  ;;  %18300 = vst [vmem:[#allocation83_spill] sm:$0xff] %v13799_v6  ;;  %v13945_v6 = vld [vmem:[%s12856_s25 + $0x78] sm:$0xff] }
 0x282   : > { %10554 = vmatpush3.xpose.msk.msra.mxu0 %vm1200_vm0, %v13424_v26  ;;  %v13804_v26 = vpop.permute.xlu1 %2552 }
 0x283   : > { %10555 = vmatprep.subr.msk.mxu0 %vm1200_vm0, %v13379_v4  ;;  %18301 = vst [vmem:[#allocation138_spill] sm:$0xff] %v13804_v26 }
 0x286   : > { %10556 = vmatpush3.xpose.msk.msra.mxu0 %vm1200_vm0, %v13379_v4  ;;  %v13812_v4 = vpop.permute.xlu0 %2554 }
 0x287   : > { %10557 = vmatprep.subr.msk.mxu0 %vm1200_vm0, %v18299_v24  ;;  %18303 = vst [vmem:[#allocation86_spill] sm:$0xff] %v13812_v4  ;;  %v13939_v4 = vld [vmem:[%s12856_s25 + $0x60] sm:$0xff] }
 0x28a   : > { %10558 = vmatpush3.xpose.msk.msra.mxu0 %vm1200_vm0, %v18299_v24  ;;  %v13818_v24 = vpop.permute.xlu1 %2584 }
 0x28b   : > { %10639 = vmatprep.subr.mxu0 %v13594_v35  ;;  %18304 = vst [vmem:[#allocation139_spill] sm:$0xff] %v13818_v24  ;;  %v642_v24 = vld [vmem:[%s12856_s25 + $0xa8] sm:$0xff] }
 0x28d   : > { %10560 = vmatmul.mubr.msk.f32.vlgmr.msra.gmra.mxu0 %vm1200_vm0, %v18302_v58 }
 0x28e   : > { %10562 = vmatprep.mubr.msk.f32.mxu0 %vm1200_vm0, %v13404_v12  ;;  %10640 = vmatpush3.msra.mxu0 %v13594_v35  ;;  %v3134_v58 = vpop.permute.xlu1 %3133  ;;  %v13852_v35 = vld [vmem:[%s12856_s25 + $0x8] sm:$0xff] }
 0x28f   : > { %10641 = vmatprep.subr.mxu0 %v13635_v57 }
 0x290   : > { %10642 = vmatpush3.msra.mxu0 %v13635_v57  ;;  %v3136_v57 = vpop.permute.xlu0 %3135 }
 0x291   : > { %10563 = vmatmul.mubr.msk.f32.gmra.mxu0 %vm1200_vm0, %v13448_v60  ;;  %10643 = vmatprep.subr.mxu0 %v13559_v17  ;;  %v13872_v60 = vld [vmem:[%s12856_s25 + $0x10] sm:$0xff] }
 0x292   : > { %10565 = vmatprep.mubr.msk.f32.mxu0 %vm1200_vm0, %v13497_v52  ;;  %10644 = vmatpush3.msra.mxu0 %v13559_v17  ;;  %v13862_v17 = vld [vmem:[%s12856_s25 + $0x18] sm:$0xff] }
 0x293   : > { %10645 = vmatprep.subr.mxu0 %v13590_v36 }
 0x294   : > { %10646 = vmatpush3.msra.mxu0 %v13590_v36  ;;  %v13882_v36 = vld [vmem:[%s12856_s25 + $0x28] sm:$0xff] }
 0x295   : > { %10566 = vmatmul.mubr.msk.f32.gmra.mxu0 %vm1200_vm0, %v13450_v2  ;;  %10647 = vmatprep.subr.mxu0 %v13485_v30 }
 0x296   : > { %10568 = vmatprep.mubr.msk.f32.mxu0 %vm1200_vm0, %v13526_v61  ;;  %10648 = vmatpush3.msra.mxu0 %v13485_v30  ;;  %v13849_v30 = vpop.f32.mrf.mxu1 }
 0x297   : > { %10649 = vmatprep.subr.mxu0 %v3136_v57  ;;  %18305 = vst [vmem:[#allocation140_spill] sm:$0xff] %v13849_v30 }
 0x298   : > { %10650 = vmatpush3.msra.mxu0 %v3136_v57 }
 0x299   : > { %10569 = vmatmul.mubr.msk.f32.gmra.mxu0 %vm1200_vm0, %v13612_v3  ;;  %10651 = vmatprep.subr.mxu0 %v3134_v58 }
 0x29a   : > { %10571 = vmatprep.mubr.msk.f32.mxu0 %vm1200_vm0, %v13647_v49  ;;  %10652 = vmatpush3.msra.mxu0 %v3134_v58  ;;  %v13892_v58 = vld [vmem:[%s12856_s25 + $0x38] sm:$0xff] }
 0x29d   : > { %10572 = vmatmul.mubr.msk.f32.gmra.mxu0 %vm1200_vm0, %v13639_v15  ;;  %v13858_v15 = vld [vmem:[%s12856_s25] sm:$0xff] }
 0x29e   : > { %10574 = vmatprep.mubr.msk.f32.mxu0 %vm1200_vm0, %v13653_v63 }
 0x2a1   : > { %10575 = vmatmul.mubr.msk.f32.gmra.mxu0 %vm1200_vm0, %v13678_v34  ;;  %v13879_v34 = vld [vmem:[%s12856_s25 + $0x20] sm:$0xff] }
 0x2a2   : > { %10577 = vmatprep.mubr.msk.f32.mxu0 %vm1200_vm0, %v13690_v0 }
 0x2a5   : > { %10578 = vmatmul.mubr.msk.f32.gmra.mxu0 %vm1200_vm0, %v13663_v33 }
 0x2a6   : > { %10580 = vmatprep.mubr.msk.f32.mxu0 %vm1200_vm0, %v13680_v45 }
 0x2a9   : > { %10581 = vmatmul.mubr.msk.f32.gmra.mxu0 %vm1200_vm0, %v13730_v43 }
 0x2be   : > { %v10337_v63 = vpop.f32.mrf.mxu1 }
 0x2bf   : > { %v13855_v61 = vadd.f32 %v10337_v63, %v13852_v35 }
 0x2c0   : > { %v1363_v3 = vpop.f32.mrf.mxu1 }
 0x2c1   : > { %1685 = vmax.xlane.f32.xlu0 %v13855_v61  ;;  %v13865_v49 = vadd.f32 %v1363_v3, %v13858_v15  ;;  %v13896_v3 = vld [vmem:[%s12856_s25 + $0x30] sm:$0xff] }
 0x2c3   : > { %v10340_v45 = vpop.f32.mrf.mxu1 }
 0x2c4   : > { %v13868_v12 = vadd.f32 %v10340_v45, %v13862_v17 }
 0x2c5   : > { %v1373_v33 = vpop.f32.mrf.mxu1  ;;  %1683 = vmax.xlane.f32.xlu0 %v13865_v49 }
 0x2c6   : > { %1689 = vmax.xlane.f32.xlu1 %v13868_v12  ;;  %v13876_v52 = vadd.f32 %v1373_v33, %v13872_v60 }
 0x2c8   : > { %v10343_v2 = vpop.f32.mrf.mxu1 }
 0x2c9   : > { %v13889_v57 = vadd.f32 %v10343_v2, %v13882_v36  ;;  %v13906_v2 = vld [vmem:[%s12856_s25 + $0x48] sm:$0xff] }
 0x2ca   : > { %v1383_v0 = vpop.f32.mrf.mxu1  ;;  %1687 = vmax.xlane.f32.xlu1 %v13876_v52 }
 0x2cb   : > { %v13886_v43 = vadd.f32 %v1383_v0, %v13879_v34 }
 0x2cd   : > { %v10346_v63 = vpop.f32.mrf.mxu1  ;;  %1691 = vmax.xlane.f32.xlu0 %v13886_v43 }
 0x2ce   : > { %1693 = vmax.xlane.f32.xlu1 %v13889_v57  ;;  %v13900_v33 = vadd.f32 %v10346_v63, %v13892_v58  ;;  %v13917_v63 = vld [vmem:[%s12856_s25 + $0x58] sm:$0xff] }
 0x2cf   : > { %v1393_v45 = vpop.f32.mrf.mxu1 }
 0x2d0   : > { %v13903_v0 = vadd.f32 %v1393_v45, %v13896_v3 }
 0x2d2   : > { %v10349_v9 = vpop.f32.mrf.mxu1  ;;  %1695 = vmax.xlane.f32.xlu0 %v13903_v0  ;;  %1697 = vmax.xlane.f32.xlu1 %v13900_v33 }
 0x2d3   : > { %v13914_v51 = vadd.f32 %v10349_v9, %v13906_v2 }
 0x2d4   : > { %v1403_v39 = vpop.f32.mrf.mxu1 }
 0x2d5   : > { %v13920_v45 = vadd.f32 %v1403_v39, %v13911_v10 }
 0x2d6   : > { %1701 = vmax.xlane.f32.xlu1 %v13914_v51 }
 0x2d7   : > { %v10352_v23 = vpop.f32.mrf.mxu1  ;;  %1699 = vmax.xlane.f32.xlu0 %v13920_v45 }
 0x2d8   : > { %v13928_v46 = vadd.f32 %v10352_v23, %v13917_v63 }
 0x2d9   : > { %v1413_v9 = vpop.f32.mrf.mxu1 }
 0x2da   : > { %v13934_v38 = vadd.f32 %v1413_v9, %v13925_v22  ;;  %1705 = vmax.xlane.f32.xlu1 %v13928_v46 }
 0x2dc   : > { %v10355_v39 = vpop.f32.mrf.mxu1  ;;  %1703 = vmax.xlane.f32.xlu0 %v13934_v38 }
 0x2dd   : > { %v13942_v26 = vadd.f32 %v10355_v39, %v13931_v21 }
 0x2de   : > { %v1423_v23 = vpop.f32.mrf.mxu1 }
 0x2df   : > { %v13948_v20 = vadd.f32 %v1423_v23, %v13939_v4  ;;  %1709 = vmax.xlane.f32.xlu1 %v13942_v26  ;;  %v638_v23 = vld [vmem:[%s12856_s25 + $0x88] sm:$0xff] }
 0x2e1   : > { %v10358_v9 = vpop.f32.mrf.mxu1  ;;  %1707 = vmax.xlane.f32.xlu0 %v13948_v20 }
 0x2e2   : > { %v13956_v40 = vadd.f32 %v10358_v9, %v13945_v6 }
 0x2e3   : > { %v1433_v39 = vpop.f32.mrf.mxu1 }
 0x2e4   : > { %v13959_v13 = vadd.f32 %v1433_v39, %v13953_v41  ;;  %1713 = vmax.xlane.f32.xlu1 %v13956_v40 }
 0x2e6   : > { %1711 = vmax.xlane.f32.xlu0 %v13959_v13 }
 0x305   : > { %v10393_v47 = vpop.f32.mrf.mxu0 }
 0x306   : > { %v13965_v11 = vadd.f32 %v10393_v47, %v638_v23 }
 0x307   : > { %v1604_v29 = vpop.f32.mrf.mxu0 }
 0x308   : > { %1717 = vmax.xlane.f32.xlu1 %v13965_v11  ;;  %v13969_v9 = vadd.f32 %v1604_v29, %v637_v59  ;;  %v644_v29 = vld [vmem:[%s12856_s25 + $0xb8] sm:$0xff] }
 0x309   : > { %v10396_v39 = vpop.f32.mrf.mxu0 }
 0x30a   : > { %v13972_v62 = vadd.f32 %v10396_v39, %v640_v1  ;;  %1715 = vmax.xlane.f32.xlu0 %v13969_v9 }
 0x30b   : > { %v1614_v44 = vpop.f32.mrf.mxu0 }
 0x30c   : > { %1721 = vmax.xlane.f32.xlu1 %v13972_v62  ;;  %v13977_v47 = vadd.f32 %v1614_v44, %v639_v19  ;;  %v646_v44 = vld [vmem:[%s12856_s25 + $0xc8] sm:$0xff] }
 0x30d   : > { %v10399_v23 = vpop.f32.mrf.mxu0 }
 0x30e   : > { %v13980_v56 = vadd.f32 %v10399_v23, %v642_v24  ;;  %1719 = vmax.xlane.f32.xlu0 %v13977_v47  ;;  %v13995_v23 = vpop.permute.xlu1 %2586 }
 0x30f   : > { %v1624_v59 = vpop.f32.mrf.mxu0  ;;  %18306 = vst [vmem:[#allocation141_spill] sm:$0xff] %v13995_v23 }
 0x310   : > { %v13984_v1 = vadd.f32 %v1624_v59, %v641_v18  ;;  %1725 = vmax.xlane.f32.xlu1 %v13980_v56  ;;  %v645_v59 = vld [vmem:[%s12856_s25 + $0xc0] sm:$0xff] }
 0x311   : > { %v10402_v39 = vpop.f32.mrf.mxu0 }
 0x312   : > { %v13988_v31 = vadd.f32 %v10402_v39, %v644_v29  ;;  %1723 = vmax.xlane.f32.xlu0 %v13984_v1  ;;  %v648_v39 = vld [vmem:[%s12856_s25 + $0xd8] sm:$0xff]  ;;  %v14009_v23 = vpop.permute.xlu1 %2556 }
 0x313   : > { %v1634_v19 = vpop.f32.mrf.mxu0  ;;  %18307 = vst [vmem:[#allocation142_spill] sm:$0xff] %v14009_v23 }
 0x314   : > { %v13992_v24 = vadd.f32 %v1634_v19, %v643_v37  ;;  %1729 = vmax.xlane.f32.xlu1 %v13988_v31  ;;  %v647_v19 = vld [vmem:[%s12856_s25 + $0xd0] sm:$0xff] }
 0x315   : > { %v10405_v18 = vpop.f32.mrf.mxu0 }
 0x316   : > { %v13998_v28 = vadd.f32 %v10405_v18, %v646_v44  ;;  %1727 = vmax.xlane.f32.xlu0 %v13992_v24  ;;  %v650_v18 = vld [vmem:[%s12856_s25 + $0xe8] sm:$0xff]  ;;  %v14023_v32 = vpop.permute.xlu1 %2588 }
 0x317   : > { %v1644_v29 = vpop.f32.mrf.mxu0  ;;  %18308 = vst [vmem:[#allocation143_spill] sm:$0xff] %v14023_v32 }
 0x318   : > { %v14002_v54 = vadd.f32 %v1644_v29, %v645_v59  ;;  %1733 = vmax.xlane.f32.xlu1 %v13998_v28  ;;  %v649_v29 = vld [vmem:[%s12856_s25 + $0xe0] sm:$0xff] }
 0x319   : > { %v10408_v37 = vpop.f32.mrf.mxu0 }
 0x31a   : > { %v14006_v16 = vadd.f32 %v10408_v37, %v648_v39  ;;  %1731 = vmax.xlane.f32.xlu0 %v14002_v54  ;;  %v652_v39 = vld [vmem:[%s12856_s25 + $0xf8] sm:$0xff] }
 0x31b   : > { %v1654_v44 = vpop.f32.mrf.mxu0 }
 0x31c   : > { %v14012_v42 = vadd.f32 %v1654_v44, %v647_v19  ;;  %1737 = vmax.xlane.f32.xlu1 %v14006_v16 }
 0x31d   : > { %v10411_v59 = vpop.f32.mrf.mxu0 }
 0x31e   : > { %v14016_v5 = vadd.f32 %v10411_v59, %v650_v18  ;;  %1735 = vmax.xlane.f32.xlu0 %v14012_v42  ;;  %v14033_v18 = vpop.permute.xlu1 %2590 }
 0x31f   : > { %v1664_v27 = vpop.f32.mrf.mxu0  ;;  %18309 = vst [vmem:[#allocation144_spill] sm:$0xff] %v14033_v18 }
 0x320   : > { %v14020_v37 = vadd.f32 %v1664_v27, %v649_v29  ;;  %1741 = vmax.xlane.f32.xlu1 %v14016_v5  ;;  %v14039_v29 = vpop.permute.xlu0 %2558 }
 0x321   : > { %v10414_v23 = vpop.f32.mrf.mxu0  ;;  %18312 = vst [vmem:[#allocation147_spill] sm:$0xff] %v14039_v29 }
 0x322   : > { %v14026_v19 = vadd.f32 %v10414_v23, %v652_v39  ;;  %1739 = vmax.xlane.f32.xlu0 %v14020_v37  ;;  %v14035_v27 = vpop.permute.xlu1 %2560 }
 0x323   : > { %v1674_v44 = vpop.f32.mrf.mxu0  ;;  %18310 = vst [vmem:[#allocation145_spill] sm:$0xff] %v14035_v27 }
 0x324   : > { %v14029_v55 = vadd.f32 %v1674_v44, %v651_v50  ;;  %1745 = vmax.xlane.f32.xlu1 %v14026_v19  ;;  %v14043_v23 = vpop.permute.xlu0 %2562 }
 0x325   : > { %18314 = vst [vmem:[#allocation149_spill] sm:$0xff] %v14043_v23 }
 0x326   : > { %1743 = vmax.xlane.f32.xlu0 %v14029_v55  ;;  %v14037_v59 = vpop.permute.xlu1 %2592 }
 0x327   : > { %18311 = vst [vmem:[#allocation146_spill] sm:$0xff] %v14037_v59 }
 0x328   : > { %v14047_v50 = vpop.permute.xlu0 %2566 }
 0x329   : > { %18316 = vst [vmem:[#allocation151_spill] sm:$0xff] %v14047_v50 }
 0x32a   : > { %v14041_v32 = vpop.permute.xlu1 %2594 }
 0x32b   : > { %18313 = vst [vmem:[#allocation148_spill] sm:$0xff] %v14041_v32 }
 0x32c   : > { %v14051_v8 = vpop.permute.xlu0 %2598 }
 0x32d   : > { %18318 = vst [vmem:[#allocation153_spill] sm:$0xff] %v14051_v8 }
 0x32e   : > { %v14045_v39 = vpop.permute.xlu1 %2564 }
 0x32f   : > { %18315 = vst [vmem:[#allocation150_spill] sm:$0xff] %v14045_v39 }
 0x330   : > { %v14055_v27 = vpop.permute.xlu0 %2600 }
 0x331   : > { %18320 = vst [vmem:[#allocation155_spill] sm:$0xff] %v14055_v27 }
 0x332   : > { %v14049_v44 = vpop.permute.xlu1 %2596 }
 0x333   : > { %18317 = vst [vmem:[#allocation152_spill] sm:$0xff] %v14049_v44 }
 0x336   : > { %v14053_v7 = vpop.permute.xlu1 %2568 }
 0x337   : > { %18319 = vst [vmem:[#allocation154_spill] sm:$0xff] %v14053_v7 }
 0x34a   : > { %v1686_v39 = vpop.xlane.xlu0 %1685 }
 0x34d   : > { %v10561_v18 = vpop.f32.mrf.mxu0 }
 0x34e   : > { %v14058_v59 = vadd.f32 %v10561_v18, %v13852_v35  ;;  %v1684_v25 = vpop.xlane.xlu0 %1683 }
 0x34f   : > { %v1690_v29 = vpop.xlane.xlu1 %1689  ;;  %v2459_v32 = vpop.f32.mrf.mxu0 }
 0x350   : > { %v14061_v23 = vadd.f32 %v2459_v32, %v13858_v15  ;;  %2813 = vmax.xlane.f32.xlu1 %v14058_v59  ;;  %v1748_v15 = vsub.f32 %v13855_v61, %v1686_v39  ;;  %v1747_v61 = vsub.f32 %v13865_v49, %v1684_v25 }
 0x351   : > { %v10564_v50 = vpop.f32.mrf.mxu0 }
 0x352   : > { %2811 = vmax.xlane.f32.xlu0 %v14061_v23  ;;  %v14066_v7 = vadd.f32 %v10564_v50, %v13862_v17  ;;  %v1781_v48 = vmul.f32 1.442695, %v1748_v15 }
 0x353   : > { %v2469_v44 = vpop.f32.mrf.mxu0  ;;  %v1688_v8 = vpop.xlane.xlu1 %1687 }
 0x354   : > { %v14070_v18 = vadd.f32 %v2469_v44, %v13872_v60  ;;  %11559 = vpow2.f32 %v1781_v48  ;;  %v1749_v25 = vsub.f32 %v13876_v52, %v1688_v8 }
 0x355   : > { %v10567_v27 = vpop.f32.mrf.mxu0 }
 0x356   : > { %2817 = vmax.xlane.f32.xlu0 %v14066_v7  ;;  %v14079_v17 = vadd.f32 %v10567_v27, %v13882_v36  ;;  %v1692_v14 = vpop.xlane.xlu0 %1691  ;;  %v1750_v36 = vsub.f32 %v13868_v12, %v1690_v29 }
 0x357   : > { %v2479_v35 = vpop.f32.mrf.mxu0  ;;  %v1694_v53 = vpop.xlane.xlu1 %1693  ;;  %v1751_v8 = vsub.f32 %v13886_v43, %v1692_v14 }
 0x358   : > { %v14073_v32 = vadd.f32 %v2479_v35, %v13879_v34  ;;  %v1752_v48 = vsub.f32 %v13889_v57, %v1694_v53 }
 0x359   : > { %v10570_v30 = vpop.f32.mrf.mxu0 }
 0x35a   : > { %2819 = vmax.xlane.f32.xlu1 %v14073_v32  ;;  %2815 = vmax.xlane.f32.xlu0 %v14070_v18  ;;  %v14088_v39 = vadd.f32 %v10570_v30, %v13892_v58  ;;  %v1785_v58 = vmul.f32 1.442695, %v1750_v36  ;;  %v1787_v36 = vmul.f32 1.442695, %v1751_v8 }
 0x35b   : > { %v2489_v50 = vpop.f32.mrf.mxu0  ;;  %v1698_v44 = vpop.xlane.xlu1 %1697 }
 0x35c   : > { %v14082_v60 = vadd.f32 %v2489_v50, %v13896_v3  ;;  %v1696_v15 = vpop.xlane.xlu0 %1695  ;;  %v1779_v50 = vmul.f32 1.442695, %v1747_v61  ;;  %v1783_v61 = vmul.f32 1.442695, %v1749_v25  ;;  %v1754_v53 = vsub.f32 %v13900_v33, %v1698_v44 }
 0x35d   : > { %v10573_v34 = vpop.f32.mrf.mxu0  ;;  %v1753_v14 = vsub.f32 %v13903_v0, %v1696_v15 }
 0x35e   : > { %2821 = vmax.xlane.f32.xlu0 %v14079_v17  ;;  %2823 = vmax.xlane.f32.xlu1 %v14082_v60  ;;  %v14098_v30 = vadd.f32 %v10573_v34, %v13906_v2  ;;  %11561 = vpow2.f32 %v1779_v50  ;;  %v1789_v34 = vmul.f32 1.442695, %v1752_v48 }
 0x35f   : > { %v2499_v35 = vpop.f32.mrf.mxu0  ;;  %11563 = vpow2.f32 %v1785_v58  ;;  %v1791_v25 = vmul.f32 1.442695, %v1753_v14 }
 0x360   : > { %v14092_v27 = vadd.f32 %v2499_v35, %v13911_v10  ;;  %v1702_v10 = vpop.xlane.xlu1 %1701  ;;  %11565 = vpow2.f32 %v1783_v61 }
 0x361   : > { %v10576_v3 = vpop.f32.mrf.mxu0  ;;  %11567 = vpow2.f32 %v1789_v34  ;;  %v1756_v33 = vsub.f32 %v13914_v51, %v1702_v10  ;;  %v14121_v44 = vpop.eup %11559 }
 0x362   : > { %2825 = vmax.xlane.f32.xlu0 %v14088_v39  ;;  %2827 = vmax.xlane.f32.xlu1 %v14092_v27  ;;  %v14108_v52 = vadd.f32 %v10576_v3, %v13917_v63  ;;  %v1793_v3 = vmul.f32 1.442695, %v1754_v53  ;;  %11569 = vpow2.f32 %v1787_v36 }
 0x363   : > { %v2509_v49 = vpop.f32.mrf.mxu0 }
 0x364   : > { %v14102_v12 = vadd.f32 %v2509_v49, %v13925_v22  ;;  %v1700_v22 = vpop.xlane.xlu0 %1699  ;;  %v1706_v43 = vpop.xlane.xlu1 %1705  ;;  %11571 = vpow2.f32 %v1793_v3 }
 0x365   : > { %v10579_v29 = vpop.f32.mrf.mxu0  ;;  %v1755_v0 = vsub.f32 %v13920_v45, %v1700_v22  ;;  %v1758_v49 = vsub.f32 %v13928_v46, %v1706_v43  ;;  %11573 = vpow2.f32 %v1791_v25 }
 0x366   : > { %2829 = vmax.xlane.f32.xlu0 %v14098_v30  ;;  %2831 = vmax.xlane.f32.xlu1 %v14102_v12  ;;  %v14118_v63 = vadd.f32 %v10579_v29, %v13931_v21  ;;  %v1797_v21 = vmul.f32 1.442695, %v1756_v33 }
 0x367   : > { %v2519_v2 = vpop.f32.mrf.mxu0  ;;  %v1795_v48 = vmul.f32 1.442695, %v1755_v0 }
 0x368   : > { %v14112_v57 = vadd.f32 %v2519_v2, %v13939_v4  ;;  %v1704_v50 = vpop.xlane.xlu0 %1703  ;;  %v1710_v58 = vpop.xlane.xlu1 %1709  ;;  %11575 = vpow2.f32 %v1797_v21 }
 0x369   : > { %v10582_v35 = vpop.f32.mrf.mxu0  ;;  %v1757_v10 = vsub.f32 %v13934_v38, %v1704_v50  ;;  %v1760_v61 = vsub.f32 %v13942_v26, %v1710_v58  ;;  %11577 = vpow2.f32 %v1795_v48 }
 0x36a   : > { %2833 = vmax.xlane.f32.xlu0 %v14108_v52  ;;  %2835 = vmax.xlane.f32.xlu1 %v14112_v57  ;;  %v14127_v15 = vadd.f32 %v10582_v35, %v13945_v6  ;;  %v1801_v6 = vmul.f32 1.442695, %v1758_v49 }
 0x36b   : > { %v2529_v4 = vpop.f32.mrf.mxu0  ;;  %v14136_v45 = vpop.eup %11561  ;;  %v1805_v38 = vmul.f32 1.442695, %v1760_v61 }
 0x36c   : > { %18321 = vst [vmem:[#allocation156_spill] sm:$0xff] %v14127_v15  ;;  %v14131_v51 = vadd.f32 %v2529_v4, %v13953_v41  ;;  %v1708_v29 = vpop.xlane.xlu0 %1707  ;;  %v14139_v46 = vpop.eup %11563  ;;  %v1799_v41 = vmul.f32 1.442695, %v1757_v10  ;;  %11579 = vpow2.f32 %v1801_v6 }
 0x36d   : > { %v1759_v8 = vsub.f32 %v13948_v20, %v1708_v29  ;;  %v14144_v2 = vpop.eup %11565  ;;  %v1714_v34 = vpop.xlane.xlu1 %1713 }
 0x36e   : > { %2837 = vmax.xlane.f32.xlu0 %v14118_v63  ;;  %1845 = vadd.xlane.f32.xlu1 %v14121_v44  ;;  %18322 = vst [vmem:[#allocation157_spill] sm:$0xff] %v14131_v51  ;;  %v14146_v53 = vpop.eup %11567  ;;  %11581 = vpow2.f32 %v1799_v41  ;;  %v1762_v22 = vsub.f32 %v13956_v40, %v1714_v34 }
 0x36f   : > { %v1803_v26 = vmul.f32 1.442695, %v1759_v8  ;;  %v14151_v35 = vpop.eup %11569  ;;  %11583 = vpow2.f32 %v1805_v38 }
 0x370   : > { %v1712_v36 = vpop.xlane.xlu0 %1711  ;;  %v1809_v43 = vmul.f32 1.442695, %v1762_v22 }
 0x371   : > { %v14153_v20 = vpop.eup %11571  ;;  %11585 = vpow2.f32 %v1803_v26  ;;  %v1761_v14 = vsub.f32 %v13959_v13, %v1712_v36 }
 0x372   : > { %2841 = vmax.xlane.f32.xlu0 %v14127_v15  ;;  %2839 = vmax.xlane.f32.xlu1 %v14131_v51  ;;  %v14158_v3 = vpop.eup %11573  ;;  %11587 = vpow2.f32 %v1809_v43  ;;  %v18332_v15 = vld [vmem:[#allocation33_spill] sm:$0xff] }
 0x373   : > { %v1807_v40 = vmul.f32 1.442695, %v1761_v14 }
 0x375   : > { %v14160_v33 = vpop.eup %11575  ;;  %11589 = vpow2.f32 %v1807_v40 }
 0x376   : > { %1843 = vadd.xlane.f32.xlu0 %v14136_v45  ;;  %1849 = vadd.xlane.f32.xlu1 %v14139_v46  ;;  %v14164_v4 = vpop.eup %11577 }
 0x379   : > { %v14166_v50 = vpop.eup %11579 }
 0x37a   : > { %1847 = vadd.xlane.f32.xlu0 %v14144_v2  ;;  %1853 = vadd.xlane.f32.xlu1 %v14146_v53 }
 0x37b   : > { %v14170_v13 = vpop.eup %11581 }
 0x37c   : > { %v14172_v25 = vpop.eup %11583 }
 0x37e   : > { %1851 = vadd.xlane.f32.xlu0 %v14151_v35  ;;  %1857 = vadd.xlane.f32.xlu1 %v14153_v20  ;;  %v14176_v0 = vpop.eup %11585 }
 0x37f   : > { %v14179_v21 = vpop.eup %11587 }
 0x382   : > { %1855 = vadd.xlane.f32.xlu0 %v14158_v3  ;;  %1861 = vadd.xlane.f32.xlu1 %v14160_v33  ;;  %v14184_v29 = vpop.eup %11589 }
 0x386   : > { %1859 = vadd.xlane.f32.xlu0 %v14164_v4  ;;  %1865 = vadd.xlane.f32.xlu1 %v14166_v50 }
 0x38a   : > { %1863 = vadd.xlane.f32.xlu0 %v14170_v13  ;;  %1869 = vadd.xlane.f32.xlu1 %v14172_v25 }
 0x38e   : > { %1867 = vadd.xlane.f32.xlu0 %v14176_v0 }
 0x391   : > { %v1718_v49 = vpop.xlane.xlu1 %1717 }
 0x392   : > { %v1764_v58 = vsub.f32 %v13965_v11, %v1718_v49  ;;  %1873 = vadd.xlane.f32.xlu0 %v14179_v21 }
 0x393   : > { %v1716_v48 = vpop.xlane.xlu0 %1715 }
 0x394   : > { %v1813_v10 = vmul.f32 1.442695, %v1764_v58  ;;  %v1763_v6 = vsub.f32 %v13969_v9, %v1716_v48 }
 0x395   : > { %v1722_v61 = vpop.xlane.xlu1 %1721 }
 0x396   : > { %11591 = vpow2.f32 %v1813_v10  ;;  %v1811_v41 = vmul.f32 1.442695, %v1763_v6  ;;  %v1766_v8 = vsub.f32 %v13972_v62, %v1722_v61  ;;  %1871 = vadd.xlane.f32.xlu0 %v14184_v29 }
 0x397   : > { %v1720_v38 = vpop.xlane.xlu0 %1719 }
 0x398   : > { %11593 = vpow2.f32 %v1811_v41  ;;  %v1817_v34 = vmul.f32 1.442695, %v1766_v8  ;;  %v1765_v11 = vsub.f32 %v13977_v47, %v1720_v38 }
 0x399   : > { %v1726_v26 = vpop.xlane.xlu1 %1725 }
 0x39a   : > { %11595 = vpow2.f32 %v1817_v34  ;;  %v1815_v22 = vmul.f32 1.442695, %v1765_v11  ;;  %v1768_v36 = vsub.f32 %v13980_v56, %v1726_v26 }
 0x39b   : > { %v1724_v9 = vpop.xlane.xlu0 %1723 }
 0x39c   : > { %11597 = vpow2.f32 %v1815_v22  ;;  %v1821_v14 = vmul.f32 1.442695, %v1768_v36  ;;  %v1767_v43 = vsub.f32 %v13984_v1, %v1724_v9 }
 0x39d   : > { %v1730_v40 = vpop.xlane.xlu1 %1729 }
 0x39e   : > { %11599 = vpow2.f32 %v1821_v14  ;;  %v1819_v62 = vmul.f32 1.442695, %v1767_v43  ;;  %v1770_v49 = vsub.f32 %v13988_v31, %v1730_v40 }
 0x39f   : > { %v1728_v58 = vpop.xlane.xlu0 %1727 }
 0x3a0   : > { %11601 = vpow2.f32 %v1819_v62  ;;  %v1825_v48 = vmul.f32 1.442695, %v1770_v49  ;;  %v1769_v47 = vsub.f32 %v13992_v24, %v1728_v58 }
 0x3a1   : > { %v1734_v10 = vpop.xlane.xlu1 %1733 }
 0x3a2   : > { %11603 = vpow2.f32 %v1825_v48  ;;  %v1823_v6 = vmul.f32 1.442695, %v1769_v47  ;;  %v1772_v56 = vsub.f32 %v13998_v28, %v1734_v10 }
 0x3a3   : > { %v14194_v61 = vpop.eup %11591  ;;  %v1732_v41 = vpop.xlane.xlu0 %1731 }
 0x3a4   : > { %11605 = vpow2.f32 %v1823_v6  ;;  %v1829_v1 = vmul.f32 1.442695, %v1772_v56  ;;  %v1771_v8 = vsub.f32 %v14002_v54, %v1732_v41  ;;  %1877 = vadd.xlane.f32.xlu1 %v14194_v61 }
 0x3a5   : > { %v14198_v31 = vpop.eup %11593  ;;  %v1738_v38 = vpop.xlane.xlu1 %1737 }
 0x3a6   : > { %11607 = vpow2.f32 %v1829_v1  ;;  %v1827_v34 = vmul.f32 1.442695, %v1771_v8  ;;  %v1774_v24 = vsub.f32 %v14006_v16, %v1738_v38  ;;  %1875 = vadd.xlane.f32.xlu0 %v14198_v31 }
 0x3a7   : > { %v14202_v11 = vpop.eup %11595  ;;  %v1736_v28 = vpop.xlane.xlu0 %1735 }
 0x3a8   : > { %11609 = vpow2.f32 %v1827_v34  ;;  %v1833_v26 = vmul.f32 1.442695, %v1774_v24  ;;  %v1773_v22 = vsub.f32 %v14012_v42, %v1736_v28  ;;  %1881 = vadd.xlane.f32.xlu1 %v14202_v11 }
 0x3a9   : > { %v14206_v54 = vpop.eup %11597  ;;  %v1742_v36 = vpop.xlane.xlu1 %1741 }
 0x3aa   : > { %11611 = vpow2.f32 %v1833_v26  ;;  %v1831_v9 = vmul.f32 1.442695, %v1773_v22  ;;  %v1776_v14 = vsub.f32 %v14016_v5, %v1742_v36  ;;  %1879 = vadd.xlane.f32.xlu0 %v14206_v54 }
 0x3ab   : > { %v14210_v16 = vpop.eup %11599  ;;  %v1740_v43 = vpop.xlane.xlu0 %1739 }
 0x3ac   : > { %11613 = vpow2.f32 %v1831_v9  ;;  %v1837_v40 = vmul.f32 1.442695, %v1776_v14  ;;  %v1775_v62 = vsub.f32 %v14020_v37, %v1740_v43  ;;  %1885 = vadd.xlane.f32.xlu1 %v14210_v16 }
 0x3ad   : > { %v14214_v42 = vpop.eup %11601  ;;  %v1746_v49 = vpop.xlane.xlu1 %1745 }
 0x3ae   : > { %11615 = vpow2.f32 %v1837_v40  ;;  %v1835_v58 = vmul.f32 1.442695, %v1775_v62  ;;  %v1778_v48 = vsub.f32 %v14026_v19, %v1746_v49  ;;  %1883 = vadd.xlane.f32.xlu0 %v14214_v42 }
 0x3af   : > { %v14218_v5 = vpop.eup %11603  ;;  %v1744_v47 = vpop.xlane.xlu0 %1743 }
 0x3b0   : > { %11617 = vpow2.f32 %v1835_v58  ;;  %v1841_v10 = vmul.f32 1.442695, %v1778_v48  ;;  %v1777_v6 = vsub.f32 %v14029_v55, %v1744_v47  ;;  %1889 = vadd.xlane.f32.xlu1 %v14218_v5 }
 0x3b1   : > { %v14222_v37 = vpop.eup %11605 }
 0x3b2   : > { %11619 = vpow2.f32 %v1841_v10  ;;  %v1839_v56 = vmul.f32 1.442695, %v1777_v6  ;;  %1887 = vadd.xlane.f32.xlu0 %v14222_v37 }
 0x3b3   : > { %v14225_v41 = vpop.eup %11607 }
 0x3b4   : > { %11621 = vpow2.f32 %v1839_v56  ;;  %1893 = vadd.xlane.f32.xlu1 %v14225_v41 }
 0x3b5   : > { %v14228_v19 = vpop.eup %11609 }
 0x3b6   : > { %1891 = vadd.xlane.f32.xlu0 %v14228_v19 }
 0x3b7   : > { %v14231_v1 = vpop.eup %11611 }
 0x3b8   : > { %1897 = vadd.xlane.f32.xlu1 %v14231_v1 }
 0x3b9   : > { %v14234_v55 = vpop.eup %11613 }
 0x3ba   : > { %1895 = vadd.xlane.f32.xlu0 %v14234_v55 }
 0x3bb   : > { %v14237_v8 = vpop.eup %11615 }
 0x3bc   : > { %1901 = vadd.xlane.f32.xlu1 %v14237_v8 }
 0x3bd   : > { %v14240_v38 = vpop.eup %11617 }
 0x3be   : > { %1899 = vadd.xlane.f32.xlu0 %v14240_v38 }
 0x3bf   : > { %v14243_v34 = vpop.eup %11619 }
 0x3c0   : > { %1905 = vadd.xlane.f32.xlu1 %v14243_v34 }
 0x3c1   : > { %v14246_v24 = vpop.eup %11621 }
 0x3c2   : > { %1903 = vadd.xlane.f32.xlu0 %v14246_v24 }
 0x3d9   : > { %v2814_v28 = vpop.xlane.xlu1 %2813 }
 0x3da   : > { %v2876_v26 = vsub.f32 %v14058_v59, %v2814_v28 }
 0x3db   : > { %v2812_v22 = vpop.xlane.xlu0 %2811 }
 0x3dc   : > { %v2909_v36 = vmul.f32 1.442695, %v2876_v26  ;;  %v2875_v9 = vsub.f32 %v14061_v23, %v2812_v22 }
 0x3de   : > { %11623 = vpow2.f32 %v2909_v36  ;;  %v2907_v14 = vmul.f32 1.442695, %v2875_v9 }
 0x3df   : > { %v2818_v43 = vpop.xlane.xlu0 %2817 }
 0x3e0   : > { %11625 = vpow2.f32 %v2907_v14  ;;  %v2878_v40 = vsub.f32 %v14066_v7, %v2818_v43 }
 0x3e2   : > { %v2913_v62 = vmul.f32 1.442695, %v2878_v40 }
 0x3e3   : > { %v2820_v49 = vpop.xlane.xlu1 %2819  ;;  %v2816_v58 = vpop.xlane.xlu0 %2815 }
 0x3e4   : > { %11627 = vpow2.f32 %v2913_v62  ;;  %v2877_v48 = vsub.f32 %v14070_v18, %v2816_v58  ;;  %v2879_v47 = vsub.f32 %v14073_v32, %v2820_v49 }
 0x3e6   : > { %v2911_v10 = vmul.f32 1.442695, %v2877_v48  ;;  %v2915_v23 = vmul.f32 1.442695, %v2879_v47 }
 0x3e7   : > { %v2822_v59 = vpop.xlane.xlu0 %2821  ;;  %v2824_v6 = vpop.xlane.xlu1 %2823 }
 0x3e8   : > { %v2880_v56 = vsub.f32 %v14079_v17, %v2822_v59  ;;  %11629 = vpow2.f32 %v2911_v10  ;;  %v2881_v28 = vsub.f32 %v14082_v60, %v2824_v6 }
 0x3ea   : > { %v2917_v26 = vmul.f32 1.442695, %v2880_v56  ;;  %v2919_v32 = vmul.f32 1.442695, %v2881_v28 }
 0x3eb   : > { %v14256_v22 = vpop.eup %11623  ;;  %v14258_v7 = vpop.xlane.xlu0 %2825 }
 0x3ec   : > { %18323 = vst [vmem:[#allocation158_spill] sm:$0xff] %v14256_v22  ;;  %11631 = vpow2.f32 %v2917_v26  ;;  %v14260_v36 = vpop.xlane.xlu1 %2827  ;;  %2973 = vadd.xlane.f32.xlu0 %v14256_v22 }
 0x3ed   : > { %v14263_v18 = vpop.eup %11625  ;;  %11633 = vpow2.f32 %v2915_v23 }
 0x3ee   : > { %2971 = vadd.xlane.f32.xlu1 %v14263_v18  ;;  %11635 = vpow2.f32 %v2919_v32 }
 0x3ef   : > { %v14266_v17 = vpop.xlane.xlu0 %2829 }
 0x3f0   : > { %v14268_v9 = vpop.xlane.xlu1 %2831 }
 0x3f1   : > { %v14270_v60 = vpop.eup %11627 }
 0x3f2   : > { %18324 = vst [vmem:[#allocation159_spill] sm:$0xff] %v14270_v60  ;;  %2977 = vadd.xlane.f32.xlu0 %v14270_v60 }
 0x3f3   : > { %v14273_v14 = vpop.xlane.xlu0 %2833 }
 0x3f4   : > { %v14275_v43 = vpop.xlane.xlu1 %2835 }
 0x3f5   : > { %v14277_v40 = vpop.eup %11629 }
 0x3f6   : > { %18325 = vst [vmem:[#allocation160_spill] sm:$0xff] %v14277_v40  ;;  %2975 = vadd.xlane.f32.xlu1 %v14277_v40 }
 0x3f7   : > { %v14280_v62 = vpop.xlane.xlu0 %2837 }
 0x3f8   : > { %v1846_v49 = vpop.xlane.xlu1 %1845 }
 0x3f9   : > { %v14282_v58 = vpop.eup %11631  ;;  %11637 = vrcp.f32 %v1846_v49  ;;  %v18331_v49 = vld [vmem:[#allocation98_spill] sm:$0xff] }
 0x3fa   : > { %18326 = vst [vmem:[#allocation161_spill] sm:$0xff] %v14282_v58  ;;  %v14284_v48 = vpop.eup %11633  ;;  %2981 = vadd.xlane.f32.xlu0 %v14282_v58 }
 0x3fb   : > { %18327 = vst [vmem:[#allocation162_spill] sm:$0xff] %v14284_v48  ;;  %2979 = vadd.xlane.f32.xlu1 %v14284_v48  ;;  %v14288_v47 = vpop.xlane.xlu0 %2841  ;;  %v14292_v59 = vpop.eup %11635 }
 0x3fc   : > { %18328 = vst [vmem:[#allocation163_spill] sm:$0xff] %v14288_v47  ;;  %v14290_v10 = vpop.xlane.xlu1 %2839  ;;  %18329 = vst [vmem:[#allocation164_spill] sm:$0xff] %v14292_v59  ;;  %v18333_v47 = vld [vmem:[#allocation140_spill] sm:$0xff] }
 0x3fd   : > { %v14304_v51 = vadd.f32 %v18333_v47, %v18332_v15 }
 0x3ff   : > { %2983 = vadd.xlane.f32.xlu1 %v14292_v59  ;;  %v1844_v6 = vpop.xlane.xlu0 %1843  ;;  %v18330_v59 = vld [vmem:[#allocation101_spill] sm:$0xff]  ;;  %18334 = vst [vmem:[#allocation33_spill] sm:$0xff] %v14304_v51 }
 0x400   : > { %v1850_v56 = vpop.xlane.xlu1 %1849  ;;  %11639 = vrcp.f32 %v1844_v6 }
 0x403   : > { %v1848_v23 = vpop.xlane.xlu0 %1847 }
 0x404   : > { %v1854_v28 = vpop.xlane.xlu1 %1853  ;;  %11641 = vrcp.f32 %v1848_v23 }
 0x405   : > { %11643 = vrcp.f32 %v1850_v56 }
 0x406   : > { %v11638_v60 = vpop.eup %11637 }
 0x407   : > { %v1852_v26 = vpop.xlane.xlu0 %1851 }
 0x408   : > { %v1858_v32 = vpop.xlane.xlu1 %1857  ;;  %11645 = vrcp.f32 %v1852_v26 }
 0x409   : > { %11647 = vrcp.f32 %v1854_v28  ;;  %v1940_v28 = vmul.f32 %v11638_v60, %v14121_v44 }
 0x40b   : > { %v1856_v58 = vpop.xlane.xlu0 %1855 }
 0x40c   : > { %v1862_v48 = vpop.xlane.xlu1 %1861  ;;  %11649 = vrcp.f32 %v1856_v58 }
 0x40d   : > { %11651 = vrcp.f32 %v1858_v32  ;;  %v11640_v22 = vpop.eup %11639 }
 0x40e   : > { %v1939_v23 = vmul.f32 %v11640_v22, %v14136_v45  ;;  %v18336_v45 = vld [vmem:[#allocation122_spill] sm:$0xff] }
 0x40f   : > { %v1860_v40 = vpop.xlane.xlu0 %1859  ;;  %v14309_v22 = vadd.f32 %v18336_v45, %v18332_v15 }
 0x410   : > { %3129 = vrot.lane.b32.xlu1 %v18330_v59, %s12566_s14  ;;  %11653 = vrcp.f32 %v1860_v40  ;;  %3131 = vrot.lane.b32.xlu0 %v18331_v49, %s12566_s14  ;;  %v1866_v56 = vpop.xlane.xlu1 %1865  ;;  %v18335_v59 = vld [vmem:[#allocation124_spill] sm:$0xff] }
 0x411   : > { %v11642_v6 = vpop.eup %11641  ;;  %11655 = vrcp.f32 %v1862_v48  ;;  %10447 = vmatprep.mubr.f32.mxu1 %v1939_v23  ;;  %18337 = vst [vmem:[#allocation140_spill] sm:$0xff] %v14309_v22 }
 0x412   : > { %v1941_v58 = vmul.f32 %v11642_v6, %v14144_v2  ;;  %v11644_v26 = vpop.eup %11643  ;;  %10448 = vmatmul.mubr.f32.vlgmr.msra.gmra.mxu1 %v1940_v28  ;;  %v18338_v6 = vld [vmem:[#allocation123_spill] sm:$0xff]  ;;  %v2882_v28 = vsub.f32 %v14088_v39, %v14258_v7  ;;  %v18342_v39 = vld [vmem:[#allocation121_spill] sm:$0xff] }
 0x413   : > { %v1864_v32 = vpop.xlane.xlu0 %1863  ;;  %10472 = vmatpush3.msra.mxu1 %v18335_v59  ;;  %v1942_v44 = vmul.f32 %v11644_v26, %v14139_v46  ;;  %v14317_v23 = vadd.f32 %v18338_v6, %v18332_v15  ;;  %v18340_v46 = vld [vmem:[#allocation120_spill] sm:$0xff]  ;;  %v14333_v7 = vadd.f32 %v18342_v39, %v18332_v15 }
 0x414   : > { %11657 = vrcp.f32 %v1864_v32  ;;  %10450 = vmatprep.mubr.f32.mxu1 %v1941_v58  ;;  %10473 = vmatprep.subr.mxu1 %v14304_v51  ;;  %v1870_v48 = vpop.xlane.xlu1 %1869 }
 0x415   : > { %v11646_v40 = vpop.eup %11645  ;;  %11659 = vrcp.f32 %v1866_v56  ;;  %10474 = vmatpush3.msra.mxu1 %v14304_v51  ;;  %18339 = vst [vmem:[#allocation122_spill] sm:$0xff] %v14317_v23  ;;  %18343 = vst [vmem:[#allocation120_spill] sm:$0xff] %v14333_v7 }
 0x416   : > { %v1943_v2 = vmul.f32 %v11646_v40, %v14151_v35  ;;  %v11648_v60 = vpop.eup %11647  ;;  %10475 = vmatprep.subr.mxu1 %v14309_v22  ;;  %10451 = vmatmul.mubr.f32.gmra.mxu1 %v1942_v44  ;;  %v14325_v35 = vadd.f32 %v18340_v46, %v18332_v15  ;;  %v2921_v44 = vmul.f32 1.442695, %v2882_v28 }
 0x417   : > { %v1868_v47 = vpop.xlane.xlu0 %1867  ;;  %10476 = vmatpush3.msra.mxu1 %v14309_v22  ;;  %v1944_v58 = vmul.f32 %v11648_v60, %v14146_v53  ;;  %v18344_v53 = vld [vmem:[#allocation118_spill] sm:$0xff] }
 0x418   : > { %11661 = vrcp.f32 %v1868_v47  ;;  %10453 = vmatprep.mubr.f32.mxu1 %v1943_v2  ;;  %18341 = vst [vmem:[#allocation123_spill] sm:$0xff] %v14325_v35  ;;  %10477 = vmatprep.subr.mxu1 %v14317_v23  ;;  %v14339_v2 = vadd.f32 %v18344_v53, %v18332_v15 }
 0x419   : > { %v11650_v56 = vpop.eup %11649  ;;  %11663 = vrcp.f32 %v1870_v48  ;;  %10478 = vmatpush3.msra.mxu1 %v14317_v23 }
 0x41a   : > { %v1945_v26 = vmul.f32 %v11650_v56, %v14158_v3  ;;  %v11652_v32 = vpop.eup %11651  ;;  %10479 = vmatprep.subr.mxu1 %v14325_v35  ;;  %10454 = vmatmul.mubr.f32.gmra.mxu1 %v1944_v58  ;;  %18345 = vst [vmem:[#allocation121_spill] sm:$0xff] %v14339_v2  ;;  %v2883_v3 = vsub.f32 %v14092_v27, %v14260_v36  ;;  %v18346_v56 = vld [vmem:[#allocation119_spill] sm:$0xff] }
 0x41b   : > { %v1874_v40 = vpop.xlane.xlu0 %1873  ;;  %10480 = vmatpush3.msra.mxu1 %v14325_v35  ;;  %v1946_v60 = vmul.f32 %v11652_v32, %v14153_v20  ;;  %v14349_v28 = vadd.f32 %v18346_v56, %v18332_v15  ;;  %v18348_v20 = vld [vmem:[#allocation116_spill] sm:$0xff]  ;;  %v18350_v32 = vld [vmem:[#allocation117_spill] sm:$0xff] }
 0x41c   : > { %10456 = vmatprep.mubr.f32.mxu1 %v1945_v26  ;;  %10481 = vmatprep.subr.mxu1 %v14333_v7  ;;  %11665 = vrcp.f32 %v1874_v40  ;;  %v2923_v36 = vmul.f32 1.442695, %v2883_v3  ;;  %v14363_v40 = vadd.f32 %v18350_v32, %v18332_v15  ;;  %v18352_v3 = vld [vmem:[#allocation115_spill] sm:$0xff]  ;;  %v18358_v32 = vld [vmem:[#allocation110_spill] sm:$0xff] }
 0x41d   : > { %v11654_v45 = vpop.eup %11653  ;;  %10482 = vmatpush3.msra.mxu1 %v14333_v7  ;;  %18347 = vst [vmem:[#allocation118_spill] sm:$0xff] %v14349_v28 }
 0x41e   : > { %v1947_v48 = vmul.f32 %v11654_v45, %v14164_v4  ;;  %v11656_v47 = vpop.eup %11655  ;;  %10483 = vmatprep.subr.mxu1 %v14339_v2  ;;  %10457 = vmatmul.mubr.f32.gmra.mxu1 %v1946_v60  ;;  %v14355_v4 = vadd.f32 %v18348_v20, %v18332_v15  ;;  %v18351_v45 = vld [vmem:[#allocation114_spill] sm:$0xff]  ;;  %v14377_v60 = vadd.f32 %v18352_v3, %v18332_v15 }
 0x41f   : > { %v1872_v6 = vpop.xlane.xlu0 %1871  ;;  %10484 = vmatpush3.msra.mxu1 %v14339_v2  ;;  %v1948_v46 = vmul.f32 %v11656_v47, %v14160_v33 }
 0x420   : > { %11667 = vrcp.f32 %v1872_v6  ;;  %10459 = vmatprep.mubr.f32.mxu1 %v1947_v48  ;;  %18349 = vst [vmem:[#allocation119_spill] sm:$0xff] %v14355_v4  ;;  %10485 = vmatprep.subr.mxu1 %v14349_v28  ;;  %v18353_v48 = vld [vmem:[#allocation112_spill] sm:$0xff]  ;;  %v18354_v6 = vld [vmem:[#allocation113_spill] sm:$0xff] }
 0x421   : > { %v11658_v27 = vpop.eup %11657  ;;  %11669 = vpow2.f32 %v2921_v44  ;;  %10486 = vmatpush3.msra.mxu1 %v14349_v28  ;;  %v14369_v44 = vadd.f32 %v18351_v45, %v18332_v15  ;;  %v14383_v47 = vadd.f32 %v18353_v48, %v18332_v15  ;;  %v14390_v56 = vadd.f32 %v18354_v6, %v18332_v15 }
 0x422   : > { %v1949_v58 = vmul.f32 %v11658_v27, %v14170_v13  ;;  %v11660_v26 = vpop.eup %11659  ;;  %10487 = vmatprep.subr.mxu1 %v14355_v4  ;;  %10460 = vmatmul.mubr.f32.gmra.mxu1 %v1948_v46  ;;  %11671 = vpow2.f32 %v2923_v36  ;;  %v18356_v46 = vld [vmem:[#allocation108_spill] sm:$0xff] }
 0x423   : > { %10488 = vmatpush3.msra.mxu1 %v14355_v4  ;;  %v1950_v33 = vmul.f32 %v11660_v26, %v14166_v50  ;;  %18355 = vst [vmem:[#allocation116_spill] sm:$0xff] %v14390_v56 }
 0x424   : > { %10462 = vmatprep.mubr.f32.mxu1 %v1949_v58  ;;  %10489 = vmatprep.subr.mxu1 %v14363_v40  ;;  %v14398_v58 = vadd.f32 %v18356_v46, %v18332_v15 }
 0x425   : > { %v11662_v39 = vpop.eup %11661  ;;  %10490 = vmatpush3.msra.mxu1 %v14363_v40 }
 0x426   : > { %v1951_v13 = vmul.f32 %v11662_v39, %v14176_v0  ;;  %v11664_v53 = vpop.eup %11663  ;;  %10491 = vmatprep.subr.mxu1 %v14369_v44  ;;  %10463 = vmatmul.mubr.f32.gmra.mxu1 %v1950_v33  ;;  %18357 = vst [vmem:[#allocation117_spill] sm:$0xff] %v14398_v58  ;;  %v14406_v39 = vadd.f32 %v18358_v32, %v18332_v15  ;;  %v18360_v15 = vld [vmem:[#allocation155_spill] sm:$0xff] }
 0x427   : > { %10492 = vmatpush3.msra.mxu1 %v14369_v44  ;;  %v1952_v50 = vmul.f32 %v11664_v53, %v14172_v25 }
 0x428   : > { %10465 = vmatprep.mubr.f32.mxu1 %v1951_v13  ;;  %10493 = vmatprep.subr.mxu1 %v14377_v60  ;;  %18359 = vst [vmem:[#allocation114_spill] sm:$0xff] %v14406_v39 }
 0x429   : > { %10494 = vmatpush3.msra.mxu1 %v14377_v60  ;;  %v11666_v0 = vpop.eup %11665 }
 0x42a   : > { %10495 = vmatprep.subr.mxu1 %v14383_v47  ;;  %10466 = vmatmul.mubr.f32.gmra.mxu1 %v1952_v50  ;;  %v1954_v45 = vmul.f32 %v11666_v0, %v14179_v21 }
 0x42b   : > { %10496 = vmatpush3.msra.mxu1 %v14383_v47 }
 0x42c   : > { %10497 = vmatprep.subr.mxu1 %v14390_v56 }
 0x42d   : > { %v11668_v27 = vpop.eup %11667  ;;  %v1878_v20 = vpop.xlane.xlu1 %1877  ;;  %10498 = vmatpush3.msra.mxu1 %v14390_v56 }
 0x42e   : > { %v14394_v36 = vpop.eup %11669  ;;  %v1953_v25 = vmul.f32 %v11668_v27, %v14184_v29  ;;  %11673 = vrcp.f32 %v1878_v20  ;;  %10499 = vmatprep.subr.mxu1 %v14398_v58 }
 0x42f   : > { %v1876_v26 = vpop.xlane.xlu0 %1875  ;;  %2985 = vadd.xlane.f32.xlu0 %v14394_v36  ;;  %10500 = vmatpush3.msra.mxu1 %v14398_v58  ;;  %v14412_v29 = vpop.eup %11671 }
 0x430   : > { %11675 = vrcp.f32 %v1876_v26  ;;  %10468 = vmatprep.mubr.f32.mxu1 %v1953_v25  ;;  %10501 = vmatprep.subr.mxu1 %v14406_v39 }
 0x431   : > { %v1882_v33 = vpop.xlane.xlu1 %1881  ;;  %10469 = vmatmul.mubr.f32.gmra.mxu1 %v1954_v45 }
 0x432   : > { %11677 = vrcp.f32 %v1882_v33  ;;  %10502 = vmatpush3.msra.mxu1 %v14406_v39  ;;  %v18361_v33 = vld [vmem:[#allocation153_spill] sm:$0xff] }
 0x433   : > { %v1880_v13 = vpop.xlane.xlu0 %1879  ;;  %10583 = vmatprep.subr.msk.mxu1 %vm1200_vm0, %v18360_v15 }
 0x434   : > { %11679 = vrcp.f32 %v1880_v13  ;;  %2987 = vadd.xlane.f32.xlu1 %v14412_v29 }
 0x435   : > { %v1886_v53 = vpop.xlane.xlu1 %1885 }
 0x436   : > { %11681 = vrcp.f32 %v1886_v53 }
 0x437   : > { %v1884_v21 = vpop.xlane.xlu0 %1883 }
 0x438   : > { %11683 = vrcp.f32 %v1884_v21 }
 0x439   : > { %v1890_v3 = vpop.xlane.xlu1 %1889 }
 0x43a   : > { %11685 = vrcp.f32 %v1890_v3  ;;  %v18362_v3 = vld [vmem:[#allocation104_spill] sm:$0xff] }
 0x43b   : > { %v1888_v48 = vpop.xlane.xlu0 %1887  ;;  %v11674_v50 = vpop.eup %11673 }
 0x43c   : > { %11687 = vrcp.f32 %v1888_v48  ;;  %v1956_v46 = vmul.f32 %v11674_v50, %v14194_v61  ;;  %v18364_v48 = vld [vmem:[#allocation152_spill] sm:$0xff] }
 0x43d   : > { %v11676_v0 = vpop.eup %11675  ;;  %v1894_v6 = vpop.xlane.xlu1 %1893 }
 0x43e   : > { %v1955_v27 = vmul.f32 %v11676_v0, %v14198_v31  ;;  %11689 = vrcp.f32 %v1894_v6 }
 0x43f   : > { %v1892_v20 = vpop.xlane.xlu0 %1891  ;;  %v11678_v25 = vpop.eup %11677 }
 0x440   : > { %11691 = vrcp.f32 %v1892_v20  ;;  %10503 = vmatprep.mubr.f32.mxu1 %v1955_v27  ;;  %v1958_v13 = vmul.f32 %v11678_v25, %v14202_v11  ;;  %v18365_v20 = vld [vmem:[#allocation148_spill] sm:$0xff] }
 0x441   : > { %v11680_v26 = vpop.eup %11679  ;;  %v1898_v32 = vpop.xlane.xlu1 %1897  ;;  %10504 = vmatmul.mubr.f32.vlgmr.msra.gmra.mxu1 %v1956_v46 }
 0x442   : > { %10584 = vmatpush3.xpose.msk.msra.mxu1 %vm1200_vm0, %v18360_v15  ;;  %v1957_v45 = vmul.f32 %v11680_v26, %v14206_v54  ;;  %11693 = vrcp.f32 %v1898_v32  ;;  %v18363_v15 = vld [vmem:[#allocation102_spill] sm:$0xff] }
 0x443   : > { %10585 = vmatprep.subr.msk.mxu1 %vm1200_vm0, %v18361_v33  ;;  %v1896_v31 = vpop.xlane.xlu0 %1895  ;;  %v11682_v53 = vpop.eup %11681 }
 0x444   : > { %11695 = vrcp.f32 %v1896_v31  ;;  %10506 = vmatprep.mubr.f32.mxu1 %v1957_v45  ;;  %v1960_v50 = vmul.f32 %v11682_v53, %v14210_v16  ;;  %v18366_v45 = vld [vmem:[#allocation146_spill] sm:$0xff] }
 0x445   : > { %v11684_v61 = vpop.eup %11683  ;;  %v1902_v21 = vpop.xlane.xlu1 %1901  ;;  %10507 = vmatmul.mubr.f32.gmra.mxu1 %v1958_v13  ;;  %3125 = vrot.lane.b32.xlu1 %v18362_v3, %s12566_s14 }
 0x446   : > { %10586 = vmatpush3.xpose.msk.msra.mxu1 %vm1200_vm0, %v18361_v33  ;;  %v1959_v54 = vmul.f32 %v11684_v61, %v14214_v42  ;;  %3127 = vrot.lane.b32.xlu0 %v18363_v15, %s12566_s14  ;;  %11697 = vrcp.f32 %v1902_v21  ;;  %v18367_v61 = vld [vmem:[#allocation144_spill] sm:$0xff] }
 0x447   : > { %10587 = vmatprep.subr.msk.mxu1 %vm1200_vm0, %v18364_v48  ;;  %v1900_v11 = vpop.xlane.xlu0 %1899  ;;  %v11686_v0 = vpop.eup %11685 }
 0x448   : > { %11699 = vrcp.f32 %v1900_v11  ;;  %10509 = vmatprep.mubr.f32.mxu1 %v1959_v54  ;;  %v1962_v25 = vmul.f32 %v11686_v0, %v14218_v5  ;;  %v18369_v11 = vld [vmem:[#allocation141_spill] sm:$0xff] }
 0x449   : > { %v11688_v6 = vpop.eup %11687  ;;  %v1906_v27 = vpop.xlane.xlu1 %1905  ;;  %10510 = vmatmul.mubr.f32.gmra.mxu1 %v1960_v50  ;;  %v18371_v50 = vld [vmem:[#allocation139_spill] sm:$0xff] }
 0x44a   : > { %10588 = vmatpush3.xpose.msk.msra.mxu1 %vm1200_vm0, %v18364_v48  ;;  %v1961_v42 = vmul.f32 %v11688_v6, %v14222_v37  ;;  %11701 = vrcp.f32 %v1906_v27  ;;  %v2884_v37 = vsub.f32 %v14098_v30, %v14266_v17  ;;  %v18374_v27 = vld [vmem:[#allocation133_spill] sm:$0xff] }
 0x44b   : > { %10589 = vmatprep.subr.msk.mxu1 %vm1200_vm0, %v18365_v20  ;;  %v1904_v46 = vpop.xlane.xlu0 %1903  ;;  %v11690_v26 = vpop.eup %11689 }
 0x44c   : > { %11703 = vrcp.f32 %v1904_v46  ;;  %10512 = vmatprep.mubr.f32.mxu1 %v1961_v42  ;;  %v1964_v33 = vmul.f32 %v11690_v26, %v14225_v41  ;;  %v2925_v53 = vmul.f32 1.442695, %v2884_v37  ;;  %v18375_v42 = vld [vmem:[#allocation132_spill] sm:$0xff]  ;;  %v18378_v26 = vld [vmem:[#allocation106_spill] sm:$0xff]  ;;  %v18380_v37 = vld [vmem:[#allocation105_spill] sm:$0xff] }
 0x44d   : > { %v11692_v16 = vpop.eup %11691  ;;  %10513 = vmatmul.mubr.f32.gmra.mxu1 %v1962_v25  ;;  %v18377_v46 = vld [vmem:[#allocation128_spill] sm:$0xff] }
 0x44e   : > { %10590 = vmatpush3.xpose.msk.msra.mxu1 %vm1200_vm0, %v18365_v20  ;;  %v1963_v32 = vmul.f32 %v11692_v16, %v14228_v19  ;;  %v2885_v19 = vsub.f32 %v14102_v12, %v14268_v9  ;;  %11705 = vpow2.f32 %v2925_v53  ;;  %v18376_v20 = vld [vmem:[#allocation129_spill] sm:$0xff] }
 0x44f   : > { %10591 = vmatprep.subr.msk.mxu1 %vm1200_vm0, %v18366_v45  ;;  %v11694_v31 = vpop.eup %11693  ;;  %v18379_v16 = vld [vmem:[#allocation125_spill] sm:$0xff] }
 0x450   : > { %10515 = vmatprep.mubr.f32.mxu1 %v1963_v32  ;;  %v1966_v30 = vmul.f32 %v11694_v31, %v14231_v1  ;;  %v2927_v54 = vmul.f32 1.442695, %v2885_v19  ;;  %v18381_v31 = vld [vmem:[#allocation127_spill] sm:$0xff]  ;;  %v2886_v19 = vsub.f32 %v14108_v52, %v14273_v14 }
 0x451   : > { %v11696_v5 = vpop.eup %11695  ;;  %10516 = vmatmul.mubr.f32.gmra.mxu1 %v1964_v33  ;;  %v18385_v52 = vld [vmem:[#allocation135_spill] sm:$0xff] }
 0x452   : > { %10592 = vmatpush3.xpose.msk.msra.mxu1 %vm1200_vm0, %v18366_v45  ;;  %v1965_v13 = vmul.f32 %v11696_v5, %v14234_v55  ;;  %v18368_v55 = vld [vmem:[#allocation143_spill] sm:$0xff]  ;;  %11707 = vpow2.f32 %v2927_v54  ;;  %v18382_v5 = vld [vmem:[#allocation130_spill] sm:$0xff]  ;;  %v2887_v54 = vsub.f32 %v14112_v57, %v14275_v43 }
 0x453   : > { %10593 = vmatprep.subr.msk.mxu1 %vm1200_vm0, %v18367_v61  ;;  %v11698_v17 = vpop.eup %11697  ;;  %v18386_v14 = vld [vmem:[#allocation83_spill] sm:$0xff]  ;;  %v18388_v57 = vld [vmem:[#allocation86_spill] sm:$0xff] }
 0x454   : > { %10518 = vmatprep.mubr.f32.mxu1 %v1965_v13  ;;  %v1968_v12 = vmul.f32 %v11698_v17, %v14237_v8  ;;  %v18370_v8 = vld [vmem:[#allocation126_spill] sm:$0xff] }
 0x455   : > { %v11700_v41 = vpop.eup %11699  ;;  %10519 = vmatmul.mubr.f32.gmra.mxu1 %v1966_v30  ;;  %v18383_v30 = vld [vmem:[#allocation131_spill] sm:$0xff]  ;;  %v18384_v17 = vld [vmem:[#allocation134_spill] sm:$0xff] }
 0x456   : > { %10594 = vmatpush3.xpose.msk.msra.mxu1 %vm1200_vm0, %v18367_v61  ;;  %v1967_v21 = vmul.f32 %v11700_v41, %v14240_v38  ;;  %v18389_v43 = vld [vmem:[#allocation142_spill] sm:$0xff] }
 0x457   : > { %10595 = vmatprep.subr.msk.mxu1 %vm1200_vm0, %v18368_v55  ;;  %v11702_v9 = vpop.eup %11701 }
 0x458   : > { %10521 = vmatprep.mubr.f32.mxu1 %v1967_v21  ;;  %v1970_v38 = vmul.f32 %v11702_v9, %v14243_v34  ;;  %v18373_v34 = vld [vmem:[#allocation136_spill] sm:$0xff]  ;;  %v2931_v9 = vmul.f32 1.442695, %v2887_v54 }
 0x459   : > { %v11704_v48 = vpop.eup %11703  ;;  %10522 = vmatmul.mubr.f32.gmra.mxu1 %v1968_v12 }
 0x45a   : > { %10596 = vmatpush3.xpose.msk.msra.mxu1 %vm1200_vm0, %v18368_v55  ;;  %v1969_v1 = vmul.f32 %v11704_v48, %v14246_v24  ;;  %v18372_v24 = vld [vmem:[#allocation137_spill] sm:$0xff]  ;;  %v2929_v55 = vmul.f32 1.442695, %v2886_v19 }
 0x45b   : > { %10597 = vmatprep.subr.msk.mxu1 %vm1200_vm0, %v18369_v11  ;;  %v14480_v0 = vpop.eup %11705 }
 0x45c   : > { %10524 = vmatprep.mubr.f32.mxu1 %v1969_v1  ;;  %v18390_v1 = vld [vmem:[#allocation147_spill] sm:$0xff] }
 0x45d   : > { %10525 = vmatmul.mubr.f32.gmra.mxu1 %v1970_v38  ;;  %v18392_v38 = vld [vmem:[#allocation149_spill] sm:$0xff] }
 0x45e   : > { %10598 = vmatpush3.xpose.msk.msra.mxu1 %vm1200_vm0, %v18369_v11  ;;  %10615 = vmatprep.mubr.msk.f32.mxu1 %vm1200_vm0, %v18370_v8  ;;  %v18391_v11 = vld [vmem:[#allocation145_spill] sm:$0xff] }
 0x45f   : > { %10599 = vmatprep.subr.msk.mxu1 %vm1200_vm0, %v18371_v50  ;;  %v14487_v6 = vpop.eup %11707 }
 0x462   : > { %10600 = vmatpush3.xpose.msk.msra.mxu1 %vm1200_vm0, %v18371_v50  ;;  %v18393_v50 = vld [vmem:[#allocation150_spill] sm:$0xff] }
 0x463   : > { %10601 = vmatprep.subr.msk.mxu1 %vm1200_vm0, %v18372_v24 }
 0x465   : > { %2989 = vadd.xlane.f32.xlu0 %v14480_v0 }
 0x466   : > { %10602 = vmatpush3.xpose.msk.msra.mxu1 %vm1200_vm0, %v18372_v24  ;;  %v18394_v24 = vld [vmem:[#allocation151_spill] sm:$0xff] }
 0x467   : > { %10603 = vmatprep.subr.msk.mxu1 %vm1200_vm0, %v18373_v34 }
 0x469   : > { %2991 = vadd.xlane.f32.xlu1 %v14487_v6 }
 0x46a   : > { %10604 = vmatpush3.xpose.msk.msra.mxu1 %vm1200_vm0, %v18373_v34 }
 0x46b   : > { %10605 = vmatprep.subr.msk.mxu1 %vm1200_vm0, %v18374_v27 }
 0x46e   : > { %10606 = vmatpush3.xpose.msk.msra.mxu1 %vm1200_vm0, %v18374_v27  ;;  %v18395_v27 = vld [vmem:[#allocation154_spill] sm:$0xff] }
 0x46f   : > { %10607 = vmatprep.subr.msk.mxu1 %vm1200_vm0, %v18375_v42 }
 0x472   : > { %10608 = vmatpush3.xpose.msk.msra.mxu1 %vm1200_vm0, %v18375_v42  ;;  %v18396_v42 = vld [vmem:[#allocation109_spill] sm:$0xff] }
 0x473   : > { %10609 = vmatprep.subr.msk.mxu1 %vm1200_vm0, %v18376_v20 }
 0x475   : > { %v14512_v32 = vpop.xlane.xlu0 %2973 }
 0x476   : > { %10610 = vmatpush3.xpose.msk.msra.mxu1 %vm1200_vm0, %v18376_v20  ;;  %v18397_v20 = vld [vmem:[#allocation107_spill] sm:$0xff] }
 0x477   : > { %10611 = vmatprep.subr.msk.mxu1 %vm1200_vm0, %v18377_v46  ;;  %v2972_v25 = vpop.xlane.xlu1 %2971 }
 0x478   : > { %11709 = vrcp.f32 %v2972_v25  ;;  %v2888_v25 = vsub.f32 %v14118_v63, %v14280_v62 }
 0x479   : > { %11711 = vpow2.f32 %v2929_v55 }
 0x47a   : > { %10612 = vmatpush3.xpose.msk.msra.mxu1 %vm1200_vm0, %v18377_v46  ;;  %3121 = vrot.lane.b32.xlu1 %v18378_v26, %s12566_s14  ;;  %11713 = vpow2.f32 %v2931_v9 }
 0x47b   : > { %10613 = vmatprep.subr.msk.mxu1 %vm1200_vm0, %v18379_v16  ;;  %3123 = vrot.lane.b32.xlu0 %v18380_v37, %s12566_s14  ;;  %v14518_v45 = vpop.xlane.xlu0 %2977 }
 0x47e   : > { %10614 = vmatpush3.xpose.msk.msra.mxu1 %vm1200_vm0, %v18379_v16 }
 0x47f   : > { %v14520_v33 = vpop.xlane.xlu1 %2975 }
 0x481   : > { %10616 = vmatmul.mubr.msk.f32.vlgmr.msra.gmra.mxu1 %vm1200_vm0, %v18381_v31  ;;  %v2933_v31 = vmul.f32 1.442695, %v2888_v25 }
 0x482   : > { %10618 = vmatprep.mubr.msk.f32.mxu1 %vm1200_vm0, %v18382_v5  ;;  %v18398_v5 = vld [vmem:[#allocation157_spill] sm:$0xff] }
 0x483   : > { %v14526_v13 = vpop.xlane.xlu0 %2981  ;;  %v2889_v19 = vsub.f32 %v18398_v5, %v14290_v10  ;;  %11715 = vpow2.f32 %v2933_v31 }
 0x484   : > { %v14530_v53 = vpop.xlane.xlu1 %2979 }
 0x485   : > { %v11710_v61 = vpop.eup %11709  ;;  %10619 = vmatmul.mubr.msk.f32.gmra.mxu1 %vm1200_vm0, %v18383_v30  ;;  %v2935_v30 = vmul.f32 1.442695, %v2889_v19 }
 0x486   : > { %10621 = vmatprep.mubr.msk.f32.mxu1 %vm1200_vm0, %v18384_v17  ;;  %v3067_v41 = vmul.f32 %v11710_v61, %v14263_v18  ;;  %v18387_v18 = vld [vmem:[#allocation138_spill] sm:$0xff]  ;;  %v14557_v8 = vpop.eup %11711 }
 0x487   : > { %v3132_v21 = vpop.permute.xlu0 %3131  ;;  %v14564_v34 = vpop.eup %11713  ;;  %11717 = vpow2.f32 %v2935_v30 }
 0x488   : > { %v14539_v12 = vpop.xlane.xlu1 %2983  ;;  %10653 = vmatprep.subr.mxu0 %v3132_v21  ;;  %10671 = vmatprep.mubr.f32.mxu0 %v3067_v41 }
 0x489   : > { %10622 = vmatmul.mubr.msk.f32.gmra.mxu1 %vm1200_vm0, %v18385_v52  ;;  %10654 = vmatpush3.msra.mxu0 %v3132_v21 }
 0x48a   : > { %10624 = vmatprep.mubr.msk.f32.mxu1 %vm1200_vm0, %v18386_v14 }
 0x48c   : > { %v3130_v48 = vpop.permute.xlu1 %3129 }
 0x48d   : > { %10625 = vmatmul.mubr.msk.f32.gmra.mxu1 %vm1200_vm0, %v18387_v18  ;;  %10655 = vmatprep.subr.mxu0 %v3130_v48 }
 0x48e   : > { %10627 = vmatprep.mubr.msk.f32.mxu1 %vm1200_vm0, %v18388_v57  ;;  %10656 = vmatpush3.msra.mxu0 %v3130_v48  ;;  %v18399_v48 = vld [vmem:[#allocation111_spill] sm:$0xff] }
 0x490   : > { %v14581_v41 = vpop.eup %11715 }
 0x491   : > { %10628 = vmatmul.mubr.msk.f32.gmra.mxu1 %vm1200_vm0, %v18389_v43  ;;  %v18400_v43 = vld [vmem:[#allocation163_spill] sm:$0xff] }
 0x492   : > { %10630 = vmatprep.mubr.msk.f32.mxu1 %vm1200_vm0, %v18390_v1  ;;  %v18401_v1 = vld [vmem:[#allocation156_spill] sm:$0xff] }
 0x494   : > { %v14584_v63 = vpop.eup %11717 }
 0x495   : > { %10631 = vmatmul.mubr.msk.f32.gmra.mxu1 %vm1200_vm0, %v18391_v11  ;;  %v2890_v11 = vsub.f32 %v18401_v1, %v18400_v43 }
 0x496   : > { %10633 = vmatprep.mubr.msk.f32.mxu1 %vm1200_vm0, %v18392_v38 }
 0x499   : > { %10634 = vmatmul.mubr.msk.f32.gmra.mxu1 %vm1200_vm0, %v18393_v50 }
 0x49a   : > { %10636 = vmatprep.mubr.msk.f32.mxu1 %vm1200_vm0, %v18394_v24  ;;  %2993 = vadd.xlane.f32.xlu0 %v14557_v8  ;;  %v2937_v24 = vmul.f32 1.442695, %v2890_v11 }
 0x49c   : > { %11719 = vpow2.f32 %v2937_v24 }
 0x49d   : > { %10637 = vmatmul.mubr.msk.f32.gmra.mxu1 %vm1200_vm0, %v18395_v27  ;;  %11721 = vrcp.f32 %v14512_v32  ;;  %v12207_v32 = vld [vmem:[%s12856_s25 + $0xc8] sm:$0xff] }
 0x49e   : > { %2995 = vadd.xlane.f32.xlu1 %v14564_v34  ;;  %11723 = vrcp.f32 %v14520_v33 }
 0x49f   : > { %11725 = vrcp.f32 %v14518_v45  ;;  %v12209_v45 = vld [vmem:[%s12856_s25 + $0xd8] sm:$0xff] }
 0x4a0   : > { %11727 = vrcp.f32 %v14530_v53 }
 0x4a1   : > { %11729 = vrcp.f32 %v14526_v13 }
 0x4a2   : > { %11731 = vrcp.f32 %v14539_v12  ;;  %v12211_v12 = vld [vmem:[%s12856_s25 + $0xe8] sm:$0xff] }
 0x4a9   : > { %v14639_v1 = vpop.eup %11719 }
 0x4af   : > { %3117 = vrot.lane.b32.xlu1 %v18396_v42, %s12566_s14 }
 0x4b0   : > { %3119 = vrot.lane.b32.xlu0 %v18397_v20, %s12566_s14 }
 0x4b8   : > { %v14573_v46 = vpop.xlane.xlu0 %2985 }
 0x4b9   : > { %11733 = vrcp.f32 %v14573_v46  ;;  %v18422_v46 = vld [vmem:[#allocation158_spill] sm:$0xff] }
 0x4bc   : > { %v3128_v16 = vpop.permute.xlu0 %3127 }
 0x4bd   : > { %v14579_v61 = vpop.xlane.xlu1 %2987  ;;  %10657 = vmatprep.subr.mxu0 %v3128_v16 }
 0x4be   : > { %10658 = vmatpush3.msra.mxu0 %v3128_v16  ;;  %11735 = vrcp.f32 %v14579_v61  ;;  %v18423_v61 = vld [vmem:[#allocation160_spill] sm:$0xff] }
 0x4c1   : > { %v3126_v17 = vpop.permute.xlu1 %3125 }
 0x4c2   : > { %10659 = vmatprep.subr.mxu0 %v3126_v17 }
 0x4c3   : > { %10660 = vmatpush3.msra.mxu0 %v3126_v17 }
 0x4cf   : > { %2997 = vadd.xlane.f32.xlu0 %v14581_v41 }
 0x4d2   : > { %v14587_v62 = vpop.f32.mrf.mxu1 }
 0x4d3   : > { %2999 = vadd.xlane.f32.xlu1 %v14584_v63 }
 0x4d4   : > { %v14589_v10 = vpop.f32.mrf.mxu1 }
 0x4d6   : > { %v14591_v21 = vpop.f32.mrf.mxu1 }
 0x4d8   : > { %v14593_v54 = vpop.f32.mrf.mxu1 }
 0x4da   : > { %v14595_v55 = vpop.f32.mrf.mxu1 }
 0x4dc   : > { %v14597_v52 = vpop.f32.mrf.mxu1 }
 0x4de   : > { %v14599_v14 = vpop.f32.mrf.mxu1 }
 0x4e0   : > { %v14601_v9 = vpop.f32.mrf.mxu1 }
 0x4e2   : > { %v14607_v18 = vpop.f32.mrf.mxu1 }
 0x4e4   : > { %3354 = vrot.lane.b32.xlu1 %v18335_v59, %s12566_s14  ;;  %v14611_v57 = vpop.f32.mrf.mxu1 }
 0x4e5   : > { %3115 = vrot.lane.b32.xlu0 %v18399_v48, %s12566_s14 }
 0x4e6   : > { %v14617_v38 = vpop.f32.mrf.mxu1 }
 0x4e8   : > { %3350 = vrot.lane.b32.xlu1 %v14309_v22, %s12566_s14  ;;  %v14623_v27 = vpop.f32.mrf.mxu1 }
 0x4ea   : > { %v14629_v31 = vpop.f32.mrf.mxu1 }
 0x4eb   : > { %18402 = vst [vmem:[#allocation115_spill] sm:$0xff] %v14629_v31  ;;  %v12214_v31 = vld [vmem:[%s12856_s25 + $0xf0] sm:$0xff] }
 0x4ec   : > { %3346 = vrot.lane.b32.xlu1 %v14325_v35, %s12566_s14  ;;  %v14631_v19 = vpop.f32.mrf.mxu1 }
 0x4ed   : > { %18403 = vst [vmem:[#allocation112_spill] sm:$0xff] %v14631_v19 }
 0x4ee   : > { %v14619_v50 = vpop.xlane.xlu0 %2989 }
 0x4ef   : > { %11737 = vrcp.f32 %v14619_v50  ;;  %v18424_v50 = vld [vmem:[#allocation159_spill] sm:$0xff] }
 0x4f0   : > { %3342 = vrot.lane.b32.xlu1 %v14339_v2, %s12566_s14 }
 0x4f1   : > { %v14633_v30 = vpop.f32.mrf.mxu1 }
 0x4f2   : > { %v14625_v25 = vpop.xlane.xlu1 %2991  ;;  %v3124_v16 = vpop.permute.xlu0 %3123  ;;  %18404 = vst [vmem:[#allocation113_spill] sm:$0xff] %v14633_v30 }
 0x4f3   : > { %10661 = vmatprep.subr.mxu0 %v3124_v16  ;;  %v14635_v17 = vpop.f32.mrf.mxu1  ;;  %11739 = vrcp.f32 %v14625_v25 }
 0x4f4   : > { %3338 = vrot.lane.b32.xlu1 %v14355_v4, %s12566_s14  ;;  %10662 = vmatpush3.msra.mxu0 %v3124_v16  ;;  %18405 = vst [vmem:[#allocation108_spill] sm:$0xff] %v14635_v17 }
 0x4f6   : > { %v3122_v5 = vpop.permute.xlu1 %3121 }
 0x4f7   : > { %10663 = vmatprep.subr.mxu0 %v3122_v5 }
 0x4f8   : > { %10664 = vmatpush3.msra.mxu0 %v3122_v5 }
 0x501   : > { %v14637_v43 = vpop.f32.mrf.mxu1 }
 0x502   : > { %18406 = vst [vmem:[#allocation110_spill] sm:$0xff] %v14637_v43 }
 0x503   : > { %v14642_v11 = vpop.f32.mrf.mxu1 }
 0x504   : > { %3001 = vadd.xlane.f32.xlu0 %v14639_v1  ;;  %18407 = vst [vmem:[#allocation155_spill] sm:$0xff] %v14642_v11 }
 0x505   : > { %v14644_v24 = vpop.f32.mrf.mxu1 }
 0x506   : > { %18408 = vst [vmem:[#allocation153_spill] sm:$0xff] %v14644_v24 }
 0x507   : > { %v14646_v16 = vpop.f32.mrf.mxu1 }
 0x508   : > { %18409 = vst [vmem:[#allocation152_spill] sm:$0xff] %v14646_v16 }
 0x509   : > { %v14648_v4 = vpop.f32.mrf.mxu1 }
 0x50a   : > { %18410 = vst [vmem:[#allocation148_spill] sm:$0xff] %v14648_v4 }
 0x50b   : > { %v14650_v5 = vpop.f32.mrf.mxu1 }
 0x50c   : > { %18411 = vst [vmem:[#allocation146_spill] sm:$0xff] %v14650_v5  ;;  %v11722_v5 = vpop.eup %11721 }
 0x50d   : > { %v14652_v2 = vpop.f32.mrf.mxu1  ;;  %v11724_v13 = vpop.eup %11723  ;;  %v3068_v11 = vmul.f32 %v11722_v5, %v18422_v46 }
 0x50e   : > { %18412 = vst [vmem:[#allocation144_spill] sm:$0xff] %v14652_v2 }
 0x50f   : > { %v14656_v35 = vpop.f32.mrf.mxu1 }
 0x510   : > { %18413 = vst [vmem:[#allocation143_spill] sm:$0xff] %v14656_v35  ;;  %v12204_v35 = vld [vmem:[%s12856_s25 + $0xa0] sm:$0xff] }
 0x511   : > { %v14660_v22 = vpop.f32.mrf.mxu1 }
 0x512   : > { %18414 = vst [vmem:[#allocation141_spill] sm:$0xff] %v14660_v22  ;;  %v12199_v22 = vld [vmem:[%s12856_s25 + $0x88] sm:$0xff] }
 0x513   : > { %v14666_v48 = vpop.f32.mrf.mxu1 }
 0x514   : > { %18415 = vst [vmem:[#allocation126_spill] sm:$0xff] %v14666_v48  ;;  %v12200_v48 = vld [vmem:[%s12856_s25 + $0x80] sm:$0xff] }
 0x51a   : > { %3352 = vrot.lane.b32.xlu0 %v14304_v51, %s12566_s14 }
 0x51e   : > { %3348 = vrot.lane.b32.xlu0 %v14317_v23, %s12566_s14  ;;  %v14672_v23 = vpop.f32.mrf.mxu1 }
 0x51f   : > { %18416 = vst [vmem:[#allocation139_spill] sm:$0xff] %v14672_v23 }
 0x522   : > { %3344 = vrot.lane.b32.xlu0 %v14333_v7, %s12566_s14  ;;  %v14674_v7 = vpop.f32.mrf.mxu1 }
 0x523   : > { %v14664_v59 = vpop.xlane.xlu0 %2993  ;;  %18417 = vst [vmem:[#allocation137_spill] sm:$0xff] %v14674_v7 }
 0x524   : > { %v14676_v26 = vpop.f32.mrf.mxu1  ;;  %11741 = vrcp.f32 %v14664_v59  ;;  %v18427_v59 = vld [vmem:[#allocation164_spill] sm:$0xff] }
 0x525   : > { %18418 = vst [vmem:[#allocation136_spill] sm:$0xff] %v14676_v26  ;;  %v12201_v26 = vld [vmem:[%s12856_s25 + $0x98] sm:$0xff] }
 0x526   : > { %3340 = vrot.lane.b32.xlu0 %v14349_v28, %s12566_s14  ;;  %v14678_v37 = vpop.f32.mrf.mxu1 }
 0x527   : > { %v14670_v42 = vpop.xlane.xlu1 %2995  ;;  %v3120_v51 = vpop.permute.xlu0 %3119  ;;  %18419 = vst [vmem:[#allocation133_spill] sm:$0xff] %v14678_v37 }
 0x528   : > { %10665 = vmatprep.subr.mxu0 %v3120_v51  ;;  %v14680_v28 = vpop.f32.mrf.mxu1  ;;  %11743 = vrcp.f32 %v14670_v42 }
 0x529   : > { %10666 = vmatpush3.msra.mxu0 %v3120_v51  ;;  %18420 = vst [vmem:[#allocation132_spill] sm:$0xff] %v14680_v28 }
 0x52a   : > { %v14682_v15 = vpop.f32.mrf.mxu1 }
 0x52b   : > { %v3118_v20 = vpop.permute.xlu1 %3117  ;;  %18421 = vst [vmem:[#allocation129_spill] sm:$0xff] %v14682_v15  ;;  %v12202_v15 = vld [vmem:[%s12856_s25 + $0x90] sm:$0xff] }
 0x52c   : > { %10667 = vmatprep.subr.mxu0 %v3118_v20 }
 0x52d   : > { %10668 = vmatpush3.msra.mxu0 %v3118_v20 }
 0x541   : > { %v10617_v3 = vpop.f32.mrf.mxu1 }
 0x542   : > { %v14685_v51 = vadd.f32 %v12199_v22, %v10617_v3 }
 0x543   : > { %v2732_v23 = vpop.f32.mrf.mxu1 }
 0x544   : > { %v14688_v20 = vadd.f32 %v12200_v48, %v2732_v23  ;;  %v12203_v23 = vld [vmem:[%s12856_s25 + $0xa8] sm:$0xff] }
 0x545   : > { %v10620_v7 = vpop.f32.mrf.mxu1  ;;  %2845 = vmax.xlane.f32.xlu0 %v14685_v51 }
 0x546   : > { %2843 = vmax.xlane.f32.xlu1 %v14688_v20  ;;  %v14693_v37 = vadd.f32 %v12201_v26, %v10620_v7 }
 0x547   : > { %v2742_v28 = vpop.f32.mrf.mxu1 }
 0x548   : > { %v14696_v2 = vadd.f32 %v12202_v15, %v2742_v28  ;;  %v12205_v28 = vld [vmem:[%s12856_s25 + $0xb8] sm:$0xff] }
 0x549   : > { %v10623_v22 = vpop.f32.mrf.mxu1  ;;  %2849 = vmax.xlane.f32.xlu0 %v14693_v37 }
 0x54a   : > { %2847 = vmax.xlane.f32.xlu1 %v14696_v2  ;;  %v14701_v3 = vadd.f32 %v12203_v23, %v10623_v22  ;;  %v12206_v22 = vld [vmem:[%s12856_s25 + $0xb0] sm:$0xff] }
 0x54b   : > { %v2752_v48 = vpop.f32.mrf.mxu1 }
 0x54c   : > { %v14704_v4 = vadd.f32 %v12204_v35, %v2752_v48 }
 0x54d   : > { %v10626_v7 = vpop.f32.mrf.mxu1  ;;  %2853 = vmax.xlane.f32.xlu0 %v14701_v3 }
 0x54e   : > { %2851 = vmax.xlane.f32.xlu1 %v14704_v4  ;;  %v14711_v15 = vadd.f32 %v12205_v28, %v10626_v7  ;;  %v12208_v7 = vld [vmem:[%s12856_s25 + $0xc0] sm:$0xff] }
 0x54f   : > { %v2762_v26 = vpop.f32.mrf.mxu1 }
 0x550   : > { %v14714_v23 = vadd.f32 %v12206_v22, %v2762_v26 }
 0x551   : > { %v10629_v35 = vpop.f32.mrf.mxu1  ;;  %2857 = vmax.xlane.f32.xlu0 %v14711_v15 }
 0x552   : > { %2855 = vmax.xlane.f32.xlu1 %v14714_v23  ;;  %v14721_v33 = vadd.f32 %v12207_v32, %v10629_v35  ;;  %v12210_v35 = vld [vmem:[%s12856_s25 + $0xd0] sm:$0xff] }
 0x553   : > { %v2772_v48 = vpop.f32.mrf.mxu1 }
 0x554   : > { %v14724_v28 = vadd.f32 %v12208_v7, %v2772_v48 }
 0x555   : > { %v10632_v26 = vpop.f32.mrf.mxu1  ;;  %2861 = vmax.xlane.f32.xlu0 %v14721_v33 }
 0x556   : > { %2859 = vmax.xlane.f32.xlu1 %v14724_v28  ;;  %v14731_v53 = vadd.f32 %v12209_v45, %v10632_v26  ;;  %v12212_v45 = vld [vmem:[%s12856_s25 + $0xe0] sm:$0xff] }
 0x557   : > { %v2782_v22 = vpop.f32.mrf.mxu1 }
 0x558   : > { %v14734_v32 = vadd.f32 %v12210_v35, %v2782_v22  ;;  %v2998_v48 = vpop.xlane.xlu0 %2997 }
 0x559   : > { %v10635_v7 = vpop.f32.mrf.mxu1  ;;  %2865 = vmax.xlane.f32.xlu0 %v14731_v53  ;;  %11745 = vrcp.f32 %v2998_v48 }
 0x55a   : > { %2863 = vmax.xlane.f32.xlu1 %v14734_v32  ;;  %v14741_v24 = vadd.f32 %v12211_v12, %v10635_v7  ;;  %v3069_v7 = vmul.f32 %v11724_v13, %v18423_v61  ;;  %v11726_v12 = vpop.eup %11725 }
 0x55b   : > { %v2792_v26 = vpop.f32.mrf.mxu1  ;;  %v11728_v17 = vpop.eup %11727  ;;  %v3070_v25 = vmul.f32 %v11726_v12, %v18424_v50 }
 0x55c   : > { %v14744_v22 = vadd.f32 %v12212_v45, %v2792_v26  ;;  %v3000_v35 = vpop.xlane.xlu1 %2999  ;;  %v3116_v16 = vpop.permute.xlu0 %3115  ;;  %v12213_v26 = vld [vmem:[%s12856_s25 + $0xf8] sm:$0xff] }
 0x55d   : > { %v10638_v43 = vpop.f32.mrf.mxu1  ;;  %2869 = vmax.xlane.f32.xlu0 %v14741_v24  ;;  %10669 = vmatprep.subr.mxu0 %v3116_v16  ;;  %11747 = vrcp.f32 %v3000_v35 }
 0x55e   : > { %2867 = vmax.xlane.f32.xlu1 %v14744_v22  ;;  %10670 = vmatpush3.msra.mxu0 %v3116_v16  ;;  %v14753_v45 = vadd.f32 %v12213_v26, %v10638_v43  ;;  %v11730_v43 = vpop.eup %11729  ;;  %v18426_v16 = vld [vmem:[#allocation161_spill] sm:$0xff] }
 0x55f   : > { %v2802_v30 = vpop.f32.mrf.mxu1  ;;  %10672 = vmatmul.mubr.f32.vlgmr.msra.gmra.mxu0 %v3068_v11  ;;  %v18425_v11 = vld [vmem:[#allocation162_spill] sm:$0xff]  ;;  %v3072_v13 = vmul.f32 %v11730_v43, %v18426_v16 }
 0x560   : > { %v14756_v19 = vadd.f32 %v12214_v31, %v2802_v30  ;;  %v3355_v5 = vpop.permute.xlu1 %3354  ;;  %10674 = vmatprep.mubr.f32.mxu0 %v3069_v7  ;;  %v3071_v31 = vmul.f32 %v11728_v17, %v18425_v11  ;;  %v11732_v30 = vpop.eup %11731 }
 0x561   : > { %11423 = vmatprep.subr.mxu1 %v3355_v5  ;;  %2873 = vmax.xlane.f32.xlu0 %v14753_v45  ;;  %v11734_v46 = vpop.eup %11733  ;;  %v3073_v61 = vmul.f32 %v11732_v30, %v18427_v59 }
 0x562   : > { %2871 = vmax.xlane.f32.xlu1 %v14756_v19  ;;  %10695 = vmatprep.subr.mxu0 %v3355_v5  ;;  %v11736_v7 = vpop.eup %11735  ;;  %v3074_v12 = vmul.f32 %v11734_v46, %v14394_v36 }
 0x563   : > { %10696 = vmatpush3.msra.mxu0 %v3355_v5  ;;  %11439 = vmatpush3.msra.mxu1 %v3355_v5  ;;  %v11738_v42 = vpop.eup %11737  ;;  %v3075_v26 = vmul.f32 %v11736_v7, %v14412_v29 }
 0x564   : > { %10675 = vmatmul.mubr.f32.gmra.mxu0 %v3070_v25  ;;  %v11740_v5 = vpop.eup %11739  ;;  %v3076_v17 = vmul.f32 %v11738_v42, %v14480_v0 }
 0x565   : > { %10677 = vmatprep.mubr.f32.mxu0 %v3071_v31  ;;  %v11742_v48 = vpop.eup %11741  ;;  %v3077_v50 = vmul.f32 %v11740_v5, %v14487_v6  ;;  %v3351_v6 = vpop.permute.xlu1 %3350 }
 0x566   : > { %v11744_v25 = vpop.eup %11743  ;;  %v3078_v35 = vmul.f32 %v11742_v48, %v14557_v8 }
 0x567   : > { %v11746_v43 = vpop.eup %11745  ;;  %v3079_v11 = vmul.f32 %v11744_v25, %v14564_v34 }
 0x568   : > { %10678 = vmatmul.mubr.f32.gmra.mxu0 %v3072_v13  ;;  %v3080_v29 = vmul.f32 %v11746_v43, %v14581_v41 }
 0x569   : > { %10680 = vmatprep.mubr.f32.mxu0 %v3073_v61  ;;  %v3347_v8 = vpop.permute.xlu1 %3346 }
 0x56a   : > { %v11748_v36 = vpop.eup %11747 }
 0x56b   : > { %v3081_v0 = vmul.f32 %v11748_v36, %v14584_v63 }
 0x56c   : > { %10681 = vmatmul.mubr.f32.gmra.mxu0 %v3074_v12 }
 0x56d   : > { %10683 = vmatprep.mubr.f32.mxu0 %v3075_v26  ;;  %v3343_v41 = vpop.permute.xlu1 %3342 }
 0x570   : > { %10684 = vmatmul.mubr.f32.gmra.mxu0 %v3076_v17 }
 0x571   : > { %10686 = vmatprep.mubr.f32.mxu0 %v3077_v50  ;;  %v3339_v59 = vpop.permute.xlu1 %3338 }
 0x574   : > { %10687 = vmatmul.mubr.f32.gmra.mxu0 %v3078_v35 }
 0x575   : > { %10689 = vmatprep.mubr.f32.mxu0 %v3079_v11 }
 0x577   : > { %3336 = vrot.lane.b32.xlu0 %v14363_v40, %s12566_s14 }
 0x578   : > { %10690 = vmatmul.mubr.f32.gmra.mxu0 %v3080_v29 }
 0x579   : > { %10692 = vmatprep.mubr.f32.mxu0 %v3081_v0 }
 0x58d   : > { %v3002_v31 = vpop.xlane.xlu0 %3001 }
 0x58e   : > { %11749 = vrcp.f32 %v3002_v31 }
 0x591   : > { %v3353_v30 = vpop.permute.xlu0 %3352 }
 0x592   : > { %10697 = vmatprep.subr.mxu0 %v3353_v30  ;;  %11424 = vmatprep.subr.mxu1 %v3353_v30 }
 0x593   : > { %10698 = vmatpush3.msra.mxu0 %v3353_v30  ;;  %11440 = vmatpush3.msra.mxu1 %v3353_v30 }
 0x594   : > { %10699 = vmatprep.subr.mxu0 %v3351_v6  ;;  %11425 = vmatprep.subr.mxu1 %v3351_v6 }
 0x595   : > { %10700 = vmatpush3.msra.mxu0 %v3351_v6  ;;  %11441 = vmatpush3.msra.mxu1 %v3351_v6  ;;  %v3349_v34 = vpop.permute.xlu0 %3348 }
 0x596   : > { %10701 = vmatprep.subr.mxu0 %v3349_v34  ;;  %11426 = vmatprep.subr.mxu1 %v3349_v34 }
 0x597   : > { %10702 = vmatpush3.msra.mxu0 %v3349_v34  ;;  %11442 = vmatpush3.msra.mxu1 %v3349_v34 }
 0x598   : > { %10703 = vmatprep.subr.mxu0 %v3347_v8  ;;  %11427 = vmatprep.subr.mxu1 %v3347_v8 }
 0x599   : > { %10704 = vmatpush3.msra.mxu0 %v3347_v8  ;;  %11443 = vmatpush3.msra.mxu1 %v3347_v8  ;;  %v3345_v63 = vpop.permute.xlu0 %3344 }
 0x59a   : > { %10705 = vmatprep.subr.mxu0 %v3345_v63  ;;  %11428 = vmatprep.subr.mxu1 %v3345_v63 }
 0x59b   : > { %v11750_v16 = vpop.eup %11749  ;;  %10706 = vmatpush3.msra.mxu0 %v3345_v63  ;;  %11444 = vmatpush3.msra.mxu1 %v3345_v63 }
 0x59c   : > { %10707 = vmatprep.subr.mxu0 %v3343_v41  ;;  %11429 = vmatprep.subr.mxu1 %v3343_v41  ;;  %v3082_v13 = vmul.f32 %v11750_v16, %v14639_v1 }
 0x59d   : > { %10708 = vmatpush3.msra.mxu0 %v3343_v41  ;;  %11445 = vmatpush3.msra.mxu1 %v3343_v41  ;;  %v3341_v46 = vpop.permute.xlu0 %3340 }
 0x59e   : > { %10693 = vmatmul.mubr.f32.gmra.mxu0 %v3082_v13  ;;  %10709 = vmatprep.subr.mxu0 %v3341_v46 }
 0x59f   : > { %11430 = vmatprep.subr.mxu1 %v3341_v46  ;;  %10710 = vmatpush3.msra.mxu0 %v3341_v46 }
 0x5a0   : > { %11446 = vmatpush3.msra.mxu1 %v3341_v46  ;;  %10711 = vmatprep.subr.mxu0 %v3339_v59 }
 0x5a1   : > { %11431 = vmatprep.subr.mxu1 %v3339_v59  ;;  %10712 = vmatpush3.msra.mxu0 %v3339_v59 }
 0x5a2   : > { %11447 = vmatpush3.msra.mxu1 %v3339_v59 }
 0x5ce   : > { %v2846_v61 = vpop.xlane.xlu0 %2845 }
 0x5cf   : > { %v2844_v7 = vpop.xlane.xlu1 %2843  ;;  %v2892_v12 = vsub.f32 %v14685_v51, %v2846_v61 }
 0x5d0   : > { %v2891_v42 = vsub.f32 %v14688_v20, %v2844_v7 }
 0x5d1   : > { %v2941_v1 = vmul.f32 1.442695, %v2892_v12 }
 0x5d2   : > { %v2939_v26 = vmul.f32 1.442695, %v2891_v42  ;;  %v2850_v5 = vpop.xlane.xlu0 %2849 }
 0x5d3   : > { %v2848_v17 = vpop.xlane.xlu1 %2847  ;;  %11751 = vpow2.f32 %v2941_v1  ;;  %v2894_v48 = vsub.f32 %v14693_v37, %v2850_v5 }
 0x5d4   : > { %11753 = vpow2.f32 %v2939_v26  ;;  %v2893_v50 = vsub.f32 %v14696_v2, %v2848_v17 }
 0x5d5   : > { %v2945_v25 = vmul.f32 1.442695, %v2894_v48 }
 0x5d6   : > { %v2943_v35 = vmul.f32 1.442695, %v2893_v50  ;;  %v2854_v43 = vpop.xlane.xlu0 %2853 }
 0x5d7   : > { %v2852_v11 = vpop.xlane.xlu1 %2851  ;;  %11755 = vpow2.f32 %v2945_v25  ;;  %v2896_v36 = vsub.f32 %v14701_v3, %v2854_v43 }
 0x5d8   : > { %11757 = vpow2.f32 %v2943_v35  ;;  %v2895_v51 = vsub.f32 %v14704_v4, %v2852_v11 }
 0x5d9   : > { %v2949_v20 = vmul.f32 1.442695, %v2896_v36 }
 0x5da   : > { %v2947_v29 = vmul.f32 1.442695, %v2895_v51  ;;  %v2858_v0 = vpop.xlane.xlu0 %2857 }
 0x5db   : > { %v2856_v6 = vpop.xlane.xlu1 %2855  ;;  %11759 = vpow2.f32 %v2949_v20  ;;  %v2898_v37 = vsub.f32 %v14711_v15, %v2858_v0 }
 0x5dc   : > { %11761 = vpow2.f32 %v2947_v29  ;;  %v2897_v2 = vsub.f32 %v14714_v23, %v2856_v6 }
 0x5dd   : > { %v2953_v31 = vmul.f32 1.442695, %v2898_v37 }
 0x5de   : > { %v2951_v30 = vmul.f32 1.442695, %v2897_v2  ;;  %v2862_v8 = vpop.xlane.xlu0 %2861 }
 0x5df   : > { %v2860_v34 = vpop.xlane.xlu1 %2859  ;;  %11763 = vpow2.f32 %v2953_v31  ;;  %v2900_v3 = vsub.f32 %v14721_v33, %v2862_v8 }
 0x5e0   : > { %v14786_v41 = vpop.eup %11751  ;;  %11765 = vpow2.f32 %v2951_v30  ;;  %v2899_v4 = vsub.f32 %v14724_v28, %v2860_v34 }
 0x5e1   : > { %v14789_v63 = vpop.eup %11753  ;;  %v2957_v16 = vmul.f32 1.442695, %v2900_v3  ;;  %3005 = vadd.xlane.f32.xlu0 %v14786_v41 }
 0x5e2   : > { %v2955_v15 = vmul.f32 1.442695, %v2899_v4  ;;  %3003 = vadd.xlane.f32.xlu1 %v14789_v63  ;;  %v2866_v23 = vpop.xlane.xlu0 %2865 }
 0x5e3   : > { %11767 = vpow2.f32 %v2957_v16  ;;  %v2864_v5 = vpop.xlane.xlu1 %2863  ;;  %v2902_v17 = vsub.f32 %v14731_v53, %v2866_v23 }
 0x5e4   : > { %v14793_v13 = vpop.eup %11755  ;;  %11769 = vpow2.f32 %v2955_v15  ;;  %v2901_v48 = vsub.f32 %v14734_v32, %v2864_v5 }
 0x5e5   : > { %v14795_v46 = vpop.eup %11757  ;;  %3009 = vadd.xlane.f32.xlu0 %v14793_v13  ;;  %v2961_v50 = vmul.f32 1.442695, %v2902_v17 }
 0x5e6   : > { %3007 = vadd.xlane.f32.xlu1 %v14795_v46  ;;  %v2870_v33 = vpop.xlane.xlu0 %2869  ;;  %v2959_v25 = vmul.f32 1.442695, %v2901_v48  ;;  %v18428_v48 = vld [vmem:[#allocation55_spill] sm:$0xff] }
 0x5e7   : > { %11771 = vpow2.f32 %v2961_v50  ;;  %v2868_v53 = vpop.xlane.xlu1 %2867  ;;  %v2904_v32 = vsub.f32 %v14741_v24, %v2870_v33  ;;  %v18429_v50 = vld [vmem:[#allocation60_spill] sm:$0xff] }
 0x5e8   : > { %v14799_v28 = vpop.eup %11759  ;;  %11773 = vpow2.f32 %v2959_v25  ;;  %v2903_v11 = vsub.f32 %v14744_v22, %v2868_v53  ;;  %v18430_v25 = vld [vmem:[#allocation56_spill] sm:$0xff]  ;;  %v18432_v53 = vld [vmem:[#allocation66_spill] sm:$0xff] }
 0x5e9   : > { %v14801_v59 = vpop.eup %11761  ;;  %3013 = vadd.xlane.f32.xlu0 %v14799_v28  ;;  %v2965_v36 = vmul.f32 1.442695, %v2904_v32  ;;  %v18433_v32 = vld [vmem:[#allocation62_spill] sm:$0xff] }
 0x5ea   : > { %3011 = vadd.xlane.f32.xlu1 %v14801_v59  ;;  %v2874_v61 = vpop.xlane.xlu0 %2873  ;;  %v2963_v51 = vmul.f32 1.442695, %v2903_v11  ;;  %v18434_v11 = vld [vmem:[#allocation58_spill] sm:$0xff] }
 0x5eb   : > { %11775 = vpow2.f32 %v2965_v36  ;;  %v2872_v0 = vpop.xlane.xlu1 %2871  ;;  %v2906_v3 = vsub.f32 %v14753_v45, %v2874_v61 }
 0x5ec   : > { %v14805_v7 = vpop.eup %11763  ;;  %11777 = vpow2.f32 %v2963_v51  ;;  %v2905_v15 = vsub.f32 %v14756_v19, %v2872_v0  ;;  %v18435_v0 = vld [vmem:[#allocation44_spill] sm:$0xff] }
 0x5ed   : > { %v14807_v12 = vpop.eup %11765  ;;  %3017 = vadd.xlane.f32.xlu0 %v14805_v7  ;;  %v2969_v33 = vmul.f32 1.442695, %v2906_v3 }
 0x5ee   : > { %3015 = vadd.xlane.f32.xlu1 %v14807_v12  ;;  %v3337_v42 = vpop.permute.xlu0 %3336 }
 0x5ef   : > { %10713 = vmatprep.subr.mxu0 %v3337_v42  ;;  %11432 = vmatprep.subr.mxu1 %v3337_v42 }
 0x5f0   : > { %v14811_v1 = vpop.eup %11767  ;;  %10714 = vmatpush3.msra.mxu0 %v3337_v42  ;;  %11448 = vmatpush3.msra.mxu1 %v3337_v42  ;;  %v2967_v42 = vmul.f32 1.442695, %v2905_v15  ;;  %v18438_v15 = vld [vmem:[#allocation45_spill] sm:$0xff] }
 0x5f1   : > { %v14813_v26 = vpop.eup %11769  ;;  %3021 = vadd.xlane.f32.xlu0 %v14811_v1 }
 0x5f2   : > { %3019 = vadd.xlane.f32.xlu1 %v14813_v26 }
 0x5f4   : > { %v14823_v35 = vpop.eup %11771 }
 0x5f5   : > { %v14825_v43 = vpop.eup %11773 }
 0x5f8   : > { %v14835_v20 = vpop.eup %11775 }
 0x5f9   : > { %v14837_v29 = vpop.eup %11777 }
 0x603   : > { %3334 = vrot.lane.b32.xlu1 %v14369_v44, %s12566_s14 }
 0x607   : > { %3332 = vrot.lane.b32.xlu0 %v14377_v60, %s12566_s14 }
 0x626   : > { %3025 = vadd.xlane.f32.xlu0 %v14823_v35 }
 0x627   : > { %3023 = vadd.xlane.f32.xlu1 %v14825_v43 }
 0x638   : > { %3330 = vrot.lane.b32.xlu1 %v14383_v47, %s12566_s14 }
 0x63c   : > { %3328 = vrot.lane.b32.xlu0 %v14390_v56, %s12566_s14 }
 0x65b   : > { %3029 = vadd.xlane.f32.xlu0 %v14835_v20 }
 0x65c   : > { %3027 = vadd.xlane.f32.xlu1 %v14837_v29 }
 0x66a   : > { %v14841_v6 = vpop.xlane.xlu0 %3005 }
 0x66b   : > { %v3004_v37 = vpop.xlane.xlu1 %3003 }
 0x66c   : > { %11779 = vrcp.f32 %v3004_v37  ;;  %v18436_v37 = vld [vmem:[#allocation51_spill] sm:$0xff] }
 0x66d   : > { %3326 = vrot.lane.b32.xlu1 %v14398_v58, %s12566_s14 }
 0x66e   : > { %v14845_v24 = vpop.xlane.xlu0 %3009 }
 0x66f   : > { %v14847_v22 = vpop.xlane.xlu1 %3007 }
 0x671   : > { %3324 = vrot.lane.b32.xlu0 %v14406_v39, %s12566_s14 }
 0x672   : > { %v14851_v2 = vpop.xlane.xlu0 %3013 }
 0x673   : > { %v14853_v31 = vpop.xlane.xlu1 %3011 }
 0x676   : > { %v14855_v30 = vpop.xlane.xlu0 %3017 }
 0x677   : > { %v14857_v8 = vpop.xlane.xlu1 %3015 }
 0x679   : > { %v11780_v34 = vpop.eup %11779 }
 0x67a   : > { %v3083_v4 = vmul.f32 %v11780_v34, %v14789_v63  ;;  %v14861_v16 = vpop.xlane.xlu0 %3021 }
 0x67b   : > { %v3020_v23 = vpop.xlane.xlu1 %3019 }
 0x67c   : > { %11781 = vrcp.f32 %v3020_v23  ;;  %10727 = vmatprep.mubr.f32.mxu0 %v3083_v4  ;;  %v18437_v4 = vld [vmem:[#allocation89_spill] sm:$0xff]  ;;  %v18439_v23 = vld [vmem:[#allocation91_spill] sm:$0xff] }
 0x67d   : > { %11783 = vpow2.f32 %v2969_v33  ;;  %v18440_v33 = vld [vmem:[#allocation43_spill] sm:$0xff] }
 0x67e   : > { %v3333_v17 = vpop.permute.xlu0 %3332  ;;  %11785 = vpow2.f32 %v2967_v42  ;;  %v18441_v42 = vld [vmem:[#allocation94_spill] sm:$0xff] }
 0x67f   : > { %v3335_v5 = vpop.permute.xlu1 %3334  ;;  %11787 = vrcp.f32 %v14841_v6  ;;  %v18459_v6 = vld [vmem:[#allocation34_spill] sm:$0xff] }
 0x680   : > { %10715 = vmatprep.subr.mxu0 %v3335_v5  ;;  %11433 = vmatprep.subr.mxu1 %v3335_v5  ;;  %11789 = vrcp.f32 %v14847_v22 }
 0x681   : > { %10716 = vmatpush3.msra.mxu0 %v3335_v5  ;;  %11449 = vmatpush3.msra.mxu1 %v3335_v5  ;;  %v18442_v5 = vld [vmem:[#allocation41_spill] sm:$0xff]  ;;  %11791 = vrcp.f32 %v14861_v16 }
 0x682   : > { %10717 = vmatprep.subr.mxu0 %v3333_v17  ;;  %11434 = vmatprep.subr.mxu1 %v3333_v17 }
 0x683   : > { %10718 = vmatpush3.msra.mxu0 %v3333_v17  ;;  %11450 = vmatpush3.msra.mxu1 %v3333_v17  ;;  %v18443_v17 = vld [vmem:[#allocation93_spill] sm:$0xff] }
 0x689   : > { %v11782_v45 = vpop.eup %11781 }
 0x68a   : > { %v3091_v19 = vmul.f32 %v11782_v45, %v14813_v26  ;;  %v14865_v63 = vpop.eup %11783  ;;  %v18431_v26 = vld [vmem:[#allocation63_spill] sm:$0xff]  ;;  %v18444_v45 = vld [vmem:[#allocation37_spill] sm:$0xff] }
 0x68b   : > { %v14867_v61 = vpop.eup %11785 }
 0x68c   : > { %10739 = vmatprep.mubr.f32.mxu1 %v3091_v19  ;;  %v18445_v19 = vld [vmem:[#allocation90_spill] sm:$0xff] }
 0x690   : > { %3033 = vadd.xlane.f32.xlu0 %v14865_v63 }
 0x691   : > { %3031 = vadd.xlane.f32.xlu1 %v14867_v61 }
 0x6a2   : > { %4226 = vrot.lane.b32.xlu1 %v18428_v48, %s12567_s23 }
 0x6a6   : > { %4222 = vrot.lane.b32.xlu1 %v18429_v50, %s12567_s23  ;;  %4224 = vrot.lane.b32.xlu0 %v18430_v25, %s12567_s23 }
 0x6aa   : > { %4220 = vrot.lane.b32.xlu1 %v18431_v26, %s12567_s23  ;;  %4218 = vrot.lane.b32.xlu0 %v18432_v53, %s12567_s23 }
 0x6ae   : > { %4216 = vrot.lane.b32.xlu1 %v18433_v32, %s12567_s23  ;;  %4214 = vrot.lane.b32.xlu0 %v18434_v11, %s12567_s23 }
 0x6af   : > { %v3026_v36 = vpop.xlane.xlu0 %3025 }
 0x6b0   : > { %v3024_v51 = vpop.xlane.xlu1 %3023 }
 0x6b1   : > { %11793 = vrcp.f32 %v3024_v51 }
 0x6b2   : > { %4212 = vrot.lane.b32.xlu1 %v18435_v0, %s12567_s23  ;;  %4210 = vrot.lane.b32.xlu0 %v18436_v37, %s12567_s23  ;;  %11795 = vrcp.f32 %v14845_v24  ;;  %v18461_v24 = vld [vmem:[#allocation38_spill] sm:$0xff] }
 0x6b3   : > { %v3329_v3 = vpop.permute.xlu0 %3328  ;;  %11797 = vrcp.f32 %v14853_v31 }
 0x6b4   : > { %v3331_v34 = vpop.permute.xlu1 %3330  ;;  %11799 = vrcp.f32 %v3026_v36  ;;  %v11788_v36 = vpop.eup %11787 }
 0x6b5   : > { %10719 = vmatprep.subr.mxu0 %v3331_v34  ;;  %11435 = vmatprep.subr.mxu1 %v3331_v34  ;;  %11801 = vrcp.f32 %v14851_v2 }
 0x6b6   : > { %4499 = vrot.lane.b32.xlu1 %v18437_v4, %s12567_s23  ;;  %10720 = vmatpush3.msra.mxu0 %v3331_v34  ;;  %v18451_v4 = vld [vmem:[#allocation77_spill] sm:$0xff]  ;;  %11803 = vrcp.f32 %v14857_v8 }
 0x6b7   : > { %11451 = vmatpush3.msra.mxu1 %v3331_v34  ;;  %10721 = vmatprep.subr.mxu0 %v3329_v3  ;;  %v18446_v34 = vld [vmem:[#allocation32_spill] sm:$0xff] }
 0x6b8   : > { %11436 = vmatprep.subr.mxu1 %v3329_v3  ;;  %10722 = vmatpush3.msra.mxu0 %v3329_v3 }
 0x6b9   : > { %11452 = vmatpush3.msra.mxu1 %v3329_v3  ;;  %4208 = vrot.lane.b32.xlu0 %v18438_v15, %s12567_s23  ;;  %v18447_v3 = vld [vmem:[#allocation84_spill] sm:$0xff] }
 0x6ba   : > { %4497 = vrot.lane.b32.xlu1 %v18439_v23, %s12567_s23  ;;  %v18449_v23 = vld [vmem:[#allocation81_spill] sm:$0xff] }
 0x6bd   : > { %4206 = vrot.lane.b32.xlu0 %v18440_v33, %s12567_s23  ;;  %v3521_v33 = vld [vmem:[#allocation8 + $0x38] sm:$0xff] }
 0x6be   : > { %4495 = vrot.lane.b32.xlu1 %v18441_v42, %s12567_s23  ;;  %v18448_v42 = vld [vmem:[#allocation30_spill] sm:$0xff] }
 0x6c1   : > { %4204 = vrot.lane.b32.xlu0 %v18442_v5, %s12567_s23 }
 0x6c2   : > { %4493 = vrot.lane.b32.xlu1 %v18443_v17, %s12567_s23  ;;  %v18450_v17 = vld [vmem:[#allocation28_spill] sm:$0xff] }
 0x6c5   : > { %4202 = vrot.lane.b32.xlu0 %v18444_v45, %s12567_s23  ;;  %v14927_v45 = vpop.f32.mrf.mxu0 }
 0x6c6   : > { %4491 = vrot.lane.b32.xlu1 %v18445_v19, %s12567_s23  ;;  %v18452_v19 = vld [vmem:[#allocation27_spill] sm:$0xff] }
 0x6c9   : > { %4200 = vrot.lane.b32.xlu0 %v18446_v34, %s12567_s23  ;;  %v18453_v34 = vld [vmem:[#allocation29_spill] sm:$0xff] }
 0x6ca   : > { %4489 = vrot.lane.b32.xlu1 %v18447_v3, %s12567_s23  ;;  %v18454_v3 = vld [vmem:[#allocation73_spill] sm:$0xff] }
 0x6cd   : > { %4198 = vrot.lane.b32.xlu0 %v18448_v42, %s12567_s23  ;;  %v18455_v42 = vld [vmem:[#allocation31_spill] sm:$0xff] }
 0x6ce   : > { %4487 = vrot.lane.b32.xlu1 %v18449_v23, %s12567_s23  ;;  %v18457_v23 = vld [vmem:[#allocation71_spill] sm:$0xff] }
 0x6d1   : > { %4196 = vrot.lane.b32.xlu0 %v18450_v17, %s12567_s23 }
 0x6d2   : > { %4485 = vrot.lane.b32.xlu1 %v18451_v4, %s12567_s23  ;;  %v18456_v4 = vld [vmem:[#allocation35_spill] sm:$0xff] }
 0x6d5   : > { %4164 = vrot.lane.b32.xlu0 %v18452_v19, %s12567_s23  ;;  %v18465_v19 = vld [vmem:[#allocation46_spill] sm:$0xff] }
 0x6d6   : > { %4166 = vrot.lane.b32.xlu1 %v18453_v34, %s12567_s23  ;;  %v14936_v34 = vpop.f32.mrf.mxu0 }
 0x6d8   : > { %v14945_v22 = vpop.f32.mrf.mxu0 }
 0x6d9   : > { %4483 = vrot.lane.b32.xlu0 %v18454_v3, %s12567_s23  ;;  %v18458_v3 = vld [vmem:[#allocation39_spill] sm:$0xff] }
 0x6da   : > { %4168 = vrot.lane.b32.xlu1 %v18455_v42, %s12567_s23  ;;  %v14952_v31 = vpop.f32.mrf.mxu0 }
 0x6dd   : > { %4170 = vrot.lane.b32.xlu0 %v18456_v4, %s12567_s23  ;;  %v18463_v4 = vld [vmem:[#allocation69_spill] sm:$0xff] }
 0x6de   : > { %4481 = vrot.lane.b32.xlu1 %v18457_v23, %s12567_s23  ;;  %v18460_v23 = vld [vmem:[#allocation85_spill] sm:$0xff] }
 0x6e1   : > { %4172 = vrot.lane.b32.xlu0 %v18458_v3, %s12567_s23  ;;  %v11790_v3 = vpop.eup %11789 }
 0x6e2   : > { %4174 = vrot.lane.b32.xlu1 %v18459_v6, %s12567_s23  ;;  %v18462_v6 = vld [vmem:[#allocation49_spill] sm:$0xff]  ;;  %v3085_v17 = vmul.f32 %v11790_v3, %v14795_v46  ;;  %v18467_v46 = vld [vmem:[#allocation48_spill] sm:$0xff] }
 0x6e4   : > { %v3030_v16 = vpop.xlane.xlu0 %3029 }
 0x6e5   : > { %v3028_v51 = vpop.xlane.xlu1 %3027  ;;  %4479 = vrot.lane.b32.xlu0 %v18460_v23, %s12567_s23  ;;  %11805 = vrcp.f32 %v3030_v16  ;;  %v11792_v16 = vpop.eup %11791 }
 0x6e6   : > { %11807 = vrcp.f32 %v3028_v51  ;;  %4176 = vrot.lane.b32.xlu1 %v18461_v24, %s12567_s23  ;;  %v11794_v51 = vpop.eup %11793  ;;  %v14959_v24 = vpop.f32.mrf.mxu0 }
 0x6e7   : > { %11809 = vrcp.f32 %v14855_v30  ;;  %v11796_v23 = vpop.eup %11795  ;;  %v3084_v30 = vmul.f32 %v11788_v36, %v14786_v41  ;;  %v3093_v5 = vmul.f32 %v11794_v51, %v14825_v43  ;;  %v2264_v36 = vld [vmem:[#allocation8 + $0x18] sm:$0xff] }
 0x6e8   : > { %v3325_v8 = vpop.permute.xlu0 %3324  ;;  %v11798_v42 = vpop.eup %11797 }
 0x6e9   : > { %v3327_v2 = vpop.permute.xlu1 %3326  ;;  %4178 = vrot.lane.b32.xlu0 %v18462_v6, %s12567_s23  ;;  %v18464_v6 = vld [vmem:[#allocation54_spill] sm:$0xff]  ;;  %v3249_v15 = vpop.f32.mrf.mxu0  ;;  %v3087_v43 = vmul.f32 %v11798_v42, %v14801_v59  ;;  %v18469_v59 = vld [vmem:[#allocation65_spill] sm:$0xff] }
 0x6ea   : > { %4477 = vrot.lane.b32.xlu1 %v18463_v4, %s12567_s23  ;;  %10723 = vmatprep.subr.mxu0 %v3327_v2  ;;  %v3092_v4 = vmul.f32 %v11792_v16, %v14811_v1  ;;  %v3086_v1 = vmul.f32 %v11796_v23, %v14793_v13  ;;  %v18468_v23 = vld [vmem:[#allocation64_spill] sm:$0xff] }
 0x6eb   : > { %11437 = vmatprep.subr.mxu1 %v3327_v2  ;;  %10724 = vmatpush3.msra.mxu0 %v3327_v2  ;;  %v10682_v13 = vpop.f32.mrf.mxu0 }
 0x6ec   : > { %11453 = vmatpush3.msra.mxu1 %v3327_v2  ;;  %10725 = vmatprep.subr.mxu0 %v3325_v8  ;;  %v11800_v2 = vpop.eup %11799 }
 0x6ed   : > { %11438 = vmatprep.subr.mxu1 %v3325_v8  ;;  %4180 = vrot.lane.b32.xlu0 %v18464_v6, %s12567_s23  ;;  %v11802_v41 = vpop.eup %11801  ;;  %v3094_v3 = vmul.f32 %v11800_v2, %v14823_v35  ;;  %v3518_v2 = vld [vmem:[#allocation8 + $0x20] sm:$0xff] }
 0x6ee   : > { %4182 = vrot.lane.b32.xlu1 %v18465_v19, %s12567_s23  ;;  %10726 = vmatpush3.msra.mxu0 %v3325_v8  ;;  %v11804_v6 = vpop.eup %11803  ;;  %v18466_v19 = vld [vmem:[#allocation80_spill] sm:$0xff]  ;;  %v3088_v51 = vmul.f32 %v11802_v41, %v14799_v28 }
 0x6ef   : > { %11454 = vmatpush3.msra.mxu1 %v3325_v8  ;;  %10728 = vmatmul.mubr.f32.vlgmr.msra.gmra.mxu0 %v3084_v30  ;;  %v3520_v8 = vld [vmem:[#allocation8 + $0x30] sm:$0xff]  ;;  %v3089_v42 = vmul.f32 %v11804_v6, %v14807_v12 }
 0x6f0   : > { %10740 = vmatmul.mubr.f32.vlgmr.msra.gmra.mxu1 %v3092_v4  ;;  %10730 = vmatprep.mubr.f32.mxu0 %v3085_v17  ;;  %v18470_v30 = vld [vmem:[#allocation68_spill] sm:$0xff] }
 0x6f1   : > { %10742 = vmatprep.mubr.f32.mxu1 %v3093_v5  ;;  %4475 = vrot.lane.b32.xlu0 %v18466_v19, %s12567_s23  ;;  %v2263_v12 = vld [vmem:[#allocation8 + $0x10] sm:$0xff] }
 0x6f2   : > { %v11806_v16 = vpop.eup %11805  ;;  %4184 = vrot.lane.b32.xlu1 %v18467_v46, %s12567_s23  ;;  %10751 = vmatprep.subr.mxu0 %v3521_v33  ;;  %v18472_v41 = vld [vmem:[#allocation76_spill] sm:$0xff] }
 0x6f3   : > { %v11808_v4 = vpop.eup %11807  ;;  %10731 = vmatmul.mubr.f32.gmra.mxu0 %v3086_v1  ;;  %10807 = vmatprep.subr.mxu1 %v2264_v36  ;;  %v3096_v17 = vmul.f32 %v11806_v16, %v14835_v20  ;;  %v3259_v20 = vpop.f32.mrf.mxu0  ;;  %v18473_v1 = vld [vmem:[#allocation52_spill] sm:$0xff]  ;;  %v18474_v16 = vld [vmem:[#allocation74_spill] sm:$0xff] }
 0x6f4   : > { %10743 = vmatmul.mubr.f32.gmra.mxu1 %v3094_v3  ;;  %10733 = vmatprep.mubr.f32.mxu0 %v3087_v43  ;;  %v3095_v5 = vmul.f32 %v11808_v4, %v14837_v29  ;;  %v11810_v35 = vpop.eup %11809  ;;  %v3519_v29 = vld [vmem:[#allocation8 + $0x28] sm:$0xff]  ;;  %v18477_v43 = vld [vmem:[#allocation61_spill] sm:$0xff] }
 0x6f5   : > { %4186 = vrot.lane.b32.xlu0 %v18468_v23, %s12567_s23  ;;  %10752 = vmatpush3.msra.mxu0 %v3521_v33  ;;  %v3090_v28 = vmul.f32 %v11810_v35, %v14805_v7  ;;  %v18471_v33 = vld [vmem:[#allocation50_spill] sm:$0xff]  ;;  %v10685_v6 = vpop.f32.mrf.mxu0  ;;  %v2262_v7 = vld [vmem:[#allocation8 + $0x8] sm:$0xff]  ;;  %v18483_v35 = vld [vmem:[#allocation72_spill] sm:$0xff] }
 0x6f6   : > { %4473 = vrot.lane.b32.xlu1 %v18469_v59, %s12567_s23  ;;  %10745 = vmatprep.mubr.f32.mxu1 %v3095_v5  ;;  %v18475_v3 = vld [vmem:[#allocation59_spill] sm:$0xff]  ;;  %v18478_v5 = vld [vmem:[#allocation78_spill] sm:$0xff] }
 0x6f7   : > { %10734 = vmatmul.mubr.f32.gmra.mxu0 %v3088_v51  ;;  %10753 = vmatprep.subr.mxu0 %v3520_v8  ;;  %v18482_v51 = vld [vmem:[#allocation88_spill] sm:$0xff] }
 0x6f8   : > { %10736 = vmatprep.mubr.f32.mxu0 %v3089_v42  ;;  %10746 = vmatmul.mubr.f32.gmra.mxu1 %v3096_v17  ;;  %v18480_v17 = vld [vmem:[#allocation82_spill] sm:$0xff]  ;;  %v18484_v42 = vld [vmem:[#allocation92_spill] sm:$0xff] }
 0x6f9   : > { %4188 = vrot.lane.b32.xlu0 %v18470_v30, %s12567_s23  ;;  %10754 = vmatpush3.msra.mxu0 %v3520_v8  ;;  %v18481_v8 = vld [vmem:[#allocation70_spill] sm:$0xff] }
 0x6fa   : > { %4190 = vrot.lane.b32.xlu1 %v18471_v33, %s12567_s23  ;;  %10755 = vmatprep.subr.mxu0 %v3519_v29  ;;  %v12243_v33 = vld [vmem:[%s12856_s25 + $0x60] sm:$0xff] }
 0x6fb   : > { %10737 = vmatmul.mubr.f32.gmra.mxu0 %v3090_v28  ;;  %10808 = vmatpush3.msra.mxu1 %v2264_v36  ;;  %v3269_v36 = vpop.f32.mrf.mxu0  ;;  %v18486_v28 = vld [vmem:[#allocation97_spill] sm:$0xff] }
 0x6fc   : > { %10756 = vmatpush3.msra.mxu0 %v3519_v29  ;;  %10759 = vmatprep.mubr.msk.f32.mxu0 %vm1200_vm0, %v14936_v34  ;;  %v2261_v34 = vld [vmem:[#allocation8] sm:$0xff]  ;;  %v18485_v29 = vld [vmem:[#allocation79_spill] sm:$0xff] }
 0x6fd   : > { %10757 = vmatprep.subr.mxu0 %v3518_v2  ;;  %4471 = vrot.lane.b32.xlu0 %v18472_v41, %s12567_s23  ;;  %v12239_v41 = vld [vmem:[%s12856_s25 + $0x40] sm:$0xff] }
 0x6fe   : > { %4192 = vrot.lane.b32.xlu1 %v18473_v1, %s12567_s23  ;;  %10758 = vmatpush3.msra.mxu0 %v3518_v2  ;;  %v12241_v1 = vld [vmem:[%s12856_s25 + $0x50] sm:$0xff] }
 0x6ff   : > { %10760 = vmatmul.mubr.msk.f32.vlgmr.msra.gmra.mxu0 %vm1200_vm0, %v14927_v45  ;;  %10809 = vmatprep.subr.mxu1 %v2263_v12  ;;  %v10688_v45 = vpop.f32.mrf.mxu0 }
 0x700   : > { %10762 = vmatprep.mubr.msk.f32.mxu0 %vm1200_vm0, %v14952_v31  ;;  %10810 = vmatpush3.msra.mxu1 %v2263_v12  ;;  %v18476_v31 = vld [vmem:[#allocation57_spill] sm:$0xff]  ;;  %v18487_v12 = vld [vmem:[#allocation87_spill] sm:$0xff] }
 0x701   : > { %4194 = vrot.lane.b32.xlu0 %v18474_v16, %s12567_s23  ;;  %10811 = vmatprep.subr.mxu1 %v2262_v7  ;;  %v3279_v4 = vpop.f32.mrf.mxu0 }
 0x702   : > { %4469 = vrot.lane.b32.xlu1 %v18475_v3, %s12567_s23  ;;  %10812 = vmatpush3.msra.mxu1 %v2262_v7  ;;  %v18488_v7 = vld [vmem:[#allocation99_spill] sm:$0xff] }
 0x703   : > { %10763 = vmatmul.mubr.msk.f32.gmra.mxu0 %vm1200_vm0, %v14945_v22  ;;  %10813 = vmatprep.subr.mxu1 %v2261_v34  ;;  %v18479_v22 = vld [vmem:[#allocation67_spill] sm:$0xff] }
 0x704   : > { %10765 = vmatprep.mubr.msk.f32.mxu0 %vm1200_vm0, %v3249_v15  ;;  %10814 = vmatpush3.msra.mxu1 %v2261_v34  ;;  %v10691_v15 = vpop.f32.mrf.mxu0 }
 0x705   : > { %4437 = vrot.lane.b32.xlu0 %v18476_v31, %s12567_s23  ;;  %v12237_v31 = vld [vmem:[%s12856_s25 + $0x30] sm:$0xff] }
 0x706   : > { %4439 = vrot.lane.b32.xlu1 %v18477_v43, %s12567_s23 }
 0x707   : > { %10766 = vmatmul.mubr.msk.f32.gmra.mxu0 %vm1200_vm0, %v14959_v24  ;;  %v3289_v24 = vpop.f32.mrf.mxu0 }
 0x708   : > { %10768 = vmatprep.mubr.msk.f32.mxu0 %vm1200_vm0, %v3259_v20 }
 0x709   : > { %4441 = vrot.lane.b32.xlu0 %v18478_v5, %s12567_s23 }
 0x70a   : > { %4443 = vrot.lane.b32.xlu1 %v18479_v22, %s12567_s23  ;;  %v12232_v22 = vld [vmem:[%s12856_s25] sm:$0xff] }
 0x70b   : > { %10769 = vmatmul.mubr.msk.f32.gmra.mxu0 %vm1200_vm0, %v10682_v13  ;;  %v10694_v13 = vpop.f32.mrf.mxu0 }
 0x70c   : > { %10771 = vmatprep.mubr.msk.f32.mxu0 %vm1200_vm0, %v3269_v36  ;;  %v18489_v36 = vld [vmem:[#allocation96_spill] sm:$0xff] }
 0x70d   : > { %4445 = vrot.lane.b32.xlu0 %v18480_v17, %s12567_s23  ;;  %v3299_v20 = vpop.f32.mrf.mxu0 }
 0x70e   : > { %4447 = vrot.lane.b32.xlu1 %v18481_v8, %s12567_s23 }
 0x70f   : > { %10772 = vmatmul.mubr.msk.f32.gmra.mxu0 %vm1200_vm0, %v10685_v6 }
 0x710   : > { %10774 = vmatprep.mubr.msk.f32.mxu0 %vm1200_vm0, %v3279_v4  ;;  %v18490_v4 = vld [vmem:[#allocation103_spill] sm:$0xff] }
 0x711   : > { %4449 = vrot.lane.b32.xlu0 %v18482_v51, %s12567_s23 }
 0x712   : > { %4451 = vrot.lane.b32.xlu1 %v18483_v35, %s12567_s23 }
 0x713   : > { %10775 = vmatmul.mubr.msk.f32.gmra.mxu0 %vm1200_vm0, %v10688_v45 }
 0x714   : > { %10777 = vmatprep.mubr.msk.f32.mxu0 %vm1200_vm0, %v3289_v24  ;;  %v18491_v24 = vld [vmem:[#allocation100_spill] sm:$0xff] }
 0x715   : > { %4453 = vrot.lane.b32.xlu0 %v18484_v42, %s12567_s23 }
 0x716   : > { %4455 = vrot.lane.b32.xlu1 %v18485_v29, %s12567_s23 }
 0x717   : > { %10778 = vmatmul.mubr.msk.f32.gmra.mxu0 %vm1200_vm0, %v10691_v15 }
 0x718   : > { %10780 = vmatprep.mubr.msk.f32.mxu0 %vm1200_vm0, %v3299_v20  ;;  %v18492_v20 = vld [vmem:[#allocation53_spill] sm:$0xff] }
 0x719   : > { %4457 = vrot.lane.b32.xlu0 %v18486_v28, %s12567_s23  ;;  %v3034_v2 = vpop.xlane.xlu0 %3033 }
 0x71a   : > { %4459 = vrot.lane.b32.xlu1 %v18487_v12, %s12567_s23  ;;  %v3032_v6 = vpop.xlane.xlu1 %3031  ;;  %11811 = vrcp.f32 %v3034_v2 }
 0x71b   : > { %11813 = vrcp.f32 %v3032_v6  ;;  %10781 = vmatmul.mubr.msk.f32.gmra.mxu0 %vm1200_vm0, %v10694_v13  ;;  %v18493_v6 = vld [vmem:[#allocation42_spill] sm:$0xff] }
 0x71d   : > { %4461 = vrot.lane.b32.xlu0 %v18488_v7, %s12567_s23  ;;  %v4225_v34 = vpop.permute.xlu0 %4224 }
 0x71e   : > { %4463 = vrot.lane.b32.xlu1 %v18489_v36, %s12567_s23  ;;  %v4227_v45 = vpop.permute.xlu1 %4226 }
 0x71f   : > { %10863 = vmatprep.subr.msk.mxu0 %vm1200_vm0, %v4227_v45 }
 0x720   : > { %10864 = vmatpush3.xpose.msk.msra.mxu0 %vm1200_vm0, %v4227_v45 }
 0x721   : > { %4465 = vrot.lane.b32.xlu0 %v18490_v4, %s12567_s23  ;;  %10865 = vmatprep.subr.msk.mxu0 %vm1200_vm0, %v4225_v34  ;;  %v4219_v15 = vpop.permute.xlu0 %4218 }
 0x722   : > { %4467 = vrot.lane.b32.xlu1 %v18491_v24, %s12567_s23  ;;  %v4223_v13 = vpop.permute.xlu1 %4222 }
 0x724   : > { %10866 = vmatpush3.xpose.msk.msra.mxu0 %vm1200_vm0, %v4225_v34  ;;  %v18494_v34 = vld [vmem:[#allocation47_spill] sm:$0xff] }
 0x725   : > { %10867 = vmatprep.subr.msk.mxu0 %vm1200_vm0, %v4223_v13  ;;  %5026 = vrot.lane.b32.xlu0 %v18492_v20, %s12567_s23  ;;  %v4215_v2 = vpop.permute.xlu0 %4214  ;;  %v18495_v20 = vld [vmem:[#allocation40_spill] sm:$0xff] }
 0x726   : > { %5028 = vrot.lane.b32.xlu1 %v18493_v6, %s12567_s23  ;;  %v4221_v45 = vpop.permute.xlu1 %4220 }
 0x727   : > { %v11812_v4 = vpop.eup %11811 }
 0x728   : > { %v11814_v36 = vpop.eup %11813  ;;  %10868 = vmatpush3.xpose.msk.msra.mxu0 %vm1200_vm0, %v4223_v13  ;;  %v3098_v7 = vmul.f32 %v11812_v4, %v14865_v63  ;;  %v18496_v63 = vld [vmem:[#allocation95_spill] sm:$0xff] }
 0x729   : > { %v3097_v24 = vmul.f32 %v11814_v36, %v14867_v61  ;;  %10869 = vmatprep.subr.msk.mxu0 %vm1200_vm0, %v4221_v45  ;;  %5022 = vrot.lane.b32.xlu0 %v18494_v34, %s12567_s23  ;;  %v4211_v12 = vpop.permute.xlu0 %4210  ;;  %v18497_v36 = vld [vmem:[#allocation36_spill] sm:$0xff] }
 0x72a   : > { %5024 = vrot.lane.b32.xlu1 %v18495_v20, %s12567_s23  ;;  %v4217_v28 = vpop.permute.xlu1 %4216 }
 0x72b   : > { %10748 = vmatprep.mubr.f32.mxu1 %v3097_v24  ;;  %v18498_v24 = vld [vmem:[#allocation75_spill] sm:$0xff] }
 0x72c   : > { %10870 = vmatpush3.xpose.msk.msra.mxu0 %vm1200_vm0, %v4221_v45  ;;  %10749 = vmatmul.mubr.f32.gmra.mxu1 %v3098_v7  ;;  %v18503_v45 = vld [vmem:[#allocation113_spill] sm:$0xff] }
 0x72d   : > { %10871 = vmatprep.subr.msk.mxu0 %vm1200_vm0, %v4219_v15  ;;  %5018 = vrot.lane.b32.xlu0 %v18496_v63, %s12567_s23  ;;  %v4209_v61 = vpop.permute.xlu0 %4208 }
 0x72e   : > { %5020 = vrot.lane.b32.xlu1 %v18497_v36, %s12567_s23  ;;  %v4213_v4 = vpop.permute.xlu1 %4212  ;;  %10815 = vmatprep.mubr.msk.f32.mxu1 %vm1200_vm0, %v14589_v10  ;;  %v18499_v10 = vld [vmem:[#allocation101_spill] sm:$0xff] }
 0x730   : > { %10872 = vmatpush3.xpose.msk.msra.mxu0 %vm1200_vm0, %v4219_v15  ;;  %10816 = vmatmul.mubr.msk.f32.vlgmr.msra.gmra.mxu1 %vm1200_vm0, %v14587_v62 }
 0x731   : > { %10873 = vmatprep.subr.msk.mxu0 %vm1200_vm0, %v4217_v28  ;;  %5014 = vrot.lane.b32.xlu0 %v18331_v49, %s12567_s23  ;;  %v4207_v7 = vpop.permute.xlu0 %4206 }
 0x732   : > { %5016 = vrot.lane.b32.xlu1 %v18498_v24, %s12567_s23  ;;  %v4500_v13 = vpop.permute.xlu1 %4499  ;;  %10818 = vmatprep.mubr.msk.f32.mxu1 %vm1200_vm0, %v14593_v54 }
 0x733   : > { %10919 = vmatprep.subr.msk.mxu1 %vm1200_vm0, %v4500_v13 }
 0x734   : > { %10920 = vmatpush3.xpose.msk.msra.mxu1 %vm1200_vm0, %v4500_v13  ;;  %10874 = vmatpush3.xpose.msk.msra.mxu0 %vm1200_vm0, %v4217_v28  ;;  %v18505_v13 = vld [vmem:[#allocation110_spill] sm:$0xff] }
 0x735   : > { %10875 = vmatprep.subr.msk.mxu0 %vm1200_vm0, %v4215_v2  ;;  %10819 = vmatmul.mubr.msk.f32.gmra.mxu1 %vm1200_vm0, %v14591_v21  ;;  %v4205_v62 = vpop.permute.xlu0 %4204 }
 0x736   : > { %5012 = vrot.lane.b32.xlu1 %v18499_v10, %s12567_s23  ;;  %v4498_v15 = vpop.permute.xlu1 %4497  ;;  %10821 = vmatprep.mubr.msk.f32.mxu1 %vm1200_vm0, %v14597_v52 }
 0x737   : > { %10921 = vmatprep.subr.msk.mxu1 %vm1200_vm0, %v4498_v15 }
 0x738   : > { %10922 = vmatpush3.xpose.msk.msra.mxu1 %vm1200_vm0, %v4498_v15  ;;  %10876 = vmatpush3.xpose.msk.msra.mxu0 %vm1200_vm0, %v4215_v2 }
 0x739   : > { %10877 = vmatprep.subr.msk.mxu0 %vm1200_vm0, %v4213_v4  ;;  %10822 = vmatmul.mubr.msk.f32.gmra.mxu1 %vm1200_vm0, %v14595_v55  ;;  %v4203_v21 = vpop.permute.xlu0 %4202 }
 0x73a   : > { %v4496_v54 = vpop.permute.xlu1 %4495  ;;  %10824 = vmatprep.mubr.msk.f32.mxu1 %vm1200_vm0, %v14601_v9 }
 0x73b   : > { %10923 = vmatprep.subr.msk.mxu1 %vm1200_vm0, %v4496_v54 }
 0x73c   : > { %10924 = vmatpush3.xpose.msk.msra.mxu1 %vm1200_vm0, %v4496_v54  ;;  %10878 = vmatpush3.xpose.msk.msra.mxu0 %vm1200_vm0, %v4213_v4  ;;  %v18506_v54 = vld [vmem:[#allocation152_spill] sm:$0xff] }
 0x73d   : > { %10879 = vmatprep.subr.msk.mxu0 %vm1200_vm0, %v4211_v12  ;;  %10825 = vmatmul.mubr.msk.f32.gmra.mxu1 %vm1200_vm0, %v14599_v14  ;;  %v4201_v52 = vpop.permute.xlu0 %4200 }
 0x73e   : > { %v4494_v28 = vpop.permute.xlu1 %4493  ;;  %10827 = vmatprep.mubr.msk.f32.mxu1 %vm1200_vm0, %v14611_v57 }
 0x73f   : > { %10925 = vmatprep.subr.msk.mxu1 %vm1200_vm0, %v4494_v28 }
 0x740   : > { %10926 = vmatpush3.xpose.msk.msra.mxu1 %vm1200_vm0, %v4494_v28  ;;  %10880 = vmatpush3.xpose.msk.msra.mxu0 %vm1200_vm0, %v4211_v12  ;;  %v18500_v12 = vld [vmem:[#allocation112_spill] sm:$0xff] }
 0x741   : > { %10881 = vmatprep.subr.msk.mxu0 %vm1200_vm0, %v4209_v61  ;;  %10828 = vmatmul.mubr.msk.f32.gmra.mxu1 %vm1200_vm0, %v14607_v18  ;;  %v4199_v55 = vpop.permute.xlu0 %4198  ;;  %v18501_v18 = vld [vmem:[#allocation115_spill] sm:$0xff] }
 0x742   : > { %v4492_v9 = vpop.permute.xlu1 %4491  ;;  %10830 = vmatprep.mubr.msk.f32.mxu1 %vm1200_vm0, %v14623_v27 }
 0x743   : > { %10927 = vmatprep.subr.msk.mxu1 %vm1200_vm0, %v4492_v9 }
 0x744   : > { %10928 = vmatpush3.xpose.msk.msra.mxu1 %vm1200_vm0, %v4492_v9  ;;  %10882 = vmatpush3.xpose.msk.msra.mxu0 %vm1200_vm0, %v4209_v61 }
 0x745   : > { %10883 = vmatprep.subr.msk.mxu0 %vm1200_vm0, %v4207_v7  ;;  %10831 = vmatmul.mubr.msk.f32.gmra.mxu1 %vm1200_vm0, %v14617_v38  ;;  %v4197_v14 = vpop.permute.xlu0 %4196  ;;  %v18502_v38 = vld [vmem:[#allocation108_spill] sm:$0xff] }
 0x746   : > { %v4490_v57 = vpop.permute.xlu1 %4489  ;;  %10833 = vmatprep.mubr.msk.f32.mxu1 %vm1200_vm0, %v18500_v12  ;;  %v18509_v12 = vld [vmem:[#allocation148_spill] sm:$0xff] }
 0x747   : > { %10929 = vmatprep.subr.msk.mxu1 %vm1200_vm0, %v4490_v57 }
 0x748   : > { %10930 = vmatpush3.xpose.msk.msra.mxu1 %vm1200_vm0, %v4490_v57  ;;  %10884 = vmatpush3.xpose.msk.msra.mxu0 %vm1200_vm0, %v4207_v7  ;;  %v18504_v7 = vld [vmem:[#allocation155_spill] sm:$0xff]  ;;  %v18508_v57 = vld [vmem:[#allocation146_spill] sm:$0xff] }
 0x749   : > { %10885 = vmatprep.subr.msk.mxu0 %vm1200_vm0, %v4205_v62  ;;  %10834 = vmatmul.mubr.msk.f32.gmra.mxu1 %vm1200_vm0, %v18501_v18  ;;  %v15133_v27 = vpop.permute.xlu0 %4164 }
 0x74a   : > { %v4488_v2 = vpop.permute.xlu1 %4487  ;;  %10836 = vmatprep.mubr.msk.f32.mxu1 %vm1200_vm0, %v18502_v38  ;;  %v18511_v38 = vld [vmem:[#allocation144_spill] sm:$0xff] }
 0x74b   : > { %10931 = vmatprep.subr.msk.mxu1 %vm1200_vm0, %v4488_v2 }
 0x74c   : > { %10932 = vmatpush3.xpose.msk.msra.mxu1 %vm1200_vm0, %v4488_v2  ;;  %10886 = vmatpush3.xpose.msk.msra.mxu0 %vm1200_vm0, %v4205_v62  ;;  %v18510_v2 = vld [vmem:[#allocation143_spill] sm:$0xff] }
 0x74d   : > { %10887 = vmatprep.subr.msk.mxu0 %vm1200_vm0, %v4203_v21  ;;  %10837 = vmatmul.mubr.msk.f32.gmra.mxu1 %vm1200_vm0, %v18503_v45  ;;  %v4484_v61 = vpop.permute.xlu0 %4483 }
 0x74e   : > { %v4486_v4 = vpop.permute.xlu1 %4485  ;;  %10839 = vmatprep.mubr.msk.f32.mxu1 %vm1200_vm0, %v18504_v7 }
 0x74f   : > { %10933 = vmatprep.subr.msk.mxu1 %vm1200_vm0, %v4486_v4 }
 0x750   : > { %10934 = vmatpush3.xpose.msk.msra.mxu1 %vm1200_vm0, %v4486_v4  ;;  %10888 = vmatpush3.xpose.msk.msra.mxu0 %vm1200_vm0, %v4203_v21  ;;  %v18507_v21 = vld [vmem:[#allocation153_spill] sm:$0xff] }
 0x751   : > { %10889 = vmatprep.subr.msk.mxu0 %vm1200_vm0, %v4201_v52  ;;  %10840 = vmatmul.mubr.msk.f32.gmra.mxu1 %vm1200_vm0, %v18505_v13  ;;  %v15151_v62 = vpop.permute.xlu0 %4170  ;;  %v18513_v4 = vld [vmem:[#allocation141_spill] sm:$0xff] }
 0x752   : > { %v15153_v15 = vpop.permute.xlu1 %4166  ;;  %10935 = vmatprep.subr.msk.mxu1 %vm1200_vm0, %v4484_v61  ;;  %10842 = vmatprep.mubr.msk.f32.mxu1 %vm1200_vm0, %v18506_v54  ;;  %v18514_v13 = vld [vmem:[#allocation137_spill] sm:$0xff]  ;;  %v18515_v54 = vld [vmem:[#allocation139_spill] sm:$0xff] }
 0x754   : > { %10890 = vmatpush3.xpose.msk.msra.mxu0 %vm1200_vm0, %v4201_v52  ;;  %10936 = vmatpush3.xpose.msk.msra.mxu1 %vm1200_vm0, %v4484_v61  ;;  %v18512_v61 = vld [vmem:[#allocation126_spill] sm:$0xff] }
 0x755   : > { %10891 = vmatprep.subr.msk.mxu0 %vm1200_vm0, %v4199_v55  ;;  %10843 = vmatmul.mubr.msk.f32.gmra.mxu1 %vm1200_vm0, %v18507_v21  ;;  %v15163_v28 = vpop.permute.xlu0 %4172 }
 0x756   : > { %v15165_v9 = vpop.permute.xlu1 %4168  ;;  %10845 = vmatprep.mubr.msk.f32.mxu1 %vm1200_vm0, %v18508_v57 }
 0x758   : > { %10892 = vmatpush3.xpose.msk.msra.mxu0 %vm1200_vm0, %v4199_v55 }
 0x759   : > { %10893 = vmatprep.subr.msk.mxu0 %vm1200_vm0, %v4197_v14  ;;  %10846 = vmatmul.mubr.msk.f32.gmra.mxu1 %vm1200_vm0, %v18509_v12  ;;  %v4480_v52 = vpop.permute.xlu0 %4479  ;;  %v18516_v12 = vld [vmem:[#allocation133_spill] sm:$0xff] }
 0x75a   : > { %v4482_v18 = vpop.permute.xlu1 %4481  ;;  %10848 = vmatprep.mubr.msk.f32.mxu1 %vm1200_vm0, %v18510_v2 }
 0x75b   : > { %10937 = vmatprep.subr.msk.mxu1 %vm1200_vm0, %v4482_v18 }
 0x75c   : > { %10938 = vmatpush3.xpose.msk.msra.mxu1 %vm1200_vm0, %v4482_v18  ;;  %10894 = vmatpush3.xpose.msk.msra.mxu0 %vm1200_vm0, %v4197_v14 }
 0x75d   : > { %10849 = vmatmul.mubr.msk.f32.gmra.mxu1 %vm1200_vm0, %v18511_v38  ;;  %10939 = vmatprep.subr.msk.mxu1 %vm1200_vm0, %v4480_v52  ;;  %v15181_v55 = vpop.permute.xlu0 %4178  ;;  %v18518_v38 = vld [vmem:[#allocation129_spill] sm:$0xff] }
 0x75e   : > { %v15183_v45 = vpop.permute.xlu1 %4174  ;;  %10851 = vmatprep.mubr.msk.f32.mxu1 %vm1200_vm0, %v18512_v61  ;;  %v18519_v61 = vld [vmem:[#allocation132_spill] sm:$0xff] }
 0x760   : > { %10940 = vmatpush3.xpose.msk.msra.mxu1 %vm1200_vm0, %v4480_v52  ;;  %v18517_v52 = vld [vmem:[#allocation136_spill] sm:$0xff] }
 0x761   : > { %10852 = vmatmul.mubr.msk.f32.gmra.mxu1 %vm1200_vm0, %v18513_v4  ;;  %v15190_v7 = vpop.permute.xlu0 %4180 }
 0x762   : > { %v15192_v14 = vpop.permute.xlu1 %4176  ;;  %10854 = vmatprep.mubr.msk.f32.mxu1 %vm1200_vm0, %v18514_v13 }
 0x765   : > { %10855 = vmatmul.mubr.msk.f32.gmra.mxu1 %vm1200_vm0, %v18515_v54  ;;  %v4476_v21 = vpop.permute.xlu0 %4475 }
 0x766   : > { %v4478_v57 = vpop.permute.xlu1 %4477  ;;  %10857 = vmatprep.mubr.msk.f32.mxu1 %vm1200_vm0, %v18516_v12 }
 0x767   : > { %10941 = vmatprep.subr.msk.mxu1 %vm1200_vm0, %v4478_v57 }
 0x768   : > { %10942 = vmatpush3.xpose.msk.msra.mxu1 %vm1200_vm0, %v4478_v57 }
 0x769   : > { %10858 = vmatmul.mubr.msk.f32.gmra.mxu1 %vm1200_vm0, %v18517_v52  ;;  %10943 = vmatprep.subr.msk.mxu1 %vm1200_vm0, %v4476_v21  ;;  %v15205_v18 = vpop.permute.xlu0 %4186 }
 0x76a   : > { %v15207_v2 = vpop.permute.xlu1 %4182  ;;  %10860 = vmatprep.mubr.msk.f32.mxu1 %vm1200_vm0, %v18518_v38 }
 0x76c   : > { %10944 = vmatpush3.xpose.msk.msra.mxu1 %vm1200_vm0, %v4476_v21 }
 0x76d   : > { %10861 = vmatmul.mubr.msk.f32.gmra.mxu1 %vm1200_vm0, %v18519_v61  ;;  %v15214_v4 = vpop.permute.xlu0 %4188 }
 0x76e   : > { %v15216_v13 = vpop.permute.xlu1 %4184 }
 0x771   : > { %v4472_v54 = vpop.permute.xlu0 %4471 }
 0x772   : > { %v4474_v57 = vpop.permute.xlu1 %4473 }
 0x773   : > { %10945 = vmatprep.subr.msk.mxu1 %vm1200_vm0, %v4474_v57 }
 0x774   : > { %10946 = vmatpush3.xpose.msk.msra.mxu1 %vm1200_vm0, %v4474_v57 }
 0x775   : > { %10947 = vmatprep.subr.msk.mxu1 %vm1200_vm0, %v4472_v54  ;;  %v15221_v12 = vpop.permute.xlu0 %4194 }
 0x776   : > { %v15223_v52 = vpop.permute.xlu1 %4190 }
 0x778   : > { %10948 = vmatpush3.xpose.msk.msra.mxu1 %vm1200_vm0, %v4472_v54 }
 0x779   : > { %v4438_v21 = vpop.permute.xlu0 %4437 }
 0x77a   : > { %v15226_v38 = vpop.permute.xlu1 %4192  ;;  %10951 = vmatprep.mubr.msk.f32.mxu1 %vm1200_vm0, %v4438_v21 }
 0x77d   : > { %v4442_v61 = vpop.permute.xlu0 %4441 }
 0x77e   : > { %v4470_v10 = vpop.permute.xlu1 %4469 }
 0x77f   : > { %10949 = vmatprep.subr.msk.mxu1 %vm1200_vm0, %v4470_v10 }
 0x780   : > { %10950 = vmatpush3.xpose.msk.msra.mxu1 %vm1200_vm0, %v4470_v10 }
 0x781   : > { %v4446_v57 = vpop.permute.xlu0 %4445 }
 0x782   : > { %v4440_v49 = vpop.permute.xlu1 %4439 }
 0x783   : > { %10952 = vmatmul.mubr.msk.f32.vlgmr.msra.gmra.mxu1 %vm1200_vm0, %v4440_v49 }
 0x784   : > { %10954 = vmatprep.mubr.msk.f32.mxu1 %vm1200_vm0, %v4442_v61 }
 0x785   : > { %v4450_v24 = vpop.permute.xlu0 %4449 }
 0x786   : > { %v4444_v63 = vpop.permute.xlu1 %4443 }
 0x787   : > { %10955 = vmatmul.mubr.msk.f32.gmra.mxu1 %vm1200_vm0, %v4444_v63 }
 0x788   : > { %10957 = vmatprep.mubr.msk.f32.mxu1 %vm1200_vm0, %v4446_v57 }
 0x789   : > { %v4454_v54 = vpop.permute.xlu0 %4453 }
 0x78a   : > { %v4448_v21 = vpop.permute.xlu1 %4447 }
 0x78b   : > { %10958 = vmatmul.mubr.msk.f32.gmra.mxu1 %vm1200_vm0, %v4448_v21 }
 0x78c   : > { %10960 = vmatprep.mubr.msk.f32.mxu1 %vm1200_vm0, %v4450_v24 }
 0x78d   : > { %v4458_v36 = vpop.permute.xlu0 %4457 }
 0x78e   : > { %v4452_v10 = vpop.permute.xlu1 %4451 }
 0x78f   : > { %10961 = vmatmul.mubr.msk.f32.gmra.mxu1 %vm1200_vm0, %v4452_v10 }
 0x790   : > { %10963 = vmatprep.mubr.msk.f32.mxu1 %vm1200_vm0, %v4454_v54 }
 0x791   : > { %v4462_v61 = vpop.permute.xlu0 %4461 }
 0x792   : > { %v4456_v49 = vpop.permute.xlu1 %4455 }
 0x793   : > { %10964 = vmatmul.mubr.msk.f32.gmra.mxu1 %vm1200_vm0, %v4456_v49 }
 0x794   : > { %10966 = vmatprep.mubr.msk.f32.mxu1 %vm1200_vm0, %v4458_v36 }
 0x795   : > { %v4466_v57 = vpop.permute.xlu0 %4465 }
 0x796   : > { %v4460_v63 = vpop.permute.xlu1 %4459 }
 0x797   : > { %10967 = vmatmul.mubr.msk.f32.gmra.mxu1 %vm1200_vm0, %v4460_v63 }
 0x798   : > { %10969 = vmatprep.mubr.msk.f32.mxu1 %vm1200_vm0, %v4462_v61 }
 0x799   : > { %v5027_v42 = vpop.permute.xlu0 %5026 }
 0x79a   : > { %v4464_v21 = vpop.permute.xlu1 %4463 }
 0x79b   : > { %10970 = vmatmul.mubr.msk.f32.gmra.mxu1 %vm1200_vm0, %v4464_v21 }
 0x79c   : > { %10972 = vmatprep.mubr.msk.f32.mxu1 %vm1200_vm0, %v4466_v57 }
 0x79e   : > { %v4468_v24 = vpop.permute.xlu1 %4467 }
 0x79f   : > { %10973 = vmatmul.mubr.msk.f32.gmra.mxu1 %vm1200_vm0, %v4468_v24 }
 0x7a2   : > { %v5029_v54 = vpop.permute.xlu1 %5028 }
 0x7a3   : > { %10975 = vmatprep.subr.mxu0 %v5029_v54 }
 0x7af   : > { %v10729_v10 = vpop.f32.mrf.mxu0 }
 0x7b0   : > { %v10741_v63 = vpop.f32.mrf.mxu1 }
 0x7b1   : > { %v3438_v49 = vpop.f32.mrf.mxu0 }
 0x7b2   : > { %10783 = vmatprep.mubr.msk.f32.mxu0 %vm1200_vm0, %v3438_v49  ;;  %v3478_v57 = vpop.f32.mrf.mxu1 }
 0x7b3   : > { %v10732_v36 = vpop.f32.mrf.mxu0  ;;  %10784 = vmatmul.mubr.msk.f32.gmra.mxu0 %vm1200_vm0, %v10729_v10 }
 0x7b4   : > { %v10744_v20 = vpop.f32.mrf.mxu1 }
 0x7b5   : > { %v3448_v61 = vpop.f32.mrf.mxu0 }
 0x7b6   : > { %10786 = vmatprep.mubr.msk.f32.mxu0 %vm1200_vm0, %v3448_v61  ;;  %v3488_v10 = vpop.f32.mrf.mxu1 }
 0x7b7   : > { %v10735_v34 = vpop.f32.mrf.mxu0  ;;  %10787 = vmatmul.mubr.msk.f32.gmra.mxu0 %vm1200_vm0, %v10732_v36 }
 0x7b8   : > { %v10747_v49 = vpop.f32.mrf.mxu1 }
 0x7b9   : > { %v3458_v21 = vpop.f32.mrf.mxu0 }
 0x7ba   : > { %10789 = vmatprep.mubr.msk.f32.mxu0 %vm1200_vm0, %v3458_v21  ;;  %v3498_v36 = vpop.f32.mrf.mxu1 }
 0x7bb   : > { %v10738_v24 = vpop.f32.mrf.mxu0  ;;  %10790 = vmatmul.mubr.msk.f32.gmra.mxu0 %vm1200_vm0, %v10735_v34 }
 0x7bd   : > { %v3468_v6 = vpop.f32.mrf.mxu0 }
 0x7be   : > { %10792 = vmatprep.mubr.msk.f32.mxu0 %vm1200_vm0, %v3468_v6 }
 0x7bf   : > { %10793 = vmatmul.mubr.msk.f32.gmra.mxu0 %vm1200_vm0, %v10738_v24  ;;  %v10761_v34 = vpop.f32.mrf.mxu0 }
 0x7c0   : > { %10795 = vmatprep.mubr.msk.f32.mxu0 %vm1200_vm0, %v3478_v57 }
 0x7c1   : > { %v15260_v61 = vpop.f32.mrf.mxu0 }
 0x7c2   : > { %18520 = vst [vmem:[#allocation128_spill] sm:$0xff] %v15260_v61 }
 0x7c3   : > { %10796 = vmatmul.mubr.msk.f32.gmra.mxu0 %vm1200_vm0, %v10741_v63  ;;  %v10764_v6 = vpop.f32.mrf.mxu0 }
 0x7c4   : > { %10798 = vmatprep.mubr.msk.f32.mxu0 %vm1200_vm0, %v3488_v10 }
 0x7c5   : > { %v15262_v21 = vpop.f32.mrf.mxu0 }
 0x7c6   : > { %18521 = vst [vmem:[#allocation125_spill] sm:$0xff] %v15262_v21 }
 0x7c7   : > { %10799 = vmatmul.mubr.msk.f32.gmra.mxu0 %vm1200_vm0, %v10744_v20  ;;  %v10767_v57 = vpop.f32.mrf.mxu0  ;;  %v5025_v20 = vpop.permute.xlu1 %5024 }
 0x7c8   : > { %10801 = vmatprep.mubr.msk.f32.mxu0 %vm1200_vm0, %v3498_v36 }
 0x7c9   : > { %v15264_v24 = vpop.f32.mrf.mxu0 }
 0x7ca   : > { %18522 = vst [vmem:[#allocation127_spill] sm:$0xff] %v15264_v24  ;;  %v5023_v24 = vpop.permute.xlu0 %5022 }
 0x7cb   : > { %10802 = vmatmul.mubr.msk.f32.gmra.mxu0 %vm1200_vm0, %v10747_v49  ;;  %v10770_v63 = vpop.f32.mrf.mxu0 }
 0x7cd   : > { %v15268_v49 = vpop.f32.mrf.mxu0 }
 0x7ce   : > { %18523 = vst [vmem:[#allocation130_spill] sm:$0xff] %v15268_v49  ;;  %v12220_v49 = vld [vmem:[%s12856_s25 + $0xa0] sm:$0xff] }
 0x7cf   : > { %v10773_v61 = vpop.f32.mrf.mxu0 }
 0x7ec   : > { %v10750_v29 = vpop.f32.mrf.mxu1 }
 0x7ee   : > { %v3508_v10 = vpop.f32.mrf.mxu1 }
 0x7ef   : > { %10804 = vmatprep.mubr.msk.f32.mxu0 %vm1200_vm0, %v3508_v10 }
 0x7f0   : > { %10805 = vmatmul.mubr.msk.f32.gmra.mxu0 %vm1200_vm0, %v10750_v29  ;;  %v10817_v36 = vpop.f32.mrf.mxu1  ;;  %v5021_v29 = vpop.permute.xlu1 %5020 }
 0x7f1   : > { %v15270_v35 = vadd.f32 %v10817_v36, %v10761_v34  ;;  %10895 = vmatprep.mubr.msk.f32.mxu0 %vm1200_vm0, %v15133_v27  ;;  %v15286_v27 = vpop.f32.mrf.mxu0 }
 0x7f2   : > { %v15274_v21 = vpop.f32.mrf.mxu1  ;;  %18528 = vst [vmem:[#allocation138_spill] sm:$0xff] %v15286_v27  ;;  %v12218_v27 = vld [vmem:[%s12856_s25 + $0x90] sm:$0xff] }
 0x7f3   : > { %18524 = vst [vmem:[#allocation131_spill] sm:$0xff] %v15270_v35  ;;  %18525 = vst [vmem:[#allocation134_spill] sm:$0xff] %v15274_v21  ;;  %v12223_v21 = vld [vmem:[%s12856_s25 + $0xc8] sm:$0xff] }
 0x7f4   : > { %10896 = vmatmul.mubr.msk.f32.vlgmr.msra.gmra.mxu0 %vm1200_vm0, %v15153_v15 }
 0x7f5   : > { %v10820_v51 = vpop.f32.mrf.mxu1  ;;  %10976 = vmatpush3.msra.mxu0 %v5029_v54  ;;  %10898 = vmatprep.mubr.msk.f32.mxu0 %vm1200_vm0, %v15165_v9  ;;  %v5019_v54 = vpop.permute.xlu0 %5018 }
 0x7f6   : > { %v15280_v10 = vadd.f32 %v10820_v51, %v10764_v6  ;;  %10977 = vmatprep.subr.mxu0 %v5027_v42  ;;  %v5017_v6 = vpop.permute.xlu1 %5016 }
 0x7f7   : > { %v15282_v34 = vpop.f32.mrf.mxu1  ;;  %10978 = vmatpush3.msra.mxu0 %v5027_v42  ;;  %v10776_v42 = vpop.f32.mrf.mxu0 }
 0x7f8   : > { %18526 = vst [vmem:[#allocation135_spill] sm:$0xff] %v15280_v10  ;;  %18527 = vst [vmem:[#allocation83_spill] sm:$0xff] %v15282_v34  ;;  %10979 = vmatprep.subr.mxu0 %v5025_v20  ;;  %10899 = vmatmul.mubr.msk.f32.gmra.mxu0 %vm1200_vm0, %v15151_v62  ;;  %v12222_v34 = vld [vmem:[%s12856_s25 + $0xb0] sm:$0xff] }
 0x7f9   : > { %v10823_v15 = vpop.f32.mrf.mxu1  ;;  %10980 = vmatpush3.msra.mxu0 %v5025_v20  ;;  %10901 = vmatprep.mubr.msk.f32.mxu0 %vm1200_vm0, %v15163_v28 }
 0x7fa   : > { %v15290_v9 = vadd.f32 %v10823_v15, %v10767_v57  ;;  %10981 = vmatprep.subr.mxu0 %v5023_v24  ;;  %v5015_v57 = vpop.permute.xlu0 %5014 }
 0x7fb   : > { %v15292_v51 = vpop.f32.mrf.mxu1  ;;  %10982 = vmatpush3.msra.mxu0 %v5023_v24  ;;  %v15304_v24 = vpop.f32.mrf.mxu0 }
 0x7fc   : > { %18529 = vst [vmem:[#allocation86_spill] sm:$0xff] %v15290_v9  ;;  %18530 = vst [vmem:[#allocation142_spill] sm:$0xff] %v15292_v51  ;;  %10983 = vmatprep.subr.mxu0 %v5021_v29  ;;  %10902 = vmatmul.mubr.msk.f32.gmra.mxu0 %vm1200_vm0, %v15183_v45  ;;  %v12221_v51 = vld [vmem:[%s12856_s25 + $0xb8] sm:$0xff] }
 0x7fd   : > { %v10826_v62 = vpop.f32.mrf.mxu1  ;;  %10984 = vmatpush3.msra.mxu0 %v5021_v29  ;;  %10904 = vmatprep.mubr.msk.f32.mxu0 %vm1200_vm0, %v15192_v14  ;;  %18533 = vst [vmem:[#allocation149_spill] sm:$0xff] %v15304_v24  ;;  %v5013_v14 = vpop.permute.xlu1 %5012 }
 0x7fe   : > { %v15298_v20 = vadd.f32 %v10826_v62, %v10770_v63  ;;  %10985 = vmatprep.subr.mxu0 %v5019_v54  ;;  %v10779_v29 = vpop.f32.mrf.mxu0 }
 0x7ff   : > { %v15300_v28 = vpop.f32.mrf.mxu1  ;;  %10986 = vmatpush3.msra.mxu0 %v5019_v54 }
 0x800   : > { %18531 = vst [vmem:[#allocation147_spill] sm:$0xff] %v15298_v20  ;;  %18532 = vst [vmem:[#allocation145_spill] sm:$0xff] %v15300_v28  ;;  %10987 = vmatprep.subr.mxu0 %v5017_v6  ;;  %10905 = vmatmul.mubr.msk.f32.gmra.mxu0 %vm1200_vm0, %v15181_v55 }
 0x801   : > { %v10829_v45 = vpop.f32.mrf.mxu1  ;;  %10988 = vmatpush3.msra.mxu0 %v5017_v6  ;;  %10907 = vmatprep.mubr.msk.f32.mxu0 %vm1200_vm0, %v15190_v7 }
 0x802   : > { %v15308_v36 = vadd.f32 %v10829_v45, %v10773_v61  ;;  %10989 = vmatprep.subr.mxu0 %v5015_v57  ;;  %v15322_v61 = vpop.f32.mrf.mxu0 }
 0x803   : > { %v15310_v63 = vpop.f32.mrf.mxu1  ;;  %10990 = vmatpush3.msra.mxu0 %v5015_v57  ;;  %18538 = vst [vmem:[#allocation163_spill] sm:$0xff] %v15322_v61 }
 0x804   : > { %18534 = vst [vmem:[#allocation150_spill] sm:$0xff] %v15308_v36  ;;  %18535 = vst [vmem:[#allocation151_spill] sm:$0xff] %v15310_v63  ;;  %10991 = vmatprep.subr.mxu0 %v5013_v14  ;;  %10908 = vmatmul.mubr.msk.f32.gmra.mxu0 %vm1200_vm0, %v15207_v2  ;;  %v12217_v63 = vld [vmem:[%s12856_s25 + $0x98] sm:$0xff] }
 0x805   : > { %v10832_v55 = vpop.f32.mrf.mxu1  ;;  %10992 = vmatpush3.msra.mxu0 %v5013_v14  ;;  %10910 = vmatprep.mubr.msk.f32.mxu0 %vm1200_vm0, %v15216_v13  ;;  %v10782_v13 = vpop.f32.mrf.mxu0 }
 0x806   : > { %v15316_v15 = vadd.f32 %v10832_v55, %v10776_v42 }
 0x807   : > { %v15318_v7 = vpop.f32.mrf.mxu1 }
 0x808   : > { %18536 = vst [vmem:[#allocation154_spill] sm:$0xff] %v15316_v15  ;;  %18537 = vst [vmem:[#allocation157_spill] sm:$0xff] %v15318_v7  ;;  %10911 = vmatmul.mubr.msk.f32.gmra.mxu0 %vm1200_vm0, %v15205_v18 }
 0x809   : > { %v10835_v54 = vpop.f32.mrf.mxu1  ;;  %10913 = vmatprep.mubr.msk.f32.mxu0 %vm1200_vm0, %v15214_v4 }
 0x80a   : > { %v15326_v2 = vadd.f32 %v10835_v54, %v10779_v29 }
 0x80b   : > { %v15328_v6 = vpop.f32.mrf.mxu1 }
 0x80c   : > { %18539 = vst [vmem:[#allocation156_spill] sm:$0xff] %v15326_v2  ;;  %18540 = vst [vmem:[#allocation158_spill] sm:$0xff] %v15328_v6  ;;  %10914 = vmatmul.mubr.msk.f32.gmra.mxu0 %vm1200_vm0, %v15223_v52 }
 0x80d   : > { %v10838_v42 = vpop.f32.mrf.mxu1  ;;  %10916 = vmatprep.mubr.msk.f32.mxu0 %vm1200_vm0, %v15226_v38 }
 0x80e   : > { %v15334_v62 = vadd.f32 %v10838_v42, %v10782_v13 }
 0x80f   : > { %v15336_v18 = vpop.f32.mrf.mxu1 }
 0x810   : > { %18541 = vst [vmem:[#allocation160_spill] sm:$0xff] %v15334_v62  ;;  %18542 = vst [vmem:[#allocation159_spill] sm:$0xff] %v15336_v18  ;;  %10917 = vmatmul.mubr.msk.f32.gmra.mxu0 %vm1200_vm0, %v15221_v12 }
 0x811   : > { %v15340_v4 = vpop.f32.mrf.mxu1 }
 0x812   : > { %18543 = vst [vmem:[#allocation162_spill] sm:$0xff] %v15340_v4 }
 0x813   : > { %v15342_v57 = vpop.f32.mrf.mxu1 }
 0x814   : > { %18544 = vst [vmem:[#allocation161_spill] sm:$0xff] %v15342_v57 }
 0x815   : > { %v15344_v45 = vpop.f32.mrf.mxu1 }
 0x816   : > { %18545 = vst [vmem:[#allocation164_spill] sm:$0xff] %v15344_v45 }
 0x817   : > { %v15346_v52 = vpop.f32.mrf.mxu1 }
 0x818   : > { %18546 = vst [vmem:[#allocation112_spill] sm:$0xff] %v15346_v52 }
 0x819   : > { %v15348_v14 = vpop.f32.mrf.mxu1 }
 0x81a   : > { %18547 = vst [vmem:[#allocation115_spill] sm:$0xff] %v15348_v14 }
 0x81b   : > { %v15350_v38 = vpop.f32.mrf.mxu1 }
 0x81c   : > { %18548 = vst [vmem:[#allocation108_spill] sm:$0xff] %v15350_v38 }
 0x81d   : > { %v15352_v29 = vpop.f32.mrf.mxu1 }
 0x81e   : > { %18549 = vst [vmem:[#allocation113_spill] sm:$0xff] %v15352_v29 }
 0x81f   : > { %v15354_v55 = vpop.f32.mrf.mxu1 }
 0x820   : > { %18550 = vst [vmem:[#allocation155_spill] sm:$0xff] %v15354_v55  ;;  %v12215_v55 = vld [vmem:[%s12856_s25 + $0x88] sm:$0xff] }
 0x821   : > { %v15356_v54 = vpop.f32.mrf.mxu1 }
 0x822   : > { %18551 = vst [vmem:[#allocation110_spill] sm:$0xff] %v15356_v54  ;;  %v12227_v54 = vld [vmem:[%s12856_s25 + $0xe8] sm:$0xff] }
 0x823   : > { %v15358_v12 = vpop.f32.mrf.mxu1 }
 0x824   : > { %18552 = vst [vmem:[#allocation152_spill] sm:$0xff] %v15358_v12  ;;  %v12216_v12 = vld [vmem:[%s12856_s25 + $0x80] sm:$0xff] }
 0x825   : > { %v15360_v13 = vpop.f32.mrf.mxu1 }
 0x826   : > { %18553 = vst [vmem:[#allocation153_spill] sm:$0xff] %v15360_v13  ;;  %v12226_v13 = vld [vmem:[%s12856_s25 + $0xd0] sm:$0xff] }
 0x827   : > { %v15362_v42 = vpop.f32.mrf.mxu1 }
 0x828   : > { %18554 = vst [vmem:[#allocation146_spill] sm:$0xff] %v15362_v42 }
 0x829   : > { %v15364_v57 = vpop.f32.mrf.mxu1 }
 0x82a   : > { %18555 = vst [vmem:[#allocation148_spill] sm:$0xff] %v15364_v57  ;;  %v12225_v57 = vld [vmem:[%s12856_s25 + $0xd8] sm:$0xff] }
 0x82b   : > { %v15366_v52 = vpop.f32.mrf.mxu1 }
 0x82c   : > { %18556 = vst [vmem:[#allocation143_spill] sm:$0xff] %v15366_v52 }
 0x82d   : > { %v15368_v18 = vpop.f32.mrf.mxu1 }
 0x82e   : > { %18557 = vst [vmem:[#allocation144_spill] sm:$0xff] %v15368_v18  ;;  %v12224_v18 = vld [vmem:[%s12856_s25 + $0xc0] sm:$0xff] }
 0x82f   : > { %v15370_v38 = vpop.f32.mrf.mxu1 }
 0x830   : > { %18558 = vst [vmem:[#allocation126_spill] sm:$0xff] %v15370_v38 }
 0x843   : > { %v10953_v6 = vpop.f32.mrf.mxu1 }
 0x844   : > { %v15373_v61 = vadd.f32 %v12215_v55, %v10953_v6  ;;  %v12219_v55 = vld [vmem:[%s12856_s25 + $0xa8] sm:$0xff] }
 0x845   : > { %v4631_v7 = vpop.f32.mrf.mxu1 }
 0x846   : > { %v15376_v24 = vadd.f32 %v12216_v12, %v4631_v7  ;;  %4744 = vmax.xlane.f32.xlu0 %v15373_v61 }
 0x847   : > { %v10956_v42 = vpop.f32.mrf.mxu1 }
 0x848   : > { %v15380_v52 = vadd.f32 %v12217_v63, %v10956_v42  ;;  %4742 = vmax.xlane.f32.xlu1 %v15376_v24 }
 0x849   : > { %v4641_v38 = vpop.f32.mrf.mxu1 }
 0x84a   : > { %v15384_v28 = vadd.f32 %v12218_v27, %v4641_v38  ;;  %4748 = vmax.xlane.f32.xlu0 %v15380_v52 }
 0x84b   : > { %v10959_v6 = vpop.f32.mrf.mxu1 }
 0x84c   : > { %v15388_v7 = vadd.f32 %v12219_v55, %v10959_v6  ;;  %4746 = vmax.xlane.f32.xlu1 %v15384_v28 }
 0x84d   : > { %v4651_v12 = vpop.f32.mrf.mxu1 }
 0x84e   : > { %v15392_v63 = vadd.f32 %v12220_v49, %v4651_v12  ;;  %4752 = vmax.xlane.f32.xlu0 %v15388_v7 }
 0x84f   : > { %v10962_v42 = vpop.f32.mrf.mxu1 }
 0x850   : > { %v15396_v27 = vadd.f32 %v12221_v51, %v10962_v42  ;;  %4750 = vmax.xlane.f32.xlu1 %v15392_v63 }
 0x851   : > { %v4661_v38 = vpop.f32.mrf.mxu1 }
 0x852   : > { %v15400_v6 = vadd.f32 %v12222_v34, %v4661_v38  ;;  %4756 = vmax.xlane.f32.xlu0 %v15396_v27 }
 0x853   : > { %v10965_v55 = vpop.f32.mrf.mxu1 }
 0x854   : > { %v15404_v49 = vadd.f32 %v12223_v21, %v10965_v55  ;;  %4754 = vmax.xlane.f32.xlu1 %v15400_v6 }
 0x855   : > { %v4671_v12 = vpop.f32.mrf.mxu1 }
 0x856   : > { %v15408_v51 = vadd.f32 %v12224_v18, %v4671_v12  ;;  %4760 = vmax.xlane.f32.xlu0 %v15404_v49  ;;  %v12228_v12 = vld [vmem:[%s12856_s25 + $0xe0] sm:$0xff] }
 0x857   : > { %v10968_v42 = vpop.f32.mrf.mxu1 }
 0x858   : > { %v15412_v34 = vadd.f32 %v12225_v57, %v10968_v42  ;;  %4758 = vmax.xlane.f32.xlu1 %v15408_v51  ;;  %v12229_v42 = vld [vmem:[%s12856_s25 + $0xf8] sm:$0xff] }
 0x859   : > { %v4681_v38 = vpop.f32.mrf.mxu1 }
 0x85a   : > { %v15416_v21 = vadd.f32 %v12226_v13, %v4681_v38  ;;  %4764 = vmax.xlane.f32.xlu0 %v15412_v34  ;;  %v15434_v13 = vpop.f32.mrf.mxu0  ;;  %v18564_v38 = vld [vmem:[#allocation102_spill] sm:$0xff] }
 0x85b   : > { %v10971_v55 = vpop.f32.mrf.mxu1  ;;  %18563 = vst [vmem:[#allocation133_spill] sm:$0xff] %v15434_v13 }
 0x85c   : > { %v15420_v29 = vadd.f32 %v12227_v54, %v10971_v55  ;;  %4762 = vmax.xlane.f32.xlu1 %v15416_v21  ;;  %v18562_v54 = vld [vmem:[#allocation104_spill] sm:$0xff] }
 0x85d   : > { %v4691_v18 = vpop.f32.mrf.mxu1 }
 0x85e   : > { %18559 = vst [vmem:[#allocation141_spill] sm:$0xff] %v15420_v29  ;;  %v15424_v14 = vadd.f32 %v12228_v12, %v4691_v18  ;;  %4768 = vmax.xlane.f32.xlu0 %v15420_v29  ;;  %v18566_v18 = vld [vmem:[#allocation105_spill] sm:$0xff] }
 0x85f   : > { %v10974_v57 = vpop.f32.mrf.mxu1 }
 0x860   : > { %18560 = vst [vmem:[#allocation137_spill] sm:$0xff] %v15424_v14  ;;  %v15428_v45 = vadd.f32 %v12229_v42, %v10974_v57  ;;  %4766 = vmax.xlane.f32.xlu1 %v15424_v14 }
 0x861   : > { %v4701_v13 = vpop.f32.mrf.mxu1 }
 0x862   : > { %18561 = vst [vmem:[#allocation139_spill] sm:$0xff] %v15428_v45  ;;  %4772 = vmax.xlane.f32.xlu0 %v15428_v45 }
 0x871   : > { %5008 = vrot.lane.b32.xlu1 %v18562_v54, %s12567_s23 }
 0x873   : > { %v15438_v55 = vpop.f32.mrf.mxu0 }
 0x874   : > { %18565 = vst [vmem:[#allocation136_spill] sm:$0xff] %v15438_v55 }
 0x875   : > { %v15442_v12 = vpop.f32.mrf.mxu0 }
 0x876   : > { %18567 = vst [vmem:[#allocation129_spill] sm:$0xff] %v15442_v12 }
 0x877   : > { %v15444_v57 = vpop.f32.mrf.mxu0 }
 0x878   : > { %5010 = vrot.lane.b32.xlu0 %v18564_v38, %s12567_s23  ;;  %18568 = vst [vmem:[#allocation132_spill] sm:$0xff] %v15444_v57  ;;  %v12230_v38 = vld [vmem:[%s12856_s25 + $0xf0] sm:$0xff] }
 0x879   : > { %v15446_v42 = vpop.f32.mrf.mxu0  ;;  %v15455_v55 = vadd.f32 %v12230_v38, %v4701_v13 }
 0x87a   : > { %18569 = vst [vmem:[#allocation165_spill] sm:$0xff] %v15446_v42 }
 0x87b   : > { %v15448_v4 = vpop.f32.mrf.mxu0  ;;  %18573 = vst [vmem:[#allocation169_spill] sm:$0xff] %v15455_v55 }
 0x87c   : > { %5006 = vrot.lane.b32.xlu0 %v18566_v18, %s12567_s23  ;;  %18570 = vst [vmem:[#allocation166_spill] sm:$0xff] %v15448_v4 }
 0x87d   : > { %v15450_v8 = vpop.f32.mrf.mxu0 }
 0x87e   : > { %18571 = vst [vmem:[#allocation167_spill] sm:$0xff] %v15450_v8 }
 0x87f   : > { %v15452_v54 = vpop.f32.mrf.mxu0 }
 0x880   : > { %18572 = vst [vmem:[#allocation168_spill] sm:$0xff] %v15452_v54 }
 0x881   : > { %v15458_v18 = vpop.f32.mrf.mxu0 }
 0x882   : > { %18574 = vst [vmem:[#allocation170_spill] sm:$0xff] %v15458_v18  ;;  %v12231_v18 = vld [vmem:[%s12856_s25 + $0x8] sm:$0xff] }
 0x883   : > { %v15460_v12 = vpop.f32.mrf.mxu0 }
 0x884   : > { %18575 = vst [vmem:[#allocation171_spill] sm:$0xff] %v15460_v12 }
 0x885   : > { %v15462_v57 = vpop.f32.mrf.mxu0 }
 0x886   : > { %18576 = vst [vmem:[#allocation172_spill] sm:$0xff] %v15462_v57 }
 0x887   : > { %v15464_v42 = vpop.f32.mrf.mxu0 }
 0x888   : > { %18577 = vst [vmem:[#allocation173_spill] sm:$0xff] %v15464_v42 }
 0x889   : > { %v15466_v8 = vpop.f32.mrf.mxu0 }
 0x88a   : > { %18578 = vst [vmem:[#allocation174_spill] sm:$0xff] %v15466_v8 }
 0x88b   : > { %v15468_v4 = vpop.f32.mrf.mxu0 }
 0x88c   : > { %18579 = vst [vmem:[#allocation175_spill] sm:$0xff] %v15468_v4 }
 0x88d   : > { %v15470_v54 = vpop.f32.mrf.mxu0 }
 0x88e   : > { %18580 = vst [vmem:[#allocation176_spill] sm:$0xff] %v15470_v54 }
 0x895   : > { %4770 = vmax.xlane.f32.xlu1 %v15455_v55 }
 0x8b0   : > { %v15472_v17 = vpop.f32.mrf.mxu0 }
 0x8b1   : > { %18581 = vst [vmem:[#allocation177_spill] sm:$0xff] %v15472_v17  ;;  %v12233_v17 = vld [vmem:[%s12856_s25 + $0x18] sm:$0xff] }
 0x8b2   : > { %v15474_v13 = vpop.f32.mrf.mxu0 }
 0x8b3   : > { %18582 = vst [vmem:[#allocation178_spill] sm:$0xff] %v15474_v13 }
 0x8b4   : > { %v10897_v38 = vpop.f32.mrf.mxu0 }
 0x8b5   : > { %v15477_v12 = vadd.f32 %v12231_v18, %v10897_v38  ;;  %v12234_v38 = vld [vmem:[%s12856_s25 + $0x10] sm:$0xff] }
 0x8b6   : > { %v4358_v57 = vpop.f32.mrf.mxu0 }
 0x8b7   : > { %v15480_v42 = vadd.f32 %v12232_v22, %v4358_v57  ;;  %4712 = vmax.xlane.f32.xlu1 %v15477_v12  ;;  %v12235_v22 = vld [vmem:[%s12856_s25 + $0x20] sm:$0xff] }
 0x8b8   : > { %v10900_v8 = vpop.f32.mrf.mxu0 }
 0x8b9   : > { %4710 = vmax.xlane.f32.xlu0 %v15480_v42  ;;  %v15485_v13 = vadd.f32 %v12233_v17, %v10900_v8  ;;  %v12236_v17 = vld [vmem:[%s12856_s25 + $0x28] sm:$0xff] }
 0x8ba   : > { %v4368_v54 = vpop.f32.mrf.mxu0 }
 0x8bb   : > { %v15489_v62 = vadd.f32 %v12234_v38, %v4368_v54  ;;  %v12238_v38 = vld [vmem:[%s12856_s25 + $0x38] sm:$0xff] }
 0x8bc   : > { %v10903_v4 = vpop.f32.mrf.mxu0 }
 0x8bd   : > { %4716 = vmax.xlane.f32.xlu0 %v15485_v13  ;;  %v15497_v8 = vadd.f32 %v12236_v17, %v10903_v4 }
 0x8be   : > { %v4378_v18 = vpop.f32.mrf.mxu0 }
 0x8bf   : > { %v15492_v57 = vadd.f32 %v12235_v22, %v4378_v18 }
 0x8c0   : > { %v10906_v5 = vpop.f32.mrf.mxu0 }
 0x8c1   : > { %4714 = vmax.xlane.f32.xlu0 %v15489_v62  ;;  %4718 = vmax.xlane.f32.xlu1 %v15492_v57  ;;  %v15505_v22 = vadd.f32 %v12238_v38, %v10906_v5  ;;  %v12242_v5 = vld [vmem:[%s12856_s25 + $0x58] sm:$0xff] }
 0x8c2   : > { %v4388_v43 = vpop.f32.mrf.mxu0 }
 0x8c3   : > { %v15500_v3 = vadd.f32 %v12237_v31, %v4388_v43  ;;  %v12240_v43 = vld [vmem:[%s12856_s25 + $0x48] sm:$0xff] }
 0x8c4   : > { %v10909_v54 = vpop.f32.mrf.mxu0 }
 0x8c5   : > { %4720 = vmax.xlane.f32.xlu0 %v15497_v8  ;;  %4722 = vmax.xlane.f32.xlu1 %v15500_v3  ;;  %v15513_v17 = vadd.f32 %v12240_v43, %v10909_v54 }
 0x8c6   : > { %v4398_v18 = vpop.f32.mrf.mxu0 }
 0x8c7   : > { %v15508_v16 = vadd.f32 %v12239_v41, %v4398_v18 }
 0x8c8   : > { %v10912_v4 = vpop.f32.mrf.mxu0 }
 0x8c9   : > { %4724 = vmax.xlane.f32.xlu0 %v15505_v22  ;;  %4726 = vmax.xlane.f32.xlu1 %v15508_v16  ;;  %v15521_v18 = vadd.f32 %v12242_v5, %v10912_v4  ;;  %v12245_v4 = vld [vmem:[%s12856_s25 + $0x70] sm:$0xff] }
 0x8ca   : > { %v4408_v31 = vpop.f32.mrf.mxu0 }
 0x8cb   : > { %v15516_v59 = vadd.f32 %v12241_v1, %v4408_v31  ;;  %v12244_v31 = vld [vmem:[%s12856_s25 + $0x68] sm:$0xff] }
 0x8cc   : > { %v10915_v19 = vpop.f32.mrf.mxu0 }
 0x8cd   : > { %4728 = vmax.xlane.f32.xlu0 %v15513_v17  ;;  %4730 = vmax.xlane.f32.xlu1 %v15516_v59  ;;  %v15533_v23 = vadd.f32 %v12244_v31, %v10915_v19 }
 0x8ce   : > { %v4418_v41 = vpop.f32.mrf.mxu0 }
 0x8cf   : > { %v15523_v38 = vpop.xlane.xlu0 %4744  ;;  %v15526_v54 = vadd.f32 %v12243_v33, %v4418_v41  ;;  %v12246_v33 = vld [vmem:[%s12856_s25 + $0x78] sm:$0xff] }
 0x8d0   : > { %v10918_v43 = vpop.f32.mrf.mxu0 }
 0x8d1   : > { %v15528_v30 = vpop.xlane.xlu1 %4742  ;;  %4732 = vmax.xlane.f32.xlu0 %v15521_v18  ;;  %4734 = vmax.xlane.f32.xlu1 %v15526_v54  ;;  %v15545_v41 = vadd.f32 %v12246_v33, %v10918_v43 }
 0x8d2   : > { %v4428_v1 = vpop.f32.mrf.mxu0  ;;  %v4790_v58 = vsub.f32 %v15376_v24, %v15528_v30  ;;  %v18593_v30 = vld [vmem:[#allocation140_spill] sm:$0xff] }
 0x8d3   : > { %v15535_v46 = vpop.xlane.xlu0 %4748  ;;  %v15538_v5 = vadd.f32 %v12245_v4, %v4428_v1 }
 0x8d4   : > { %v4838_v29 = vmul.f32 1.442695, %v4790_v58  ;;  %v18594_v58 = vld [vmem:[#allocation122_spill] sm:$0xff]  ;;  %v4793_v24 = vsub.f32 %v15380_v52, %v15535_v46 }
 0x8d5   : > { %v15540_v2 = vpop.xlane.xlu1 %4746  ;;  %4736 = vmax.xlane.f32.xlu0 %v15533_v23  ;;  %4738 = vmax.xlane.f32.xlu1 %v15538_v5 }
 0x8d7   : > { %v15547_v15 = vpop.xlane.xlu0 %4752 }
 0x8d9   : > { %v15549_v36 = vpop.xlane.xlu1 %4750  ;;  %4740 = vmax.xlane.f32.xlu0 %v15545_v41 }
 0x8db   : > { %v15552_v19 = vpop.xlane.xlu0 %4756 }
 0x8dd   : > { %v15554_v31 = vpop.xlane.xlu1 %4754 }
 0x8df   : > { %v15556_v1 = vpop.xlane.xlu0 %4760 }
 0x8e1   : > { %v15558_v4 = vpop.xlane.xlu1 %4758 }
 0x8e3   : > { %v15560_v20 = vpop.xlane.xlu0 %4764 }
 0x8e5   : > { %v15562_v9 = vpop.xlane.xlu1 %4762 }
 0x8e7   : > { %v15564_v43 = vpop.xlane.xlu0 %4768 }
 0x8e8   : > { %18583 = vst [vmem:[#allocation179_spill] sm:$0xff] %v15564_v43 }
 0x8e9   : > { %v15566_v33 = vpop.xlane.xlu1 %4766 }
 0x8ea   : > { %18584 = vst [vmem:[#allocation180_spill] sm:$0xff] %v15566_v33 }
 0x8eb   : > { %v15568_v10 = vpop.xlane.xlu0 %4772 }
 0x8ec   : > { %18585 = vst [vmem:[#allocation181_spill] sm:$0xff] %v15568_v10 }
 0x8ed   : > { %v5009_v37 = vpop.permute.xlu1 %5008 }
 0x8ef   : > { %v5011_v35 = vpop.permute.xlu0 %5010 }
 0x8f0   : > { %10993 = vmatprep.subr.mxu0 %v5011_v35 }
 0x8f1   : > { %10994 = vmatpush3.msra.mxu0 %v5011_v35 }
 0x8f2   : > { %10995 = vmatprep.subr.mxu0 %v5009_v37 }
 0x8f3   : > { %10996 = vmatpush3.msra.mxu0 %v5009_v37  ;;  %v5007_v0 = vpop.permute.xlu0 %5006 }
 0x8f4   : > { %10997 = vmatprep.subr.mxu0 %v5007_v0 }
 0x8f5   : > { %10998 = vmatpush3.msra.mxu0 %v5007_v0 }
 0x91e   : > { %v15570_v11 = vpop.xlane.xlu1 %4770 }
 0x91f   : > { %18586 = vst [vmem:[#allocation182_spill] sm:$0xff] %v15570_v11 }
 0x940   : > { %v4713_v32 = vpop.xlane.xlu1 %4712 }
 0x941   : > { %v4775_v53 = vsub.f32 %v15477_v12, %v4713_v32 }
 0x942   : > { %v4711_v26 = vpop.xlane.xlu0 %4710 }
 0x943   : > { %v4808_v25 = vmul.f32 1.442695, %v4775_v53  ;;  %v4774_v50 = vsub.f32 %v15480_v42, %v4711_v26 }
 0x945   : > { %11815 = vpow2.f32 %v4808_v25  ;;  %v4806_v48 = vmul.f32 1.442695, %v4774_v50 }
 0x946   : > { %v4717_v55 = vpop.xlane.xlu0 %4716 }
 0x947   : > { %11817 = vpow2.f32 %v4806_v48  ;;  %v4777_v35 = vsub.f32 %v15485_v13, %v4717_v55 }
 0x949   : > { %v4812_v45 = vmul.f32 1.442695, %v4777_v35 }
 0x94a   : > { %v4719_v37 = vpop.xlane.xlu1 %4718  ;;  %v4715_v10 = vpop.xlane.xlu0 %4714 }
 0x94b   : > { %11819 = vpow2.f32 %v4812_v45  ;;  %v4778_v0 = vsub.f32 %v15492_v57, %v4719_v37  ;;  %v4776_v11 = vsub.f32 %v15489_v62, %v4715_v10 }
 0x94d   : > { %v4810_v39 = vmul.f32 1.442695, %v4776_v11  ;;  %v4814_v53 = vmul.f32 1.442695, %v4778_v0 }
 0x94e   : > { %v4723_v32 = vpop.xlane.xlu1 %4722  ;;  %v4721_v12 = vpop.xlane.xlu0 %4720 }
 0x94f   : > { %v4780_v26 = vsub.f32 %v15500_v3, %v4723_v32  ;;  %v4779_v50 = vsub.f32 %v15497_v8, %v4721_v12  ;;  %11821 = vpow2.f32 %v4810_v39 }
 0x950   : > { %11823 = vpow2.f32 %v4814_v53 }
 0x951   : > { %v4816_v48 = vmul.f32 1.442695, %v4779_v50  ;;  %v4818_v45 = vmul.f32 1.442695, %v4780_v26 }
 0x952   : > { %v15579_v25 = vpop.eup %11815  ;;  %v4727_v55 = vpop.xlane.xlu1 %4726 }
 0x953   : > { %v4725_v42 = vpop.xlane.xlu0 %4724  ;;  %v4782_v13 = vsub.f32 %v15508_v16, %v4727_v55  ;;  %4872 = vadd.xlane.f32.xlu0 %v15579_v25  ;;  %11825 = vpow2.f32 %v4816_v48 }
 0x954   : > { %v4781_v10 = vsub.f32 %v15505_v22, %v4725_v42  ;;  %v15584_v11 = vpop.eup %11817  ;;  %11827 = vpow2.f32 %v4818_v45  ;;  %v18587_v45 = vld [vmem:[#allocation106_spill] sm:$0xff] }
 0x955   : > { %4870 = vadd.xlane.f32.xlu1 %v15584_v11  ;;  %v4822_v57 = vmul.f32 1.442695, %v4782_v13  ;;  %v18588_v13 = vld [vmem:[#allocation107_spill] sm:$0xff] }
 0x956   : > { %v4820_v3 = vmul.f32 1.442695, %v4781_v10  ;;  %v4731_v39 = vpop.xlane.xlu1 %4730 }
 0x957   : > { %v4729_v62 = vpop.xlane.xlu0 %4728  ;;  %v4784_v8 = vsub.f32 %v15516_v59, %v4731_v39 }
 0x958   : > { %v4783_v35 = vsub.f32 %v15513_v17, %v4729_v62  ;;  %v15589_v37 = vpop.eup %11819  ;;  %11829 = vpow2.f32 %v4820_v3 }
 0x959   : > { %4876 = vadd.xlane.f32.xlu0 %v15589_v37  ;;  %11831 = vpow2.f32 %v4822_v57  ;;  %v4826_v0 = vmul.f32 1.442695, %v4784_v8 }
 0x95a   : > { %v4824_v16 = vmul.f32 1.442695, %v4783_v35  ;;  %v4735_v10 = vpop.xlane.xlu1 %4734 }
 0x95b   : > { %v4733_v22 = vpop.xlane.xlu0 %4732  ;;  %v4786_v39 = vsub.f32 %v15526_v54, %v4735_v10 }
 0x95c   : > { %v4785_v32 = vsub.f32 %v15521_v18, %v4733_v22  ;;  %11833 = vpow2.f32 %v4824_v16  ;;  %v15593_v12 = vpop.eup %11821  ;;  %v18589_v22 = vld [vmem:[#allocation109_spill] sm:$0xff] }
 0x95d   : > { %4874 = vadd.xlane.f32.xlu1 %v15593_v12  ;;  %11835 = vpow2.f32 %v4826_v0  ;;  %v15596_v59 = vpop.eup %11823  ;;  %v4830_v57 = vmul.f32 1.442695, %v4786_v39  ;;  %v18590_v0 = vld [vmem:[#allocation111_spill] sm:$0xff] }
 0x95e   : > { %v4828_v53 = vmul.f32 1.442695, %v4785_v32  ;;  %v4739_v54 = vpop.xlane.xlu1 %4738 }
 0x95f   : > { %v4737_v3 = vpop.xlane.xlu0 %4736  ;;  %v4788_v32 = vsub.f32 %v15538_v5, %v4739_v54  ;;  %v18591_v5 = vld [vmem:[#allocation124_spill] sm:$0xff] }
 0x960   : > { %11837 = vpow2.f32 %v4828_v53  ;;  %v15598_v17 = vpop.eup %11825  ;;  %v4787_v62 = vsub.f32 %v15533_v23, %v4737_v3 }
 0x961   : > { %4878 = vadd.xlane.f32.xlu1 %v15596_v59  ;;  %4880 = vadd.xlane.f32.xlu0 %v15598_v17  ;;  %v15602_v26 = vpop.eup %11827  ;;  %11839 = vpow2.f32 %v4830_v57  ;;  %v4834_v10 = vmul.f32 1.442695, %v4788_v32 }
 0x962   : > { %v4832_v8 = vmul.f32 1.442695, %v4787_v62 }
 0x963   : > { %v4741_v23 = vpop.xlane.xlu0 %4740 }
 0x964   : > { %11841 = vpow2.f32 %v4832_v8  ;;  %v4789_v53 = vsub.f32 %v15545_v41, %v4741_v23 }
 0x965   : > { %v15604_v50 = vpop.eup %11829  ;;  %4882 = vadd.xlane.f32.xlu1 %v15602_v26  ;;  %11843 = vpow2.f32 %v4834_v10 }
 0x966   : > { %4884 = vadd.xlane.f32.xlu0 %v15604_v50  ;;  %v15608_v18 = vpop.eup %11831  ;;  %v4836_v3 = vmul.f32 1.442695, %v4789_v53  ;;  %v18592_v53 = vld [vmem:[#allocation33_spill] sm:$0xff] }
 0x968   : > { %11845 = vpow2.f32 %v4836_v3 }
 0x969   : > { %v15610_v48 = vpop.eup %11833  ;;  %4886 = vadd.xlane.f32.xlu1 %v15608_v18 }
 0x96a   : > { %4888 = vadd.xlane.f32.xlu0 %v15610_v48  ;;  %v15614_v55 = vpop.eup %11835 }
 0x96d   : > { %v15616_v42 = vpop.eup %11837  ;;  %4890 = vadd.xlane.f32.xlu1 %v15614_v55 }
 0x96e   : > { %4892 = vadd.xlane.f32.xlu0 %v15616_v42  ;;  %v15626_v35 = vpop.eup %11839 }
 0x971   : > { %v15628_v16 = vpop.eup %11841 }
 0x972   : > { %v15638_v39 = vpop.eup %11843 }
 0x975   : > { %v15640_v62 = vpop.eup %11845 }
 0x97e   : > { %5004 = vrot.lane.b32.xlu1 %v18587_v45, %s12567_s23 }
 0x984   : > { %5002 = vrot.lane.b32.xlu0 %v18588_v13, %s12567_s23 }
 0x9a2   : > { %4894 = vadd.xlane.f32.xlu1 %v15626_v35 }
 0x9a3   : > { %4896 = vadd.xlane.f32.xlu0 %v15628_v16 }
 0x9b3   : > { %5000 = vrot.lane.b32.xlu1 %v18589_v22, %s12567_s23 }
 0x9b9   : > { %4998 = vrot.lane.b32.xlu0 %v18590_v0, %s12567_s23 }
 0x9d7   : > { %4898 = vadd.xlane.f32.xlu1 %v15638_v39 }
 0x9d8   : > { %4900 = vadd.xlane.f32.xlu0 %v15640_v62 }
 0x9dc   : > { %v4873_v8 = vpop.xlane.xlu0 %4872 }
 0x9de   : > { %v4871_v57 = vpop.xlane.xlu1 %4870 }
 0x9df   : > { %11847 = vrcp.f32 %v4871_v57  ;;  %v4791_v57 = vsub.f32 %v15373_v61, %v15523_v38  ;;  %v4792_v61 = vsub.f32 %v15384_v28, %v15540_v2 }
 0x9e1   : > { %v4840_v33 = vmul.f32 1.442695, %v4791_v57 }
 0x9e2   : > { %v4877_v0 = vpop.xlane.xlu0 %4876 }
 0x9e3   : > { %11849 = vpow2.f32 %v4840_v33  ;;  %v4842_v33 = vmul.f32 1.442695, %v4792_v61 }
 0x9e4   : > { %11851 = vpow2.f32 %v4838_v29  ;;  %v4844_v29 = vmul.f32 1.442695, %v4793_v24 }
 0x9e5   : > { %11853 = vrcp.f32 %v4873_v8 }
 0x9e6   : > { %v4875_v22 = vpop.xlane.xlu1 %4874 }
 0x9e7   : > { %11855 = vrcp.f32 %v4875_v22 }
 0x9e8   : > { %5221 = vrot.lane.b32.xlu1 %v18591_v5, %s12567_s23  ;;  %11857 = vrcp.f32 %v4877_v0 }
 0x9ea   : > { %v4879_v41 = vpop.xlane.xlu1 %4878  ;;  %v4881_v54 = vpop.xlane.xlu0 %4880 }
 0x9eb   : > { %11859 = vrcp.f32 %v4879_v41 }
 0x9ec   : > { %v11848_v23 = vpop.eup %11847  ;;  %11861 = vrcp.f32 %v4881_v54 }
 0x9ed   : > { %v4966_v32 = vmul.f32 %v11848_v23, %v15584_v11 }
 0x9ee   : > { %5219 = vrot.lane.b32.xlu0 %v18592_v53, %s12567_s23  ;;  %v4883_v10 = vpop.xlane.xlu1 %4882 }
 0x9ef   : > { %v4885_v3 = vpop.xlane.xlu0 %4884  ;;  %11007 = vmatprep.mubr.f32.mxu0 %v4966_v32  ;;  %11863 = vrcp.f32 %v4883_v10 }
 0x9f0   : > { %v15653_v23 = vpop.eup %11849  ;;  %11865 = vrcp.f32 %v4885_v3 }
 0x9f1   : > { %v15655_v32 = vpop.eup %11851  ;;  %11867 = vpow2.f32 %v4844_v29 }
 0x9f2   : > { %v4887_v13 = vpop.xlane.xlu1 %4886  ;;  %v11854_v8 = vpop.eup %11853 }
 0x9f3   : > { %v4889_v45 = vpop.xlane.xlu0 %4888  ;;  %11869 = vrcp.f32 %v4887_v13  ;;  %v4967_v46 = vmul.f32 %v11854_v8, %v15579_v25 }
 0x9f4   : > { %11871 = vpow2.f32 %v4842_v33  ;;  %v18595_v33 = vld [vmem:[#allocation123_spill] sm:$0xff] }
 0x9f5   : > { %11873 = vrcp.f32 %v4889_v45 }
 0x9f6   : > { %v4891_v5 = vpop.xlane.xlu1 %4890 }
 0x9f7   : > { %v4893_v14 = vpop.xlane.xlu0 %4892  ;;  %11875 = vrcp.f32 %v4891_v5 }
 0x9f8   : > { %11877 = vrcp.f32 %v4893_v14 }
 0x9fa   : > { %v5005_v43 = vpop.permute.xlu1 %5004 }
 0x9fb   : > { %10999 = vmatprep.subr.mxu0 %v5005_v43  ;;  %v5003_v11 = vpop.permute.xlu0 %5002 }
 0x9fc   : > { %11000 = vmatpush3.msra.mxu0 %v5005_v43 }
 0x9fd   : > { %11001 = vmatprep.subr.mxu0 %v5003_v11 }
 0x9fe   : > { %11002 = vmatpush3.msra.mxu0 %v5003_v11  ;;  %v11856_v11 = vpop.eup %11855 }
 0x9ff   : > { %v11858_v28 = vpop.eup %11857  ;;  %v4968_v2 = vmul.f32 %v11856_v11, %v15593_v12 }
 0xa00   : > { %v11860_v52 = vpop.eup %11859  ;;  %v4969_v0 = vmul.f32 %v11858_v28, %v15589_v37  ;;  %v5387_v28 = vld [vmem:[#allocation8 + $0x50] sm:$0xff] }
 0xa01   : > { %v11862_v13 = vpop.eup %11861  ;;  %v4970_v41 = vmul.f32 %v11860_v52, %v15596_v59  ;;  %v5386_v52 = vld [vmem:[#allocation8 + $0x48] sm:$0xff] }
 0xa02   : > { %v11864_v54 = vpop.eup %11863  ;;  %v4971_v25 = vmul.f32 %v11862_v13, %v15598_v17  ;;  %v5385_v13 = vld [vmem:[#allocation8 + $0x40] sm:$0xff] }
 0xa03   : > { %v11866_v45 = vpop.eup %11865  ;;  %v4972_v5 = vmul.f32 %v11864_v54, %v15602_v26  ;;  %v4796_v54 = vsub.f32 %v15400_v6, %v15554_v31  ;;  %v18599_v31 = vld [vmem:[#allocation119_spill] sm:$0xff] }
 0xa04   : > { %v15673_v12 = vpop.eup %11867  ;;  %v4973_v37 = vmul.f32 %v11866_v45, %v15604_v50 }
 0xa05   : > { %v11870_v10 = vpop.eup %11869 }
 0xa06   : > { %v15675_v14 = vpop.eup %11871  ;;  %v4974_v24 = vmul.f32 %v11870_v10, %v15608_v18  ;;  %v4850_v10 = vmul.f32 1.442695, %v4796_v54  ;;  %v18600_v54 = vld [vmem:[#allocation179_spill] sm:$0xff] }
 0xa07   : > { %v11874_v3 = vpop.eup %11873 }
 0xa08   : > { %v11876_v59 = vpop.eup %11875  ;;  %v4975_v17 = vmul.f32 %v11874_v3, %v15610_v48  ;;  %v18596_v48 = vld [vmem:[#allocation120_spill] sm:$0xff] }
 0xa09   : > { %v11878_v26 = vpop.eup %11877  ;;  %v4976_v61 = vmul.f32 %v11876_v59, %v15614_v55  ;;  %v4795_v55 = vsub.f32 %v15388_v7, %v15547_v15 }
 0xa0a   : > { %v4977_v50 = vmul.f32 %v11878_v26, %v15616_v42  ;;  %v4794_v42 = vsub.f32 %v15392_v63, %v15549_v36 }
 0xa0c   : > { %4902 = vadd.xlane.f32.xlu1 %v15655_v32  ;;  %v4846_v11 = vmul.f32 1.442695, %v4794_v42  ;;  %v4801_v42 = vsub.f32 %v15412_v34, %v15560_v20 }
 0xa0d   : > { %4904 = vadd.xlane.f32.xlu0 %v15653_v23 }
 0xa1d   : > { %5217 = vrot.lane.b32.xlu1 %v18593_v30, %s12567_s23 }
 0xa23   : > { %5215 = vrot.lane.b32.xlu0 %v18594_v58, %s12567_s23 }
 0xa2b   : > { %v4895_v38 = vpop.xlane.xlu1 %4894 }
 0xa2c   : > { %v4897_v43 = vpop.xlane.xlu0 %4896  ;;  %11879 = vrcp.f32 %v4895_v38 }
 0xa2d   : > { %11881 = vrcp.f32 %v4897_v43 }
 0xa2f   : > { %v5001_v57 = vpop.permute.xlu1 %5000 }
 0xa30   : > { %11003 = vmatprep.subr.mxu0 %v5001_v57  ;;  %v4999_v22 = vpop.permute.xlu0 %4998 }
 0xa31   : > { %11004 = vmatpush3.msra.mxu0 %v5001_v57 }
 0xa32   : > { %11005 = vmatprep.subr.mxu0 %v4999_v22 }
 0xa33   : > { %11006 = vmatpush3.msra.mxu0 %v4999_v22 }
 0xa34   : > { %11008 = vmatmul.mubr.f32.vlgmr.msra.gmra.mxu0 %v4967_v46 }
 0xa35   : > { %11010 = vmatprep.mubr.f32.mxu0 %v4968_v2 }
 0xa38   : > { %11011 = vmatmul.mubr.f32.gmra.mxu0 %v4969_v0 }
 0xa39   : > { %11013 = vmatprep.mubr.f32.mxu0 %v4970_v41  ;;  %v11880_v29 = vpop.eup %11879  ;;  %v4797_v41 = vsub.f32 %v15396_v27, %v15552_v19 }
 0xa3a   : > { %v11882_v38 = vpop.eup %11881  ;;  %v4978_v43 = vmul.f32 %v11880_v29, %v15626_v35  ;;  %v5388_v35 = vld [vmem:[#allocation8 + $0x58] sm:$0xff] }
 0xa3b   : > { %v4979_v18 = vmul.f32 %v11882_v38, %v15628_v16  ;;  %11087 = vmatprep.subr.mxu0 %v5388_v35  ;;  %v4848_v16 = vmul.f32 1.442695, %v4795_v55 }
 0xa3c   : > { %11014 = vmatmul.mubr.f32.gmra.mxu0 %v4971_v25 }
 0xa3d   : > { %11016 = vmatprep.mubr.f32.mxu0 %v4972_v5  ;;  %11088 = vmatpush3.msra.mxu0 %v5388_v35  ;;  %v4852_v5 = vmul.f32 1.442695, %v4797_v41 }
 0xa3e   : > { %11089 = vmatprep.subr.mxu0 %v5387_v28 }
 0xa3f   : > { %11090 = vmatpush3.msra.mxu0 %v5387_v28 }
 0xa40   : > { %11017 = vmatmul.mubr.f32.gmra.mxu0 %v4973_v37  ;;  %11091 = vmatprep.subr.mxu0 %v5386_v52 }
 0xa41   : > { %4906 = vadd.xlane.f32.xlu1 %v15675_v14  ;;  %11019 = vmatprep.mubr.f32.mxu0 %v4974_v24  ;;  %v4799_v24 = vsub.f32 %v15404_v49, %v15556_v1 }
 0xa42   : > { %4908 = vadd.xlane.f32.xlu0 %v15673_v12  ;;  %11092 = vmatpush3.msra.mxu0 %v5386_v52 }
 0xa43   : > { %11093 = vmatprep.subr.mxu0 %v5385_v13 }
 0xa44   : > { %11020 = vmatmul.mubr.f32.gmra.mxu0 %v4975_v17 }
 0xa45   : > { %11022 = vmatprep.mubr.f32.mxu0 %v4976_v61  ;;  %11094 = vmatpush3.msra.mxu0 %v5385_v13  ;;  %v4856_v61 = vmul.f32 1.442695, %v4799_v24 }
 0xa48   : > { %11023 = vmatmul.mubr.f32.gmra.mxu0 %v4977_v50 }
 0xa49   : > { %11025 = vmatprep.mubr.f32.mxu0 %v4978_v43 }
 0xa4c   : > { %11026 = vmatmul.mubr.f32.gmra.mxu0 %v4979_v18 }
 0xa52   : > { %5213 = vrot.lane.b32.xlu1 %v18595_v33, %s12567_s23 }
 0xa58   : > { %5211 = vrot.lane.b32.xlu0 %v18596_v48, %s12567_s23 }
 0xa60   : > { %v4899_v8 = vpop.xlane.xlu1 %4898 }
 0xa61   : > { %v4901_v57 = vpop.xlane.xlu0 %4900  ;;  %11883 = vrcp.f32 %v4899_v8 }
 0xa62   : > { %11885 = vrcp.f32 %v4901_v57  ;;  %v4800_v57 = vsub.f32 %v15416_v21, %v15562_v9 }
 0xa63   : > { %11887 = vpow2.f32 %v4848_v16 }
 0xa64   : > { %v5222_v22 = vpop.permute.xlu1 %5221  ;;  %11889 = vpow2.f32 %v4846_v11 }
 0xa65   : > { %11031 = vmatprep.subr.mxu1 %v5222_v22  ;;  %v5220_v46 = vpop.permute.xlu0 %5219 }
 0xa66   : > { %11032 = vmatpush3.msra.mxu1 %v5222_v22  ;;  %v4860_v22 = vmul.f32 1.442695, %v4801_v42 }
 0xa67   : > { %11033 = vmatprep.subr.mxu1 %v5220_v46 }
 0xa68   : > { %11034 = vmatpush3.msra.mxu1 %v5220_v46 }
 0xa6e   : > { %v11884_v15 = vpop.eup %11883 }
 0xa6f   : > { %v11886_v7 = vpop.eup %11885  ;;  %v4980_v36 = vmul.f32 %v11884_v15, %v15638_v39  ;;  %v18597_v39 = vld [vmem:[#allocation121_spill] sm:$0xff]  ;;  %v4858_v15 = vmul.f32 1.442695, %v4800_v57 }
 0xa70   : > { %v4981_v63 = vmul.f32 %v11886_v7, %v15640_v62  ;;  %v15696_v2 = vpop.eup %11887  ;;  %v18598_v62 = vld [vmem:[#allocation118_spill] sm:$0xff]  ;;  %v18609_v57 = vld [vmem:[#allocation169_spill] sm:$0xff] }
 0xa71   : > { %11028 = vmatprep.mubr.f32.mxu0 %v4980_v36  ;;  %v15698_v0 = vpop.eup %11889 }
 0xa72   : > { %11029 = vmatmul.mubr.f32.gmra.mxu0 %v4981_v63 }
 0xa76   : > { %4910 = vadd.xlane.f32.xlu1 %v15698_v0 }
 0xa77   : > { %4912 = vadd.xlane.f32.xlu0 %v15696_v2 }
 0xa87   : > { %5209 = vrot.lane.b32.xlu1 %v18597_v39, %s12567_s23 }
 0xa8d   : > { %5207 = vrot.lane.b32.xlu0 %v18598_v62, %s12567_s23 }
 0xa95   : > { %v4903_v25 = vpop.xlane.xlu1 %4902 }
 0xa96   : > { %v15710_v45 = vpop.xlane.xlu0 %4904  ;;  %11891 = vrcp.f32 %v4903_v25  ;;  %v18601_v25 = vld [vmem:[#allocation141_spill] sm:$0xff] }
 0xa97   : > { %11893 = vpow2.f32 %v4852_v5  ;;  %v4803_v5 = vsub.f32 %v18601_v25, %v18600_v54  ;;  %v18614_v54 = vld [vmem:[#allocation66_spill] sm:$0xff] }
 0xa98   : > { %11895 = vpow2.f32 %v4850_v10  ;;  %v18602_v10 = vld [vmem:[#allocation180_spill] sm:$0xff]  ;;  %v18615_v25 = vld [vmem:[#allocation62_spill] sm:$0xff] }
 0xa99   : > { %v5218_v37 = vpop.permute.xlu1 %5217  ;;  %11897 = vpow2.f32 %v4856_v61 }
 0xa9a   : > { %11035 = vmatprep.subr.mxu1 %v5218_v37  ;;  %v5216_v3 = vpop.permute.xlu0 %5215 }
 0xa9b   : > { %11036 = vmatpush3.msra.mxu1 %v5218_v37  ;;  %v18603_v37 = vld [vmem:[#allocation137_spill] sm:$0xff] }
 0xa9c   : > { %11037 = vmatprep.subr.mxu1 %v5216_v3 }
 0xa9d   : > { %11038 = vmatpush3.msra.mxu1 %v5216_v3  ;;  %v4802_v3 = vsub.f32 %v18603_v37, %v18602_v10 }
 0xa9f   : > { %v4862_v61 = vmul.f32 1.442695, %v4802_v3  ;;  %v18617_v3 = vld [vmem:[#allocation44_spill] sm:$0xff] }
 0xaa3   : > { %v11892_v59 = vpop.eup %11891 }
 0xaa4   : > { %v4982_v27 = vmul.f32 %v11892_v59, %v15655_v32  ;;  %v15713_v19 = vpop.eup %11893  ;;  %v4798_v32 = vsub.f32 %v15408_v51, %v15558_v4 }
 0xaa5   : > { %v15715_v6 = vpop.eup %11895 }
 0xaa6   : > { %11063 = vmatprep.mubr.f32.mxu1 %v4982_v27  ;;  %v4854_v29 = vmul.f32 1.442695, %v4798_v32  ;;  %v15731_v43 = vpop.eup %11897  ;;  %v4864_v32 = vmul.f32 1.442695, %v4803_v5  ;;  %v18616_v5 = vld [vmem:[#allocation58_spill] sm:$0xff] }
 0xaa8   : > { %11899 = vpow2.f32 %v4854_v29 }
 0xaa9   : > { %11901 = vpow2.f32 %v4860_v22 }
 0xaaa   : > { %11903 = vpow2.f32 %v4858_v15 }
 0xaab   : > { %4914 = vadd.xlane.f32.xlu1 %v15715_v6  ;;  %11905 = vpow2.f32 %v4864_v32 }
 0xaac   : > { %4916 = vadd.xlane.f32.xlu0 %v15713_v19  ;;  %11907 = vpow2.f32 %v4862_v61 }
 0xab5   : > { %v15733_v49 = vpop.eup %11899 }
 0xab6   : > { %v15763_v52 = vpop.eup %11901 }
 0xab7   : > { %v15765_v13 = vpop.eup %11903 }
 0xabc   : > { %5205 = vrot.lane.b32.xlu1 %v18599_v31, %s12567_s23 }
 0xac2   : > { %5203 = vrot.lane.b32.xlu0 %v14363_v40, %s12567_s23 }
 0xaca   : > { %v15727_v17 = vpop.xlane.xlu1 %4906 }
 0xacb   : > { %v15729_v26 = vpop.xlane.xlu0 %4908 }
 0xace   : > { %v5214_v50 = vpop.permute.xlu1 %5213 }
 0xacf   : > { %11039 = vmatprep.subr.mxu1 %v5214_v50  ;;  %v5212_v38 = vpop.permute.xlu0 %5211 }
 0xad0   : > { %11040 = vmatpush3.msra.mxu1 %v5214_v50 }
 0xad1   : > { %11041 = vmatprep.subr.mxu1 %v5212_v38 }
 0xad2   : > { %11042 = vmatpush3.msra.mxu1 %v5212_v38  ;;  %v15783_v38 = vpop.eup %11905 }
 0xae0   : > { %4918 = vadd.xlane.f32.xlu1 %v15733_v49 }
 0xae1   : > { %4920 = vadd.xlane.f32.xlu0 %v15731_v43 }
 0xaf1   : > { %5201 = vrot.lane.b32.xlu1 %v14369_v44, %s12567_s23 }
 0xaf4   : > { %v11009_v51 = vpop.f32.mrf.mxu0 }
 0xaf6   : > { %v5112_v1 = vpop.f32.mrf.mxu0 }
 0xaf7   : > { %5199 = vrot.lane.b32.xlu0 %v14377_v60, %s12567_s23  ;;  %11095 = vmatprep.mubr.msk.f32.mxu0 %vm1200_vm0, %v5112_v1  ;;  %v18604_v1 = vld [vmem:[#allocation117_spill] sm:$0xff] }
 0xaf8   : > { %v11012_v4 = vpop.f32.mrf.mxu0  ;;  %11096 = vmatmul.mubr.msk.f32.vlgmr.msra.gmra.mxu0 %vm1200_vm0, %v11009_v51  ;;  %v15785_v51 = vpop.eup %11907 }
 0xafa   : > { %v5122_v18 = vpop.f32.mrf.mxu0 }
 0xafb   : > { %11098 = vmatprep.mubr.msk.f32.mxu0 %vm1200_vm0, %v5122_v18  ;;  %v18606_v18 = vld [vmem:[#allocation181_spill] sm:$0xff] }
 0xafc   : > { %v11015_v55 = vpop.f32.mrf.mxu0  ;;  %11099 = vmatmul.mubr.msk.f32.gmra.mxu0 %vm1200_vm0, %v11012_v4  ;;  %v18605_v4 = vld [vmem:[#allocation114_spill] sm:$0xff] }
 0xafe   : > { %v5132_v8 = vpop.f32.mrf.mxu0 }
 0xaff   : > { %v15749_v35 = vpop.xlane.xlu1 %4910  ;;  %11101 = vmatprep.mubr.msk.f32.mxu0 %vm1200_vm0, %v5132_v8  ;;  %v18608_v8 = vld [vmem:[#allocation182_spill] sm:$0xff] }
 0xb00   : > { %v15752_v16 = vpop.xlane.xlu0 %4912  ;;  %v11018_v11 = vpop.f32.mrf.mxu0  ;;  %11102 = vmatmul.mubr.msk.f32.gmra.mxu0 %vm1200_vm0, %v11015_v55  ;;  %v18607_v55 = vld [vmem:[#allocation139_spill] sm:$0xff] }
 0xb01   : > { %v4805_v42 = vsub.f32 %v18607_v55, %v18606_v18  ;;  %v18621_v18 = vld [vmem:[#allocation41_spill] sm:$0xff] }
 0xb02   : > { %v5142_v46 = vpop.f32.mrf.mxu0  ;;  %v18622_v55 = vld [vmem:[#allocation37_spill] sm:$0xff] }
 0xb03   : > { %v5210_v7 = vpop.permute.xlu1 %5209  ;;  %11104 = vmatprep.mubr.msk.f32.mxu0 %vm1200_vm0, %v5142_v46  ;;  %v4868_v15 = vmul.f32 1.442695, %v4805_v42  ;;  %v18623_v42 = vld [vmem:[#allocation32_spill] sm:$0xff] }
 0xb04   : > { %v11021_v20 = vpop.f32.mrf.mxu0  ;;  %11043 = vmatprep.subr.mxu1 %v5210_v7  ;;  %11105 = vmatmul.mubr.msk.f32.gmra.mxu0 %vm1200_vm0, %v11018_v11  ;;  %v5208_v9 = vpop.permute.xlu0 %5207  ;;  %v4804_v11 = vsub.f32 %v18609_v57, %v18608_v8  ;;  %v18624_v8 = vld [vmem:[#allocation30_spill] sm:$0xff]  ;;  %v18625_v57 = vld [vmem:[#allocation28_spill] sm:$0xff] }
 0xb05   : > { %11044 = vmatpush3.msra.mxu1 %v5210_v7  ;;  %11909 = vpow2.f32 %v4868_v15  ;;  %v18627_v15 = vld [vmem:[#allocation29_spill] sm:$0xff] }
 0xb06   : > { %v5152_v34 = vpop.f32.mrf.mxu0  ;;  %11045 = vmatprep.subr.mxu1 %v5208_v9  ;;  %v4866_v7 = vmul.f32 1.442695, %v4804_v11  ;;  %v18626_v11 = vld [vmem:[#allocation27_spill] sm:$0xff] }
 0xb07   : > { %11046 = vmatpush3.msra.mxu1 %v5208_v9  ;;  %11107 = vmatprep.mubr.msk.f32.mxu0 %vm1200_vm0, %v5152_v34 }
 0xb08   : > { %v11024_v21 = vpop.f32.mrf.mxu0  ;;  %11108 = vmatmul.mubr.msk.f32.gmra.mxu0 %vm1200_vm0, %v11021_v20  ;;  %11911 = vpow2.f32 %v4866_v7  ;;  %v18628_v7 = vld [vmem:[#allocation89_spill] sm:$0xff] }
 0xb09   : > { %11913 = vrcp.f32 %v15710_v45  ;;  %v18659_v45 = vld [vmem:[#allocation77_spill] sm:$0xff] }
 0xb0a   : > { %v5162_v36 = vpop.f32.mrf.mxu0  ;;  %11915 = vrcp.f32 %v15727_v17 }
 0xb0b   : > { %11110 = vmatprep.mubr.msk.f32.mxu0 %vm1200_vm0, %v5162_v36  ;;  %v18610_v36 = vld [vmem:[#allocation55_spill] sm:$0xff]  ;;  %11917 = vrcp.f32 %v15729_v26 }
 0xb0c   : > { %v11027_v63 = vpop.f32.mrf.mxu0  ;;  %11111 = vmatmul.mubr.msk.f32.gmra.mxu0 %vm1200_vm0, %v11024_v21  ;;  %11919 = vrcp.f32 %v15749_v35  ;;  %v18664_v35 = vld [vmem:[#allocation73_spill] sm:$0xff] }
 0xb0d   : > { %11921 = vrcp.f32 %v15752_v16 }
 0xb0e   : > { %v5172_v28 = vpop.f32.mrf.mxu0 }
 0xb0f   : > { %11113 = vmatprep.mubr.msk.f32.mxu0 %vm1200_vm0, %v5172_v28  ;;  %v18612_v28 = vld [vmem:[#allocation56_spill] sm:$0xff] }
 0xb10   : > { %11114 = vmatmul.mubr.msk.f32.gmra.mxu0 %vm1200_vm0, %v11027_v63  ;;  %v18611_v63 = vld [vmem:[#allocation60_spill] sm:$0xff] }
 0xb12   : > { %v15801_v34 = vpop.eup %11909 }
 0xb15   : > { %4922 = vadd.xlane.f32.xlu1 %v15765_v13  ;;  %v15803_v21 = vpop.eup %11911 }
 0xb16   : > { %4924 = vadd.xlane.f32.xlu0 %v15763_v52 }
 0xb26   : > { %5197 = vrot.lane.b32.xlu1 %v14383_v47, %s12567_s23 }
 0xb2c   : > { %5195 = vrot.lane.b32.xlu0 %v14390_v56, %s12567_s23 }
 0xb32   : > { %v11030_v41 = vpop.f32.mrf.mxu0 }
 0xb34   : > { %v15777_v59 = vpop.xlane.xlu1 %4914  ;;  %v5182_v27 = vpop.f32.mrf.mxu0 }
 0xb35   : > { %v15779_v24 = vpop.xlane.xlu0 %4916  ;;  %11116 = vmatprep.mubr.msk.f32.mxu0 %vm1200_vm0, %v5182_v27  ;;  %v18618_v27 = vld [vmem:[#allocation51_spill] sm:$0xff]  ;;  %11923 = vrcp.f32 %v15777_v59  ;;  %v18666_v59 = vld [vmem:[#allocation48_spill] sm:$0xff] }
 0xb36   : > { %11117 = vmatmul.mubr.msk.f32.gmra.mxu0 %vm1200_vm0, %v11030_v41  ;;  %v18613_v41 = vld [vmem:[#allocation63_spill] sm:$0xff]  ;;  %11925 = vrcp.f32 %v15779_v24 }
 0xb38   : > { %v5206_v29 = vpop.permute.xlu1 %5205 }
 0xb39   : > { %11047 = vmatprep.subr.mxu1 %v5206_v29  ;;  %v5204_v50 = vpop.permute.xlu0 %5203 }
 0xb3a   : > { %11048 = vmatpush3.msra.mxu1 %v5206_v29  ;;  %v18619_v29 = vld [vmem:[#allocation45_spill] sm:$0xff] }
 0xb3b   : > { %11049 = vmatprep.subr.mxu1 %v5204_v50 }
 0xb3c   : > { %11050 = vmatpush3.msra.mxu1 %v5204_v50  ;;  %v18620_v50 = vld [vmem:[#allocation43_spill] sm:$0xff] }
 0xb4a   : > { %4926 = vadd.xlane.f32.xlu1 %v15785_v51 }
 0xb4b   : > { %4928 = vadd.xlane.f32.xlu0 %v15783_v38 }
 0xb5b   : > { %5193 = vrot.lane.b32.xlu1 %v18604_v1, %s12567_s23 }
 0xb61   : > { %5191 = vrot.lane.b32.xlu0 %v18605_v4, %s12567_s23  ;;  %s17716_s23 = scalar_lea.vmem [#allocation13], %s12844_s18  ;;  %s18832_s18 = sld [smem:[#allocation24_spill]] }
 0xb62   : > { %s8960_s2 = sshll.u32 %s17716_s23, 4  ;;  %s17846_s2 = int_to_ptr.vmem [resolvable:$true] %s8960_s2 }
 0xb63   : > { %s12471_s28 = scalar_lea.vmem %s17846_s2, 4096 }
 0xb64   : > { %p12472_p10 = scmp.ne.s32.totalorder %s17846_s2, %s12471_s28 }
 0xb67   : > { %p18834_p1 = scmp.ne.s32.totalorder %s18832_s18, 0 }
 0xb69   : > { %v15797_v22 = vpop.xlane.xlu1 %4918  ;;  %p12473_p6 = pnand %p12472_p10, %p18834_p1 }
 0xb6a   : > { %v15799_v46 = vpop.xlane.xlu0 %4920  ;;  %11927 = vrcp.f32 %v15797_v22 }
 0xb6b   : > { %11929 = vrcp.f32 %v15799_v46  ;;  %p12474_p12 = pneg %p12473_p6 }
 0xb6d   : > { %v5202_v20 = vpop.permute.xlu1 %5201 }
 0xb6e   : > { %11051 = vmatprep.subr.mxu1 %v5202_v20  ;;  %v5200_v9 = vpop.permute.xlu0 %5199 }
 0xb6f   : > { %11052 = vmatpush3.msra.mxu1 %v5202_v20  ;;  %v18629_v20 = vld [vmem:[#allocation91_spill] sm:$0xff] }
 0xb70   : > { %11053 = vmatprep.subr.mxu1 %v5200_v9 }
 0xb71   : > { %11054 = vmatpush3.msra.mxu1 %v5200_v9 }
 0xb7f   : > { %4930 = vadd.xlane.f32.xlu1 %v15803_v21 }
 0xb80   : > { %4932 = vadd.xlane.f32.xlu0 %v15801_v34 }
 0xb90   : > { %5804 = vrot.lane.b32.xlu1 %v18610_v36, %s12568_s26  ;;  %v18630_v36 = vld [vmem:[#allocation131_spill] sm:$0xff] }
 0xb94   : > { %5800 = vrot.lane.b32.xlu1 %v18611_v63, %s12568_s26 }
 0xb96   : > { %5802 = vrot.lane.b32.xlu0 %v18612_v28, %s12568_s26  ;;  %v18632_v28 = vld [vmem:[#allocation31_spill] sm:$0xff] }
 0xb98   : > { %5798 = vrot.lane.b32.xlu1 %v18613_v41, %s12568_s26 }
 0xb9a   : > { %5796 = vrot.lane.b32.xlu0 %v18614_v54, %s12568_s26  ;;  %v18634_v54 = vld [vmem:[#allocation35_spill] sm:$0xff] }
 0xb9c   : > { %5794 = vrot.lane.b32.xlu1 %v18615_v25, %s12568_s26 }
 0xb9e   : > { %5792 = vrot.lane.b32.xlu0 %v18616_v5, %s12568_s26  ;;  %v15821_v10 = vpop.xlane.xlu1 %4922  ;;  %v18635_v5 = vld [vmem:[#allocation135_spill] sm:$0xff] }
 0xb9f   : > { %v15823_v37 = vpop.xlane.xlu0 %4924  ;;  %11931 = vrcp.f32 %v15821_v10 }
 0xba0   : > { %5790 = vrot.lane.b32.xlu1 %v18617_v3, %s12568_s26  ;;  %11933 = vrcp.f32 %v15823_v37 }
 0xba2   : > { %5788 = vrot.lane.b32.xlu0 %v18618_v27, %s12568_s26  ;;  %v5198_v32 = vpop.permute.xlu1 %5197  ;;  %v18637_v27 = vld [vmem:[#allocation94_spill] sm:$0xff] }
 0xba3   : > { %11055 = vmatprep.subr.mxu1 %v5198_v32  ;;  %v5196_v61 = vpop.permute.xlu0 %5195 }
 0xba4   : > { %5786 = vrot.lane.b32.xlu1 %v18619_v29, %s12568_s26  ;;  %11056 = vmatpush3.msra.mxu1 %v5198_v32 }
 0xba5   : > { %11057 = vmatprep.subr.mxu1 %v5196_v61 }
 0xba6   : > { %5784 = vrot.lane.b32.xlu0 %v18620_v50, %s12568_s26  ;;  %11058 = vmatpush3.msra.mxu1 %v5196_v61  ;;  %v18639_v61 = vld [vmem:[#allocation93_spill] sm:$0xff]  ;;  %v18640_v50 = vld [vmem:[#allocation86_spill] sm:$0xff] }
 0xba8   : > { %5782 = vrot.lane.b32.xlu1 %v18621_v18, %s12568_s26 }
 0xbaa   : > { %5780 = vrot.lane.b32.xlu0 %v18622_v55, %s12568_s26  ;;  %v18642_v55 = vld [vmem:[#allocation39_spill] sm:$0xff] }
 0xbac   : > { %5778 = vrot.lane.b32.xlu1 %v18623_v42, %s12568_s26 }
 0xbae   : > { %5776 = vrot.lane.b32.xlu0 %v18624_v8, %s12568_s26  ;;  %v18644_v8 = vld [vmem:[#allocation34_spill] sm:$0xff] }
 0xbb0   : > { %5774 = vrot.lane.b32.xlu1 %v18625_v57, %s12568_s26 }
 0xbb2   : > { %5742 = vrot.lane.b32.xlu0 %v18626_v11, %s12568_s26  ;;  %v18645_v11 = vld [vmem:[#allocation147_spill] sm:$0xff] }
 0xbb4   : > { %5744 = vrot.lane.b32.xlu1 %v18627_v15, %s12568_s26 }
 0xbb6   : > { %6077 = vrot.lane.b32.xlu0 %v18628_v7, %s12568_s26  ;;  %v18647_v7 = vld [vmem:[#allocation90_spill] sm:$0xff] }
 0xbb8   : > { %6075 = vrot.lane.b32.xlu1 %v18629_v20, %s12568_s26  ;;  %v11097_v9 = vpop.f32.mrf.mxu0 }
 0xbb9   : > { %v15852_v63 = vadd.f32 %v11097_v9, %v18630_v36  ;;  %v18649_v9 = vld [vmem:[#allocation84_spill] sm:$0xff] }
 0xbba   : > { %5746 = vrot.lane.b32.xlu0 %v18632_v28, %s12568_s26  ;;  %v15856_v41 = vpop.f32.mrf.mxu0  ;;  %v18650_v28 = vld [vmem:[#allocation150_spill] sm:$0xff] }
 0xbbb   : > { %18631 = vst [vmem:[#allocation33_spill] sm:$0xff] %v15852_v63  ;;  %18633 = vst [vmem:[#allocation140_spill] sm:$0xff] %v15856_v41 }
 0xbbc   : > { %5748 = vrot.lane.b32.xlu1 %v18634_v54, %s12568_s26  ;;  %v11100_v25 = vpop.f32.mrf.mxu0 }
 0xbbd   : > { %v15861_v3 = vadd.f32 %v11100_v25, %v18635_v5  ;;  %v18652_v25 = vld [vmem:[#allocation38_spill] sm:$0xff] }
 0xbbe   : > { %6073 = vrot.lane.b32.xlu0 %v18637_v27, %s12568_s26  ;;  %v15865_v32 = vpop.f32.mrf.mxu0  ;;  %v18654_v27 = vld [vmem:[#allocation49_spill] sm:$0xff] }
 0xbbf   : > { %18636 = vst [vmem:[#allocation122_spill] sm:$0xff] %v15861_v3  ;;  %18638 = vst [vmem:[#allocation123_spill] sm:$0xff] %v15865_v32  ;;  %v18741_v3 = vld [vmem:[#allocation98_spill] sm:$0xff]  ;;  %v18742_v32 = vld [vmem:[#allocation101_spill] sm:$0xff] }
 0xbc0   : > { %6071 = vrot.lane.b32.xlu1 %v18639_v61, %s12568_s26  ;;  %v11103_v29 = vpop.f32.mrf.mxu0 }
 0xbc1   : > { %v15870_v18 = vadd.f32 %v11103_v29, %v18640_v50  ;;  %v18655_v29 = vld [vmem:[#allocation154_spill] sm:$0xff] }
 0xbc2   : > { %5750 = vrot.lane.b32.xlu0 %v18642_v55, %s12568_s26  ;;  %v15874_v42 = vpop.f32.mrf.mxu0  ;;  %v18657_v55 = vld [vmem:[#allocation81_spill] sm:$0xff] }
 0xbc3   : > { %18641 = vst [vmem:[#allocation120_spill] sm:$0xff] %v15870_v18  ;;  %18643 = vst [vmem:[#allocation121_spill] sm:$0xff] %v15874_v42 }
 0xbc4   : > { %5752 = vrot.lane.b32.xlu1 %v18644_v8, %s12568_s26  ;;  %v11106_v57 = vpop.f32.mrf.mxu0 }
 0xbc5   : > { %v15879_v15 = vadd.f32 %v11106_v57, %v18645_v11  ;;  %v18660_v57 = vld [vmem:[#allocation156_spill] sm:$0xff] }
 0xbc6   : > { %6069 = vrot.lane.b32.xlu0 %v18647_v7, %s12568_s26  ;;  %v15883_v20 = vpop.f32.mrf.mxu0  ;;  %v18662_v7 = vld [vmem:[#allocation54_spill] sm:$0xff] }
 0xbc7   : > { %18646 = vst [vmem:[#allocation118_spill] sm:$0xff] %v15879_v15  ;;  %18648 = vst [vmem:[#allocation119_spill] sm:$0xff] %v15883_v20  ;;  %v18740_v20 = vld [vmem:[#allocation75_spill] sm:$0xff] }
 0xbc8   : > { %6067 = vrot.lane.b32.xlu1 %v18649_v9, %s12568_s26  ;;  %v11109_v36 = vpop.f32.mrf.mxu0 }
 0xbc9   : > { %v15888_v54 = vadd.f32 %v11109_v36, %v18650_v28  ;;  %v18663_v36 = vld [vmem:[#allocation46_spill] sm:$0xff]  ;;  %v11914_v28 = vpop.eup %11913 }
 0xbca   : > { %5754 = vrot.lane.b32.xlu0 %v18652_v25, %s12568_s26  ;;  %v15893_v5 = vpop.f32.mrf.mxu0 }
 0xbcb   : > { %18651 = vst [vmem:[#allocation179_spill] sm:$0xff] %v15888_v54  ;;  %18653 = vst [vmem:[#allocation141_spill] sm:$0xff] %v15893_v5 }
 0xbcc   : > { %5756 = vrot.lane.b32.xlu1 %v18654_v27, %s12568_s26  ;;  %v11112_v61 = vpop.f32.mrf.mxu0  ;;  %v11916_v27 = vpop.eup %11915 }
 0xbcd   : > { %v15899_v50 = vadd.f32 %v11112_v61, %v18655_v29  ;;  %v18665_v61 = vld [vmem:[#allocation71_spill] sm:$0xff]  ;;  %v4983_v29 = vmul.f32 %v11914_v28, %v15653_v23  ;;  %v11918_v24 = vpop.eup %11917  ;;  %v4984_v22 = vmul.f32 %v11916_v27, %v15675_v14  ;;  %v18669_v14 = vld [vmem:[#allocation69_spill] sm:$0xff] }
 0xbce   : > { %6065 = vrot.lane.b32.xlu0 %v18657_v55, %s12568_s26  ;;  %v15904_v8 = vpop.f32.mrf.mxu0  ;;  %v11920_v55 = vpop.eup %11919  ;;  %v4985_v23 = vmul.f32 %v11918_v24, %v15673_v12 }
 0xbcf   : > { %18656 = vst [vmem:[#allocation180_spill] sm:$0xff] %v15899_v50  ;;  %18658 = vst [vmem:[#allocation137_spill] sm:$0xff] %v15904_v8  ;;  %v11922_v46 = vpop.eup %11921  ;;  %v4986_v10 = vmul.f32 %v11920_v55, %v15698_v0  ;;  %v18672_v0 = vld [vmem:[#allocation80_spill] sm:$0xff] }
 0xbd0   : > { %6063 = vrot.lane.b32.xlu1 %v18659_v45, %s12568_s26  ;;  %v11115_v17 = vpop.f32.mrf.mxu0  ;;  %v18667_v45 = vld [vmem:[#allocation64_spill] sm:$0xff] }
 0xbd1   : > { %v15910_v11 = vadd.f32 %v11115_v17, %v18660_v57  ;;  %v18668_v17 = vld [vmem:[#allocation85_spill] sm:$0xff]  ;;  %v11924_v57 = vpop.eup %11923 }
 0xbd2   : > { %5758 = vrot.lane.b32.xlu0 %v18662_v7, %s12568_s26  ;;  %v18670_v7 = vld [vmem:[#allocation68_spill] sm:$0xff]  ;;  %v4988_v37 = vmul.f32 %v11924_v57, %v15715_v6  ;;  %v18684_v57 = vld [vmem:[#allocation67_spill] sm:$0xff] }
 0xbd3   : > { %18661 = vst [vmem:[#allocation181_spill] sm:$0xff] %v15910_v11  ;;  %v4927_v9 = vpop.xlane.xlu1 %4926  ;;  %v18674_v6 = vld [vmem:[#allocation52_spill] sm:$0xff] }
 0xbd4   : > { %v4929_v26 = vpop.xlane.xlu0 %4928  ;;  %5760 = vrot.lane.b32.xlu1 %v18663_v36, %s12568_s26  ;;  %11935 = vrcp.f32 %v4927_v9  ;;  %v4987_v36 = vmul.f32 %v11922_v46, %v15696_v2  ;;  %v18671_v9 = vld [vmem:[#allocation50_spill] sm:$0xff]  ;;  %v18673_v2 = vld [vmem:[#allocation65_spill] sm:$0xff]  ;;  %v18682_v46 = vld [vmem:[#allocation160_spill] sm:$0xff] }
 0xbd5   : > { %11937 = vrcp.f32 %v4929_v26 }
 0xbd6   : > { %6061 = vrot.lane.b32.xlu0 %v18664_v35, %s12568_s26  ;;  %v11926_v35 = vpop.eup %11925 }
 0xbd7   : > { %v5194_v25 = vpop.permute.xlu1 %5193  ;;  %v11928_v12 = vpop.eup %11927  ;;  %v4989_v28 = vmul.f32 %v11926_v35, %v15713_v19  ;;  %v18675_v19 = vld [vmem:[#allocation74_spill] sm:$0xff]  ;;  %v18689_v35 = vld [vmem:[#allocation92_spill] sm:$0xff] }
 0xbd8   : > { %6059 = vrot.lane.b32.xlu1 %v18665_v61, %s12568_s26  ;;  %11059 = vmatprep.subr.mxu1 %v5194_v25  ;;  %v5192_v16 = vpop.permute.xlu0 %5191  ;;  %v4990_v27 = vmul.f32 %v11928_v12, %v15733_v49  ;;  %v18676_v49 = vld [vmem:[#allocation76_spill] sm:$0xff]  ;;  %v18691_v12 = vld [vmem:[#allocation97_spill] sm:$0xff] }
 0xbd9   : > { %11060 = vmatpush3.msra.mxu1 %v5194_v25  ;;  %v11930_v25 = vpop.eup %11929 }
 0xbda   : > { %5762 = vrot.lane.b32.xlu0 %v18666_v59, %s12568_s26  ;;  %11061 = vmatprep.subr.mxu1 %v5192_v16  ;;  %v11932_v26 = vpop.eup %11931  ;;  %v4991_v61 = vmul.f32 %v11930_v25, %v15731_v43  ;;  %v18678_v43 = vld [vmem:[#allocation57_spill] sm:$0xff]  ;;  %v18693_v25 = vld [vmem:[#allocation99_spill] sm:$0xff] }
 0xbdb   : > { %11062 = vmatpush3.msra.mxu1 %v5192_v16  ;;  %v11934_v16 = vpop.eup %11933  ;;  %v4992_v59 = vmul.f32 %v11932_v26, %v15765_v13 }
 0xbdc   : > { %5764 = vrot.lane.b32.xlu1 %v18667_v45, %s12568_s26  ;;  %11064 = vmatmul.mubr.f32.vlgmr.msra.gmra.mxu1 %v4983_v29  ;;  %v4993_v24 = vmul.f32 %v11934_v16, %v15763_v52  ;;  %v18677_v45 = vld [vmem:[#allocation59_spill] sm:$0xff]  ;;  %v18681_v52 = vld [vmem:[#allocation78_spill] sm:$0xff] }
 0xbdd   : > { %11066 = vmatprep.mubr.f32.mxu1 %v4984_v22 }
 0xbde   : > { %6057 = vrot.lane.b32.xlu0 %v18668_v17, %s12568_s26  ;;  %v15966_v17 = vpop.f32.mrf.mxu0 }
 0xbdf   : > { %18679 = vst [vmem:[#allocation139_spill] sm:$0xff] %v15966_v17 }
 0xbe0   : > { %6055 = vrot.lane.b32.xlu1 %v18669_v14, %s12568_s26  ;;  %11067 = vmatmul.mubr.f32.gmra.mxu1 %v4985_v23  ;;  %v18680_v23 = vld [vmem:[#allocation61_spill] sm:$0xff]  ;;  %v18685_v14 = vld [vmem:[#allocation82_spill] sm:$0xff] }
 0xbe1   : > { %11069 = vmatprep.mubr.f32.mxu1 %v4986_v10  ;;  %v11936_v29 = vpop.eup %11935 }
 0xbe2   : > { %5766 = vrot.lane.b32.xlu0 %v18670_v7, %s12568_s26  ;;  %v11938_v22 = vpop.eup %11937  ;;  %v4994_v55 = vmul.f32 %v11936_v29, %v15785_v51  ;;  %v18687_v7 = vld [vmem:[#allocation88_spill] sm:$0xff] }
 0xbe3   : > { %v4995_v13 = vmul.f32 %v11938_v22, %v15783_v38  ;;  %v18686_v38 = vld [vmem:[#allocation70_spill] sm:$0xff] }
 0xbe4   : > { %5768 = vrot.lane.b32.xlu1 %v18671_v9, %s12568_s26  ;;  %11070 = vmatmul.mubr.f32.gmra.mxu1 %v4987_v36  ;;  %v18688_v36 = vld [vmem:[#allocation72_spill] sm:$0xff]  ;;  %v18692_v9 = vld [vmem:[#allocation87_spill] sm:$0xff] }
 0xbe5   : > { %11072 = vmatprep.mubr.f32.mxu1 %v4988_v37  ;;  %v18690_v37 = vld [vmem:[#allocation79_spill] sm:$0xff] }
 0xbe6   : > { %6053 = vrot.lane.b32.xlu0 %v18672_v0, %s12568_s26 }
 0xbe8   : > { %6051 = vrot.lane.b32.xlu1 %v18673_v2, %s12568_s26  ;;  %11073 = vmatmul.mubr.f32.gmra.mxu1 %v4989_v28 }
 0xbe9   : > { %11075 = vmatprep.mubr.f32.mxu1 %v4990_v27  ;;  %v18694_v27 = vld [vmem:[#allocation96_spill] sm:$0xff] }
 0xbea   : > { %5770 = vrot.lane.b32.xlu0 %v18674_v6, %s12568_s26  ;;  %v18695_v6 = vld [vmem:[#allocation103_spill] sm:$0xff] }
 0xbec   : > { %5772 = vrot.lane.b32.xlu1 %v18675_v19, %s12568_s26  ;;  %11076 = vmatmul.mubr.f32.gmra.mxu1 %v4991_v61  ;;  %v18696_v61 = vld [vmem:[#allocation100_spill] sm:$0xff] }
 0xbed   : > { %11078 = vmatprep.mubr.f32.mxu1 %v4992_v59 }
 0xbee   : > { %6049 = vrot.lane.b32.xlu0 %v18676_v49, %s12568_s26 }
 0xbf0   : > { %6047 = vrot.lane.b32.xlu1 %v18677_v45, %s12568_s26  ;;  %11079 = vmatmul.mubr.f32.gmra.mxu1 %v4993_v24 }
 0xbf1   : > { %11081 = vmatprep.mubr.f32.mxu1 %v4994_v55 }
 0xbf2   : > { %6015 = vrot.lane.b32.xlu0 %v18678_v43, %s12568_s26 }
 0xbf4   : > { %6017 = vrot.lane.b32.xlu1 %v18680_v23, %s12568_s26  ;;  %11082 = vmatmul.mubr.f32.gmra.mxu1 %v4995_v13 }
 0xbf6   : > { %6019 = vrot.lane.b32.xlu0 %v18681_v52, %s12568_s26  ;;  %v11118_v51 = vpop.f32.mrf.mxu0 }
 0xbf7   : > { %v15973_v10 = vadd.f32 %v11118_v51, %v18682_v46 }
 0xbf8   : > { %6021 = vrot.lane.b32.xlu1 %v18684_v57, %s12568_s26 }
 0xbf9   : > { %18683 = vst [vmem:[#allocation182_spill] sm:$0xff] %v15973_v10  ;;  %v12269_v10 = vld [vmem:[%s12856_s25 + $0xb0] sm:$0xff] }
 0xbfa   : > { %6023 = vrot.lane.b32.xlu0 %v18685_v14, %s12568_s26 }
 0xbfc   : > { %6025 = vrot.lane.b32.xlu1 %v18686_v38, %s12568_s26 }
 0xbfe   : > { %6027 = vrot.lane.b32.xlu0 %v18687_v7, %s12568_s26 }
 0xc00   : > { %6029 = vrot.lane.b32.xlu1 %v18688_v36, %s12568_s26 }
 0xc02   : > { %6031 = vrot.lane.b32.xlu0 %v18689_v35, %s12568_s26 }
 0xc04   : > { %6033 = vrot.lane.b32.xlu1 %v18690_v37, %s12568_s26 }
 0xc06   : > { %6035 = vrot.lane.b32.xlu0 %v18691_v12, %s12568_s26 }
 0xc08   : > { %6037 = vrot.lane.b32.xlu1 %v18692_v9, %s12568_s26  ;;  %v4931_v0 = vpop.xlane.xlu1 %4930 }
 0xc09   : > { %v4933_v28 = vpop.xlane.xlu0 %4932  ;;  %11939 = vrcp.f32 %v4931_v0 }
 0xc0a   : > { %6039 = vrot.lane.b32.xlu0 %v18693_v25, %s12568_s26  ;;  %11941 = vrcp.f32 %v4933_v28 }
 0xc0c   : > { %6041 = vrot.lane.b32.xlu1 %v18694_v27, %s12568_s26  ;;  %v5805_v26 = vpop.permute.xlu1 %5804 }
 0xc0d   : > { %v5803_v2 = vpop.permute.xlu0 %5802  ;;  %11143 = vmatprep.subr.msk.mxu1 %vm1200_vm0, %v5805_v26 }
 0xc0e   : > { %6043 = vrot.lane.b32.xlu0 %v18695_v6, %s12568_s26  ;;  %11144 = vmatpush3.xpose.msk.msra.mxu1 %vm1200_vm0, %v5805_v26 }
 0xc0f   : > { %11145 = vmatprep.subr.msk.mxu1 %vm1200_vm0, %v5803_v2 }
 0xc10   : > { %6045 = vrot.lane.b32.xlu1 %v18696_v61, %s12568_s26  ;;  %v5801_v16 = vpop.permute.xlu1 %5800 }
 0xc11   : > { %v5797_v59 = vpop.permute.xlu0 %5796 }
 0xc12   : > { %11146 = vmatpush3.xpose.msk.msra.mxu1 %vm1200_vm0, %v5803_v2 }
 0xc13   : > { %11147 = vmatprep.subr.msk.mxu1 %vm1200_vm0, %v5801_v16 }
 0xc14   : > { %v5799_v29 = vpop.permute.xlu1 %5798 }
 0xc15   : > { %v5793_v19 = vpop.permute.xlu0 %5792 }
 0xc16   : > { %v11940_v49 = vpop.eup %11939  ;;  %11148 = vmatpush3.xpose.msk.msra.mxu1 %vm1200_vm0, %v5801_v16 }
 0xc17   : > { %v11942_v24 = vpop.eup %11941  ;;  %11149 = vmatprep.subr.msk.mxu1 %vm1200_vm0, %v5799_v29  ;;  %v4996_v22 = vmul.f32 %v11940_v49, %v15803_v21 }
 0xc18   : > { %v5795_v55 = vpop.permute.xlu1 %5794  ;;  %v4997_v43 = vmul.f32 %v11942_v24, %v15801_v34 }
 0xc19   : > { %v5789_v45 = vpop.permute.xlu0 %5788  ;;  %11084 = vmatprep.mubr.f32.mxu1 %v4996_v22 }
 0xc1a   : > { %11085 = vmatmul.mubr.f32.gmra.mxu1 %v4997_v43 }
 0xc1b   : > { %11150 = vmatpush3.xpose.msk.msra.mxu1 %vm1200_vm0, %v5799_v29 }
 0xc1c   : > { %11151 = vmatprep.subr.msk.mxu1 %vm1200_vm0, %v5797_v59  ;;  %v5791_v13 = vpop.permute.xlu1 %5790 }
 0xc1d   : > { %v5785_v23 = vpop.permute.xlu0 %5784 }
 0xc1f   : > { %11152 = vmatpush3.xpose.msk.msra.mxu1 %vm1200_vm0, %v5797_v59 }
 0xc20   : > { %11153 = vmatprep.subr.msk.mxu1 %vm1200_vm0, %v5795_v55  ;;  %v5787_v52 = vpop.permute.xlu1 %5786 }
 0xc21   : > { %v5781_v51 = vpop.permute.xlu0 %5780 }
 0xc23   : > { %11154 = vmatpush3.xpose.msk.msra.mxu1 %vm1200_vm0, %v5795_v55 }
 0xc24   : > { %11155 = vmatprep.subr.msk.mxu1 %vm1200_vm0, %v5793_v19  ;;  %v5783_v21 = vpop.permute.xlu1 %5782 }
 0xc25   : > { %v5777_v34 = vpop.permute.xlu0 %5776 }
 0xc27   : > { %11156 = vmatpush3.xpose.msk.msra.mxu1 %vm1200_vm0, %v5793_v19 }
 0xc28   : > { %11157 = vmatprep.subr.msk.mxu1 %vm1200_vm0, %v5791_v13  ;;  %v5779_v46 = vpop.permute.xlu1 %5778 }
 0xc29   : > { %v5743_v57 = vpop.permute.xlu0 %5742 }
 0xc2a   : > { %11175 = vmatprep.mubr.msk.f32.mxu1 %vm1200_vm0, %v5743_v57 }
 0xc2b   : > { %11158 = vmatpush3.xpose.msk.msra.mxu1 %vm1200_vm0, %v5791_v13 }
 0xc2c   : > { %11159 = vmatprep.subr.msk.mxu1 %vm1200_vm0, %v5789_v45  ;;  %v5775_v14 = vpop.permute.xlu1 %5774 }
 0xc2d   : > { %v6078_v38 = vpop.permute.xlu0 %6077 }
 0xc2e   : > { %11199 = vmatprep.subr.msk.mxu0 %vm1200_vm0, %v6078_v38 }
 0xc2f   : > { %11200 = vmatpush3.xpose.msk.msra.mxu0 %vm1200_vm0, %v6078_v38  ;;  %11160 = vmatpush3.xpose.msk.msra.mxu1 %vm1200_vm0, %v5789_v45 }
 0xc30   : > { %11161 = vmatprep.subr.msk.mxu1 %vm1200_vm0, %v5787_v52  ;;  %v5745_v7 = vpop.permute.xlu1 %5744 }
 0xc31   : > { %v5747_v36 = vpop.permute.xlu0 %5746 }
 0xc33   : > { %11162 = vmatpush3.xpose.msk.msra.mxu1 %vm1200_vm0, %v5787_v52 }
 0xc34   : > { %11163 = vmatprep.subr.msk.mxu1 %vm1200_vm0, %v5785_v23  ;;  %v6076_v35 = vpop.permute.xlu1 %6075 }
 0xc35   : > { %v6074_v37 = vpop.permute.xlu0 %6073  ;;  %11201 = vmatprep.subr.msk.mxu0 %vm1200_vm0, %v6076_v35 }
 0xc36   : > { %11202 = vmatpush3.xpose.msk.msra.mxu0 %vm1200_vm0, %v6076_v35 }
 0xc37   : > { %11164 = vmatpush3.xpose.msk.msra.mxu1 %vm1200_vm0, %v5785_v23  ;;  %11203 = vmatprep.subr.msk.mxu0 %vm1200_vm0, %v6074_v37 }
 0xc38   : > { %11165 = vmatprep.subr.msk.mxu1 %vm1200_vm0, %v5783_v21  ;;  %v5749_v12 = vpop.permute.xlu1 %5748 }
 0xc39   : > { %v5751_v9 = vpop.permute.xlu0 %5750 }
 0xc3a   : > { %11204 = vmatpush3.xpose.msk.msra.mxu0 %vm1200_vm0, %v6074_v37 }
 0xc3b   : > { %11166 = vmatpush3.xpose.msk.msra.mxu1 %vm1200_vm0, %v5783_v21 }
 0xc3c   : > { %11167 = vmatprep.subr.msk.mxu1 %vm1200_vm0, %v5781_v51  ;;  %v6072_v0 = vpop.permute.xlu1 %6071 }
 0xc3d   : > { %v6070_v28 = vpop.permute.xlu0 %6069  ;;  %11205 = vmatprep.subr.msk.mxu0 %vm1200_vm0, %v6072_v0 }
 0xc3e   : > { %11206 = vmatpush3.xpose.msk.msra.mxu0 %vm1200_vm0, %v6072_v0 }
 0xc3f   : > { %11168 = vmatpush3.xpose.msk.msra.mxu1 %vm1200_vm0, %v5781_v51  ;;  %11207 = vmatprep.subr.msk.mxu0 %vm1200_vm0, %v6070_v28 }
 0xc40   : > { %11169 = vmatprep.subr.msk.mxu1 %vm1200_vm0, %v5779_v46  ;;  %v5753_v25 = vpop.permute.xlu1 %5752 }
 0xc41   : > { %v5755_v27 = vpop.permute.xlu0 %5754 }
 0xc42   : > { %11208 = vmatpush3.xpose.msk.msra.mxu0 %vm1200_vm0, %v6070_v28 }
 0xc43   : > { %11170 = vmatpush3.xpose.msk.msra.mxu1 %vm1200_vm0, %v5779_v46 }
 0xc44   : > { %11171 = vmatprep.subr.msk.mxu1 %vm1200_vm0, %v5777_v34  ;;  %v6068_v26 = vpop.permute.xlu1 %6067 }
 0xc45   : > { %v6066_v2 = vpop.permute.xlu0 %6065  ;;  %11209 = vmatprep.subr.msk.mxu0 %vm1200_vm0, %v6068_v26 }
 0xc46   : > { %11210 = vmatpush3.xpose.msk.msra.mxu0 %vm1200_vm0, %v6068_v26 }
 0xc47   : > { %11172 = vmatpush3.xpose.msk.msra.mxu1 %vm1200_vm0, %v5777_v34  ;;  %11211 = vmatprep.subr.msk.mxu0 %vm1200_vm0, %v6066_v2 }
 0xc48   : > { %11173 = vmatprep.subr.msk.mxu1 %vm1200_vm0, %v5775_v14  ;;  %v5757_v6 = vpop.permute.xlu1 %5756 }
 0xc49   : > { %v5759_v61 = vpop.permute.xlu0 %5758 }
 0xc4a   : > { %11212 = vmatpush3.xpose.msk.msra.mxu0 %vm1200_vm0, %v6066_v2 }
 0xc4b   : > { %11174 = vmatpush3.xpose.msk.msra.mxu1 %vm1200_vm0, %v5775_v14 }
 0xc4c   : > { %v6064_v16 = vpop.permute.xlu1 %6063 }
 0xc4d   : > { %v6062_v59 = vpop.permute.xlu0 %6061  ;;  %11213 = vmatprep.subr.msk.mxu0 %vm1200_vm0, %v6064_v16 }
 0xc4e   : > { %11176 = vmatmul.mubr.msk.f32.vlgmr.msra.gmra.mxu1 %vm1200_vm0, %v5745_v7  ;;  %11214 = vmatpush3.xpose.msk.msra.mxu0 %vm1200_vm0, %v6064_v16 }
 0xc4f   : > { %11178 = vmatprep.mubr.msk.f32.mxu1 %vm1200_vm0, %v5747_v36  ;;  %11215 = vmatprep.subr.msk.mxu0 %vm1200_vm0, %v6062_v59 }
 0xc50   : > { %v5761_v29 = vpop.permute.xlu1 %5760 }
 0xc51   : > { %v5763_v19 = vpop.permute.xlu0 %5762 }
 0xc52   : > { %11179 = vmatmul.mubr.msk.f32.gmra.mxu1 %vm1200_vm0, %v5749_v12  ;;  %11216 = vmatpush3.xpose.msk.msra.mxu0 %vm1200_vm0, %v6062_v59 }
 0xc53   : > { %11181 = vmatprep.mubr.msk.f32.mxu1 %vm1200_vm0, %v5751_v9 }
 0xc54   : > { %v6060_v49 = vpop.permute.xlu1 %6059 }
 0xc55   : > { %v6058_v24 = vpop.permute.xlu0 %6057  ;;  %11217 = vmatprep.subr.msk.mxu0 %vm1200_vm0, %v6060_v49 }
 0xc56   : > { %11182 = vmatmul.mubr.msk.f32.gmra.mxu1 %vm1200_vm0, %v5753_v25  ;;  %11218 = vmatpush3.xpose.msk.msra.mxu0 %vm1200_vm0, %v6060_v49 }
 0xc57   : > { %11184 = vmatprep.mubr.msk.f32.mxu1 %vm1200_vm0, %v5755_v27  ;;  %11219 = vmatprep.subr.msk.mxu0 %vm1200_vm0, %v6058_v24 }
 0xc58   : > { %v5765_v22 = vpop.permute.xlu1 %5764 }
 0xc59   : > { %v5767_v55 = vpop.permute.xlu0 %5766 }
 0xc5a   : > { %11185 = vmatmul.mubr.msk.f32.gmra.mxu1 %vm1200_vm0, %v5757_v6  ;;  %11220 = vmatpush3.xpose.msk.msra.mxu0 %vm1200_vm0, %v6058_v24 }
 0xc5b   : > { %11187 = vmatprep.mubr.msk.f32.mxu1 %vm1200_vm0, %v5759_v61 }
 0xc5c   : > { %v6056_v45 = vpop.permute.xlu1 %6055 }
 0xc5d   : > { %v6054_v43 = vpop.permute.xlu0 %6053  ;;  %11221 = vmatprep.subr.msk.mxu0 %vm1200_vm0, %v6056_v45 }
 0xc5e   : > { %11188 = vmatmul.mubr.msk.f32.gmra.mxu1 %vm1200_vm0, %v5761_v29  ;;  %11222 = vmatpush3.xpose.msk.msra.mxu0 %vm1200_vm0, %v6056_v45 }
 0xc5f   : > { %11190 = vmatprep.mubr.msk.f32.mxu1 %vm1200_vm0, %v5763_v19  ;;  %11223 = vmatprep.subr.msk.mxu0 %vm1200_vm0, %v6054_v43 }
 0xc60   : > { %v5769_v13 = vpop.permute.xlu1 %5768 }
 0xc61   : > { %v5771_v23 = vpop.permute.xlu0 %5770 }
 0xc62   : > { %11191 = vmatmul.mubr.msk.f32.gmra.mxu1 %vm1200_vm0, %v5765_v22  ;;  %11224 = vmatpush3.xpose.msk.msra.mxu0 %vm1200_vm0, %v6054_v43 }
 0xc63   : > { %11193 = vmatprep.mubr.msk.f32.mxu1 %vm1200_vm0, %v5767_v55 }
 0xc64   : > { %v6052_v52 = vpop.permute.xlu1 %6051 }
 0xc65   : > { %11225 = vmatprep.subr.msk.mxu0 %vm1200_vm0, %v6052_v52  ;;  %v6050_v51 = vpop.permute.xlu0 %6049 }
 0xc66   : > { %11194 = vmatmul.mubr.msk.f32.gmra.mxu1 %vm1200_vm0, %v5769_v13  ;;  %11226 = vmatpush3.xpose.msk.msra.mxu0 %vm1200_vm0, %v6052_v52 }
 0xc67   : > { %11196 = vmatprep.mubr.msk.f32.mxu1 %vm1200_vm0, %v5771_v23  ;;  %11227 = vmatprep.subr.msk.mxu0 %vm1200_vm0, %v6050_v51 }
 0xc68   : > { %v5773_v21 = vpop.permute.xlu1 %5772 }
 0xc69   : > { %v6016_v26 = vpop.permute.xlu0 %6015 }
 0xc6a   : > { %11197 = vmatmul.mubr.msk.f32.gmra.mxu1 %vm1200_vm0, %v5773_v21  ;;  %11228 = vmatpush3.xpose.msk.msra.mxu0 %vm1200_vm0, %v6050_v51 }
 0xc6c   : > { %v6048_v34 = vpop.permute.xlu1 %6047 }
 0xc6d   : > { %11229 = vmatprep.subr.msk.mxu0 %vm1200_vm0, %v6048_v34  ;;  %v6020_v6 = vpop.permute.xlu0 %6019 }
 0xc6e   : > { %11230 = vmatpush3.xpose.msk.msra.mxu0 %vm1200_vm0, %v6048_v34  ;;  %v12247_v34 = vld [vmem:[%s12856_s25 + $0x8] sm:$0xff] }
 0xc70   : > { %v6018_v2 = vpop.permute.xlu1 %6017 }
 0xc71   : > { %v6024_v59 = vpop.permute.xlu0 %6023 }
 0xc74   : > { %v6022_v61 = vpop.permute.xlu1 %6021 }
 0xc75   : > { %v6028_v49 = vpop.permute.xlu0 %6027 }
 0xc78   : > { %v6026_v19 = vpop.permute.xlu1 %6025 }
 0xc79   : > { %v6032_v22 = vpop.permute.xlu0 %6031 }
 0xc7c   : > { %v6030_v24 = vpop.permute.xlu1 %6029 }
 0xc7d   : > { %v6036_v45 = vpop.permute.xlu0 %6035 }
 0xc80   : > { %v6034_v55 = vpop.permute.xlu1 %6033 }
 0xc81   : > { %v6040_v13 = vpop.permute.xlu0 %6039 }
 0xc84   : > { %v6038_v43 = vpop.permute.xlu1 %6037 }
 0xc85   : > { %v6044_v52 = vpop.permute.xlu0 %6043 }
 0xc88   : > { %v6042_v23 = vpop.permute.xlu1 %6041 }
 0xc8c   : > { %v6046_v51 = vpop.permute.xlu1 %6045 }
 0xc9c   : > { %v11065_v46 = vpop.f32.mrf.mxu1 }
 0xc9e   : > { %v5305_v57 = vpop.f32.mrf.mxu1 }
 0xc9f   : > { %11119 = vmatprep.mubr.msk.f32.mxu0 %vm1200_vm0, %v5305_v57 }
 0xca0   : > { %v11068_v14 = vpop.f32.mrf.mxu1  ;;  %11120 = vmatmul.mubr.msk.f32.gmra.mxu0 %vm1200_vm0, %v11065_v46 }
 0xca2   : > { %v5315_v38 = vpop.f32.mrf.mxu1 }
 0xca3   : > { %11122 = vmatprep.mubr.msk.f32.mxu0 %vm1200_vm0, %v5315_v38 }
 0xca4   : > { %v11071_v7 = vpop.f32.mrf.mxu1  ;;  %11123 = vmatmul.mubr.msk.f32.gmra.mxu0 %vm1200_vm0, %v11068_v14  ;;  %v12248_v14 = vld [vmem:[%s12856_s25] sm:$0xff] }
 0xca6   : > { %v5325_v36 = vpop.f32.mrf.mxu1 }
 0xca7   : > { %11125 = vmatprep.mubr.msk.f32.mxu0 %vm1200_vm0, %v5325_v36 }
 0xca8   : > { %v11074_v35 = vpop.f32.mrf.mxu1  ;;  %11126 = vmatmul.mubr.msk.f32.gmra.mxu0 %vm1200_vm0, %v11071_v7 }
 0xcaa   : > { %v5335_v37 = vpop.f32.mrf.mxu1 }
 0xcab   : > { %11128 = vmatprep.mubr.msk.f32.mxu0 %vm1200_vm0, %v5335_v37 }
 0xcac   : > { %v11077_v12 = vpop.f32.mrf.mxu1  ;;  %11129 = vmatmul.mubr.msk.f32.gmra.mxu0 %vm1200_vm0, %v11074_v35  ;;  %v12249_v35 = vld [vmem:[%s12856_s25 + $0x10] sm:$0xff] }
 0xcae   : > { %v5345_v9 = vpop.f32.mrf.mxu1 }
 0xcaf   : > { %11131 = vmatprep.mubr.msk.f32.mxu0 %vm1200_vm0, %v5345_v9 }
 0xcb0   : > { %v11080_v0 = vpop.f32.mrf.mxu1  ;;  %11132 = vmatmul.mubr.msk.f32.gmra.mxu0 %vm1200_vm0, %v11077_v12 }
 0xcb2   : > { %v5355_v28 = vpop.f32.mrf.mxu1 }
 0xcb3   : > { %11134 = vmatprep.mubr.msk.f32.mxu0 %vm1200_vm0, %v5355_v28 }
 0xcb4   : > { %v11083_v25 = vpop.f32.mrf.mxu1  ;;  %11135 = vmatmul.mubr.msk.f32.gmra.mxu0 %vm1200_vm0, %v11080_v0  ;;  %v12250_v0 = vld [vmem:[%s12856_s25 + $0x18] sm:$0xff] }
 0xcb6   : > { %v5365_v27 = vpop.f32.mrf.mxu1 }
 0xcb7   : > { %11137 = vmatprep.mubr.msk.f32.mxu0 %vm1200_vm0, %v5365_v27 }
 0xcb8   : > { %11138 = vmatmul.mubr.msk.f32.gmra.mxu0 %vm1200_vm0, %v11083_v25  ;;  %v12251_v25 = vld [vmem:[%s12856_s25 + $0x20] sm:$0xff] }
 0xcda   : > { %v11086_v16 = vpop.f32.mrf.mxu1 }
 0xcdc   : > { %v5375_v29 = vpop.f32.mrf.mxu1 }
 0xcdd   : > { %11140 = vmatprep.mubr.msk.f32.mxu0 %vm1200_vm0, %v5375_v29 }
 0xcde   : > { %11141 = vmatmul.mubr.msk.f32.gmra.mxu0 %vm1200_vm0, %v11086_v16  ;;  %v12253_v16 = vld [vmem:[%s12856_s25 + $0x30] sm:$0xff] }
 0xcdf   : > { %11231 = vmatprep.mubr.msk.f32.mxu0 %vm1200_vm0, %v6016_v26 }
 0xce2   : > { %11232 = vmatmul.mubr.msk.f32.vlgmr.msra.gmra.mxu0 %vm1200_vm0, %v6018_v2 }
 0xce3   : > { %11234 = vmatprep.mubr.msk.f32.mxu0 %vm1200_vm0, %v6020_v6  ;;  %v12252_v6 = vld [vmem:[%s12856_s25 + $0x28] sm:$0xff] }
 0xce6   : > { %11235 = vmatmul.mubr.msk.f32.gmra.mxu0 %vm1200_vm0, %v6022_v61 }
 0xce7   : > { %11237 = vmatprep.mubr.msk.f32.mxu0 %vm1200_vm0, %v6024_v59 }
 0xcea   : > { %11238 = vmatmul.mubr.msk.f32.gmra.mxu0 %vm1200_vm0, %v6026_v19 }
 0xceb   : > { %11240 = vmatprep.mubr.msk.f32.mxu0 %vm1200_vm0, %v6028_v49  ;;  %v12254_v49 = vld [vmem:[%s12856_s25 + $0x38] sm:$0xff] }
 0xcee   : > { %11241 = vmatmul.mubr.msk.f32.gmra.mxu0 %vm1200_vm0, %v6030_v24 }
 0xcef   : > { %11243 = vmatprep.mubr.msk.f32.mxu0 %vm1200_vm0, %v6032_v22  ;;  %v12255_v22 = vld [vmem:[%s12856_s25 + $0x40] sm:$0xff] }
 0xcf2   : > { %11244 = vmatmul.mubr.msk.f32.gmra.mxu0 %vm1200_vm0, %v6034_v55 }
 0xcf3   : > { %11246 = vmatprep.mubr.msk.f32.mxu0 %vm1200_vm0, %v6036_v45 }
 0xcf6   : > { %11247 = vmatmul.mubr.msk.f32.gmra.mxu0 %vm1200_vm0, %v6038_v43 }
 0xcf7   : > { %11249 = vmatprep.mubr.msk.f32.mxu0 %vm1200_vm0, %v6040_v13  ;;  %v12256_v13 = vld [vmem:[%s12856_s25 + $0x48] sm:$0xff] }
 0xcfa   : > { %11250 = vmatmul.mubr.msk.f32.gmra.mxu0 %vm1200_vm0, %v6042_v23 }
 0xcfb   : > { %11252 = vmatprep.mubr.msk.f32.mxu0 %vm1200_vm0, %v6044_v52  ;;  %v12257_v52 = vld [vmem:[%s12856_s25 + $0x50] sm:$0xff] }
 0xcfe   : > { %11253 = vmatmul.mubr.msk.f32.gmra.mxu0 %vm1200_vm0, %v6046_v51 }
 0xd0e   : > { %v11177_v21 = vpop.f32.mrf.mxu1 }
 0xd0f   : > { %v16116_v46 = vadd.f32 %v12247_v34, %v11177_v21 }
 0xd10   : > { %v5936_v57 = vpop.f32.mrf.mxu1 }
 0xd11   : > { %v16119_v38 = vadd.f32 %v12248_v14, %v5936_v57  ;;  %6290 = vmax.xlane.f32.xlu1 %v16116_v46  ;;  %v12258_v57 = vld [vmem:[%s12856_s25 + $0x58] sm:$0xff] }
 0xd12   : > { %v11180_v7 = vpop.f32.mrf.mxu1 }
 0xd13   : > { %6288 = vmax.xlane.f32.xlu0 %v16119_v38  ;;  %v16128_v28 = vadd.f32 %v12250_v0, %v11180_v7  ;;  %v12259_v7 = vld [vmem:[%s12856_s25 + $0x60] sm:$0xff] }
 0xd14   : > { %v5946_v36 = vpop.f32.mrf.mxu1 }
 0xd15   : > { %v16124_v37 = vadd.f32 %v12249_v35, %v5946_v36 }
 0xd16   : > { %v11183_v12 = vpop.f32.mrf.mxu1 }
 0xd17   : > { %6292 = vmax.xlane.f32.xlu0 %v16124_v37  ;;  %v16136_v61 = vadd.f32 %v12252_v6, %v11183_v12 }
 0xd18   : > { %v5956_v9 = vpop.f32.mrf.mxu1 }
 0xd19   : > { %v16131_v27 = vadd.f32 %v12251_v25, %v5956_v9  ;;  %v12260_v9 = vld [vmem:[%s12856_s25 + $0x68] sm:$0xff]  ;;  %v12261_v25 = vld [vmem:[%s12856_s25 + $0x70] sm:$0xff] }
 0xd1a   : > { %v11186_v26 = vpop.f32.mrf.mxu1 }
 0xd1b   : > { %6294 = vmax.xlane.f32.xlu0 %v16128_v28  ;;  %6296 = vmax.xlane.f32.xlu1 %v16131_v27  ;;  %v16144_v24 = vadd.f32 %v12254_v49, %v11186_v26 }
 0xd1c   : > { %v5966_v2 = vpop.f32.mrf.mxu1 }
 0xd1d   : > { %v16139_v59 = vadd.f32 %v12253_v16, %v5966_v2  ;;  %v12262_v2 = vld [vmem:[%s12856_s25 + $0x78] sm:$0xff]  ;;  %v16179_v16 = vpop.f32.mrf.mxu0 }
 0xd1e   : > { %v11189_v29 = vpop.f32.mrf.mxu1  ;;  %18697 = vst [vmem:[#allocation169_spill] sm:$0xff] %v16179_v16 }
 0xd1f   : > { %6298 = vmax.xlane.f32.xlu0 %v16136_v61  ;;  %6300 = vmax.xlane.f32.xlu1 %v16139_v59  ;;  %v16152_v23 = vadd.f32 %v12256_v13, %v11189_v29  ;;  %v18698_v29 = vld [vmem:[#allocation136_spill] sm:$0xff] }
 0xd20   : > { %v5976_v19 = vpop.f32.mrf.mxu1  ;;  %v18702_v13 = vld [vmem:[#allocation132_spill] sm:$0xff] }
 0xd21   : > { %v16147_v55 = vadd.f32 %v12255_v22, %v5976_v19  ;;  %v18699_v19 = vld [vmem:[#allocation162_spill] sm:$0xff] }
 0xd22   : > { %v11192_v45 = vpop.f32.mrf.mxu1  ;;  %v4091_v49 = vadd.f32 %v18699_v19, %v18698_v29  ;;  %v18710_v19 = vld [vmem:[#allocation168_spill] sm:$0xff] }
 0xd23   : > { %6302 = vmax.xlane.f32.xlu0 %v16144_v24  ;;  %6304 = vmax.xlane.f32.xlu1 %v16147_v55  ;;  %v16160_v14 = vadd.f32 %v12258_v57, %v11192_v45 }
 0xd24   : > { %v5986_v43 = vpop.f32.mrf.mxu1 }
 0xd25   : > { %v16155_v51 = vadd.f32 %v12257_v52, %v5986_v43  ;;  %v18703_v52 = vld [vmem:[#allocation164_spill] sm:$0xff] }
 0xd26   : > { %v11195_v21 = vpop.f32.mrf.mxu1 }
 0xd27   : > { %6306 = vmax.xlane.f32.xlu0 %v16152_v23  ;;  %6308 = vmax.xlane.f32.xlu1 %v16155_v51  ;;  %v16168_v0 = vadd.f32 %v12260_v9, %v11195_v21  ;;  %v4101_v21 = vadd.f32 %v18703_v52, %v18702_v13  ;;  %v18714_v52 = vld [vmem:[#allocation171_spill] sm:$0xff] }
 0xd28   : > { %v5996_v34 = vpop.f32.mrf.mxu1 }
 0xd29   : > { %v16163_v36 = vadd.f32 %v12259_v7, %v5996_v34 }
 0xd2a   : > { %v11198_v35 = vpop.f32.mrf.mxu1 }
 0xd2b   : > { %6310 = vmax.xlane.f32.xlu0 %v16160_v14  ;;  %6312 = vmax.xlane.f32.xlu1 %v16163_v36  ;;  %v16176_v6 = vadd.f32 %v12262_v2, %v11198_v35  ;;  %v18706_v35 = vld [vmem:[#allocation166_spill] sm:$0xff] }
 0xd2c   : > { %v6006_v12 = vpop.f32.mrf.mxu1 }
 0xd2d   : > { %v16171_v26 = vadd.f32 %v12261_v25, %v6006_v12  ;;  %v18707_v12 = vld [vmem:[#allocation115_spill] sm:$0xff] }
 0xd2e   : > { %v4111_v9 = vadd.f32 %v18707_v12, %v18706_v35  ;;  %v18718_v12 = vld [vmem:[#allocation173_spill] sm:$0xff] }
 0xd2f   : > { %6314 = vmax.xlane.f32.xlu0 %v16168_v0  ;;  %6316 = vmax.xlane.f32.xlu1 %v16171_v26 }
 0xd33   : > { %6318 = vmax.xlane.f32.xlu0 %v16176_v6 }
 0xd60   : > { %v11121_v22 = vpop.f32.mrf.mxu0 }
 0xd61   : > { %v16183_v45 = vadd.f32 %v11121_v22, %v4091_v49  ;;  %v18711_v49 = vld [vmem:[#allocation113_spill] sm:$0xff] }
 0xd62   : > { %v16185_v43 = vpop.f32.mrf.mxu0  ;;  %v4121_v22 = vadd.f32 %v18711_v49, %v18710_v19  ;;  %v18722_v49 = vld [vmem:[#allocation175_spill] sm:$0xff] }
 0xd63   : > { %18700 = vst [vmem:[#allocation55_spill] sm:$0xff] %v16183_v45  ;;  %18701 = vst [vmem:[#allocation60_spill] sm:$0xff] %v16185_v43 }
 0xd64   : > { %v11124_v34 = vpop.f32.mrf.mxu0 }
 0xd65   : > { %v16189_v57 = vadd.f32 %v11124_v34, %v4101_v21  ;;  %v18715_v21 = vld [vmem:[#allocation110_spill] sm:$0xff] }
 0xd66   : > { %v16191_v7 = vpop.f32.mrf.mxu0  ;;  %v4131_v34 = vadd.f32 %v18715_v21, %v18714_v52 }
 0xd67   : > { %18704 = vst [vmem:[#allocation56_spill] sm:$0xff] %v16189_v57  ;;  %18705 = vst [vmem:[#allocation63_spill] sm:$0xff] %v16191_v7 }
 0xd68   : > { %v11127_v25 = vpop.f32.mrf.mxu0 }
 0xd69   : > { %v16195_v2 = vadd.f32 %v11127_v25, %v4111_v9  ;;  %v18719_v9 = vld [vmem:[#allocation153_spill] sm:$0xff] }
 0xd6a   : > { %v16197_v29 = vpop.f32.mrf.mxu0  ;;  %v4141_v25 = vadd.f32 %v18719_v9, %v18718_v12 }
 0xd6b   : > { %18708 = vst [vmem:[#allocation66_spill] sm:$0xff] %v16195_v2  ;;  %18709 = vst [vmem:[#allocation62_spill] sm:$0xff] %v16197_v29 }
 0xd6c   : > { %v11130_v45 = vpop.f32.mrf.mxu0 }
 0xd6d   : > { %v16201_v43 = vadd.f32 %v11130_v45, %v4121_v22  ;;  %v18723_v22 = vld [vmem:[#allocation148_spill] sm:$0xff] }
 0xd6e   : > { %v16203_v13 = vpop.f32.mrf.mxu0 }
 0xd6f   : > { %18712 = vst [vmem:[#allocation58_spill] sm:$0xff] %v16201_v43  ;;  %18713 = vst [vmem:[#allocation44_spill] sm:$0xff] %v16203_v13  ;;  %v4151_v43 = vadd.f32 %v18723_v22, %v18722_v49 }
 0xd70   : > { %v11133_v57 = vpop.f32.mrf.mxu0 }
 0xd71   : > { %v16207_v7 = vadd.f32 %v11133_v57, %v4131_v34  ;;  %v18726_v34 = vld [vmem:[#allocation177_spill] sm:$0xff] }
 0xd72   : > { %v16209_v35 = vpop.f32.mrf.mxu0 }
 0xd73   : > { %18716 = vst [vmem:[#allocation51_spill] sm:$0xff] %v16207_v7  ;;  %18717 = vst [vmem:[#allocation45_spill] sm:$0xff] %v16209_v35  ;;  %v18727_v7 = vld [vmem:[#allocation144_spill] sm:$0xff] }
 0xd74   : > { %v11136_v2 = vpop.f32.mrf.mxu0  ;;  %v4161_v35 = vadd.f32 %v18727_v7, %v18726_v34  ;;  %v12265_v7 = vld [vmem:[%s12856_s25 + $0x98] sm:$0xff] }
 0xd75   : > { %v16213_v19 = vadd.f32 %v11136_v2, %v4141_v25 }
 0xd76   : > { %v16215_v45 = vpop.f32.mrf.mxu0 }
 0xd77   : > { %18720 = vst [vmem:[#allocation43_spill] sm:$0xff] %v16213_v19  ;;  %18721 = vst [vmem:[#allocation41_spill] sm:$0xff] %v16215_v45  ;;  %v12263_v19 = vld [vmem:[%s12856_s25 + $0x88] sm:$0xff] }
 0xd78   : > { %v11139_v52 = vpop.f32.mrf.mxu0 }
 0xd79   : > { %v16219_v21 = vadd.f32 %v11139_v52, %v4151_v43  ;;  %v12264_v43 = vld [vmem:[%s12856_s25 + $0x80] sm:$0xff] }
 0xd7a   : > { %v16221_v57 = vpop.f32.mrf.mxu0 }
 0xd7b   : > { %18724 = vst [vmem:[#allocation37_spill] sm:$0xff] %v16219_v21  ;;  %18725 = vst [vmem:[#allocation32_spill] sm:$0xff] %v16221_v57 }
 0xd9e   : > { %v11142_v12 = vpop.f32.mrf.mxu0 }
 0xd9f   : > { %v16225_v9 = vadd.f32 %v11142_v12, %v4161_v35  ;;  %v12266_v12 = vld [vmem:[%s12856_s25 + $0x90] sm:$0xff] }
 0xda0   : > { %v16227_v2 = vpop.f32.mrf.mxu0 }
 0xda1   : > { %18728 = vst [vmem:[#allocation30_spill] sm:$0xff] %v16225_v9  ;;  %18729 = vst [vmem:[#allocation28_spill] sm:$0xff] %v16227_v2 }
 0xda2   : > { %v11233_v25 = vpop.f32.mrf.mxu0 }
 0xda3   : > { %v16230_v45 = vadd.f32 %v12263_v19, %v11233_v25  ;;  %v12267_v25 = vld [vmem:[%s12856_s25 + $0xa8] sm:$0xff] }
 0xda4   : > { %v6209_v49 = vpop.f32.mrf.mxu0 }
 0xda5   : > { %6322 = vmax.xlane.f32.xlu0 %v16230_v45  ;;  %v16234_v22 = vadd.f32 %v12264_v43, %v6209_v49  ;;  %v12268_v43 = vld [vmem:[%s12856_s25 + $0xa0] sm:$0xff] }
 0xda6   : > { %v11236_v52 = vpop.f32.mrf.mxu0 }
 0xda7   : > { %v16237_v34 = vadd.f32 %v12265_v7, %v11236_v52  ;;  %6320 = vmax.xlane.f32.xlu1 %v16234_v22  ;;  %v18730_v52 = vld [vmem:[#allocation42_spill] sm:$0xff]  ;;  %v18731_v7 = vld [vmem:[#allocation53_spill] sm:$0xff] }
 0xda8   : > { %v6219_v35 = vpop.f32.mrf.mxu0 }
 0xda9   : > { %v16241_v9 = vadd.f32 %v12266_v12, %v6219_v35  ;;  %6326 = vmax.xlane.f32.xlu0 %v16237_v34  ;;  %v6289_v35 = vpop.xlane.xlu0 %6288 }
 0xdaa   : > { %v11239_v19 = vpop.f32.mrf.mxu0  ;;  %v6352_v12 = vsub.f32 %v16119_v38, %v6289_v35  ;;  %v12270_v38 = vld [vmem:[%s12856_s25 + $0xb8] sm:$0xff] }
 0xdab   : > { %v16245_v2 = vadd.f32 %v12267_v25, %v11239_v19  ;;  %6324 = vmax.xlane.f32.xlu1 %v16241_v9  ;;  %v6291_v19 = vpop.xlane.xlu1 %6290 }
 0xdac   : > { %v6229_v49 = vpop.f32.mrf.mxu0  ;;  %v6353_v25 = vsub.f32 %v16116_v46, %v6291_v19  ;;  %v18734_v46 = vld [vmem:[#allocation40_spill] sm:$0xff]  ;;  %v18737_v19 = vld [vmem:[#allocation95_spill] sm:$0xff] }
 0xdad   : > { %v16249_v21 = vadd.f32 %v12268_v43, %v6229_v49  ;;  %6330 = vmax.xlane.f32.xlu0 %v16245_v2  ;;  %v6384_v49 = vmul.f32 1.442695, %v6352_v12  ;;  %v18735_v12 = vld [vmem:[#allocation47_spill] sm:$0xff] }
 0xdae   : > { %v6386_v43 = vmul.f32 1.442695, %v6353_v25  ;;  %v11242_v57 = vpop.f32.mrf.mxu0 }
 0xdaf   : > { %6328 = vmax.xlane.f32.xlu1 %v16249_v21  ;;  %11943 = vpow2.f32 %v6384_v49  ;;  %v16269_v35 = vadd.f32 %v12270_v38, %v11242_v57 }
 0xdb0   : > { %11945 = vpow2.f32 %v6386_v43  ;;  %v6239_v13 = vpop.f32.mrf.mxu0  ;;  %v6297_v43 = vpop.xlane.xlu1 %6296 }
 0xdb1   : > { %18733 = vst [vmem:[#allocation29_spill] sm:$0xff] %v16269_v35 }
 0xdb4   : > { %v16285_v17 = vpop.xlane.xlu1 %6300 }
 0xdbc   : > { %v16259_v29 = vpop.eup %11943 }
 0xdc0   : > { %6606 = vrot.lane.b32.xlu1 %v18730_v52, %s12568_s26  ;;  %v16262_v52 = vadd.f32 %v12269_v10, %v6239_v13  ;;  %v18736_v10 = vld [vmem:[#allocation36_spill] sm:$0xff]  ;;  %v6293_v13 = vpop.xlane.xlu0 %6292 }
 0xdc1   : > { %v6354_v38 = vsub.f32 %v16124_v37, %v6293_v13  ;;  %v12272_v37 = vld [vmem:[%s12856_s25 + $0xc8] sm:$0xff] }
 0xdc2   : > { %18732 = vst [vmem:[#allocation27_spill] sm:$0xff] %v16262_v52 }
 0xdc3   : > { %6604 = vrot.lane.b32.xlu0 %v18731_v7, %s12568_s26  ;;  %v16266_v7 = vpop.eup %11945  ;;  %v6388_v11 = vmul.f32 1.442695, %v6354_v38 }
 0xdc4   : > { %v6295_v57 = vpop.xlane.xlu0 %6294 }
 0xdc5   : > { %v6355_v49 = vsub.f32 %v16128_v28, %v6295_v57  ;;  %v16292_v28 = vpop.xlane.xlu1 %6304 }
 0xdc8   : > { %v6299_v25 = vpop.xlane.xlu0 %6298 }
 0xdcc   : > { %v16283_v16 = vpop.xlane.xlu0 %6302 }
 0xdd0   : > { %v16287_v50 = vpop.xlane.xlu0 %6306 }
 0xdd4   : > { %v16298_v57 = vpop.xlane.xlu0 %6310 }
 0xde2   : > { %6448 = vadd.xlane.f32.xlu0 %v16259_v29 }
 0xde4   : > { %6332 = vmax.xlane.f32.xlu1 %v16262_v52 }
 0xde6   : > { %6450 = vadd.xlane.f32.xlu0 %v16266_v7 }
 0xde8   : > { %6334 = vmax.xlane.f32.xlu1 %v16269_v35  ;;  %v12273_v35 = vld [vmem:[%s12856_s25 + $0xd0] sm:$0xff] }
 0xdf9   : > { %6602 = vrot.lane.b32.xlu1 %v18734_v46, %s12568_s26  ;;  %v6390_v46 = vmul.f32 1.442695, %v6355_v49  ;;  %v16301_v49 = vpop.xlane.xlu1 %6308 }
 0xdfb   : > { %11947 = vpow2.f32 %v6390_v46 }
 0xdfc   : > { %6600 = vrot.lane.b32.xlu0 %v18735_v12, %s12568_s26  ;;  %v11245_v12 = vpop.f32.mrf.mxu0  ;;  %11949 = vpow2.f32 %v6388_v11  ;;  %v16305_v11 = vpop.xlane.xlu0 %6314 }
 0xdfd   : > { %6598 = vrot.lane.b32.xlu1 %v18736_v10, %s12568_s26  ;;  %v16296_v13 = vadd.f32 %v12272_v37, %v11245_v12 }
 0xdfe   : > { %v6249_v10 = vpop.f32.mrf.mxu0 }
 0xdff   : > { %18739 = vst [vmem:[#allocation91_spill] sm:$0xff] %v16296_v13 }
 0xe00   : > { %v16313_v12 = vpop.xlane.xlu0 %6318 }
 0xe01   : > { %6596 = vrot.lane.b32.xlu1 %v18737_v19, %s12568_s26  ;;  %v12271_v19 = vld [vmem:[%s12856_s25 + $0xc0] sm:$0xff] }
 0xe02   : > { %v16290_v8 = vadd.f32 %v12271_v19, %v6249_v10  ;;  %v16311_v10 = vpop.xlane.xlu1 %6312 }
 0xe04   : > { %18738 = vst [vmem:[#allocation89_spill] sm:$0xff] %v16290_v8 }
 0xe06   : > { %v16315_v19 = vpop.xlane.xlu1 %6316 }
 0xe08   : > { %v16303_v38 = vpop.eup %11947 }
 0xe09   : > { %v16308_v46 = vpop.eup %11949 }
 0xe1b   : > { %6336 = vmax.xlane.f32.xlu0 %v16290_v8  ;;  %v6356_v8 = vsub.f32 %v16131_v27, %v6297_v43  ;;  %v18746_v43 = vld [vmem:[#allocation105_spill] sm:$0xff] }
 0xe1d   : > { %v6392_v1 = vmul.f32 1.442695, %v6356_v8 }
 0xe1f   : > { %6338 = vmax.xlane.f32.xlu0 %v16296_v13  ;;  %v18743_v13 = vld [vmem:[#allocation102_spill] sm:$0xff] }
 0xe23   : > { %6454 = vadd.xlane.f32.xlu0 %v16303_v38 }
 0xe25   : > { %6452 = vadd.xlane.f32.xlu1 %v16308_v46 }
 0xe2e   : > { %v16317_v37 = vpop.xlane.xlu0 %6322 }
 0xe30   : > { %v16319_v54 = vpop.xlane.xlu1 %6320 }
 0xe32   : > { %v16321_v5 = vpop.xlane.xlu0 %6326 }
 0xe34   : > { %v16323_v15 = vpop.xlane.xlu1 %6324 }
 0xe36   : > { %6594 = vrot.lane.b32.xlu1 %v18740_v20, %s12568_s26  ;;  %v16327_v18 = vpop.xlane.xlu0 %6330  ;;  %v6357_v20 = vsub.f32 %v16136_v61, %v6299_v25 }
 0xe38   : > { %v16329_v42 = vpop.xlane.xlu1 %6328  ;;  %v6394_v4 = vmul.f32 1.442695, %v6357_v20  ;;  %v18747_v20 = vld [vmem:[#allocation106_spill] sm:$0xff] }
 0xe39   : > { %6592 = vrot.lane.b32.xlu0 %v18741_v3, %s12568_s26  ;;  %v11248_v3 = vpop.f32.mrf.mxu0 }
 0xe3a   : > { %6590 = vrot.lane.b32.xlu1 %v18742_v32, %s12568_s26  ;;  %v6605_v41 = vpop.permute.xlu0 %6604  ;;  %11951 = vpow2.f32 %v6394_v4 }
 0xe3b   : > { %v6259_v32 = vpop.f32.mrf.mxu0  ;;  %11953 = vpow2.f32 %v6392_v1 }
 0xe3c   : > { %v6607_v63 = vpop.permute.xlu1 %6606  ;;  %v16340_v52 = vadd.f32 %v12273_v35, %v6259_v32  ;;  %v18745_v35 = vld [vmem:[#allocation104_spill] sm:$0xff] }
 0xe3d   : > { %11255 = vmatprep.subr.mxu1 %v6607_v63 }
 0xe3e   : > { %11256 = vmatpush3.msra.mxu1 %v6607_v63  ;;  %6588 = vrot.lane.b32.xlu1 %v18743_v13, %s12568_s26  ;;  %v12274_v63 = vld [vmem:[%s12856_s25 + $0xd8] sm:$0xff] }
 0xe3f   : > { %11257 = vmatprep.subr.mxu1 %v6605_v41  ;;  %v16344_v56 = vadd.f32 %v12274_v63, %v11248_v3 }
 0xe40   : > { %11258 = vmatpush3.msra.mxu1 %v6605_v41 }
 0xe41   : > { %18744 = vst [vmem:[#allocation131_spill] sm:$0xff] %v16344_v56 }
 0xe47   : > { %v16347_v41 = vpop.eup %11951 }
 0xe48   : > { %v16350_v27 = vpop.eup %11953 }
 0xe58   : > { %6340 = vmax.xlane.f32.xlu0 %v16340_v52 }
 0xe5c   : > { %6342 = vmax.xlane.f32.xlu0 %v16344_v56 }
 0xe60   : > { %6458 = vadd.xlane.f32.xlu0 %v16347_v41 }
 0xe62   : > { %6456 = vadd.xlane.f32.xlu1 %v16350_v27 }
 0xe6b   : > { %v6449_v4 = vpop.xlane.xlu0 %6448 }
 0xe6c   : > { %11955 = vrcp.f32 %v6449_v4  ;;  %v18748_v4 = vld [vmem:[#allocation107_spill] sm:$0xff] }
 0xe6d   : > { %v16353_v1 = vpop.xlane.xlu1 %6332 }
 0xe6f   : > { %v16355_v8 = vpop.xlane.xlu0 %6450 }
 0xe71   : > { %v16357_v61 = vpop.xlane.xlu1 %6334 }
 0xe73   : > { %6586 = vrot.lane.b32.xlu1 %v18745_v35, %s12568_s26  ;;  %v6601_v13 = vpop.permute.xlu0 %6600 }
 0xe75   : > { %v6603_v25 = vpop.permute.xlu1 %6602 }
 0xe76   : > { %6584 = vrot.lane.b32.xlu0 %v18746_v43, %s12568_s26  ;;  %11259 = vmatprep.subr.mxu1 %v6603_v25  ;;  %v6358_v43 = vsub.f32 %v16139_v59, %v16285_v17 }
 0xe77   : > { %6582 = vrot.lane.b32.xlu1 %v18747_v20, %s12568_s26  ;;  %11260 = vmatpush3.msra.mxu1 %v6603_v25  ;;  %v6359_v25 = vsub.f32 %v16144_v24, %v16283_v16  ;;  %v11251_v20 = vpop.f32.mrf.mxu0 }
 0xe78   : > { %11261 = vmatprep.subr.mxu1 %v6601_v13  ;;  %v6396_v56 = vmul.f32 1.442695, %v6358_v43 }
 0xe79   : > { %v11956_v3 = vpop.eup %11955  ;;  %v6599_v32 = vpop.permute.xlu1 %6598  ;;  %11262 = vmatpush3.msra.mxu1 %v6601_v13  ;;  %v6398_v13 = vmul.f32 1.442695, %v6359_v25  ;;  %v18751_v25 = vld [vmem:[#allocation109_spill] sm:$0xff] }
 0xe7a   : > { %11263 = vmatprep.subr.mxu1 %v6599_v32  ;;  %v6544_v63 = vmul.f32 %v11956_v3, %v16259_v29  ;;  %v6269_v29 = vpop.f32.mrf.mxu0  ;;  %v12275_v3 = vld [vmem:[%s12856_s25 + $0xe0] sm:$0xff] }
 0xe7b   : > { %6580 = vrot.lane.b32.xlu1 %v18748_v4, %s12568_s26  ;;  %11264 = vmatpush3.msra.mxu1 %v6599_v32  ;;  %11957 = vpow2.f32 %v6398_v13  ;;  %v16373_v4 = vadd.f32 %v12275_v3, %v6269_v29  ;;  %v12276_v32 = vld [vmem:[%s12856_s25 + $0xe8] sm:$0xff] }
 0xe7c   : > { %11287 = vmatprep.mubr.f32.mxu1 %v6544_v63  ;;  %11959 = vpow2.f32 %v6396_v56  ;;  %v16377_v63 = vadd.f32 %v12276_v32, %v11251_v20  ;;  %v18752_v13 = vld [vmem:[#allocation111_spill] sm:$0xff]  ;;  %v6360_v32 = vsub.f32 %v16147_v55, %v16292_v28  ;;  %v6364_v28 = vsub.f32 %v16163_v36, %v16311_v10  ;;  %v12277_v36 = vld [vmem:[%s12856_s25 + $0xf0] sm:$0xff] }
 0xe7d   : > { %v6597_v35 = vpop.permute.xlu1 %6596  ;;  %18749 = vst [vmem:[#allocation31_spill] sm:$0xff] %v16373_v4 }
 0xe7e   : > { %11265 = vmatprep.subr.mxu1 %v6597_v35  ;;  %18750 = vst [vmem:[#allocation35_spill] sm:$0xff] %v16377_v63 }
 0xe7f   : > { %11266 = vmatpush3.msra.mxu1 %v6597_v35 }
 0xe88   : > { %v16380_v24 = vpop.eup %11957 }
 0xe89   : > { %v16383_v17 = vpop.eup %11959 }
 0xe95   : > { %6344 = vmax.xlane.f32.xlu0 %v16373_v4  ;;  %v6400_v4 = vmul.f32 1.442695, %v6360_v32 }
 0xe97   : > { %11961 = vpow2.f32 %v6400_v4 }
 0xe99   : > { %6346 = vmax.xlane.f32.xlu0 %v16377_v63  ;;  %v6365_v63 = vsub.f32 %v16168_v0, %v16305_v11 }
 0xe9d   : > { %6462 = vadd.xlane.f32.xlu0 %v16380_v24 }
 0xe9f   : > { %6460 = vadd.xlane.f32.xlu1 %v16383_v17 }
 0xea4   : > { %v16386_v59 = vpop.xlane.xlu0 %6336 }
 0xea8   : > { %v16388_v56 = vpop.xlane.xlu0 %6338 }
 0xeac   : > { %v16390_v16 = vpop.xlane.xlu0 %6454 }
 0xeae   : > { %v16392_v35 = vpop.xlane.xlu1 %6452 }
 0xeb0   : > { %6578 = vrot.lane.b32.xlu1 %v18751_v25, %s12568_s26  ;;  %v6593_v20 = vpop.permute.xlu0 %6592  ;;  %v6361_v25 = vsub.f32 %v16152_v23, %v16287_v50  ;;  %v6410_v50 = vmul.f32 1.442695, %v6365_v63  ;;  %v6367_v23 = vsub.f32 %v16176_v6, %v16313_v12  ;;  %v12278_v12 = vld [vmem:[%s12856_s25 + $0xf8] sm:$0xff] }
 0xeb2   : > { %v6595_v43 = vpop.permute.xlu1 %6594  ;;  %v6414_v0 = vmul.f32 1.442695, %v6367_v23  ;;  %v18753_v23 = vld [vmem:[#allocation124_spill] sm:$0xff] }
 0xeb3   : > { %6576 = vrot.lane.b32.xlu0 %v18752_v13, %s12568_s26  ;;  %11267 = vmatprep.subr.mxu1 %v6595_v43  ;;  %v6402_v13 = vmul.f32 1.442695, %v6361_v25 }
 0xeb4   : > { %11268 = vmatpush3.msra.mxu1 %v6595_v43  ;;  %v6363_v43 = vsub.f32 %v16160_v14, %v16298_v57  ;;  %v6408_v14 = vmul.f32 1.442695, %v6364_v28 }
 0xeb5   : > { %11269 = vmatprep.subr.mxu1 %v6593_v20  ;;  %11963 = vpow2.f32 %v6402_v13 }
 0xeb6   : > { %v6591_v29 = vpop.permute.xlu1 %6590  ;;  %11270 = vmatpush3.msra.mxu1 %v6593_v20  ;;  %v6362_v20 = vsub.f32 %v16155_v51, %v16301_v49  ;;  %v6366_v51 = vsub.f32 %v16171_v26, %v16315_v19  ;;  %v16414_v49 = vpop.eup %11961 }
 0xeb7   : > { %11271 = vmatprep.subr.mxu1 %v6591_v29 }
 0xeb8   : > { %11272 = vmatpush3.msra.mxu1 %v6591_v29  ;;  %v6406_v29 = vmul.f32 1.442695, %v6363_v43  ;;  %v6404_v55 = vmul.f32 1.442695, %v6362_v20  ;;  %v6412_v11 = vmul.f32 1.442695, %v6366_v51  ;;  %v6369_v51 = vsub.f32 %v16230_v45, %v16317_v37 }
 0xeba   : > { %v6589_v3 = vpop.permute.xlu1 %6588  ;;  %11965 = vpow2.f32 %v6406_v29 }
 0xebb   : > { %11273 = vmatprep.subr.mxu1 %v6589_v3  ;;  %11967 = vpow2.f32 %v6404_v55 }
 0xebc   : > { %11274 = vmatpush3.msra.mxu1 %v6589_v3  ;;  %v11254_v3 = vpop.f32.mrf.mxu0  ;;  %11969 = vpow2.f32 %v6410_v50 }
 0xebd   : > { %11971 = vpow2.f32 %v6408_v14  ;;  %v16424_v26 = vadd.f32 %v12278_v12, %v11254_v3 }
 0xebe   : > { %v6279_v57 = vpop.f32.mrf.mxu0  ;;  %11973 = vpow2.f32 %v6414_v0  ;;  %v6418_v0 = vmul.f32 1.442695, %v6369_v51 }
 0xebf   : > { %v16417_v10 = vadd.f32 %v12277_v36, %v6279_v57  ;;  %11975 = vpow2.f32 %v6412_v11  ;;  %v6368_v57 = vsub.f32 %v16234_v22, %v16319_v54 }
 0xec0   : > { %11977 = vpow2.f32 %v6418_v0 }
 0xec1   : > { %v6416_v11 = vmul.f32 1.442695, %v6368_v57 }
 0xec2   : > { %v16421_v6 = vpop.eup %11963 }
 0xec3   : > { %11979 = vpow2.f32 %v6416_v11 }
 0xec4   : > { %11981 = vrcp.f32 %v16355_v8 }
 0xec5   : > { %11983 = vrcp.f32 %v16392_v35 }
 0xec6   : > { %11985 = vrcp.f32 %v16390_v16 }
 0xec7   : > { %v16428_v19 = vpop.eup %11965 }
 0xec8   : > { %v16431_v4 = vpop.eup %11967 }
 0xec9   : > { %v16434_v63 = vpop.eup %11969 }
 0xeca   : > { %v16437_v32 = vpop.eup %11971 }
 0xecb   : > { %v16440_v25 = vpop.eup %11973 }
 0xecc   : > { %v16445_v43 = vpop.eup %11975 }
 0xecd   : > { %v16458_v36 = vpop.eup %11977 }
 0xed0   : > { %v16461_v12 = vpop.eup %11979 }
 0xed1   : > { %v11982_v37 = vpop.eup %11981 }
 0xed2   : > { %6464 = vadd.xlane.f32.xlu0 %v16414_v49  ;;  %v6545_v16 = vmul.f32 %v11982_v37, %v16266_v7  ;;  %v6370_v7 = vsub.f32 %v16241_v9, %v16323_v15  ;;  %v6965_v37 = vld [vmem:[#allocation8 + $0x70] sm:$0xff] }
 0xed4   : > { %6348 = vmax.xlane.f32.xlu1 %v16417_v10  ;;  %v6420_v51 = vmul.f32 1.442695, %v6370_v7  ;;  %v6373_v7 = vsub.f32 %v16245_v2, %v16327_v18 }
 0xed6   : > { %6466 = vadd.xlane.f32.xlu0 %v16421_v6 }
 0xed8   : > { %6350 = vmax.xlane.f32.xlu1 %v16424_v26 }
 0xeda   : > { %6470 = vadd.xlane.f32.xlu0 %v16428_v19 }
 0xedc   : > { %6468 = vadd.xlane.f32.xlu1 %v16431_v4 }
 0xede   : > { %6474 = vadd.xlane.f32.xlu0 %v16434_v63 }
 0xee0   : > { %6472 = vadd.xlane.f32.xlu1 %v16437_v32 }
 0xee1   : > { %v16442_v13 = vpop.xlane.xlu0 %6340 }
 0xee2   : > { %6478 = vadd.xlane.f32.xlu0 %v16440_v25 }
 0xee4   : > { %6476 = vadd.xlane.f32.xlu1 %v16445_v43 }
 0xee5   : > { %v16448_v20 = vpop.xlane.xlu0 %6342 }
 0xee9   : > { %v6459_v29 = vpop.xlane.xlu0 %6458 }
 0xeeb   : > { %v6457_v55 = vpop.xlane.xlu1 %6456 }
 0xeec   : > { %11987 = vrcp.f32 %v6457_v55 }
 0xeed   : > { %v6585_v3 = vpop.permute.xlu0 %6584  ;;  %11989 = vrcp.f32 %v6459_v29 }
 0xeef   : > { %v6587_v28 = vpop.permute.xlu1 %6586 }
 0xef0   : > { %11275 = vmatprep.subr.mxu1 %v6587_v28 }
 0xef1   : > { %11276 = vmatpush3.msra.mxu1 %v6587_v28 }
 0xef2   : > { %11277 = vmatprep.subr.mxu1 %v6585_v3 }
 0xef3   : > { %v6583_v50 = vpop.permute.xlu1 %6582  ;;  %11278 = vmatpush3.msra.mxu1 %v6585_v3  ;;  %v11984_v3 = vpop.eup %11983 }
 0xef4   : > { %11279 = vmatprep.subr.mxu1 %v6583_v50  ;;  %v11986_v35 = vpop.eup %11985 }
 0xef5   : > { %6799 = vrot.lane.b32.xlu1 %v18753_v23, %s12568_s26  ;;  %11280 = vmatpush3.msra.mxu1 %v6583_v50 }
 0xef7   : > { %v6581_v14 = vpop.permute.xlu1 %6580 }
 0xef8   : > { %6797 = vrot.lane.b32.xlu0 %v18592_v53, %s12568_s26  ;;  %11281 = vmatprep.subr.mxu1 %v6581_v14 }
 0xef9   : > { %11282 = vmatpush3.msra.mxu1 %v6581_v14  ;;  %v11988_v29 = vpop.eup %11987 }
 0xefa   : > { %v11990_v55 = vpop.eup %11989  ;;  %v6548_v50 = vmul.f32 %v11988_v29, %v16350_v27  ;;  %v6963_v29 = vld [vmem:[#allocation8 + $0x60] sm:$0xff] }
 0xefb   : > { %v6549_v23 = vmul.f32 %v11990_v55, %v16347_v41 }
 0xf17   : > { %6482 = vadd.xlane.f32.xlu0 %v16458_v36 }
 0xf19   : > { %6480 = vadd.xlane.f32.xlu1 %v16461_v12 }
 0xf1e   : > { %v16464_v53 = vpop.xlane.xlu0 %6344 }
 0xf22   : > { %v16468_v45 = vpop.xlane.xlu0 %6346 }
 0xf26   : > { %v6463_v54 = vpop.xlane.xlu0 %6462 }
 0xf28   : > { %v6461_v22 = vpop.xlane.xlu1 %6460 }
 0xf29   : > { %11991 = vrcp.f32 %v6461_v22  ;;  %v6966_v22 = vld [vmem:[#allocation8 + $0x78] sm:$0xff] }
 0xf2a   : > { %6795 = vrot.lane.b32.xlu1 %v18593_v30, %s12568_s26  ;;  %11993 = vrcp.f32 %v6463_v54  ;;  %v6577_v8 = vpop.permute.xlu0 %6576  ;;  %v6546_v30 = vmul.f32 %v11984_v3, %v16308_v46 }
 0xf2b   : > { %11995 = vpow2.f32 %v6420_v51 }
 0xf2c   : > { %v6579_v28 = vpop.permute.xlu1 %6578 }
 0xf2d   : > { %6793 = vrot.lane.b32.xlu0 %v18594_v58, %s12568_s26  ;;  %11283 = vmatprep.subr.mxu1 %v6579_v28  ;;  %v6547_v58 = vmul.f32 %v11986_v35, %v16303_v38  ;;  %v6371_v38 = vsub.f32 %v16237_v34, %v16321_v5 }
 0xf2e   : > { %6791 = vrot.lane.b32.xlu1 %v18595_v33, %s12568_s26  ;;  %11284 = vmatpush3.msra.mxu1 %v6579_v28 }
 0xf2f   : > { %11285 = vmatprep.subr.mxu1 %v6577_v8  ;;  %v6422_v27 = vmul.f32 1.442695, %v6371_v38 }
 0xf30   : > { %11286 = vmatpush3.msra.mxu1 %v6577_v8  ;;  %v6372_v8 = vsub.f32 %v16249_v21, %v16329_v42  ;;  %v18754_v21 = vmov 0.0  }
 0xf31   : > { %11288 = vmatmul.mubr.f32.vlgmr.msra.gmra.mxu1 %v6545_v16  ;;  %11997 = vpow2.f32 %v6422_v27  ;;  %11367 = vmatprep.subr.mxu1 %v6966_v22  ;;  %v6964_v16 = vld [vmem:[#allocation8 + $0x68] sm:$0xff] }
 0xf32   : > { %6789 = vrot.lane.b32.xlu1 %v18596_v48, %s12568_s26  ;;  %11290 = vmatprep.mubr.f32.mxu1 %v6546_v30  ;;  %v6424_v35 = vmul.f32 1.442695, %v6372_v8 }
 0xf33   : > { %11368 = vmatpush3.msra.mxu1 %v6966_v22 }
 0xf34   : > { %11369 = vmatprep.subr.mxu1 %v6965_v37 }
 0xf35   : > { %11291 = vmatmul.mubr.f32.gmra.mxu1 %v6547_v58 }
 0xf36   : > { %v11992_v33 = vpop.eup %11991  ;;  %11293 = vmatprep.mubr.f32.mxu1 %v6548_v50  ;;  %11370 = vmatpush3.msra.mxu1 %v6965_v37  ;;  %v18760_v37 = vld [vmem:[#allocation89_spill] sm:$0xff] }
 0xf37   : > { %v6550_v46 = vmul.f32 %v11992_v33, %v16383_v17  ;;  %v11994_v14 = vpop.eup %11993  ;;  %11371 = vmatprep.subr.mxu1 %v6964_v16 }
 0xf38   : > { %v6551_v48 = vmul.f32 %v11994_v14, %v16380_v24  ;;  %v16490_v57 = vpop.eup %11995  ;;  %11372 = vmatpush3.msra.mxu1 %v6964_v16 }
 0xf39   : > { %11294 = vmatmul.mubr.f32.gmra.mxu1 %v6549_v23  ;;  %11373 = vmatprep.subr.mxu1 %v6963_v29 }
 0xf3a   : > { %11296 = vmatprep.mubr.f32.mxu1 %v6550_v46  ;;  %11374 = vmatpush3.msra.mxu1 %v6963_v29 }
 0xf3b   : > { %8226 = vmatprep.subr.mxu1 %v18754_v21 }
 0xf3d   : > { %11297 = vmatmul.mubr.f32.gmra.mxu1 %v6551_v48 }
 0xf3e   : > { %v16493_v15 = vpop.eup %11997 }
 0xf4c   : > { %6484 = vadd.xlane.f32.xlu0 %v16490_v57 }
 0xf56   : > { %6486 = vadd.xlane.f32.xlu1 %v16493_v15 }
 0xf5b   : > { %v6465_v9 = vpop.xlane.xlu0 %6464 }
 0xf5c   : > { %11999 = vrcp.f32 %v6465_v9 }
 0xf5d   : > { %v16496_v41 = vpop.xlane.xlu1 %6348 }
 0xf5f   : > { %v6467_v24 = vpop.xlane.xlu0 %6466 }
 0xf60   : > { %12001 = vrcp.f32 %v6467_v24 }
 0xf61   : > { %v16498_v17 = vpop.xlane.xlu1 %6350 }
 0xf62   : > { %6787 = vrot.lane.b32.xlu0 %v18597_v39, %s12568_s26 }
 0xf63   : > { %v6471_v5 = vpop.xlane.xlu0 %6470 }
 0xf64   : > { %12003 = vrcp.f32 %v6471_v5  ;;  %v18757_v5 = vld [vmem:[#allocation29_spill] sm:$0xff] }
 0xf65   : > { %v6469_v34 = vpop.xlane.xlu1 %6468 }
 0xf66   : > { %6783 = vrot.lane.b32.xlu0 %v18599_v31, %s12568_s26  ;;  %12005 = vrcp.f32 %v6469_v34  ;;  %v6375_v34 = vsub.f32 %v18757_v5, %v16357_v61 }
 0xf67   : > { %6785 = vrot.lane.b32.xlu1 %v18598_v62, %s12568_s26  ;;  %v6475_v0 = vpop.xlane.xlu0 %6474 }
 0xf68   : > { %12007 = vrcp.f32 %v6475_v0 }
 0xf69   : > { %v12000_v11 = vpop.eup %11999  ;;  %v6473_v54 = vpop.xlane.xlu1 %6472 }
 0xf6a   : > { %12009 = vrcp.f32 %v6473_v54  ;;  %v6552_v28 = vmul.f32 %v12000_v11, %v16414_v49  ;;  %v18758_v54 = vld [vmem:[#allocation117_spill] sm:$0xff] }
 0xf6b   : > { %6781 = vrot.lane.b32.xlu1 %v14363_v40, %s12568_s26  ;;  %v6479_v39 = vpop.xlane.xlu0 %6478 }
 0xf6c   : > { %11299 = vmatprep.mubr.f32.mxu1 %v6552_v28  ;;  %12011 = vrcp.f32 %v6479_v39  ;;  %v6376_v28 = vsub.f32 %v18760_v37, %v16386_v59 }
 0xf6d   : > { %v12002_v31 = vpop.eup %12001  ;;  %v6477_v62 = vpop.xlane.xlu1 %6476 }
 0xf6e   : > { %12013 = vrcp.f32 %v6477_v62  ;;  %v6553_v3 = vmul.f32 %v12002_v31, %v16421_v6  ;;  %v6432_v31 = vmul.f32 1.442695, %v6376_v28  ;;  %v6378_v62 = vsub.f32 %v16340_v52, %v16442_v13  ;;  %v18763_v52 = vld [vmem:[#allocation35_spill] sm:$0xff] }
 0xf6f   : > { %v6798_v30 = vpop.permute.xlu0 %6797  ;;  %12015 = vpow2.f32 %v6424_v35  ;;  %v18762_v35 = vld [vmem:[#allocation91_spill] sm:$0xff]  ;;  %v6381_v13 = vsub.f32 %v18763_v52, %v16468_v45 }
 0xf70   : > { %11300 = vmatmul.mubr.f32.gmra.mxu1 %v6553_v3  ;;  %v6436_v8 = vmul.f32 1.442695, %v6378_v62 }
 0xf71   : > { %v6800_v49 = vpop.permute.xlu1 %6799  ;;  %v12004_v40 = vpop.eup %12003 }
 0xf72   : > { %11311 = vmatprep.subr.mxu0 %v6800_v49  ;;  %v6555_v42 = vmul.f32 %v12004_v40, %v16428_v19  ;;  %v6426_v19 = vmul.f32 1.442695, %v6373_v7 }
 0xf73   : > { %11312 = vmatpush3.msra.mxu0 %v6800_v49  ;;  %v12006_v58 = vpop.eup %12005  ;;  %v18761_v49 = vld [vmem:[#allocation131_spill] sm:$0xff] }
 0xf74   : > { %11313 = vmatprep.subr.mxu0 %v6798_v30  ;;  %v6554_v6 = vmul.f32 %v12006_v58, %v16431_v4  ;;  %12017 = vpow2.f32 %v6426_v19  ;;  %v6379_v16 = vsub.f32 %v18761_v49, %v16448_v20  ;;  %v6442_v20 = vmul.f32 1.442695, %v6381_v13 }
 0xf75   : > { %11314 = vmatpush3.msra.mxu0 %v6798_v30  ;;  %v12008_v55 = vpop.eup %12007  ;;  %v6377_v30 = vsub.f32 %v18762_v35, %v16388_v56 }
 0xf76   : > { %11302 = vmatprep.mubr.f32.mxu1 %v6554_v6  ;;  %v6557_v46 = vmul.f32 %v12008_v55, %v16434_v63  ;;  %v18755_v63 = vld [vmem:[#allocation116_spill] sm:$0xff]  ;;  %v6438_v29 = vmul.f32 1.442695, %v6379_v16  ;;  %v18764_v6 = vld [vmem:[#allocation31_spill] sm:$0xff] }
 0xf77   : > { %v12010_v50 = vpop.eup %12009  ;;  %11303 = vmatmul.mubr.f32.gmra.mxu1 %v6555_v42  ;;  %v6434_v58 = vmul.f32 1.442695, %v6377_v30  ;;  %v6380_v55 = vsub.f32 %v18764_v6, %v16464_v53  ;;  %v6383_v42 = vsub.f32 %v16424_v26, %v16498_v17 }
 0xf78   : > { %v6556_v33 = vmul.f32 %v12010_v50, %v16437_v32  ;;  %v6382_v50 = vsub.f32 %v16417_v10, %v16496_v41 }
 0xf79   : > { %v12012_v23 = vpop.eup %12011  ;;  %v6440_v56 = vmul.f32 1.442695, %v6380_v55 }
 0xf7a   : > { %11305 = vmatprep.mubr.f32.mxu1 %v6556_v33  ;;  %v6559_v51 = vmul.f32 %v12012_v23, %v16440_v25  ;;  %v6446_v33 = vmul.f32 1.442695, %v6383_v42  ;;  %v6444_v45 = vmul.f32 1.442695, %v6382_v50 }
 0xf7b   : > { %v12014_v4 = vpop.eup %12013  ;;  %11306 = vmatmul.mubr.f32.gmra.mxu1 %v6557_v46 }
 0xf7c   : > { %v6558_v14 = vmul.f32 %v12014_v4, %v16445_v43  ;;  %v16521_v48 = vpop.eup %12015  ;;  %v18756_v43 = vld [vmem:[#allocation27_spill] sm:$0xff] }
 0xf7d   : > { %v6374_v38 = vsub.f32 %v18756_v43, %v16353_v1  ;;  %v6430_v1 = vmul.f32 1.442695, %v6375_v34 }
 0xf7e   : > { %11308 = vmatprep.mubr.f32.mxu1 %v6558_v14 }
 0xf7f   : > { %11309 = vmatmul.mubr.f32.gmra.mxu1 %v6559_v51 }
 0xf81   : > { %v16524_v32 = vpop.eup %12017 }
 0xf85   : > { %6488 = vadd.xlane.f32.xlu0 %v16521_v48 }
 0xf8f   : > { %6490 = vadd.xlane.f32.xlu1 %v16524_v32 }
 0xf9b   : > { %6779 = vrot.lane.b32.xlu0 %v14369_v44, %s12568_s26 }
 0xf9f   : > { %6775 = vrot.lane.b32.xlu0 %v14383_v47, %s12568_s26  ;;  %v6428_v47 = vmul.f32 1.442695, %v6374_v38 }
 0xfa0   : > { %6777 = vrot.lane.b32.xlu1 %v14377_v60, %s12568_s26  ;;  %v16533_v18 = vpop.xlane.xlu0 %6482 }
 0xfa2   : > { %v6481_v2 = vpop.xlane.xlu1 %6480 }
 0xfa3   : > { %12019 = vrcp.f32 %v6481_v2 }
 0xfa4   : > { %6773 = vrot.lane.b32.xlu1 %v18755_v63, %s12568_s26  ;;  %v6794_v27 = vpop.permute.xlu0 %6793  ;;  %12021 = vpow2.f32 %v6428_v47 }
 0xfa5   : > { %12023 = vpow2.f32 %v6430_v1 }
 0xfa6   : > { %v6796_v25 = vpop.permute.xlu1 %6795  ;;  %12025 = vpow2.f32 %v6432_v31 }
 0xfa7   : > { %11315 = vmatprep.subr.mxu0 %v6796_v25  ;;  %12027 = vpow2.f32 %v6436_v8 }
 0xfa8   : > { %11316 = vmatpush3.msra.mxu0 %v6796_v25  ;;  %12029 = vpow2.f32 %v6438_v29 }
 0xfa9   : > { %11317 = vmatprep.subr.mxu0 %v6794_v27  ;;  %12031 = vpow2.f32 %v6434_v58 }
 0xfaa   : > { %v6792_v44 = vpop.permute.xlu1 %6791  ;;  %11318 = vmatpush3.msra.mxu0 %v6794_v27  ;;  %12033 = vpow2.f32 %v6442_v20 }
 0xfab   : > { %11319 = vmatprep.subr.mxu0 %v6792_v44  ;;  %12035 = vpow2.f32 %v6440_v56 }
 0xfac   : > { %11320 = vmatpush3.msra.mxu0 %v6792_v44  ;;  %12037 = vpow2.f32 %v6446_v33 }
 0xfad   : > { %12039 = vpow2.f32 %v6444_v45 }
 0xfae   : > { %v6790_v60 = vpop.permute.xlu1 %6789  ;;  %12041 = vrcp.f32 %v16533_v18 }
 0xfaf   : > { %11321 = vmatprep.subr.mxu0 %v6790_v60 }
 0xfb0   : > { %v12020_v9 = vpop.eup %12019  ;;  %11322 = vmatpush3.msra.mxu0 %v6790_v60 }
 0xfb1   : > { %v6560_v24 = vmul.f32 %v12020_v9, %v16461_v12  ;;  %v16542_v0 = vpop.eup %12021  ;;  %v18759_v12 = vld [vmem:[#allocation114_spill] sm:$0xff] }
 0xfb2   : > { %v16545_v11 = vpop.eup %12023 }
 0xfb3   : > { %11343 = vmatprep.mubr.f32.mxu0 %v6560_v24  ;;  %v16572_v23 = vpop.eup %12025 }
 0xfb4   : > { %v16577_v26 = vpop.eup %12027 }
 0xfb5   : > { %v16582_v17 = vpop.eup %12029 }
 0xfb6   : > { %v16585_v14 = vpop.eup %12031 }
 0xfb7   : > { %v16590_v51 = vpop.eup %12033 }
 0xfb8   : > { %v16593_v63 = vpop.eup %12035 }
 0xfb9   : > { %v16598_v25 = vpop.eup %12037 }
 0xfba   : > { %v16601_v43 = vpop.eup %12039 }
 0xfbe   : > { %6492 = vadd.xlane.f32.xlu0 %v16542_v0 }
 0xfc8   : > { %6494 = vadd.xlane.f32.xlu1 %v16545_v11 }
 0xfd4   : > { %6771 = vrot.lane.b32.xlu0 %v18758_v54, %s12568_s26 }
 0xfd5   : > { %v16550_v22 = vpop.xlane.xlu0 %6484 }
 0xfd6   : > { %12043 = vrcp.f32 %v16550_v22 }
 0xfd9   : > { %6769 = vrot.lane.b32.xlu1 %v18759_v12, %s12568_s26  ;;  %v6788_v61 = vpop.permute.xlu0 %6787  ;;  %s9518_s26 = sshll.u32 %s12668_s17, 12  ;;  %s12569_s17 = smov [#allocation13]  }
 0xfda   : > { %11323 = vmatprep.subr.mxu0 %v6788_v61  ;;  %s17844_s27 = scalar_lea.hbm %s18833_s8, %s9518_s26 }
 0xfdb   : > { %11324 = vmatpush3.msra.mxu0 %v6788_v61 }
 0xfdd   : > { %v6784_v40 = vpop.permute.xlu0 %6783 }
 0xfdf   : > { %v16556_v39 = vpop.xlane.xlu1 %6486 }
 0xfe0   : > { %12045 = vrcp.f32 %v16556_v39 }
 0xfe3   : > { %v6786_v3 = vpop.permute.xlu1 %6785 }
 0xfe4   : > { %11325 = vmatprep.subr.mxu0 %v6786_v3 }
 0xfe5   : > { %11326 = vmatpush3.msra.mxu0 %v6786_v3  ;;  %v12042_v3 = vpop.eup %12041 }
 0xfe6   : > { %11327 = vmatprep.subr.mxu0 %v6784_v40  ;;  %v12044_v8 = vpop.eup %12043  ;;  %v6561_v16 = vmul.f32 %v12042_v3, %v16458_v36  ;;  %v18773_v3 = vld [vmem:[#allocation127_spill] sm:$0xff] }
 0xfe7   : > { %v6782_v59 = vpop.permute.xlu1 %6781  ;;  %11328 = vmatpush3.msra.mxu0 %v6784_v40  ;;  %v6562_v22 = vmul.f32 %v12044_v8, %v16490_v57  ;;  %v18774_v8 = vld [vmem:[#allocation142_spill] sm:$0xff] }
 0xfe8   : > { %11329 = vmatprep.subr.mxu0 %v6782_v59 }
 0xfe9   : > { %11330 = vmatpush3.msra.mxu0 %v6782_v59 }
 0xfed   : > { %v12046_v18 = vpop.eup %12045 }
 0xfee   : > { %v6563_v39 = vmul.f32 %v12046_v18, %v16493_v15 }
 0xff1   : > { %v11289_v7 = vpop.f32.mrf.mxu1 }
 0xff3   : > { %6496 = vadd.xlane.f32.xlu0 %v16572_v23  ;;  %v6690_v53 = vpop.f32.mrf.mxu1 }
 0xff4   : > { %11375 = vmatprep.mubr.msk.f32.mxu1 %vm1200_vm0, %v6690_v53 }
 0xff5   : > { %v11292_v46 = vpop.f32.mrf.mxu1  ;;  %11376 = vmatmul.mubr.msk.f32.vlgmr.msra.gmra.mxu1 %vm1200_vm0, %v11289_v7 }
 0xff7   : > { %6500 = vadd.xlane.f32.xlu0 %v16577_v26  ;;  %v6700_v10 = vpop.f32.mrf.mxu1 }
 0xff8   : > { %11378 = vmatprep.mubr.msk.f32.mxu1 %vm1200_vm0, %v6700_v10 }
 0xff9   : > { %v11295_v41 = vpop.f32.mrf.mxu1  ;;  %11379 = vmatmul.mubr.msk.f32.gmra.mxu1 %vm1200_vm0, %v11292_v46 }
 0xffb   : > { %6502 = vadd.xlane.f32.xlu0 %v16582_v17  ;;  %v6710_v4 = vpop.f32.mrf.mxu1 }
 0xffc   : > { %11381 = vmatprep.mubr.msk.f32.mxu1 %vm1200_vm0, %v6710_v4 }
 0xffd   : > { %6498 = vadd.xlane.f32.xlu1 %v16585_v14  ;;  %v11298_v19 = vpop.f32.mrf.mxu1  ;;  %11382 = vmatmul.mubr.msk.f32.gmra.mxu1 %vm1200_vm0, %v11295_v41 }
 0xfff   : > { %6506 = vadd.xlane.f32.xlu0 %v16590_v51  ;;  %v6720_v2 = vpop.f32.mrf.mxu1 }
0x1000   : > { %11384 = vmatprep.mubr.msk.f32.mxu1 %vm1200_vm0, %v6720_v2 }
0x1001   : > { %6504 = vadd.xlane.f32.xlu1 %v16593_v63  ;;  %11385 = vmatmul.mubr.msk.f32.gmra.mxu1 %vm1200_vm0, %v11298_v19 }
0x1003   : > { %6510 = vadd.xlane.f32.xlu0 %v16598_v25 }
0x1005   : > { %6508 = vadd.xlane.f32.xlu1 %v16601_v43 }
0x100e   : > { %v6489_v38 = vpop.xlane.xlu0 %6488 }
0x100f   : > { %12047 = vrcp.f32 %v6489_v38  ;;  %v16636_v38 = vld [vmem:[%s17896_s5] ss:$0 sm:$0xff] }
0x1012   : > { %v6780_v27 = vpop.permute.xlu0 %6779 }
0x1013   : > { %11331 = vmatprep.subr.mxu0 %v6780_v27 }
0x1014   : > { %11332 = vmatpush3.msra.mxu0 %v6780_v27  ;;  %v18768_v27 = vld [vmem:[#allocation33_spill] sm:$0xff] }
0x1016   : > { %v6776_v60 = vpop.permute.xlu0 %6775 }
0x1018   : > { %v6491_v44 = vpop.xlane.xlu1 %6490 }
0x1019   : > { %12049 = vrcp.f32 %v6491_v44 }
0x101c   : > { %v6778_v47 = vpop.permute.xlu1 %6777  ;;  %v12048_v40 = vpop.eup %12047 }
0x101d   : > { %11333 = vmatprep.subr.mxu0 %v6778_v47  ;;  %v6564_v30 = vmul.f32 %v12048_v40, %v16521_v48 }
0x101e   : > { %11334 = vmatpush3.msra.mxu0 %v6778_v47 }
0x101f   : > { %11335 = vmatprep.subr.mxu0 %v6776_v60 }
0x1020   : > { %v6774_v9 = vpop.permute.xlu1 %6773  ;;  %11336 = vmatpush3.msra.mxu0 %v6776_v60  ;;  %v18770_v60 = vld [vmem:[#allocation83_spill] sm:$0xff] }
0x1021   : > { %11337 = vmatprep.subr.mxu0 %v6774_v9 }
0x1022   : > { %11338 = vmatpush3.msra.mxu0 %v6774_v9 }
0x1026   : > { %v12050_v35 = vpop.eup %12049 }
0x1027   : > { %v6565_v29 = vmul.f32 %v12050_v35, %v16524_v32  ;;  %v18775_v35 = vld [vmem:[#allocation121_spill] sm:$0xff] }
0x1030   : > { %v11301_v24 = vpop.f32.mrf.mxu1 }
0x1032   : > { %v6730_v5 = vpop.f32.mrf.mxu1 }
0x1033   : > { %11387 = vmatprep.mubr.msk.f32.mxu1 %vm1200_vm0, %v6730_v5 }
0x1034   : > { %11388 = vmatmul.mubr.msk.f32.gmra.mxu1 %vm1200_vm0, %v11301_v24 }
0x1037   : > { %v11304_v34 = vpop.f32.mrf.mxu1 }
0x1039   : > { %v6740_v1 = vpop.f32.mrf.mxu1 }
0x103a   : > { %11390 = vmatprep.mubr.msk.f32.mxu1 %vm1200_vm0, %v6740_v1  ;;  %v18771_v1 = vld [vmem:[#allocation123_spill] sm:$0xff] }
0x103b   : > { %v11307_v54 = vpop.f32.mrf.mxu1  ;;  %11391 = vmatmul.mubr.msk.f32.gmra.mxu1 %vm1200_vm0, %v11304_v34 }
0x103d   : > { %v6750_v12 = vpop.f32.mrf.mxu1 }
0x103e   : > { %11393 = vmatprep.mubr.msk.f32.mxu1 %vm1200_vm0, %v6750_v12 }
0x103f   : > { %v11310_v61 = vpop.f32.mrf.mxu1  ;;  %11394 = vmatmul.mubr.msk.f32.gmra.mxu1 %vm1200_vm0, %v11307_v54 }
0x1041   : > { %v6760_v37 = vpop.f32.mrf.mxu1 }
0x1042   : > { %11396 = vmatprep.mubr.msk.f32.mxu1 %vm1200_vm0, %v6760_v37 }
0x1043   : > { %11397 = vmatmul.mubr.msk.f32.gmra.mxu1 %vm1200_vm0, %v11310_v61  ;;  %v18772_v61 = vld [vmem:[#allocation122_spill] sm:$0xff] }
0x1047   : > { %v6493_v28 = vpop.xlane.xlu0 %6492 }
0x1048   : > { %12051 = vrcp.f32 %v6493_v28  ;;  %v12279_v28 = vld [vmem:[%s12848_s10 + $0x8] sm:$0xff] }
0x104b   : > { %v6772_v31 = vpop.permute.xlu0 %6771 }
0x104c   : > { %11339 = vmatprep.subr.mxu0 %v6772_v31 }
0x104d   : > { %11340 = vmatpush3.msra.mxu0 %v6772_v31 }
0x1051   : > { %v6495_v62 = vpop.xlane.xlu1 %6494 }
0x1052   : > { %12053 = vrcp.f32 %v6495_v62 }
0x1055   : > { %v6770_v49 = vpop.permute.xlu1 %6769  ;;  %v12052_v59 = vpop.eup %12051 }
0x1056   : > { %11341 = vmatprep.subr.mxu0 %v6770_v49  ;;  %v6566_v36 = vmul.f32 %v12052_v59, %v16542_v0 }
0x1057   : > { %11342 = vmatpush3.msra.mxu0 %v6770_v49  ;;  %v4026_v49 = vadd.f32 %v18774_v8, %v18773_v3  ;;  %v18787_v3 = vld [vmem:[#allocation137_spill] sm:$0xff] }
0x1058   : > { %11344 = vmatmul.mubr.f32.vlgmr.msra.gmra.mxu0 %v6561_v16 }
0x1059   : > { %11346 = vmatprep.mubr.f32.mxu0 %v6562_v22  ;;  %v12280_v22 = vld [vmem:[%s12848_s10] sm:$0xff] }
0x105c   : > { %11347 = vmatmul.mubr.f32.gmra.mxu0 %v6563_v39 }
0x105d   : > { %11349 = vmatprep.mubr.f32.mxu0 %v6564_v30  ;;  %v5714_v30 = vadd.f32 %v18775_v35, %v4026_v49  ;;  %v18788_v49 = vld [vmem:[#allocation180_spill] sm:$0xff] }
0x105f   : > { %v12054_v52 = vpop.eup %12053 }
0x1060   : > { %11350 = vmatmul.mubr.f32.gmra.mxu0 %v6565_v29  ;;  %v6567_v57 = vmul.f32 %v12054_v52, %v16545_v11  ;;  %v18776_v29 = vld [vmem:[#allocation120_spill] sm:$0xff] }
0x1061   : > { %11352 = vmatprep.mubr.f32.mxu0 %v6566_v36  ;;  %v12281_v36 = vld [vmem:[%s12848_s10 + $0x18] sm:$0xff] }
0x1064   : > { %11353 = vmatmul.mubr.f32.gmra.mxu0 %v6567_v57 }
0x107c   : > { %v6497_v13 = vpop.xlane.xlu0 %6496 }
0x107d   : > { %12055 = vrcp.f32 %v6497_v13 }
0x1080   : > { %v6501_v58 = vpop.xlane.xlu0 %6500 }
0x1081   : > { %12057 = vrcp.f32 %v6501_v58  ;;  %v18777_v58 = vld [vmem:[#allocation130_spill] sm:$0xff] }
0x1084   : > { %v6503_v15 = vpop.xlane.xlu0 %6502 }
0x1086   : > { %v6499_v6 = vpop.xlane.xlu1 %6498 }
0x1087   : > { %12059 = vrcp.f32 %v6499_v6 }
0x1088   : > { %v6507_v48 = vpop.xlane.xlu0 %6506  ;;  %12061 = vrcp.f32 %v6503_v15  ;;  %v18778_v15 = vld [vmem:[#allocation145_spill] sm:$0xff] }
0x1089   : > { %v4036_v6 = vadd.f32 %v18778_v15, %v18777_v58  ;;  %v18792_v58 = vld [vmem:[#allocation181_spill] sm:$0xff] }
0x108a   : > { %v12056_v55 = vpop.eup %12055  ;;  %v6505_v20 = vpop.xlane.xlu1 %6504 }
0x108b   : > { %12063 = vrcp.f32 %v6505_v20  ;;  %v6568_v32 = vmul.f32 %v12056_v55, %v16572_v23  ;;  %v12282_v20 = vld [vmem:[%s12848_s10 + $0x10] sm:$0xff] }
0x108c   : > { %12065 = vrcp.f32 %v6507_v48  ;;  %v6511_v0 = vpop.xlane.xlu0 %6510 }
0x108d   : > { %11355 = vmatprep.mubr.f32.mxu0 %v6568_v32 }
0x108e   : > { %v6509_v42 = vpop.xlane.xlu1 %6508  ;;  %v12058_v11 = vpop.eup %12057 }
0x108f   : > { %12067 = vrcp.f32 %v6509_v42  ;;  %v6570_v7 = vmul.f32 %v12058_v11, %v16577_v26  ;;  %v18779_v42 = vld [vmem:[#allocation119_spill] sm:$0xff] }
0x1090   : > { %12069 = vrcp.f32 %v6511_v0  ;;  %v5716_v11 = vadd.f32 %v18779_v42, %v4036_v6  ;;  %v12289_v6 = vld [vmem:[%s12848_s10 + $0x58] sm:$0xff] }
0x1094   : > { %v12060_v56 = vpop.eup %12059 }
0x1095   : > { %v6569_v50 = vmul.f32 %v12060_v56, %v16585_v14  ;;  %v12062_v33 = vpop.eup %12061  ;;  %v18766_v14 = vld [vmem:[#allocation134_spill] sm:$0xff] }
0x1096   : > { %v6571_v53 = vmul.f32 %v12062_v33, %v16582_v17  ;;  %v18765_v17 = vld [vmem:[#allocation128_spill] sm:$0xff] }
0x1097   : > { %11356 = vmatmul.mubr.f32.gmra.mxu0 %v6569_v50  ;;  %v4006_v2 = vadd.f32 %v18766_v14, %v18765_v17  ;;  %v18780_v50 = vld [vmem:[#allocation118_spill] sm:$0xff]  ;;  %v12286_v17 = vld [vmem:[%s12848_s10 + $0x30] sm:$0xff] }
0x1098   : > { %v12064_v45 = vpop.eup %12063  ;;  %11358 = vmatprep.mubr.f32.mxu0 %v6570_v7  ;;  %v12283_v7 = vld [vmem:[%s12848_s10 + $0x28] sm:$0xff] }
0x1099   : > { %v6572_v23 = vmul.f32 %v12064_v45, %v16593_v63  ;;  %v12066_v46 = vpop.eup %12065 }
0x109a   : > { %v6573_v41 = vmul.f32 %v12066_v46, %v16590_v51  ;;  %v18767_v51 = vld [vmem:[#allocation140_spill] sm:$0xff] }
0x109b   : > { %11359 = vmatmul.mubr.f32.gmra.mxu0 %v6571_v53 }
0x109c   : > { %v12068_v10 = vpop.eup %12067  ;;  %11361 = vmatprep.mubr.f32.mxu0 %v6572_v23 }
0x109d   : > { %v6574_v4 = vmul.f32 %v12068_v10, %v16601_v43  ;;  %v12070_v19 = vpop.eup %12069  ;;  %v5710_v43 = vadd.f32 %v18767_v51, %v4006_v2  ;;  %v12284_v10 = vld [vmem:[%s12848_s10 + $0x20] sm:$0xff] }
0x109e   : > { %v6575_v26 = vmul.f32 %v12070_v19, %v16598_v25  ;;  %v18769_v25 = vld [vmem:[#allocation125_spill] sm:$0xff]  ;;  %v18781_v2 = vld [vmem:[#allocation138_spill] sm:$0xff] }
0x109f   : > { %11362 = vmatmul.mubr.f32.gmra.mxu0 %v6573_v41  ;;  %v4016_v9 = vadd.f32 %v18770_v60, %v18769_v25  ;;  %v12285_v19 = vld [vmem:[%s12848_s10 + $0x38] sm:$0xff] }
0x10a0   : > { %11364 = vmatprep.mubr.f32.mxu0 %v6574_v4 }
0x10a1   : > { %v5712_v54 = vadd.f32 %v18771_v1, %v4016_v9 }
0x10a3   : > { %11365 = vmatmul.mubr.f32.gmra.mxu0 %v6575_v26 }
0x10a4   : > { %7930 = vmatprep.mubr.f32.mxu0 %v18754_v21 }
0x10b5   : > { %v11377_v63 = vpop.f32.mrf.mxu1 }
0x10b6   : > { %v7289_v44 = vadd.f32 %v11377_v63, %v18768_v27  ;;  %v18782_v63 = vld [vmem:[#allocation151_spill] sm:$0xff]  ;;  %v18783_v27 = vld [vmem:[#allocation141_spill] sm:$0xff] }
0x10b7   : > { %v7129_v47 = vpop.f32.mrf.mxu1  ;;  %v4046_v51 = vadd.f32 %v18782_v63, %v18781_v2 }
0x10b8   : > { %v7328_v24 = vadd.f32 %v16636_v38, %v7289_v44  ;;  %v7288_v5 = vadd.f32 %v7129_v47, %v5710_v43  ;;  %v18784_v47 = vld [vmem:[#allocation179_spill] sm:$0xff] }
0x10b9   : > { %v11380_v34 = vpop.f32.mrf.mxu1  ;;  %v5718_v44 = vadd.f32 %v18783_v27, %v4046_v51 }
0x10ba   : > { %v7327_v12 = vadd.f32 %v16636_v38, %v7288_v5  ;;  %v7291_v37 = vadd.f32 %v11380_v34, %v18772_v61  ;;  %v16647_v31 = vadd.f32 %v12279_v28, %v7328_v24  ;;  %v12287_v34 = vld [vmem:[%s12848_s10 + $0x48] sm:$0xff] }
0x10bb   : > { %v7139_v62 = vpop.f32.mrf.mxu1 }
0x10bc   : > { %v7330_v16 = vadd.f32 %v16636_v38, %v7291_v37  ;;  %v7290_v18 = vadd.f32 %v7139_v62, %v5712_v54  ;;  %7395 = vadd.xlane.f32.xlu0 %v16647_v31  ;;  %v16654_v40 = vadd.f32 %v12280_v22, %v7327_v12  ;;  %v18785_v54 = vld [vmem:[#allocation149_spill] sm:$0xff]  ;;  %v12288_v37 = vld [vmem:[%s12848_s10 + $0x40] sm:$0xff]  ;;  %v18789_v22 = vld [vmem:[#allocation163_spill] sm:$0xff] }
0x10bd   : > { %v11383_v39 = vpop.f32.mrf.mxu1  ;;  %v18786_v12 = vld [vmem:[#allocation157_spill] sm:$0xff] }
0x10be   : > { %v7329_v59 = vadd.f32 %v16636_v38, %v7290_v18  ;;  %v7293_v52 = vadd.f32 %v11383_v39, %v18776_v29  ;;  %7393 = vadd.xlane.f32.xlu1 %v16654_v40  ;;  %v16661_v57 = vadd.f32 %v12281_v36, %v7330_v16  ;;  %v4056_v61 = vadd.f32 %v18786_v12, %v18785_v54  ;;  %v18790_v39 = vld [vmem:[#allocation158_spill] sm:$0xff] }
0x10bf   : > { %v7149_v13 = vpop.f32.mrf.mxu1  ;;  %v4066_v35 = vadd.f32 %v18790_v39, %v18789_v22 }
0x10c0   : > { %v7332_v48 = vadd.f32 %v16636_v38, %v7293_v52  ;;  %v7292_v55 = vadd.f32 %v7149_v13, %v5714_v30  ;;  %7399 = vadd.xlane.f32.xlu0 %v16661_v57  ;;  %v16668_v32 = vadd.f32 %v12282_v20, %v7329_v59  ;;  %v5720_v8 = vadd.f32 %v18787_v3, %v4056_v61  ;;  %v18791_v52 = vld [vmem:[#allocation139_spill] sm:$0xff]  ;;  %v18793_v20 = vld [vmem:[#allocation133_spill] sm:$0xff] }
0x10c1   : > { %v11386_v0 = vpop.f32.mrf.mxu1  ;;  %v5722_v36 = vadd.f32 %v18791_v52, %v4066_v35 }
0x10c2   : > { %v7331_v56 = vadd.f32 %v16636_v38, %v7292_v55  ;;  %v7295_v33 = vadd.f32 %v11386_v0, %v18780_v50  ;;  %7397 = vadd.xlane.f32.xlu1 %v16668_v32  ;;  %v16675_v45 = vadd.f32 %v12283_v7, %v7332_v48  ;;  %v18794_v0 = vld [vmem:[#allocation159_spill] sm:$0xff]  ;;  %v12290_v50 = vld [vmem:[%s12848_s10 + $0x50] sm:$0xff] }
0x10c3   : > { %v7159_v53 = vpop.f32.mrf.mxu1  ;;  %v4076_v42 = vadd.f32 %v18794_v0, %v18793_v20  ;;  %v18802_v20 = vld [vmem:[#allocation112_spill] sm:$0xff] }
0x10c4   : > { %v7334_v23 = vadd.f32 %v16636_v38, %v7295_v33  ;;  %v7294_v46 = vadd.f32 %v7159_v53, %v5716_v11  ;;  %7403 = vadd.xlane.f32.xlu0 %v16675_v45  ;;  %v16680_v41 = vadd.f32 %v12284_v10, %v7331_v56  ;;  %v18795_v53 = vld [vmem:[#allocation169_spill] sm:$0xff]  ;;  %v18796_v10 = vld [vmem:[#allocation182_spill] sm:$0xff] }
0x10c6   : > { %v7333_v4 = vadd.f32 %v16636_v38, %v7294_v46  ;;  %7401 = vadd.xlane.f32.xlu1 %v16680_v41  ;;  %v16685_v26 = vadd.f32 %v12285_v19, %v7334_v23  ;;  %v5724_v23 = vadd.f32 %v18795_v53, %v4076_v42  ;;  %v12291_v19 = vld [vmem:[%s12848_s10 + $0x68] sm:$0xff] }
0x10c8   : > { %7407 = vadd.xlane.f32.xlu0 %v16685_v26  ;;  %v16689_v14 = vadd.f32 %v12286_v17, %v7333_v4 }
0x10ca   : > { %7405 = vadd.xlane.f32.xlu1 %v16689_v14 }
0x10f4   : > { %v11389_v43 = vpop.f32.mrf.mxu1 }
0x10f5   : > { %v7297_v25 = vadd.f32 %v11389_v43, %v18784_v47  ;;  %v12292_v43 = vld [vmem:[%s12848_s10 + $0x60] sm:$0xff]  ;;  %v12293_v47 = vld [vmem:[%s12848_s10 + $0x78] sm:$0xff] }
0x10f6   : > { %v7169_v60 = vpop.f32.mrf.mxu1 }
0x10f7   : > { %v7336_v9 = vadd.f32 %v16636_v38, %v7297_v25  ;;  %v7296_v24 = vadd.f32 %v7169_v60, %v5718_v44  ;;  %v12294_v60 = vld [vmem:[%s12848_s10 + $0x70] sm:$0xff] }
0x10f9   : > { %v7335_v5 = vadd.f32 %v16636_v38, %v7296_v24  ;;  %v16699_v1 = vadd.f32 %v12287_v34, %v7336_v9 }
0x10fb   : > { %7411 = vadd.xlane.f32.xlu0 %v16699_v1  ;;  %v16705_v28 = vadd.f32 %v12288_v37, %v7335_v5  ;;  %v11392_v62 = vpop.f32.mrf.mxu1 }
0x10fc   : > { %v7299_v16 = vadd.f32 %v11392_v62, %v18788_v49 }
0x10fd   : > { %7409 = vadd.xlane.f32.xlu1 %v16705_v28  ;;  %v7179_v18 = vpop.f32.mrf.mxu1 }
0x10fe   : > { %v7338_v30 = vadd.f32 %v16636_v38, %v7299_v16  ;;  %v7298_v59 = vadd.f32 %v7179_v18, %v5720_v8 }
0x10ff   : > { %v11395_v29 = vpop.f32.mrf.mxu1 }
0x1100   : > { %v7337_v13 = vadd.f32 %v16636_v38, %v7298_v59  ;;  %v7301_v15 = vadd.f32 %v11395_v29, %v18792_v58  ;;  %v16717_v48 = vadd.f32 %v12289_v6, %v7338_v30  ;;  %v18797_v30 = vld [vmem:[#allocation129_spill] sm:$0xff]  ;;  %v18800_v58 = vld [vmem:[#allocation55_spill] sm:$0xff] }
0x1101   : > { %v7189_v55 = vpop.f32.mrf.mxu1  ;;  %v18798_v59 = vld [vmem:[#allocation161_spill] sm:$0xff] }
0x1102   : > { %v7340_v11 = vadd.f32 %v16636_v38, %v7301_v15  ;;  %v7300_v56 = vadd.f32 %v7189_v55, %v5722_v36  ;;  %7415 = vadd.xlane.f32.xlu0 %v16717_v48  ;;  %v16724_v33 = vadd.f32 %v12290_v50, %v7337_v13  ;;  %v4086_v29 = vadd.f32 %v18798_v59, %v18797_v30  ;;  %v18799_v36 = vld [vmem:[#allocation60_spill] sm:$0xff]  ;;  %v18801_v55 = vld [vmem:[#allocation165_spill] sm:$0xff]  ;;  %v18810_v30 = vld [vmem:[#allocation66_spill] sm:$0xff] }
0x1103   : > { %v11398_v7 = vpop.f32.mrf.mxu1  ;;  %v4096_v0 = vadd.f32 %v18802_v20, %v18801_v55 }
0x1104   : > { %v7339_v46 = vadd.f32 %v16636_v38, %v7300_v56  ;;  %v7303_v4 = vadd.f32 %v11398_v7, %v18796_v10  ;;  %7413 = vadd.xlane.f32.xlu1 %v16724_v33  ;;  %v16731_v17 = vadd.f32 %v12291_v19, %v7340_v11  ;;  %v5726_v13 = vadd.f32 %v18799_v36, %v4086_v29  ;;  %v18803_v7 = vld [vmem:[#allocation63_spill] sm:$0xff] }
0x1105   : > { %v7199_v2 = vpop.f32.mrf.mxu1  ;;  %v5728_v53 = vadd.f32 %v18803_v7, %v4096_v0 }
0x1106   : > { %v7342_v63 = vadd.f32 %v16636_v38, %v7303_v4  ;;  %v7302_v51 = vadd.f32 %v7199_v2, %v5724_v23  ;;  %7419 = vadd.xlane.f32.xlu0 %v16731_v17  ;;  %v16736_v27 = vadd.f32 %v12292_v43, %v7339_v46  ;;  %v18804_v46 = vld [vmem:[#allocation56_spill] sm:$0xff]  ;;  %v12295_v4 = vld [vmem:[%s12848_s10 + $0x88] sm:$0xff] }
0x1107   : > { %v18805_v2 = vld [vmem:[#allocation167_spill] sm:$0xff] }
0x1108   : > { %v7341_v44 = vadd.f32 %v16636_v38, %v7302_v51  ;;  %7417 = vadd.xlane.f32.xlu1 %v16736_v27  ;;  %v16741_v25 = vadd.f32 %v12293_v47, %v7342_v63  ;;  %v18806_v63 = vld [vmem:[#allocation108_spill] sm:$0xff] }
0x1109   : > { %v4106_v51 = vadd.f32 %v18806_v63, %v18805_v2  ;;  %v12300_v2 = vld [vmem:[%s12848_s10 + $0xa8] sm:$0xff] }
0x110a   : > { %7423 = vadd.xlane.f32.xlu0 %v16741_v25  ;;  %v16745_v9 = vadd.f32 %v12294_v60, %v7341_v44 }
0x110c   : > { %7421 = vadd.xlane.f32.xlu1 %v16745_v9 }
0x1118   : > { %v11345_v24 = vpop.f32.mrf.mxu0 }
0x111a   : > { %v6883_v5 = vpop.f32.mrf.mxu0 }
0x111b   : > { %11399 = vmatprep.mubr.msk.f32.mxu1 %vm1200_vm0, %v6883_v5  ;;  %v12296_v5 = vld [vmem:[%s12848_s10 + $0x80] sm:$0xff] }
0x111c   : > { %v11348_v34 = vpop.f32.mrf.mxu0  ;;  %11400 = vmatmul.mubr.msk.f32.gmra.mxu1 %vm1200_vm0, %v11345_v24 }
0x111e   : > { %v6893_v54 = vpop.f32.mrf.mxu0 }
0x111f   : > { %11402 = vmatprep.mubr.msk.f32.mxu1 %vm1200_vm0, %v6893_v54 }
0x1120   : > { %v11351_v12 = vpop.f32.mrf.mxu0  ;;  %11403 = vmatmul.mubr.msk.f32.gmra.mxu1 %vm1200_vm0, %v11348_v34 }
0x1122   : > { %v6903_v61 = vpop.f32.mrf.mxu0 }
0x1123   : > { %11405 = vmatprep.mubr.msk.f32.mxu1 %vm1200_vm0, %v6903_v61 }
0x1124   : > { %v11354_v37 = vpop.f32.mrf.mxu0  ;;  %11406 = vmatmul.mubr.msk.f32.gmra.mxu1 %vm1200_vm0, %v11351_v12  ;;  %v18807_v12 = vld [vmem:[#allocation62_spill] sm:$0xff] }
0x1125   : > { %v5730_v61 = vadd.f32 %v18807_v12, %v4106_v51  ;;  %v7851_v12 = vld [vmem:[#allocation10 + $0xe8] sm:$0xff] }
0x1126   : > { %v6913_v62 = vpop.f32.mrf.mxu0 }
0x1127   : > { %11408 = vmatprep.mubr.msk.f32.mxu1 %vm1200_vm0, %v6913_v62  ;;  %v12297_v62 = vld [vmem:[%s12848_s10 + $0x98] sm:$0xff] }
0x1128   : > { %11409 = vmatmul.mubr.msk.f32.gmra.mxu1 %vm1200_vm0, %v11354_v37 }
0x1145   : > { %v7396_v44 = vpop.xlane.xlu0 %7395 }
0x1147   : > { %v7394_v56 = vpop.xlane.xlu1 %7393 }
0x1148   : > { %v7458_v47 = vmul.f32 0.0078125, %v7394_v56 }
0x1149   : > { %v7400_v0 = vpop.xlane.xlu0 %7399 }
0x1157   : > { %v11357_v3 = vpop.f32.mrf.mxu0 }
0x1159   : > { %v6923_v8 = vpop.f32.mrf.mxu0 }
0x115a   : > { %11411 = vmatprep.mubr.msk.f32.mxu1 %vm1200_vm0, %v6923_v8  ;;  %v18808_v8 = vld [vmem:[#allocation170_spill] sm:$0xff] }
0x115b   : > { %v11360_v49 = vpop.f32.mrf.mxu0  ;;  %11412 = vmatmul.mubr.msk.f32.gmra.mxu1 %vm1200_vm0, %v11357_v3 }
0x115d   : > { %v6933_v16 = vpop.f32.mrf.mxu0 }
0x115e   : > { %11414 = vmatprep.mubr.msk.f32.mxu1 %vm1200_vm0, %v6933_v16 }
0x115f   : > { %v11363_v18 = vpop.f32.mrf.mxu0  ;;  %11415 = vmatmul.mubr.msk.f32.gmra.mxu1 %vm1200_vm0, %v11360_v49  ;;  %v18809_v49 = vld [vmem:[#allocation155_spill] sm:$0xff] }
0x1160   : > { %v4116_v16 = vadd.f32 %v18809_v49, %v18808_v8 }
0x1161   : > { %v6943_v22 = vpop.f32.mrf.mxu0 }
0x1162   : > { %11417 = vmatprep.mubr.msk.f32.mxu1 %vm1200_vm0, %v6943_v22 }
0x1163   : > { %v11366_v39 = vpop.f32.mrf.mxu0  ;;  %11418 = vmatmul.mubr.msk.f32.gmra.mxu1 %vm1200_vm0, %v11363_v18  ;;  %v7459_v18 = vmul.f32 0.0078125, %v7396_v44  ;;  %v7852_v44 = vld [vmem:[#allocation10 + $0xf0] sm:$0xff] }
0x1165   : > { %v6953_v35 = vpop.f32.mrf.mxu0 }
0x1166   : > { %11420 = vmatprep.mubr.msk.f32.mxu1 %vm1200_vm0, %v6953_v35  ;;  %v7398_v35 = vpop.xlane.xlu1 %7397 }
0x1167   : > { %11421 = vmatmul.mubr.msk.f32.gmra.mxu1 %vm1200_vm0, %v11366_v39  ;;  %v16793_v39 = vsub.f32 %v16654_v40, %v7458_v47  ;;  %v16804_v40 = vsub.f32 %v16647_v31, %v7459_v18  ;;  %v7460_v55 = vmul.f32 0.0078125, %v7398_v35  ;;  %v7847_v35 = vld [vmem:[#allocation10 + $0xc8] sm:$0xff] }
0x1169   : > { %v7522_v56 = vmul.f32 %v16793_v39, %v16793_v39  ;;  %v7523_v31 = vmul.f32 %v16804_v40, %v16804_v40 }
0x116a   : > { %v7402_v51 = vpop.xlane.xlu1 %7401 }
0x11dc   : > { %v11401_v52 = vpop.f32.mrf.mxu1 }
0x11dd   : > { %v7305_v15 = vadd.f32 %v11401_v52, %v18800_v58  ;;  %v12298_v52 = vld [vmem:[%s12848_s10 + $0x90] sm:$0xff] }
0x11de   : > { %v7209_v6 = vpop.f32.mrf.mxu1  ;;  %v18811_v58 = vld [vmem:[#allocation44_spill] sm:$0xff] }
0x11df   : > { %v7344_v42 = vadd.f32 %v16636_v38, %v7305_v15  ;;  %v7304_v11 = vadd.f32 %v7209_v6, %v5726_v13  ;;  %v5732_v15 = vadd.f32 %v18811_v58, %v4116_v16  ;;  %v12302_v16 = vld [vmem:[%s12848_s10 + $0xb8] sm:$0xff]  ;;  %v7844_v58 = vld [vmem:[#allocation10 + $0xb0] sm:$0xff] }
0x11e0   : > { %v11404_v50 = vpop.f32.mrf.mxu1 }
0x11e1   : > { %v7343_v23 = vadd.f32 %v16636_v38, %v7304_v11  ;;  %v7307_v10 = vadd.f32 %v11404_v50, %v18804_v46  ;;  %v16775_v19 = vadd.f32 %v12295_v4, %v7344_v42  ;;  %v12299_v50 = vld [vmem:[%s12848_s10 + $0xa0] sm:$0xff] }
0x11e2   : > { %v7219_v43 = vpop.f32.mrf.mxu1  ;;  %v18812_v46 = vld [vmem:[#allocation58_spill] sm:$0xff] }
0x11e3   : > { %v7346_v60 = vadd.f32 %v16636_v38, %v7307_v10  ;;  %v7306_v24 = vadd.f32 %v7219_v43, %v5728_v53  ;;  %7427 = vadd.xlane.f32.xlu0 %v16775_v19  ;;  %v16782_v34 = vadd.f32 %v12296_v5, %v7343_v23  ;;  %v7461_v53 = vmul.f32 0.0078125, %v7400_v0  ;;  %v7853_v43 = vld [vmem:[#allocation10 + $0xf8] sm:$0xff] }
0x11e4   : > { %v11407_v54 = vpop.f32.mrf.mxu1  ;;  %v16816_v23 = vsub.f32 %v16668_v32, %v7460_v55  ;;  %7866 = vmatprep.subr.mxu0 %v7853_v43  ;;  %v7842_v55 = vld [vmem:[#allocation10 + $0xa0] sm:$0xff] }
0x11e5   : > { %v7345_v37 = vadd.f32 %v16636_v38, %v7306_v24  ;;  %7425 = vadd.xlane.f32.xlu1 %v16782_v34  ;;  %v16788_v3 = vadd.f32 %v12297_v62, %v7346_v60  ;;  %v7309_v59 = vadd.f32 %v11407_v54, %v18810_v30  ;;  %v16825_v47 = vsub.f32 %v16661_v57, %v7461_v53  ;;  %v12301_v24 = vld [vmem:[%s12848_s10 + $0xb0] sm:$0xff]  ;;  %v7849_v57 = vld [vmem:[#allocation10 + $0xd8] sm:$0xff]  ;;  %v7406_v30 = vpop.xlane.xlu1 %7405  ;;  %v7838_v53 = vld [vmem:[#allocation10 + $0x80] sm:$0xff] }
0x11e6   : > { %v7229_v22 = vpop.f32.mrf.mxu1  ;;  %v7462_v60 = vmul.f32 0.0078125, %v7402_v51  ;;  %v7524_v54 = vmul.f32 %v16816_v23, %v16816_v23  ;;  %7867 = vmatpush1.msra.mxu0 %v7852_v44  ;;  %v7848_v62 = vld [vmem:[#allocation10 + $0xd0] sm:$0xff]  ;;  %v7835_v51 = vld [vmem:[#allocation10 + $0x68] sm:$0xff]  ;;  %v7834_v43 = vld [vmem:[#allocation10 + $0x60] sm:$0xff] }
0x11e7   : > { %v7308_v29 = vadd.f32 %v7229_v22, %v5730_v61  ;;  %7431 = vadd.xlane.f32.xlu0 %v16788_v3  ;;  %v16798_v36 = vadd.f32 %v12298_v52, %v7345_v37  ;;  %v7348_v42 = vadd.f32 %v16636_v38, %v7309_v59  ;;  %v7850_v61 = vld [vmem:[#allocation10 + $0xe0] sm:$0xff]  ;;  %v7404_v37 = vpop.xlane.xlu0 %7403  ;;  %7868 = vmatprep.subr.mxu0 %v7851_v12  ;;  %v7833_v44 = vld [vmem:[#allocation10 + $0x58] sm:$0xff]  ;;  %v7831_v12 = vld [vmem:[#allocation10 + $0x48] sm:$0xff] }
0x11e8   : > { %v11410_v13 = vpop.f32.mrf.mxu1  ;;  %7869 = vmatpush1.msra.mxu0 %v7850_v61  ;;  %v7463_v8 = vmul.f32 0.0078125, %v7404_v37  ;;  %v16835_v49 = vsub.f32 %v16680_v41, %v7462_v60  ;;  %v7525_v22 = vmul.f32 %v16825_v47, %v16825_v47  ;;  %v7846_v59 = vld [vmem:[#allocation10 + $0xc0] sm:$0xff]  ;;  %v7464_v41 = vmul.f32 0.0078125, %v7406_v30  ;;  %v7829_v37 = vld [vmem:[#allocation10 + $0x38] sm:$0xff] }
0x11e9   : > { %v7347_v6 = vadd.f32 %v16636_v38, %v7308_v29  ;;  %7429 = vadd.xlane.f32.xlu1 %v16798_v36  ;;  %v7311_v10 = vadd.f32 %v11410_v13, %v18812_v46  ;;  %v16821_v63 = vadd.f32 %v12300_v2, %v7348_v42  ;;  %7870 = vmatprep.subr.mxu0 %v7849_v57  ;;  %v7845_v29 = vld [vmem:[#allocation10 + $0xb8] sm:$0xff]  ;;  %v7830_v61 = vld [vmem:[#allocation10 + $0x40] sm:$0xff] }
0x11ea   : > { %v7239_v20 = vpop.f32.mrf.mxu1  ;;  %7871 = vmatpush1.msra.mxu0 %v7848_v62  ;;  %v16844_v52 = vsub.f32 %v16675_v45, %v7463_v8  ;;  %v7526_v13 = vmul.f32 %v16835_v49, %v16835_v49  ;;  %v16849_v42 = vsub.f32 %v16689_v14, %v7464_v41  ;;  %v7828_v8 = vld [vmem:[#allocation10 + $0x30] sm:$0xff] }
0x11eb   : > { %v7310_v11 = vadd.f32 %v7239_v20, %v5732_v15  ;;  %v16810_v7 = vadd.f32 %v12299_v50, %v7347_v6  ;;  %v7350_v32 = vadd.f32 %v16636_v38, %v7311_v10  ;;  %7872 = vmatprep.subr.mxu0 %v7847_v35  ;;  %v7408_v15 = vpop.xlane.xlu0 %7407  ;;  %v7843_v6 = vld [vmem:[#allocation10 + $0xa8] sm:$0xff]  ;;  %v7841_v20 = vld [vmem:[#allocation10 + $0x98] sm:$0xff]  ;;  %v7826_v35 = vld [vmem:[#allocation10 + $0x20] sm:$0xff] }
0x11ec   : > { %7873 = vmatpush1.msra.mxu0 %v7846_v59  ;;  %v7465_v0 = vmul.f32 0.0078125, %v7408_v15  ;;  %v7527_v45 = vmul.f32 %v16844_v52, %v16844_v52  ;;  %v7839_v50 = vld [vmem:[#allocation10 + $0x88] sm:$0xff]  ;;  %v7528_v14 = vmul.f32 %v16849_v42, %v16849_v42  ;;  %v7825_v59 = vld [vmem:[#allocation10 + $0x18] sm:$0xff]  ;;  %v7822_v15 = vld [vmem:[#allocation10] sm:$0xff] }
0x11ed   : > { %7554 = vadd.xlane.f32.xlu1 %v7522_v56  ;;  %7433 = vadd.xlane.f32.xlu0 %v16810_v7  ;;  %v7349_v4 = vadd.f32 %v16636_v38, %v7310_v11  ;;  %v16838_v18 = vadd.f32 %v12302_v16, %v7350_v32  ;;  %v7840_v11 = vld [vmem:[#allocation10 + $0x90] sm:$0xff]  ;;  %v7410_v56 = vpop.xlane.xlu1 %7409  ;;  %v7827_v16 = vld [vmem:[#allocation10 + $0x28] sm:$0xff] }
0x11ee   : > { %7874 = vmatprep.subr.mxu0 %v7845_v29  ;;  %v16854_v46 = vsub.f32 %v16685_v26, %v7465_v0  ;;  %v7466_v10 = vmul.f32 0.0078125, %v7410_v56  ;;  %v18813_v56 = vld [vmem:[#allocation172_spill] sm:$0xff] }
0x11ef   : > { %v16829_v5 = vadd.f32 %v12301_v24, %v7349_v4  ;;  %7875 = vmatpush1.msra.mxu0 %v7844_v58  ;;  %v7836_v4 = vld [vmem:[#allocation10 + $0x70] sm:$0xff]  ;;  %v7412_v2 = vpop.xlane.xlu0 %7411  ;;  %v7823_v58 = vld [vmem:[#allocation10 + $0x8] sm:$0xff] }
0x11f0   : > { %7876 = vmatprep.subr.mxu0 %v7843_v6  ;;  %v7467_v60 = vmul.f32 0.0078125, %v7412_v2  ;;  %v16859_v32 = vsub.f32 %v16705_v28, %v7466_v10  ;;  %v7529_v26 = vmul.f32 %v16854_v46, %v16854_v46  ;;  %v7832_v24 = vld [vmem:[#allocation10 + $0x50] sm:$0xff]  ;;  %v18816_v2 = vld [vmem:[#allocation174_spill] sm:$0xff] }
0x11f1   : > { %7435 = vadd.xlane.f32.xlu0 %v16821_v63  ;;  %7556 = vadd.xlane.f32.xlu1 %v7523_v31  ;;  %v7837_v31 = vld [vmem:[#allocation10 + $0x78] sm:$0xff] }
0x11f2   : > { %7877 = vmatpush1.msra.mxu0 %v7842_v55  ;;  %v16864_v57 = vsub.f32 %v16699_v1, %v7467_v60  ;;  %v7530_v28 = vmul.f32 %v16859_v32, %v16859_v32 }
0x11f3   : > { %7878 = vmatprep.subr.mxu0 %v7841_v20 }
0x11f4   : > { %7879 = vmatpush1.msra.mxu0 %v7840_v11  ;;  %v7531_v1 = vmul.f32 %v16864_v57, %v16864_v57 }
0x11f5   : > { %7437 = vadd.xlane.f32.xlu0 %v16829_v5  ;;  %7558 = vadd.xlane.f32.xlu1 %v7524_v54  ;;  %v7414_v54 = vpop.xlane.xlu1 %7413 }
0x11f6   : > { %7880 = vmatprep.subr.mxu0 %v7839_v50  ;;  %v7468_v62 = vmul.f32 0.0078125, %v7414_v54  ;;  %v18814_v50 = vld [vmem:[#allocation152_spill] sm:$0xff]  ;;  %v18819_v54 = vld [vmem:[#allocation41_spill] sm:$0xff] }
0x11f7   : > { %7881 = vmatpush1.msra.mxu0 %v7838_v53  ;;  %v4126_v53 = vadd.f32 %v18814_v50, %v18813_v56  ;;  %v12305_v56 = vld [vmem:[%s12848_s10 + $0xd0] sm:$0xff] }
0x11f8   : > { %7882 = vmatprep.subr.mxu0 %v7837_v31  ;;  %v16869_v41 = vsub.f32 %v16724_v33, %v7468_v62 }
0x11f9   : > { %7439 = vadd.xlane.f32.xlu0 %v16838_v18  ;;  %7560 = vadd.xlane.f32.xlu1 %v7525_v22  ;;  %v7416_v22 = vpop.xlane.xlu0 %7415  ;;  %v7418_v30 = vpop.xlane.xlu1 %7417 }
0x11fa   : > { %7883 = vmatpush1.msra.mxu0 %v7836_v4  ;;  %v7469_v29 = vmul.f32 0.0078125, %v7416_v22  ;;  %v7470_v55 = vmul.f32 0.0078125, %v7418_v30  ;;  %v7532_v20 = vmul.f32 %v16869_v41, %v16869_v41  ;;  %v18821_v30 = vld [vmem:[#allocation143_spill] sm:$0xff] }
0x11fb   : > { %7884 = vmatprep.subr.mxu0 %v7835_v51  ;;  %v18817_v51 = vld [vmem:[#allocation146_spill] sm:$0xff] }
0x11fc   : > { %7885 = vmatpush1.msra.mxu0 %v7834_v43  ;;  %v16874_v6 = vsub.f32 %v16717_v48, %v7469_v29  ;;  %v16879_v0 = vsub.f32 %v16736_v27, %v7470_v55  ;;  %v4136_v43 = vadd.f32 %v18817_v51, %v18816_v2  ;;  %v18822_v29 = vld [vmem:[#allocation43_spill] sm:$0xff]  ;;  %v12306_v51 = vld [vmem:[%s12848_s10 + $0xd8] sm:$0xff] }
0x11fd   : > { %7562 = vadd.xlane.f32.xlu1 %v7526_v13  ;;  %7886 = vmatprep.subr.mxu0 %v7833_v44  ;;  %v7824_v13 = vld [vmem:[#allocation10 + $0x10] sm:$0xff]  ;;  %v7422_v33 = vpop.xlane.xlu1 %7421  ;;  %v18818_v44 = vld [vmem:[#allocation51_spill] sm:$0xff] }
0x11fe   : > { %7887 = vmatpush1.msra.mxu0 %v7832_v24  ;;  %v7533_v11 = vmul.f32 %v16874_v6, %v16874_v6  ;;  %v7534_v10 = vmul.f32 %v16879_v0, %v16879_v0 }
0x11ff   : > { %7888 = vmatprep.subr.mxu0 %v7831_v12  ;;  %v5736_v12 = vadd.f32 %v18819_v54, %v4136_v43  ;;  %v12307_v54 = vld [vmem:[%s12848_s10 + $0xe0] sm:$0xff] }
0x1200   : > { %7889 = vmatpush1.msra.mxu0 %v7830_v61 }
0x1201   : > { %7564 = vadd.xlane.f32.xlu1 %v7527_v45  ;;  %7890 = vmatprep.subr.mxu0 %v7829_v37  ;;  %v7472_v45 = vmul.f32 0.0078125, %v7422_v33 }
0x1202   : > { %7891 = vmatpush1.msra.mxu0 %v7828_v8  ;;  %v12303_v8 = vld [vmem:[%s12848_s10 + $0xc0] sm:$0xff] }
0x1203   : > { %7892 = vmatprep.subr.mxu0 %v7827_v16  ;;  %v16886_v48 = vsub.f32 %v16745_v9, %v7472_v45 }
0x1204   : > { %7893 = vmatpush1.msra.mxu0 %v7826_v35  ;;  %v18820_v35 = vld [vmem:[#allocation176_spill] sm:$0xff] }
0x1205   : > { %7566 = vadd.xlane.f32.xlu1 %v7528_v14  ;;  %7894 = vmatprep.subr.mxu0 %v7825_v59  ;;  %v18815_v14 = vld [vmem:[#allocation45_spill] sm:$0xff]  ;;  %v7536_v9 = vmul.f32 %v16886_v48, %v16886_v48  ;;  %v4146_v59 = vadd.f32 %v18821_v30, %v18820_v35 }
0x1206   : > { %7895 = vmatpush1.msra.mxu0 %v7824_v13  ;;  %v5734_v4 = vadd.f32 %v18815_v14, %v4126_v53 }
0x1207   : > { %7896 = vmatprep.subr.mxu0 %v7823_v58  ;;  %v12304_v58 = vld [vmem:[%s12848_s10 + $0xc8] sm:$0xff] }
0x1208   : > { %7897 = vmatpush1.msra.mxu0 %v7822_v15 }
0x1209   : > { %7568 = vadd.xlane.f32.xlu1 %v7529_v26 }
0x120d   : > { %7570 = vadd.xlane.f32.xlu1 %v7530_v28 }
0x1211   : > { %7572 = vadd.xlane.f32.xlu1 %v7531_v1 }
0x1215   : > { %7574 = vadd.xlane.f32.xlu1 %v7532_v20  ;;  %v18823_v20 = vld [vmem:[#allocation32_spill] sm:$0xff] }
0x1216   : > { %v5738_v33 = vadd.f32 %v18823_v20, %v4146_v59  ;;  %v12309_v59 = vld [vmem:[%s12848_s10 + $0xf0] sm:$0xff] }
0x1219   : > { %7576 = vadd.xlane.f32.xlu1 %v7533_v11 }
0x121b   : > { %v11413_v31 = vpop.f32.mrf.mxu1 }
0x121c   : > { %v7313_v60 = vadd.f32 %v11413_v31, %v18818_v44  ;;  %v18824_v31 = vld [vmem:[#allocation178_spill] sm:$0xff] }
0x121d   : > { %v7249_v27 = vpop.f32.mrf.mxu1  ;;  %7578 = vadd.xlane.f32.xlu1 %v7534_v10  ;;  %v18825_v10 = vld [vmem:[#allocation126_spill] sm:$0xff] }
0x121e   : > { %v7312_v26 = vadd.f32 %v7249_v27, %v5734_v4  ;;  %v7352_v62 = vadd.f32 %v16636_v38, %v7313_v60  ;;  %v4156_v14 = vadd.f32 %v18825_v10, %v18824_v31  ;;  %v18826_v4 = vld [vmem:[#allocation37_spill] sm:$0xff]  ;;  %v18827_v60 = vld [vmem:[#allocation28_spill] sm:$0xff] }
0x121f   : > { %v11416_v24 = vpop.f32.mrf.mxu1 }
0x1220   : > { %v7351_v61 = vadd.f32 %v16636_v38, %v7312_v26  ;;  %v7315_v1 = vadd.f32 %v11416_v24, %v18822_v29  ;;  %v16908_v15 = vadd.f32 %v12304_v58, %v7352_v62  ;;  %v5740_v26 = vadd.f32 %v18827_v60, %v4156_v14 }
0x1221   : > { %v7259_v37 = vpop.f32.mrf.mxu1  ;;  %7582 = vadd.xlane.f32.xlu1 %v7536_v9 }
0x1222   : > { %v7314_v28 = vadd.f32 %v7259_v37, %v5736_v12  ;;  %v16900_v16 = vadd.f32 %v12303_v8, %v7351_v61  ;;  %v7354_v45 = vadd.f32 %v16636_v38, %v7315_v1  ;;  %v7420_v61 = vpop.xlane.xlu0 %7419  ;;  %v18828_v37 = vld [vmem:[#allocation30_spill] sm:$0xff]  ;;  %v12308_v8 = vld [vmem:[%s12848_s10 + $0xe8] sm:$0xff] }
0x1223   : > { %v11419_v22 = vpop.f32.mrf.mxu1  ;;  %v7471_v35 = vmul.f32 0.0078125, %v7420_v61 }
0x1224   : > { %7441 = vadd.xlane.f32.xlu0 %v16900_v16  ;;  %v7353_v13 = vadd.f32 %v16636_v38, %v7314_v28  ;;  %v7317_v27 = vadd.f32 %v11419_v22, %v18826_v4  ;;  %v16922_v43 = vadd.f32 %v12306_v51, %v7354_v45 }
0x1225   : > { %v7269_v55 = vpop.f32.mrf.mxu1 }
0x1226   : > { %v7316_v11 = vadd.f32 %v7269_v55, %v5738_v33  ;;  %v16914_v50 = vadd.f32 %v12305_v56, %v7353_v13  ;;  %v7356_v24 = vadd.f32 %v16636_v38, %v7317_v27  ;;  %v7424_v1 = vpop.xlane.xlu0 %7423  ;;  %v16943_v13 = vsub.f32 %v16731_v17, %v7471_v35  ;;  %v12310_v55 = vld [vmem:[%s12848_s10 + $0xf8] sm:$0xff]  ;;  %s12475_s10 = sshll.u32 %s12569_s17, 4  ;;  %s12476_s10 = int_to_ptr.vmem [resolvable:$false] %s12475_s10 }
0x1227   : > { %v11422_v53 = vpop.f32.mrf.mxu1  ;;  %v7473_v58 = vmul.f32 0.0078125, %v7424_v1  ;;  %s12477_s15 = scalar_lea.vmem %s12476_s10, 8192  ;;  %p12478_p4 = scmp.lt.s32.totalorder %s17846_s2, %s12476_s10 }
0x1228   : > { %7443 = vadd.xlane.f32.xlu0 %v16908_v15  ;;  %v7355_v2 = vadd.f32 %v16636_v38, %v7316_v11  ;;  %v7319_v62 = vadd.f32 %v11422_v53, %v18828_v37  ;;  %v16934_v22 = vadd.f32 %v12308_v8, %v7356_v24  ;;  %p12479_p0 = scmp.lt.s32.totalorder %s12477_s15, %s12471_s28 }
0x1229   : > { %v7279_v44 = vpop.f32.mrf.mxu1  ;;  %v16950_v33 = vsub.f32 %v16741_v25, %v7473_v58 }
0x122a   : > { %v7318_v9 = vadd.f32 %v7279_v44, %v5740_v26  ;;  %v16928_v12 = vadd.f32 %v12307_v54, %v7355_v2  ;;  %v7358_v30 = vadd.f32 %v16636_v38, %v7319_v62  ;;  %p12480_p7 = por %p12479_p0, %p12478_p4 }
0x122b   : > { %v7537_v45 = vmul.f32 %v16950_v33, %v16950_v33 }
0x122c   : > { %7445 = vadd.xlane.f32.xlu0 %v16914_v50  ;;  %v7357_v28 = vadd.f32 %v16636_v38, %v7318_v9  ;;  %v16946_v20 = vadd.f32 %v12310_v55, %v7358_v30  ;;  %v7535_v38 = vmul.f32 %v16943_v13, %v16943_v13  ;;  %p12481_p2 = pnand %p12480_p7, %p12474_p12 }
0x122e   : > { %v16939_v29 = vadd.f32 %v12309_v59, %v7357_v28 }
0x1230   : > { %7447 = vadd.xlane.f32.xlu0 %v16922_v43 }
0x1234   : > { %7449 = vadd.xlane.f32.xlu0 %v16928_v12 }
0x1238   : > { %7451 = vadd.xlane.f32.xlu0 %v16934_v22 }
0x123c   : > { %7453 = vadd.xlane.f32.xlu0 %v16939_v29 }
0x1240   : > { %7455 = vadd.xlane.f32.xlu0 %v16946_v20 }
0x1244   : > { %7580 = vadd.xlane.f32.xlu0 %v7535_v38 }
0x1248   : > { %7584 = vadd.xlane.f32.xlu0 %v7537_v45 }
0x126c   : > { %v7428_v11 = vpop.xlane.xlu0 %7427 }
0x126d   : > { %v7475_v17 = vmul.f32 0.0078125, %v7428_v11 }
0x126e   : > { %v7426_v56 = vpop.xlane.xlu1 %7425 }
0x126f   : > { %v16957_v53 = vsub.f32 %v16775_v19, %v7475_v17  ;;  %v7474_v31 = vmul.f32 0.0078125, %v7426_v56 }
0x1270   : > { %v7432_v10 = vpop.xlane.xlu0 %7431 }
0x1271   : > { %v16960_v14 = vsub.f32 %v16782_v34, %v7474_v31  ;;  %v7477_v25 = vmul.f32 0.0078125, %v7432_v10  ;;  %v7539_v4 = vmul.f32 %v16957_v53, %v16957_v53 }
0x1272   : > { %v7430_v27 = vpop.xlane.xlu1 %7429 }
0x1273   : > { %v16965_v2 = vsub.f32 %v16788_v3, %v7477_v25  ;;  %v7476_v51 = vmul.f32 0.0078125, %v7430_v27  ;;  %7588 = vadd.xlane.f32.xlu0 %v7539_v4  ;;  %v7538_v44 = vmul.f32 %v16960_v14, %v16960_v14 }
0x1275   : > { %v16970_v19 = vsub.f32 %v16798_v36, %v7476_v51  ;;  %7586 = vadd.xlane.f32.xlu1 %v7538_v44  ;;  %v7541_v34 = vmul.f32 %v16965_v2, %v16965_v2  ;;  %v16999_v44 = vld [vmem:[%s17897_s6] ss:$0 sm:$0xff] }
0x1276   : > { %v7555_v60 = vpop.xlane.xlu1 %7554  ;;  %v7434_v26 = vpop.xlane.xlu0 %7433 }
0x1277   : > { %v7618_v24 = vmul.f32 0.0078125, %v7555_v60  ;;  %v7478_v9 = vmul.f32 0.0078125, %v7434_v26  ;;  %7592 = vadd.xlane.f32.xlu0 %v7541_v34  ;;  %v7540_v3 = vmul.f32 %v16970_v19, %v16970_v19 }
0x1279   : > { %v7650_v54 = vadd.f32 1e-12, %v7618_v24  ;;  %v16977_v61 = vsub.f32 %v16810_v7, %v7478_v9  ;;  %7590 = vadd.xlane.f32.xlu1 %v7540_v3 }
0x127a   : > { %v7557_v37 = vpop.xlane.xlu1 %7556  ;;  %v7436_v36 = vpop.xlane.xlu0 %7435 }
0x127b   : > { %12071 = vrsqrt.f32 %v7650_v54  ;;  %v7619_v62 = vmul.f32 0.0078125, %v7557_v37  ;;  %v7479_v28 = vmul.f32 0.0078125, %v7436_v36  ;;  %v7542_v8 = vmul.f32 %v16977_v61, %v16977_v61 }
0x127d   : > { %v7651_v35 = vadd.f32 1e-12, %v7619_v62  ;;  %v16982_v30 = vsub.f32 %v16821_v63, %v7479_v28  ;;  %7594 = vadd.xlane.f32.xlu1 %v7542_v8 }
0x127e   : > { %v7559_v59 = vpop.xlane.xlu1 %7558  ;;  %v7438_v1 = vpop.xlane.xlu0 %7437 }
0x127f   : > { %12073 = vrsqrt.f32 %v7651_v35  ;;  %v7620_v58 = vmul.f32 0.0078125, %v7559_v59  ;;  %v7480_v7 = vmul.f32 0.0078125, %v7438_v1  ;;  %v7543_v55 = vmul.f32 %v16982_v30, %v16982_v30 }
0x1281   : > { %v7652_v38 = vadd.f32 1e-12, %v7620_v58  ;;  %v16987_v45 = vsub.f32 %v16829_v5, %v7480_v7  ;;  %7596 = vadd.xlane.f32.xlu0 %v7543_v55 }
0x1282   : > { %v7561_v11 = vpop.xlane.xlu1 %7560  ;;  %v7440_v17 = vpop.xlane.xlu0 %7439 }
0x1283   : > { %12075 = vrsqrt.f32 %v7652_v38  ;;  %v7621_v56 = vmul.f32 0.0078125, %v7561_v11  ;;  %v7481_v63 = vmul.f32 0.0078125, %v7440_v17  ;;  %v7544_v31 = vmul.f32 %v16987_v45, %v16987_v45 }
0x1285   : > { %v7653_v10 = vadd.f32 1e-12, %v7621_v56  ;;  %v16992_v25 = vsub.f32 %v16838_v18, %v7481_v63  ;;  %7598 = vadd.xlane.f32.xlu1 %v7544_v31  ;;  %v17005_v18 = vld [vmem:[%s17898_s7] ss:$0 sm:$0xff]  ;;  %v8202_v31 = vld [vmem:[#allocation11 + $0x78] sm:$0xff] }
0x1286   : > { %v7563_v4 = vpop.xlane.xlu1 %7562  ;;  %8227 = vmatpush1.msra.mxu1 %v8202_v31 }
0x1287   : > { %12077 = vrsqrt.f32 %v7653_v10  ;;  %v7622_v27 = vmul.f32 0.0078125, %v7563_v4  ;;  %v7545_v5 = vmul.f32 %v16992_v25, %v16992_v25  ;;  %v8201_v4 = vld [vmem:[#allocation11 + $0x70] sm:$0xff]  ;;  %8228 = vmatprep.subr.mxu1 %v18754_v21 }
0x1288   : > { %v12072_v51 = vpop.eup %12071  ;;  %8229 = vmatpush1.msra.mxu1 %v8201_v4 }
0x1289   : > { %v7714_v34 = vmul.f32 %v12072_v51, %v16793_v39  ;;  %v7654_v60 = vadd.f32 1e-12, %v7622_v27  ;;  %7600 = vadd.xlane.f32.xlu0 %v7545_v5  ;;  %8230 = vmatprep.subr.mxu1 %v18754_v21 }
0x128a   : > { %v7565_v26 = vpop.xlane.xlu1 %7564 }
0x128b   : > { %v7752_v24 = vmul.f32 %v16999_v44, %v7714_v34  ;;  %12079 = vrsqrt.f32 %v7654_v60  ;;  %v7623_v9 = vmul.f32 0.0078125, %v7565_v26  ;;  %v8200_v26 = vld [vmem:[#allocation11 + $0x68] sm:$0xff] }
0x128c   : > { %v12074_v3 = vpop.eup %12073  ;;  %8231 = vmatpush1.msra.mxu1 %v8200_v26 }
0x128d   : > { %v7655_v54 = vadd.f32 1e-12, %v7623_v9  ;;  %v17009_v37 = vadd.f32 %v17005_v18, %v7752_v24  ;;  %v7715_v36 = vmul.f32 %v12074_v3, %v16804_v40  ;;  %v8199_v9 = vld [vmem:[#allocation11 + $0x60] sm:$0xff]  ;;  %8232 = vmatprep.subr.mxu1 %v18754_v21 }
0x128e   : > { %v7567_v39 = vpop.xlane.xlu1 %7566  ;;  %8233 = vmatpush1.msra.mxu1 %v8199_v9 }
0x128f   : > { %12081 = vrsqrt.f32 %v7655_v54  ;;  %v7624_v62 = vmul.f32 0.0078125, %v7567_v39  ;;  %7931 = vmatmul.mubr.f32.vlgmr.msra.gmra.mxu0 %v17009_v37  ;;  %v7753_v28 = vmul.f32 %v16999_v44, %v7715_v36  ;;  %8234 = vmatprep.subr.mxu1 %v18754_v21 }
0x1290   : > { %v12076_v8 = vpop.eup %12075  ;;  %7936 = vmatprep.mubr.f32.mxu0 %v18754_v21 }
0x1291   : > { %v7656_v35 = vadd.f32 1e-12, %v7624_v62  ;;  %v17016_v59 = vadd.f32 %v17005_v18, %v7753_v28  ;;  %v7716_v1 = vmul.f32 %v12076_v8, %v16816_v23  ;;  %v8198_v28 = vld [vmem:[#allocation11 + $0x58] sm:$0xff] }
0x1292   : > { %v7569_v58 = vpop.xlane.xlu1 %7568  ;;  %8235 = vmatpush1.msra.mxu1 %v8198_v28  ;;  %v8190_v28 = vld [vmem:[#allocation11 + $0x18] sm:$0xff] }
0x1293   : > { %12083 = vrsqrt.f32 %v7656_v35  ;;  %v7625_v7 = vmul.f32 0.0078125, %v7569_v58  ;;  %7937 = vmatmul.mubr.f32.gmra.mxu0 %v17016_v59  ;;  %v7754_v40 = vmul.f32 %v16999_v44, %v7716_v1  ;;  %v8197_v35 = vld [vmem:[#allocation11 + $0x50] sm:$0xff]  ;;  %8236 = vmatprep.subr.mxu1 %v18754_v21 }
0x1294   : > { %v12078_v55 = vpop.eup %12077  ;;  %7942 = vmatprep.mubr.f32.mxu0 %v18754_v21  ;;  %8237 = vmatpush1.msra.mxu1 %v8197_v35 }
0x1295   : > { %v7657_v38 = vadd.f32 1e-12, %v7625_v7  ;;  %v17023_v11 = vadd.f32 %v17005_v18, %v7754_v40  ;;  %v7717_v17 = vmul.f32 %v12078_v55, %v16825_v47  ;;  %8238 = vmatprep.subr.mxu1 %v18754_v21 }
0x1296   : > { %v7571_v56 = vpop.xlane.xlu1 %7570 }
0x1297   : > { %12085 = vrsqrt.f32 %v7657_v38  ;;  %v7626_v63 = vmul.f32 0.0078125, %v7571_v56  ;;  %7943 = vmatmul.mubr.f32.gmra.mxu0 %v17023_v11  ;;  %v7755_v23 = vmul.f32 %v16999_v44, %v7717_v17  ;;  %v8196_v38 = vld [vmem:[#allocation11 + $0x48] sm:$0xff]  ;;  %v8195_v56 = vld [vmem:[#allocation11 + $0x40] sm:$0xff] }
0x1298   : > { %v12080_v10 = vpop.eup %12079  ;;  %7948 = vmatprep.mubr.f32.mxu0 %v18754_v21  ;;  %8239 = vmatpush1.msra.mxu1 %v8196_v38  ;;  %v8188_v38 = vld [vmem:[#allocation11 + $0x8] sm:$0xff] }
0x1299   : > { %v7658_v27 = vadd.f32 1e-12, %v7626_v63  ;;  %v17030_v5 = vadd.f32 %v17005_v18, %v7755_v23  ;;  %v7718_v51 = vmul.f32 %v12080_v10, %v16835_v49  ;;  %8240 = vmatprep.subr.mxu1 %v18754_v21 }
0x129a   : > { %v7573_v47 = vpop.xlane.xlu1 %7572  ;;  %8241 = vmatpush1.msra.mxu1 %v8195_v56 }
0x129b   : > { %12087 = vrsqrt.f32 %v7658_v27  ;;  %v7627_v34 = vmul.f32 0.0078125, %v7573_v47  ;;  %7949 = vmatmul.mubr.f32.gmra.mxu0 %v17030_v5  ;;  %v7756_v60 = vmul.f32 %v16999_v44, %v7718_v51  ;;  %8242 = vmatprep.subr.mxu1 %v18754_v21  ;;  %v8194_v27 = vld [vmem:[#allocation11 + $0x38] sm:$0xff]  ;;  %v8193_v47 = vld [vmem:[#allocation11 + $0x30] sm:$0xff] }
0x129c   : > { %v12082_v24 = vpop.eup %12081  ;;  %7954 = vmatprep.mubr.f32.mxu0 %v18754_v21  ;;  %8243 = vmatpush1.msra.mxu1 %v8194_v27  ;;  %v8218_v27 = vld [vmem:[#allocation11 + $0xf8] sm:$0xff] }
0x129d   : > { %v7659_v3 = vadd.f32 1e-12, %v7627_v34  ;;  %v17039_v49 = vadd.f32 %v17005_v18, %v7756_v60  ;;  %v7719_v54 = vmul.f32 %v12082_v24, %v16844_v52  ;;  %8244 = vmatprep.subr.mxu1 %v18754_v21  ;;  %v8192_v24 = vld [vmem:[#allocation11 + $0x28] sm:$0xff] }
0x129e   : > { %v7575_v36 = vpop.xlane.xlu1 %7574  ;;  %8245 = vmatpush1.msra.mxu1 %v8193_v47 }
0x129f   : > { %12089 = vrsqrt.f32 %v7659_v3  ;;  %v7628_v39 = vmul.f32 0.0078125, %v7575_v36  ;;  %7955 = vmatmul.mubr.f32.gmra.mxu0 %v17039_v49  ;;  %v7757_v62 = vmul.f32 %v16999_v44, %v7719_v54  ;;  %8246 = vmatprep.subr.mxu1 %v18754_v21  ;;  %v8191_v3 = vld [vmem:[#allocation11 + $0x20] sm:$0xff] }
0x12a0   : > { %v12084_v8 = vpop.eup %12083  ;;  %7960 = vmatprep.mubr.f32.mxu0 %v18754_v21  ;;  %8247 = vmatpush1.msra.mxu1 %v8192_v24 }
0x12a1   : > { %v7660_v1 = vadd.f32 1e-12, %v7628_v39  ;;  %v17048_v52 = vadd.f32 %v17005_v18, %v7757_v62  ;;  %v7720_v58 = vmul.f32 %v12084_v8, %v16849_v42  ;;  %8248 = vmatprep.subr.mxu1 %v18754_v21 }
0x12a2   : > { %v7577_v7 = vpop.xlane.xlu1 %7576  ;;  %8249 = vmatpush1.msra.mxu1 %v8191_v3 }
0x12a3   : > { %12091 = vrsqrt.f32 %v7660_v1  ;;  %v7629_v40 = vmul.f32 0.0078125, %v7577_v7  ;;  %7961 = vmatmul.mubr.f32.gmra.mxu0 %v17048_v52  ;;  %v7758_v55 = vmul.f32 %v16999_v44, %v7720_v58  ;;  %8250 = vmatprep.subr.mxu1 %v18754_v21  ;;  %v8189_v1 = vld [vmem:[#allocation11 + $0x10] sm:$0xff] }
0x12a4   : > { %v12086_v17 = vpop.eup %12085  ;;  %7966 = vmatprep.mubr.f32.mxu0 %v18754_v21  ;;  %8251 = vmatpush1.msra.mxu1 %v8190_v28 }
0x12a5   : > { %v7661_v63 = vadd.f32 1e-12, %v7629_v40  ;;  %v17057_v42 = vadd.f32 %v17005_v18, %v7758_v55  ;;  %v7721_v23 = vmul.f32 %v12086_v17, %v16854_v46  ;;  %8252 = vmatprep.subr.mxu1 %v18754_v21 }
0x12a6   : > { %v7579_v31 = vpop.xlane.xlu1 %7578  ;;  %8253 = vmatpush1.msra.mxu1 %v8189_v1 }
0x12a7   : > { %12093 = vrsqrt.f32 %v7661_v63  ;;  %v7630_v10 = vmul.f32 0.0078125, %v7579_v31  ;;  %7967 = vmatmul.mubr.f32.gmra.mxu0 %v17057_v42  ;;  %v7759_v4 = vmul.f32 %v16999_v44, %v7721_v23  ;;  %8254 = vmatprep.subr.mxu1 %v18754_v21 }
0x12a8   : > { %v12088_v51 = vpop.eup %12087  ;;  %7972 = vmatprep.mubr.f32.mxu0 %v18754_v21  ;;  %8255 = vmatpush1.msra.mxu1 %v8188_v38 }
0x12a9   : > { %v7662_v34 = vadd.f32 1e-12, %v7630_v10  ;;  %v17066_v46 = vadd.f32 %v17005_v18, %v7759_v4  ;;  %v7722_v60 = vmul.f32 %v12088_v51, %v16859_v32  ;;  %8256 = vmatprep.subr.mxu1 %v18754_v21 }
0x12ab   : > { %12095 = vrsqrt.f32 %v7662_v34  ;;  %7973 = vmatmul.mubr.f32.gmra.mxu0 %v17066_v46  ;;  %v7760_v26 = vmul.f32 %v16999_v44, %v7722_v60 }
0x12ac   : > { %v12090_v9 = vpop.eup %12089  ;;  %7978 = vmatprep.mubr.f32.mxu0 %v18754_v21 }
0x12ad   : > { %v7442_v54 = vpop.xlane.xlu0 %7441  ;;  %v17075_v36 = vadd.f32 %v17005_v18, %v7760_v26  ;;  %v7723_v32 = vmul.f32 %v12090_v9, %v16864_v57  ;;  %v8217_v9 = vld [vmem:[#allocation11 + $0xf0] sm:$0xff] }
0x12ae   : > { %v7482_v39 = vmul.f32 0.0078125, %v7442_v54 }
0x12af   : > { %7979 = vmatmul.mubr.f32.gmra.mxu0 %v17075_v36  ;;  %v7761_v62 = vmul.f32 %v16999_v44, %v7723_v32 }
0x12b0   : > { %v12092_v8 = vpop.eup %12091  ;;  %v17083_v35 = vsub.f32 %v16900_v16, %v7482_v39  ;;  %7984 = vmatprep.mubr.f32.mxu0 %v18754_v21 }
0x12b1   : > { %v7444_v57 = vpop.xlane.xlu0 %7443  ;;  %v17087_v58 = vadd.f32 %v17005_v18, %v7761_v62  ;;  %v7724_v7 = vmul.f32 %v12092_v8, %v16869_v41  ;;  %v8187_v41 = vld [vmem:[#allocation11] sm:$0xff] }
0x12b2   : > { %v7483_v40 = vmul.f32 0.0078125, %v7444_v57  ;;  %v7546_v55 = vmul.f32 %v17083_v35, %v17083_v35  ;;  %8257 = vmatpush1.msra.mxu1 %v8187_v41  ;;  %v8215_v8 = vld [vmem:[#allocation11 + $0xe0] sm:$0xff]  ;;  %v8212_v41 = vld [vmem:[#allocation11 + $0xc8] sm:$0xff] }
0x12b3   : > { %7985 = vmatmul.mubr.f32.gmra.mxu0 %v17087_v58  ;;  %v7762_v16 = vmul.f32 %v16999_v44, %v7724_v7  ;;  %8258 = vmatprep.subr.mxu1 %v18754_v21  ;;  %v8214_v7 = vld [vmem:[#allocation11 + $0xd8] sm:$0xff] }
0x12b4   : > { %v12094_v17 = vpop.eup %12093  ;;  %v17097_v56 = vsub.f32 %v16908_v15, %v7483_v40  ;;  %7602 = vadd.xlane.f32.xlu1 %v7546_v55  ;;  %7990 = vmatprep.mubr.f32.mxu0 %v18754_v21 }
0x12b5   : > { %v7446_v63 = vpop.xlane.xlu0 %7445  ;;  %v17101_v23 = vadd.f32 %v17005_v18, %v7762_v16  ;;  %v7725_v31 = vmul.f32 %v12094_v17, %v16874_v6  ;;  %8259 = vmatpush2.msra.mxu1 %v8218_v27  ;;  %v8213_v16 = vld [vmem:[#allocation11 + $0xd0] sm:$0xff]  ;;  %v8210_v27 = vld [vmem:[#allocation11 + $0xb8] sm:$0xff] }
0x12b6   : > { %v7484_v10 = vmul.f32 0.0078125, %v7446_v63  ;;  %v7547_v4 = vmul.f32 %v17097_v56, %v17097_v56  ;;  %8260 = vmatprep.subr.mxu1 %v18754_v21 }
0x12b7   : > { %7991 = vmatmul.mubr.f32.gmra.mxu0 %v17101_v23  ;;  %v7763_v15 = vmul.f32 %v16999_v44, %v7725_v31  ;;  %8261 = vmatpush2.msra.mxu1 %v8217_v9  ;;  %v8208_v9 = vld [vmem:[#allocation11 + $0xa8] sm:$0xff] }
0x12b8   : > { %v12096_v51 = vpop.eup %12095  ;;  %v17110_v47 = vsub.f32 %v16914_v50, %v7484_v10  ;;  %7604 = vadd.xlane.f32.xlu0 %v7547_v4  ;;  %7996 = vmatprep.mubr.f32.mxu0 %v18754_v21  ;;  %v8211_v10 = vld [vmem:[#allocation11 + $0xc0] sm:$0xff] }
0x12b9   : > { %v7448_v6 = vpop.xlane.xlu0 %7447  ;;  %v17114_v34 = vadd.f32 %v17005_v18, %v7763_v15  ;;  %v7726_v60 = vmul.f32 %v12096_v51, %v16879_v0  ;;  %v8216_v0 = vld [vmem:[#allocation11 + $0xe8] sm:$0xff]  ;;  %8262 = vmatprep.subr.mxu1 %v18754_v21 }
0x12ba   : > { %v7485_v26 = vmul.f32 0.0078125, %v7448_v6  ;;  %v7548_v24 = vmul.f32 %v17110_v47, %v17110_v47  ;;  %8263 = vmatpush2.msra.mxu1 %v8216_v0  ;;  %v8207_v0 = vld [vmem:[#allocation11 + $0xa0] sm:$0xff] }
0x12bb   : > { %7997 = vmatmul.mubr.f32.gmra.mxu0 %v17114_v34  ;;  %v7764_v50 = vmul.f32 %v16999_v44, %v7726_v60  ;;  %8264 = vmatprep.subr.mxu1 %v18754_v21  ;;  %v8209_v60 = vld [vmem:[#allocation11 + $0xb0] sm:$0xff] }
0x12bc   : > { %v17124_v3 = vsub.f32 %v16922_v43, %v7485_v26  ;;  %7606 = vadd.xlane.f32.xlu1 %v7548_v24  ;;  %8002 = vmatprep.mubr.f32.mxu0 %v18754_v21 }
0x12bd   : > { %v7450_v54 = vpop.xlane.xlu0 %7449  ;;  %v17128_v32 = vadd.f32 %v17005_v18, %v7764_v50  ;;  %8265 = vmatpush2.msra.mxu1 %v8215_v8  ;;  %v8204_v8 = vld [vmem:[#allocation11 + $0x88] sm:$0xff] }
0x12be   : > { %v7486_v39 = vmul.f32 0.0078125, %v7450_v54  ;;  %v7549_v62 = vmul.f32 %v17124_v3, %v17124_v3  ;;  %8266 = vmatprep.subr.mxu1 %v18754_v21 }
0x12bf   : > { %8003 = vmatmul.mubr.f32.gmra.mxu0 %v17128_v32  ;;  %8267 = vmatpush2.msra.mxu1 %v8214_v7 }
0x12c0   : > { %v17135_v43 = vsub.f32 %v16928_v12, %v7486_v39  ;;  %7608 = vadd.xlane.f32.xlu0 %v7549_v62  ;;  %8008 = vmatprep.mubr.f32.mxu0 %v18754_v21  ;;  %v7583_v12 = vpop.xlane.xlu1 %7582  ;;  %v8206_v39 = vld [vmem:[#allocation11 + $0x98] sm:$0xff] }
0x12c1   : > { %v7452_v28 = vpop.xlane.xlu0 %7451  ;;  %8268 = vmatprep.subr.mxu1 %v18754_v21  ;;  %v7632_v63 = vmul.f32 0.0078125, %v7583_v12 }
0x12c2   : > { %v7487_v1 = vmul.f32 0.0078125, %v7452_v28  ;;  %v7550_v57 = vmul.f32 %v17135_v43, %v17135_v43  ;;  %8269 = vmatpush2.msra.mxu1 %v8213_v16  ;;  %v8205_v28 = vld [vmem:[#allocation11 + $0x90] sm:$0xff] }
0x12c3   : > { %8270 = vmatprep.subr.mxu1 %v18754_v21  ;;  %v7664_v51 = vadd.f32 1e-12, %v7632_v63 }
0x12c4   : > { %v17143_v40 = vsub.f32 %v16934_v22, %v7487_v1  ;;  %7610 = vadd.xlane.f32.xlu1 %v7550_v57  ;;  %8271 = vmatpush2.msra.mxu1 %v8212_v41  ;;  %v8203_v1 = vld [vmem:[#allocation11 + $0x80] sm:$0xff] }
0x12c5   : > { %v7454_v55 = vpop.xlane.xlu0 %7453  ;;  %8272 = vmatprep.subr.mxu1 %v18754_v21  ;;  %12097 = vrsqrt.f32 %v7664_v51 }
0x12c6   : > { %v7488_v38 = vmul.f32 0.0078125, %v7454_v55  ;;  %v7551_v17 = vmul.f32 %v17143_v40, %v17143_v40  ;;  %8273 = vmatpush2.msra.mxu1 %v8211_v10 }
0x12c7   : > { %8274 = vmatprep.subr.mxu1 %v18754_v21 }
0x12c8   : > { %v17150_v31 = vsub.f32 %v16939_v29, %v7488_v38  ;;  %7612 = vadd.xlane.f32.xlu0 %v7551_v17  ;;  %8275 = vmatpush2.msra.mxu1 %v8210_v27 }
0x12c9   : > { %v7456_v22 = vpop.xlane.xlu0 %7455  ;;  %8276 = vmatprep.subr.mxu1 %v18754_v21 }
0x12ca   : > { %v7489_v4 = vmul.f32 0.0078125, %v7456_v22  ;;  %v7552_v15 = vmul.f32 %v17150_v31, %v17150_v31  ;;  %8277 = vmatpush2.msra.mxu1 %v8209_v60 }
0x12cb   : > { %8278 = vmatprep.subr.mxu1 %v18754_v21 }
0x12cc   : > { %v17157_v6 = vsub.f32 %v16946_v20, %v7489_v4  ;;  %7614 = vadd.xlane.f32.xlu1 %v7552_v15  ;;  %8279 = vmatpush2.msra.mxu1 %v8208_v9 }
0x12cd   : > { %v7581_v29 = vpop.xlane.xlu0 %7580  ;;  %8280 = vmatprep.subr.mxu1 %v18754_v21 }
0x12ce   : > { %v7631_v26 = vmul.f32 0.0078125, %v7581_v29  ;;  %v7553_v24 = vmul.f32 %v17157_v6, %v17157_v6  ;;  %8281 = vmatpush2.msra.mxu1 %v8207_v0 }
0x12cf   : > { %8282 = vmatprep.subr.mxu1 %v18754_v21 }
0x12d0   : > { %v7663_v50 = vadd.f32 1e-12, %v7631_v26  ;;  %7616 = vadd.xlane.f32.xlu0 %v7553_v24  ;;  %8283 = vmatpush2.msra.mxu1 %v8206_v39 }
0x12d1   : > { %v7585_v20 = vpop.xlane.xlu0 %7584  ;;  %8284 = vmatprep.subr.mxu1 %v18754_v21 }
0x12d2   : > { %12099 = vrsqrt.f32 %v7663_v50  ;;  %v7633_v54 = vmul.f32 0.0078125, %v7585_v20  ;;  %8285 = vmatpush2.msra.mxu1 %v8205_v28  ;;  %v12098_v57 = vpop.eup %12097 }
0x12d3   : > { %8286 = vmatprep.subr.mxu1 %v18754_v21  ;;  %v7728_v55 = vmul.f32 %v12098_v57, %v16886_v48 }
0x12d4   : > { %v7665_v62 = vadd.f32 1e-12, %v7633_v54  ;;  %8287 = vmatpush2.msra.mxu1 %v8204_v8 }
0x12d5   : > { %8288 = vmatprep.subr.mxu1 %v18754_v21  ;;  %v7766_v41 = vmul.f32 %v16999_v44, %v7728_v55 }
0x12d6   : > { %12101 = vrsqrt.f32 %v7665_v62  ;;  %8289 = vmatpush2.msra.mxu1 %v8203_v1 }
0x12d7   : > { %v17179_v22 = vadd.f32 %v17005_v18, %v7766_v41 }
0x12df   : > { %v12100_v7 = vpop.eup %12099 }
0x12e0   : > { %v7727_v12 = vmul.f32 %v12100_v7, %v16943_v13 }
0x12e2   : > { %v7765_v16 = vmul.f32 %v16999_v44, %v7727_v12 }
0x12e3   : > { %v12102_v38 = vpop.eup %12101 }
0x12e4   : > { %v17172_v17 = vadd.f32 %v17005_v18, %v7765_v16  ;;  %v7729_v63 = vmul.f32 %v12102_v38, %v16950_v33 }
0x12e6   : > { %8009 = vmatmul.mubr.f32.gmra.mxu0 %v17172_v17  ;;  %v7767_v13 = vmul.f32 %v16999_v44, %v7729_v63 }
0x12e7   : > { %8014 = vmatprep.mubr.f32.mxu0 %v18754_v21 }
0x12e8   : > { %v17185_v48 = vadd.f32 %v17005_v18, %v7767_v13 }
0x12ea   : > { %8015 = vmatmul.mubr.f32.gmra.mxu0 %v17179_v22 }
0x12eb   : > { %8020 = vmatprep.mubr.f32.mxu0 %v18754_v21 }
0x12ee   : > { %8021 = vmatmul.mubr.f32.gmra.mxu0 %v17185_v48 }
0x12ef   : > { %8026 = vmatprep.mubr.f32.mxu0 %v18754_v21 }
0x12fc   : > { %v7589_v33 = vpop.xlane.xlu0 %7588 }
0x12fd   : > { %v7635_v10 = vmul.f32 0.0078125, %v7589_v33 }
0x12fe   : > { %v7587_v4 = vpop.xlane.xlu1 %7586 }
0x12ff   : > { %v7667_v15 = vadd.f32 1e-12, %v7635_v10  ;;  %v7634_v27 = vmul.f32 0.0078125, %v7587_v4 }
0x1300   : > { %v7593_v51 = vpop.xlane.xlu0 %7592 }
0x1301   : > { %12103 = vrsqrt.f32 %v7667_v15  ;;  %v7666_v29 = vadd.f32 1e-12, %v7634_v27  ;;  %v7637_v60 = vmul.f32 0.0078125, %v7593_v51 }
0x1302   : > { %v7591_v26 = vpop.xlane.xlu1 %7590 }
0x1303   : > { %12105 = vrsqrt.f32 %v7666_v29  ;;  %v7636_v24 = vmul.f32 0.0078125, %v7591_v26  ;;  %v7669_v9 = vadd.f32 1e-12, %v7637_v60 }
0x1305   : > { %v7668_v50 = vadd.f32 1e-12, %v7636_v24 }
0x1306   : > { %v7595_v20 = vpop.xlane.xlu1 %7594 }
0x1307   : > { %12107 = vrsqrt.f32 %v7668_v50  ;;  %v7638_v0 = vmul.f32 0.0078125, %v7595_v20 }
0x1308   : > { %12109 = vrsqrt.f32 %v7669_v9 }
0x1309   : > { %v7670_v54 = vadd.f32 1e-12, %v7638_v0 }
0x130a   : > { %v7597_v39 = vpop.xlane.xlu0 %7596 }
0x130b   : > { %v7639_v62 = vmul.f32 0.0078125, %v7597_v39  ;;  %12111 = vrsqrt.f32 %v7670_v54 }
0x130d   : > { %v7671_v28 = vadd.f32 1e-12, %v7639_v62 }
0x130e   : > { %v12104_v8 = vpop.eup %12103  ;;  %v7599_v1 = vpop.xlane.xlu1 %7598 }
0x130f   : > { %v7640_v57 = vmul.f32 0.0078125, %v7599_v1  ;;  %v7731_v12 = vmul.f32 %v12104_v8, %v16957_v53  ;;  %12113 = vrsqrt.f32 %v7671_v28 }
0x1310   : > { %v12106_v7 = vpop.eup %12105 }
0x1311   : > { %v7672_v55 = vadd.f32 1e-12, %v7640_v57  ;;  %v7730_v16 = vmul.f32 %v12106_v7, %v16960_v14  ;;  %v7769_v33 = vmul.f32 %v16999_v44, %v7731_v12 }
0x1312   : > { %v7601_v38 = vpop.xlane.xlu0 %7600 }
0x1313   : > { %v7641_v41 = vmul.f32 0.0078125, %v7601_v38  ;;  %v7768_v63 = vmul.f32 %v16999_v44, %v7730_v16  ;;  %12115 = vrsqrt.f32 %v7672_v55  ;;  %v17200_v53 = vadd.f32 %v17005_v18, %v7769_v33 }
0x1314   : > { %v12108_v13 = vpop.eup %12107 }
0x1315   : > { %v7673_v10 = vadd.f32 1e-12, %v7641_v41  ;;  %v17194_v4 = vadd.f32 %v17005_v18, %v7768_v63  ;;  %v7732_v15 = vmul.f32 %v12108_v13, %v16970_v19  ;;  %v12110_v27 = vpop.eup %12109 }
0x1316   : > { %v7733_v51 = vmul.f32 %v12110_v27, %v16965_v2 }
0x1317   : > { %8027 = vmatmul.mubr.f32.gmra.mxu0 %v17194_v4  ;;  %12117 = vrsqrt.f32 %v7673_v10  ;;  %v7770_v14 = vmul.f32 %v16999_v44, %v7732_v15  ;;  %v7854_v10 = vld [vmem:[%s17900_s9] sm:$0x3] }
0x1318   : > { %8032 = vmatprep.mubr.f32.mxu0 %v18754_v21  ;;  %v12112_v29 = vpop.eup %12111  ;;  %v7771_v60 = vmul.f32 %v16999_v44, %v7733_v51 }
0x1319   : > { %v17207_v19 = vadd.f32 %v17005_v18, %v7770_v14  ;;  %v7734_v26 = vmul.f32 %v12112_v29, %v16977_v61  ;;  %v18829_v14 = vld [vmem:[#allocation26_spill] sm:$0xff] }
0x131a   : > { %v17214_v9 = vadd.f32 %v17005_v18, %v7771_v60  ;;  %v18830_v51 = vsub.s32 0, %v18829_v14 }
0x131b   : > { %8033 = vmatmul.mubr.f32.gmra.mxu0 %v17200_v53  ;;  %v7772_v2 = vmul.f32 %v16999_v44, %v7734_v26  ;;  %v18831_v26 = vsub.s32 1, %v18829_v14 }
0x131c   : > { %8038 = vmatprep.mubr.f32.mxu0 %v18754_v21  ;;  %v12114_v24 = vpop.eup %12113  ;;  %v17250_v29 = vrot.slane %v7854_v10, %v18830_v51 }
0x131d   : > { %v7735_v50 = vmul.f32 %v12114_v24, %v16982_v30  ;;  %v17221_v0 = vadd.f32 %v17005_v18, %v7772_v2  ;;  %v17254_v24 = vrot.slane %v7854_v10, %v18831_v26 }
0x131f   : > { %8039 = vmatmul.mubr.f32.gmra.mxu0 %v17207_v19  ;;  %v7773_v61 = vmul.f32 %v16999_v44, %v7735_v50 }
0x1320   : > { %8044 = vmatprep.mubr.f32.mxu0 %v18754_v21  ;;  %v12116_v20 = vpop.eup %12115 }
0x1321   : > { %v7736_v54 = vmul.f32 %v12116_v20, %v16987_v45  ;;  %v17228_v62 = vadd.f32 %v17005_v18, %v7773_v61 }
0x1323   : > { %8045 = vmatmul.mubr.f32.gmra.mxu0 %v17214_v9  ;;  %v7774_v30 = vmul.f32 %v16999_v44, %v7736_v54 }
0x1324   : > { %8050 = vmatprep.mubr.f32.mxu0 %v18754_v21  ;;  %v12118_v39 = vpop.eup %12117 }
0x1325   : > { %v7737_v28 = vmul.f32 %v12118_v39, %v16992_v25  ;;  %v17235_v8 = vadd.f32 %v17005_v18, %v7774_v30 }
0x1327   : > { %8051 = vmatmul.mubr.f32.gmra.mxu0 %v17221_v0  ;;  %v7775_v45 = vmul.f32 %v16999_v44, %v7737_v28 }
0x1328   : > { %8056 = vmatprep.mubr.f32.mxu0 %v18754_v21 }
0x1329   : > { %v17241_v1 = vadd.f32 %v17005_v18, %v7775_v45 }
0x132b   : > { %8057 = vmatmul.mubr.f32.gmra.mxu0 %v17228_v62 }
0x132c   : > { %8062 = vmatprep.mubr.f32.mxu0 %v18754_v21 }
0x132f   : > { %8063 = vmatmul.mubr.f32.gmra.mxu0 %v17235_v8 }
0x1330   : > { %8068 = vmatprep.mubr.f32.mxu0 %v18754_v21 }
0x1333   : > { %8069 = vmatmul.mubr.f32.gmra.mxu0 %v17241_v1 }
0x1334   : > { %8074 = vmatprep.mubr.f32.mxu0 %v18754_v21 }
0x133d   : > { %v7603_v25 = vpop.xlane.xlu1 %7602 }
0x133e   : > { %v7642_v57 = vmul.f32 0.0078125, %v7603_v25 }
0x1340   : > { %v7674_v7 = vadd.f32 1e-12, %v7642_v57 }
0x1341   : > { %v7605_v12 = vpop.xlane.xlu0 %7604 }
0x1342   : > { %12119 = vrsqrt.f32 %v7674_v7  ;;  %v7643_v55 = vmul.f32 0.0078125, %v7605_v12 }
0x1344   : > { %v7675_v16 = vadd.f32 1e-12, %v7643_v55 }
0x1345   : > { %v7607_v38 = vpop.xlane.xlu1 %7606 }
0x1346   : > { %12121 = vrsqrt.f32 %v7675_v16  ;;  %v7644_v41 = vmul.f32 0.0078125, %v7607_v38 }
0x1348   : > { %v7676_v63 = vadd.f32 1e-12, %v7644_v41 }
0x1349   : > { %v7609_v13 = vpop.xlane.xlu0 %7608 }
0x134a   : > { %12123 = vrsqrt.f32 %v7676_v63  ;;  %v7645_v33 = vmul.f32 0.0078125, %v7609_v13 }
0x134c   : > { %v7677_v15 = vadd.f32 1e-12, %v7645_v33 }
0x134d   : > { %v7611_v27 = vpop.xlane.xlu1 %7610 }
0x134e   : > { %12125 = vrsqrt.f32 %v7677_v15  ;;  %v7646_v60 = vmul.f32 0.0078125, %v7611_v27 }
0x134f   : > { %v12120_v2 = vpop.eup %12119  ;;  %v7932_v50 = vpop.f32.mrf.mxu0 }
0x1350   : > { %v7678_v20 = vadd.f32 1e-12, %v7646_v60  ;;  %v7738_v61 = vmul.f32 %v12120_v2, %v17083_v35  ;;  %v7933_v54 = vadd.f32 %v7932_v50, %v17250_v29 }
0x1351   : > { %v7934_v39 = vpop.f32.mrf.mxu0  ;;  %v7613_v30 = vpop.xlane.xlu0 %7612 }
0x1352   : > { %12127 = vrsqrt.f32 %v7678_v20  ;;  %v7935_v28 = vadd.f32 %v7934_v39, %v17254_v24  ;;  %v7647_v45 = vmul.f32 0.0078125, %v7613_v30  ;;  %v7776_v7 = vmul.f32 %v16999_v44, %v7738_v61 }
0x1353   : > { %v12122_v25 = vpop.eup %12121  ;;  %v7938_v57 = vpop.f32.mrf.mxu0  ;;  %v8123_v38 = vmax.f32 %v7933_v54, 0.0 }
0x1354   : > { %v8124_v12 = vmax.f32 %v7935_v28, 0.0  ;;  %v7679_v55 = vadd.f32 1e-12, %v7647_v45  ;;  %v7739_v16 = vmul.f32 %v12122_v25, %v17097_v56  ;;  %v7939_v41 = vadd.f32 %v7938_v57, %v17250_v29 }
0x1355   : > { %v7940_v35 = vpop.f32.mrf.mxu0  ;;  %v7615_v63 = vpop.xlane.xlu1 %7614  ;;  %v17263_v13 = vadd.f32 %v17005_v18, %v7776_v7 }
0x1356   : > { %12129 = vrsqrt.f32 %v7679_v55  ;;  %v7941_v33 = vadd.f32 %v7940_v35, %v17254_v24  ;;  %v7648_v10 = vmul.f32 0.0078125, %v7615_v63  ;;  %8290 = vmatprep.mubr.f32.mxu1 %v8124_v12  ;;  %v7777_v56 = vmul.f32 %v16999_v44, %v7739_v16 }
0x1357   : > { %v12124_v15 = vpop.eup %12123  ;;  %8075 = vmatmul.mubr.f32.gmra.mxu0 %v17263_v13  ;;  %v7944_v27 = vpop.f32.mrf.mxu0  ;;  %8291 = vmatmul.mubr.f32.vlgmr.msra.gmra.mxu1 %v8123_v38  ;;  %v8125_v26 = vmax.f32 %v7939_v41, 0.0 }
0x1358   : > { %v8126_v14 = vmax.f32 %v7941_v33, 0.0  ;;  %v7680_v51 = vadd.f32 1e-12, %v7648_v10  ;;  %8080 = vmatprep.mubr.f32.mxu0 %v18754_v21  ;;  %v7740_v60 = vmul.f32 %v12124_v15, %v17110_v47  ;;  %v7945_v2 = vadd.f32 %v7944_v27, %v17250_v29 }
0x1359   : > { %v7946_v50 = vpop.f32.mrf.mxu0  ;;  %v7617_v20 = vpop.xlane.xlu0 %7616  ;;  %v17272_v61 = vadd.f32 %v17005_v18, %v7777_v56 }
0x135a   : > { %12131 = vrsqrt.f32 %v7680_v51  ;;  %v7947_v54 = vadd.f32 %v7946_v50, %v17254_v24  ;;  %v7649_v39 = vmul.f32 0.0078125, %v7617_v20  ;;  %8295 = vmatprep.mubr.f32.mxu1 %v8126_v14  ;;  %v7778_v47 = vmul.f32 %v16999_v44, %v7740_v60 }
0x135b   : > { %v12126_v30 = vpop.eup %12125  ;;  %8081 = vmatmul.mubr.f32.gmra.mxu0 %v17272_v61  ;;  %v7950_v28 = vpop.f32.mrf.mxu0  ;;  %8296 = vmatmul.mubr.f32.gmra.mxu1 %v8125_v26  ;;  %v8127_v7 = vmax.f32 %v7945_v2, 0.0 }
0x135c   : > { %v8128_v45 = vmax.f32 %v7947_v54, 0.0  ;;  %v7681_v25 = vadd.f32 1e-12, %v7649_v39  ;;  %8086 = vmatprep.mubr.f32.mxu0 %v18754_v21  ;;  %v7741_v57 = vmul.f32 %v12126_v30, %v17124_v3  ;;  %v7951_v12 = vadd.f32 %v7950_v28, %v17250_v29 }
0x135d   : > { %v7952_v55 = vpop.f32.mrf.mxu0  ;;  %v17281_v16 = vadd.f32 %v17005_v18, %v7778_v47 }
0x135e   : > { %12133 = vrsqrt.f32 %v7681_v25  ;;  %v7953_v38 = vadd.f32 %v7952_v55, %v17254_v24  ;;  %8300 = vmatprep.mubr.f32.mxu1 %v8128_v45  ;;  %v7779_v41 = vmul.f32 %v16999_v44, %v7741_v57  ;;  %v8129_v15 = vmax.f32 %v7951_v12, 0.0 }
0x135f   : > { %v12128_v35 = vpop.eup %12127  ;;  %8087 = vmatmul.mubr.f32.gmra.mxu0 %v17281_v16  ;;  %v7956_v63 = vpop.f32.mrf.mxu0  ;;  %8301 = vmatmul.mubr.f32.gmra.mxu1 %v8127_v7 }
0x1360   : > { %v8130_v33 = vmax.f32 %v7953_v38, 0.0  ;;  %8092 = vmatprep.mubr.f32.mxu0 %v18754_v21  ;;  %v17288_v3 = vadd.f32 %v17005_v18, %v7779_v41  ;;  %v7742_v10 = vmul.f32 %v12128_v35, %v17135_v43  ;;  %v7957_v27 = vadd.f32 %v7956_v63, %v17250_v29 }
0x1361   : > { %v7958_v56 = vpop.f32.mrf.mxu0 }
0x1362   : > { %v7959_v14 = vadd.f32 %v7958_v56, %v17254_v24  ;;  %8305 = vmatprep.mubr.f32.mxu1 %v8130_v33  ;;  %v7780_v51 = vmul.f32 %v16999_v44, %v7742_v10  ;;  %v8131_v20 = vmax.f32 %v7957_v27, 0.0 }
0x1363   : > { %v12130_v60 = vpop.eup %12129  ;;  %8093 = vmatmul.mubr.f32.gmra.mxu0 %v17288_v3  ;;  %v7962_v26 = vpop.f32.mrf.mxu0  ;;  %8306 = vmatmul.mubr.f32.gmra.mxu1 %v8129_v15 }
0x1364   : > { %v8132_v2 = vmax.f32 %v7959_v14, 0.0  ;;  %8098 = vmatprep.mubr.f32.mxu0 %v18754_v21  ;;  %v17297_v50 = vadd.f32 %v17005_v18, %v7780_v51  ;;  %v7743_v43 = vmul.f32 %v12130_v60, %v17143_v40  ;;  %v7963_v54 = vadd.f32 %v7962_v26, %v17250_v29 }
0x1365   : > { %v7964_v39 = vpop.f32.mrf.mxu0 }
0x1366   : > { %v7965_v30 = vadd.f32 %v7964_v39, %v17254_v24  ;;  %8310 = vmatprep.mubr.f32.mxu1 %v8132_v2  ;;  %v7781_v28 = vmul.f32 %v16999_v44, %v7743_v43  ;;  %v8133_v7 = vmax.f32 %v7963_v54, 0.0 }
0x1367   : > { %v12132_v47 = vpop.eup %12131  ;;  %8099 = vmatmul.mubr.f32.gmra.mxu0 %v17297_v50  ;;  %v7968_v45 = vpop.f32.mrf.mxu0  ;;  %8311 = vmatmul.mubr.f32.gmra.mxu1 %v8131_v20 }
0x1368   : > { %v8134_v25 = vmax.f32 %v7965_v30, 0.0  ;;  %8104 = vmatprep.mubr.f32.mxu0 %v18754_v21  ;;  %v17306_v57 = vadd.f32 %v17005_v18, %v7781_v28  ;;  %v7744_v40 = vmul.f32 %v12132_v47, %v17150_v31  ;;  %v7969_v12 = vadd.f32 %v7968_v45, %v17250_v29 }
0x1369   : > { %v7970_v55 = vpop.f32.mrf.mxu0 }
0x136a   : > { %v7971_v38 = vadd.f32 %v7970_v55, %v17254_v24  ;;  %8315 = vmatprep.mubr.f32.mxu1 %v8134_v25  ;;  %v7782_v41 = vmul.f32 %v16999_v44, %v7744_v40  ;;  %v8135_v15 = vmax.f32 %v7969_v12, 0.0 }
0x136b   : > { %v12134_v35 = vpop.eup %12133  ;;  %8105 = vmatmul.mubr.f32.gmra.mxu0 %v17306_v57  ;;  %v7974_v63 = vpop.f32.mrf.mxu0  ;;  %8316 = vmatmul.mubr.f32.gmra.mxu1 %v8133_v7 }
0x136c   : > { %v8136_v33 = vmax.f32 %v7971_v38, 0.0  ;;  %8110 = vmatprep.mubr.f32.mxu0 %v18754_v21  ;;  %v17315_v10 = vadd.f32 %v17005_v18, %v7782_v41  ;;  %v7745_v31 = vmul.f32 %v12134_v35, %v17157_v6  ;;  %v7975_v27 = vadd.f32 %v7974_v63, %v17250_v29 }
0x136d   : > { %v7976_v56 = vpop.f32.mrf.mxu0 }
0x136e   : > { %v7977_v14 = vadd.f32 %v7976_v56, %v17254_v24  ;;  %8320 = vmatprep.mubr.f32.mxu1 %v8136_v33  ;;  %v7783_v51 = vmul.f32 %v16999_v44, %v7745_v31  ;;  %v8137_v6 = vmax.f32 %v7975_v27, 0.0 }
0x136f   : > { %8111 = vmatmul.mubr.f32.gmra.mxu0 %v17315_v10  ;;  %v7980_v60 = vpop.f32.mrf.mxu0  ;;  %8321 = vmatmul.mubr.f32.gmra.mxu1 %v8135_v15 }
0x1370   : > { %v8138_v26 = vmax.f32 %v7977_v14, 0.0  ;;  %8116 = vmatprep.mubr.f32.mxu0 %v18754_v21  ;;  %v17324_v2 = vadd.f32 %v17005_v18, %v7783_v51  ;;  %v7981_v43 = vadd.f32 %v7980_v60, %v17250_v29 }
0x1371   : > { %v7982_v20 = vpop.f32.mrf.mxu0 }
0x1372   : > { %v7983_v54 = vadd.f32 %v7982_v20, %v17254_v24  ;;  %8325 = vmatprep.mubr.f32.mxu1 %v8138_v26  ;;  %v8139_v30 = vmax.f32 %v7981_v43, 0.0 }
0x1373   : > { %8117 = vmatmul.mubr.f32.gmra.mxu0 %v17324_v2  ;;  %v7986_v44 = vpop.f32.mrf.mxu0  ;;  %8326 = vmatmul.mubr.f32.gmra.mxu1 %v8137_v6 }
0x1374   : > { %v8140_v39 = vmax.f32 %v7983_v54, 0.0  ;;  %v7987_v28 = vadd.f32 %v7986_v44, %v17250_v29 }
0x1375   : > { %v7988_v47 = vpop.f32.mrf.mxu0 }
0x1376   : > { %v7989_v21 = vadd.f32 %v7988_v47, %v17254_v24  ;;  %8330 = vmatprep.mubr.f32.mxu1 %v8140_v39  ;;  %v8141_v25 = vmax.f32 %v7987_v28, 0.0 }
0x1377   : > { %v7992_v18 = vpop.f32.mrf.mxu0  ;;  %8331 = vmatmul.mubr.f32.gmra.mxu1 %v8139_v30 }
0x1378   : > { %v8142_v45 = vmax.f32 %v7989_v21, 0.0  ;;  %v7993_v40 = vadd.f32 %v7992_v18, %v17250_v29 }
0x1379   : > { %v7994_v7 = vpop.f32.mrf.mxu0 }
0x137a   : > { %v7995_v12 = vadd.f32 %v7994_v7, %v17254_v24  ;;  %8335 = vmatprep.mubr.f32.mxu1 %v8142_v45  ;;  %v8143_v41 = vmax.f32 %v7993_v40, 0.0 }
0x137b   : > { %v7998_v55 = vpop.f32.mrf.mxu0  ;;  %8336 = vmatmul.mubr.f32.gmra.mxu1 %v8141_v25 }
0x137c   : > { %v8144_v38 = vmax.f32 %v7995_v12, 0.0  ;;  %v7999_v35 = vadd.f32 %v7998_v55, %v17250_v29 }
0x137d   : > { %v8000_v63 = vpop.f32.mrf.mxu0 }
0x137e   : > { %v8001_v33 = vadd.f32 %v8000_v63, %v17254_v24  ;;  %8340 = vmatprep.mubr.f32.mxu1 %v8144_v38  ;;  %v8145_v27 = vmax.f32 %v7999_v35, 0.0 }
0x137f   : > { %v8004_v31 = vpop.f32.mrf.mxu0  ;;  %8341 = vmatmul.mubr.f32.gmra.mxu1 %v8143_v41 }
0x1380   : > { %v8146_v15 = vmax.f32 %v8001_v33, 0.0  ;;  %v8005_v56 = vadd.f32 %v8004_v31, %v17250_v29 }
0x1381   : > { %v8006_v14 = vpop.f32.mrf.mxu0 }
0x1382   : > { %v8007_v51 = vadd.f32 %v8006_v14, %v17254_v24  ;;  %8345 = vmatprep.mubr.f32.mxu1 %v8146_v15  ;;  %v8147_v26 = vmax.f32 %v8005_v56, 0.0 }
0x1383   : > { %8346 = vmatmul.mubr.f32.gmra.mxu1 %v8145_v27 }
0x1384   : > { %v8148_v60 = vmax.f32 %v8007_v51, 0.0 }
0x1386   : > { %8350 = vmatprep.mubr.f32.mxu1 %v8148_v60 }
0x1387   : > { %8351 = vmatmul.mubr.f32.gmra.mxu1 %v8147_v26 }
0x13a6   : > { %v8010_v6 = vpop.f32.mrf.mxu0 }
0x13a7   : > { %v8011_v43 = vadd.f32 %v8010_v6, %v17250_v29 }
0x13a8   : > { %v8012_v20 = vpop.f32.mrf.mxu0 }
0x13a9   : > { %v8013_v54 = vadd.f32 %v8012_v20, %v17254_v24  ;;  %v8149_v30 = vmax.f32 %v8011_v43, 0.0 }
0x13aa   : > { %v8016_v44 = vpop.f32.mrf.mxu0 }
0x13ab   : > { %v8150_v39 = vmax.f32 %v8013_v54, 0.0  ;;  %v8017_v28 = vadd.f32 %v8016_v44, %v17250_v29 }
0x13ac   : > { %v8018_v47 = vpop.f32.mrf.mxu0 }
0x13ad   : > { %v8019_v21 = vadd.f32 %v8018_v47, %v17254_v24  ;;  %8355 = vmatprep.mubr.f32.mxu1 %v8150_v39  ;;  %v8151_v25 = vmax.f32 %v8017_v28, 0.0 }
0x13ae   : > { %v8022_v18 = vpop.f32.mrf.mxu0  ;;  %8356 = vmatmul.mubr.f32.gmra.mxu1 %v8149_v30 }
0x13af   : > { %v8152_v45 = vmax.f32 %v8019_v21, 0.0  ;;  %v8023_v40 = vadd.f32 %v8022_v18, %v17250_v29 }
0x13b0   : > { %v8024_v7 = vpop.f32.mrf.mxu0 }
0x13b1   : > { %v8025_v12 = vadd.f32 %v8024_v7, %v17254_v24  ;;  %8360 = vmatprep.mubr.f32.mxu1 %v8152_v45  ;;  %v8153_v38 = vmax.f32 %v8023_v40, 0.0 }
0x13b2   : > { %8361 = vmatmul.mubr.f32.gmra.mxu1 %v8151_v25 }
0x13b3   : > { %v8154_v55 = vmax.f32 %v8025_v12, 0.0 }
0x13b5   : > { %8365 = vmatprep.mubr.f32.mxu1 %v8154_v55 }
0x13b6   : > { %8366 = vmatmul.mubr.f32.gmra.mxu1 %v8153_v38 }
0x13d7   : > { %v8028_v41 = vpop.f32.mrf.mxu0 }
0x13d8   : > { %v8029_v35 = vadd.f32 %v8028_v41, %v17250_v29 }
0x13d9   : > { %v8030_v63 = vpop.f32.mrf.mxu0 }
0x13da   : > { %v8031_v33 = vadd.f32 %v8030_v63, %v17254_v24  ;;  %v8155_v27 = vmax.f32 %v8029_v35, 0.0 }
0x13db   : > { %v8034_v31 = vpop.f32.mrf.mxu0 }
0x13dc   : > { %v8156_v15 = vmax.f32 %v8031_v33, 0.0  ;;  %v8035_v56 = vadd.f32 %v8034_v31, %v17250_v29 }
0x13dd   : > { %v8036_v14 = vpop.f32.mrf.mxu0 }
0x13de   : > { %v8037_v51 = vadd.f32 %v8036_v14, %v17254_v24  ;;  %8370 = vmatprep.mubr.f32.mxu1 %v8156_v15  ;;  %v8157_v6 = vmax.f32 %v8035_v56, 0.0 }
0x13df   : > { %v8040_v60 = vpop.f32.mrf.mxu0  ;;  %8371 = vmatmul.mubr.f32.gmra.mxu1 %v8155_v27 }
0x13e0   : > { %v8158_v26 = vmax.f32 %v8037_v51, 0.0  ;;  %v8041_v43 = vadd.f32 %v8040_v60, %v17250_v29 }
0x13e1   : > { %v8042_v20 = vpop.f32.mrf.mxu0 }
0x13e2   : > { %v8043_v54 = vadd.f32 %v8042_v20, %v17254_v24  ;;  %8375 = vmatprep.mubr.f32.mxu1 %v8158_v26  ;;  %v8159_v30 = vmax.f32 %v8041_v43, 0.0 }
0x13e3   : > { %v8046_v44 = vpop.f32.mrf.mxu0  ;;  %8376 = vmatmul.mubr.f32.gmra.mxu1 %v8157_v6 }
0x13e4   : > { %v8160_v39 = vmax.f32 %v8043_v54, 0.0  ;;  %v8047_v28 = vadd.f32 %v8046_v44, %v17250_v29 }
0x13e5   : > { %v8048_v47 = vpop.f32.mrf.mxu0 }
0x13e6   : > { %v8049_v21 = vadd.f32 %v8048_v47, %v17254_v24  ;;  %8380 = vmatprep.mubr.f32.mxu1 %v8160_v39  ;;  %v8161_v25 = vmax.f32 %v8047_v28, 0.0 }
0x13e7   : > { %v8052_v18 = vpop.f32.mrf.mxu0  ;;  %8381 = vmatmul.mubr.f32.gmra.mxu1 %v8159_v30  ;;  %v17362_v30 = vld [vmem:[%s17902_s11] ss:$0 sm:$0xff] }
0x13e8   : > { %v8162_v45 = vmax.f32 %v8049_v21, 0.0  ;;  %v8053_v40 = vadd.f32 %v8052_v18, %v17250_v29 }
0x13e9   : > { %v8054_v7 = vpop.f32.mrf.mxu0 }
0x13ea   : > { %v8055_v12 = vadd.f32 %v8054_v7, %v17254_v24  ;;  %8385 = vmatprep.mubr.f32.mxu1 %v8162_v45  ;;  %v8163_v41 = vmax.f32 %v8053_v40, 0.0 }
0x13eb   : > { %v8058_v55 = vpop.f32.mrf.mxu0  ;;  %8386 = vmatmul.mubr.f32.gmra.mxu1 %v8161_v25 }
0x13ec   : > { %v8164_v38 = vmax.f32 %v8055_v12, 0.0  ;;  %v8059_v35 = vadd.f32 %v8058_v55, %v17250_v29 }
0x13ed   : > { %v8060_v63 = vpop.f32.mrf.mxu0 }
0x13ee   : > { %v8061_v33 = vadd.f32 %v8060_v63, %v17254_v24  ;;  %8390 = vmatprep.mubr.f32.mxu1 %v8164_v38  ;;  %v8165_v27 = vmax.f32 %v8059_v35, 0.0 }
0x13ef   : > { %v8064_v31 = vpop.f32.mrf.mxu0  ;;  %8391 = vmatmul.mubr.f32.gmra.mxu1 %v8163_v41 }
0x13f0   : > { %v8166_v15 = vmax.f32 %v8061_v33, 0.0  ;;  %v8065_v56 = vadd.f32 %v8064_v31, %v17250_v29 }
0x13f1   : > { %v8066_v14 = vpop.f32.mrf.mxu0 }
0x13f2   : > { %v8067_v51 = vadd.f32 %v8066_v14, %v17254_v24  ;;  %8395 = vmatprep.mubr.f32.mxu1 %v8166_v15  ;;  %v8167_v6 = vmax.f32 %v8065_v56, 0.0 }
0x13f3   : > { %v8070_v60 = vpop.f32.mrf.mxu0  ;;  %8396 = vmatmul.mubr.f32.gmra.mxu1 %v8165_v27 }
0x13f4   : > { %v8168_v26 = vmax.f32 %v8067_v51, 0.0  ;;  %v8071_v43 = vadd.f32 %v8070_v60, %v17250_v29 }
0x13f5   : > { %v8072_v20 = vpop.f32.mrf.mxu0 }
0x13f6   : > { %v8073_v54 = vadd.f32 %v8072_v20, %v17254_v24  ;;  %8400 = vmatprep.mubr.f32.mxu1 %v8168_v26  ;;  %v8169_v39 = vmax.f32 %v8071_v43, 0.0 }
0x13f7   : > { %8401 = vmatmul.mubr.f32.gmra.mxu1 %v8167_v6 }
0x13f8   : > { %v8170_v44 = vmax.f32 %v8073_v54, 0.0 }
0x13fa   : > { %8405 = vmatprep.mubr.f32.mxu1 %v8170_v44 }
0x13fb   : > { %8406 = vmatmul.mubr.f32.gmra.mxu1 %v8169_v39 }
0x1417   : > { %v8076_v28 = vpop.f32.mrf.mxu0  ;;  %v8292_v47 = vpop.f32.mrf.mxu1 }
0x1418   : > { %v8293_v21 = vadd.f32 %v17362_v30, %v8292_v47  ;;  %v8077_v18 = vadd.f32 %v8076_v28, %v17250_v29 }
0x1419   : > { %v8078_v45 = vpop.f32.mrf.mxu0  ;;  %v8294_v25 = vpop.f32.mrf.mxu1 }
0x141a   : > { %v17367_v40 = vadd.f32 %v8293_v21, %v17009_v37  ;;  %v8079_v7 = vadd.f32 %v8078_v45, %v17254_v24  ;;  %v8171_v35 = vmax.f32 %v8077_v18, 0.0 }
0x141b   : > { %v8082_v12 = vpop.f32.mrf.mxu0  ;;  %v8297_v55 = vpop.f32.mrf.mxu1 }
0x141c   : > { %v8172_v38 = vmax.f32 %v8079_v7, 0.0  ;;  %v8298_v41 = vadd.f32 %v17362_v30, %v8297_v55  ;;  %8485 = vadd.xlane.f32.xlu1 %v17367_v40  ;;  %v8083_v63 = vadd.f32 %v8082_v12, %v17250_v29 }
0x141d   : > { %v8084_v33 = vpop.f32.mrf.mxu0  ;;  %v8299_v31 = vpop.f32.mrf.mxu1 }
0x141e   : > { %v17374_v15 = vadd.f32 %v8298_v41, %v17016_v59  ;;  %v8085_v37 = vadd.f32 %v8084_v33, %v17254_v24  ;;  %8410 = vmatprep.mubr.f32.mxu1 %v8172_v38  ;;  %v8173_v60 = vmax.f32 %v8083_v63, 0.0 }
0x141f   : > { %v8088_v27 = vpop.f32.mrf.mxu0  ;;  %8411 = vmatmul.mubr.f32.gmra.mxu1 %v8171_v35  ;;  %v8302_v56 = vpop.f32.mrf.mxu1 }
0x1420   : > { %v8174_v14 = vmax.f32 %v8085_v37, 0.0  ;;  %v8303_v51 = vadd.f32 %v17362_v30, %v8302_v56  ;;  %8487 = vadd.xlane.f32.xlu0 %v17374_v15  ;;  %v8089_v26 = vadd.f32 %v8088_v27, %v17250_v29 }
0x1421   : > { %v8090_v6 = vpop.f32.mrf.mxu0  ;;  %v8304_v43 = vpop.f32.mrf.mxu1 }
0x1422   : > { %v17381_v20 = vadd.f32 %v8303_v51, %v17023_v11  ;;  %v8091_v59 = vadd.f32 %v8090_v6, %v17254_v24  ;;  %8415 = vmatprep.mubr.f32.mxu1 %v8174_v14  ;;  %v8175_v47 = vmax.f32 %v8089_v26, 0.0 }
0x1423   : > { %v8094_v54 = vpop.f32.mrf.mxu0  ;;  %8416 = vmatmul.mubr.f32.gmra.mxu1 %v8173_v60  ;;  %v8307_v44 = vpop.f32.mrf.mxu1 }
0x1424   : > { %v8176_v39 = vmax.f32 %v8091_v59, 0.0  ;;  %v8308_v28 = vadd.f32 %v17362_v30, %v8307_v44  ;;  %8489 = vadd.xlane.f32.xlu1 %v17381_v20  ;;  %v8095_v21 = vadd.f32 %v8094_v54, %v17250_v29 }
0x1425   : > { %v8096_v18 = vpop.f32.mrf.mxu0  ;;  %v8309_v45 = vpop.f32.mrf.mxu1 }
0x1426   : > { %v17388_v25 = vadd.f32 %v8308_v28, %v17030_v5  ;;  %v8097_v11 = vadd.f32 %v8096_v18, %v17254_v24  ;;  %8420 = vmatprep.mubr.f32.mxu1 %v8176_v39  ;;  %v8177_v41 = vmax.f32 %v8095_v21, 0.0 }
0x1427   : > { %v8100_v7 = vpop.f32.mrf.mxu0  ;;  %8421 = vmatmul.mubr.f32.gmra.mxu1 %v8175_v47  ;;  %v8312_v12 = vpop.f32.mrf.mxu1 }
0x1428   : > { %v8178_v55 = vmax.f32 %v8097_v11, 0.0  ;;  %v8313_v38 = vadd.f32 %v17362_v30, %v8312_v12  ;;  %8491 = vadd.xlane.f32.xlu0 %v17388_v25  ;;  %v8101_v35 = vadd.f32 %v8100_v7, %v17250_v29 }
0x1429   : > { %v8102_v63 = vpop.f32.mrf.mxu0  ;;  %v8314_v33 = vpop.f32.mrf.mxu1 }
0x142a   : > { %v17395_v31 = vadd.f32 %v8313_v38, %v17039_v49  ;;  %v8103_v5 = vadd.f32 %v8102_v63, %v17254_v24  ;;  %8425 = vmatprep.mubr.f32.mxu1 %v8178_v55  ;;  %v8179_v51 = vmax.f32 %v8101_v35, 0.0 }
0x142b   : > { %v8106_v37 = vpop.f32.mrf.mxu0  ;;  %8426 = vmatmul.mubr.f32.gmra.mxu1 %v8177_v41  ;;  %v8317_v27 = vpop.f32.mrf.mxu1 }
0x142c   : > { %v8180_v56 = vmax.f32 %v8103_v5, 0.0  ;;  %v8318_v14 = vadd.f32 %v17362_v30, %v8317_v27  ;;  %8493 = vadd.xlane.f32.xlu1 %v17395_v31  ;;  %v8107_v60 = vadd.f32 %v8106_v37, %v17250_v29 }
0x142d   : > { %v8108_v26 = vpop.f32.mrf.mxu0  ;;  %v8319_v6 = vpop.f32.mrf.mxu1 }
0x142e   : > { %v17402_v43 = vadd.f32 %v8318_v14, %v17048_v52  ;;  %v8109_v49 = vadd.f32 %v8108_v26, %v17254_v24  ;;  %8430 = vmatprep.mubr.f32.mxu1 %v8180_v56  ;;  %v8181_v28 = vmax.f32 %v8107_v60, 0.0 }
0x142f   : > { %v8112_v59 = vpop.f32.mrf.mxu0  ;;  %8431 = vmatmul.mubr.f32.gmra.mxu1 %v8179_v51  ;;  %v8322_v54 = vpop.f32.mrf.mxu1 }
0x1430   : > { %v8182_v44 = vmax.f32 %v8109_v49, 0.0  ;;  %v8323_v39 = vadd.f32 %v17362_v30, %v8322_v54  ;;  %8495 = vadd.xlane.f32.xlu0 %v17402_v43  ;;  %v8113_v47 = vadd.f32 %v8112_v59, %v17250_v29 }
0x1431   : > { %v8114_v21 = vpop.f32.mrf.mxu0  ;;  %v8324_v18 = vpop.f32.mrf.mxu1 }
0x1432   : > { %v17409_v45 = vadd.f32 %v8323_v39, %v17057_v42  ;;  %v8115_v52 = vadd.f32 %v8114_v21, %v17254_v24  ;;  %8435 = vmatprep.mubr.f32.mxu1 %v8182_v44  ;;  %v8183_v38 = vmax.f32 %v8113_v47, 0.0 }
0x1433   : > { %v8118_v11 = vpop.f32.mrf.mxu0  ;;  %8436 = vmatmul.mubr.f32.gmra.mxu1 %v8181_v28  ;;  %v8327_v7 = vpop.f32.mrf.mxu1 }
0x1434   : > { %v8184_v12 = vmax.f32 %v8115_v52, 0.0  ;;  %v8328_v55 = vadd.f32 %v17362_v30, %v8327_v7  ;;  %8497 = vadd.xlane.f32.xlu1 %v17409_v45  ;;  %v8119_v41 = vadd.f32 %v8118_v11, %v17250_v29 }
0x1435   : > { %v8120_v35 = vpop.f32.mrf.mxu0  ;;  %v8329_v63 = vpop.f32.mrf.mxu1 }
0x1436   : > { %v17416_v33 = vadd.f32 %v8328_v55, %v17066_v46  ;;  %v8121_v42 = vadd.f32 %v8120_v35, %v17254_v24  ;;  %8440 = vmatprep.mubr.f32.mxu1 %v8184_v12  ;;  %v8185_v56 = vmax.f32 %v8119_v41, 0.0 }
0x1437   : > { %8441 = vmatmul.mubr.f32.gmra.mxu1 %v8183_v38  ;;  %v8332_v5 = vpop.f32.mrf.mxu1 }
0x1438   : > { %v8186_v37 = vmax.f32 %v8121_v42, 0.0  ;;  %v8333_v27 = vadd.f32 %v17362_v30, %v8332_v5  ;;  %8499 = vadd.xlane.f32.xlu0 %v17416_v33 }
0x1439   : > { %v8334_v14 = vpop.f32.mrf.mxu1 }
0x143a   : > { %v17422_v51 = vadd.f32 %v8333_v27, %v17075_v36  ;;  %8445 = vmatprep.mubr.f32.mxu1 %v8186_v37 }
0x143b   : > { %8446 = vmatmul.mubr.f32.gmra.mxu1 %v8185_v56  ;;  %v8337_v29 = vpop.f32.mrf.mxu1 }
0x143c   : > { %v8338_v46 = vadd.f32 %v17362_v30, %v8337_v29  ;;  %8501 = vadd.xlane.f32.xlu1 %v17422_v51 }
0x143d   : > { %v8339_v24 = vpop.f32.mrf.mxu1 }
0x143e   : > { %v17427_v60 = vadd.f32 %v8338_v46, %v17087_v58 }
0x143f   : > { %v8342_v26 = vpop.f32.mrf.mxu1 }
0x1440   : > { %v8343_v6 = vadd.f32 %v17362_v30, %v8342_v26  ;;  %8503 = vadd.xlane.f32.xlu0 %v17427_v60 }
0x1441   : > { %v8344_v49 = vpop.f32.mrf.mxu1 }
0x1442   : > { %v17432_v36 = vadd.f32 %v8343_v6, %v17101_v23 }
0x1443   : > { %v8347_v59 = vpop.f32.mrf.mxu1 }
0x1444   : > { %v8348_v54 = vadd.f32 %v17362_v30, %v8347_v59  ;;  %8505 = vadd.xlane.f32.xlu1 %v17432_v36 }
0x1445   : > { %v8349_v44 = vpop.f32.mrf.mxu1 }
0x1446   : > { %v17437_v39 = vadd.f32 %v8348_v54, %v17114_v34 }
0x1447   : > { %v8352_v58 = vpop.f32.mrf.mxu1 }
0x1448   : > { %v8353_v28 = vadd.f32 %v17362_v30, %v8352_v58  ;;  %8507 = vadd.xlane.f32.xlu0 %v17437_v39 }
0x1449   : > { %v8354_v47 = vpop.f32.mrf.mxu1 }
0x144a   : > { %v17442_v21 = vadd.f32 %v8353_v28, %v17128_v32 }
0x144c   : > { %8509 = vadd.xlane.f32.xlu1 %v17442_v21 }
0x146e   : > { %v8357_v23 = vpop.f32.mrf.mxu1 }
0x146f   : > { %v8358_v18 = vadd.f32 %v17362_v30, %v8357_v23 }
0x1470   : > { %v8359_v52 = vpop.f32.mrf.mxu1 }
0x1471   : > { %v17447_v11 = vadd.f32 %v8358_v18, %v17172_v17 }
0x1472   : > { %v8362_v34 = vpop.f32.mrf.mxu1 }
0x1473   : > { %v8363_v7 = vadd.f32 %v17362_v30, %v8362_v34  ;;  %8511 = vadd.xlane.f32.xlu0 %v17447_v11 }
0x1474   : > { %v8364_v12 = vpop.f32.mrf.mxu1 }
0x1475   : > { %v17452_v55 = vadd.f32 %v8363_v7, %v17179_v22 }
0x1476   : > { %v8367_v32 = vpop.f32.mrf.mxu1 }
0x1477   : > { %v8368_v38 = vadd.f32 %v17362_v30, %v8367_v32  ;;  %8513 = vadd.xlane.f32.xlu1 %v17452_v55 }
0x1478   : > { %v8369_v41 = vpop.f32.mrf.mxu1 }
0x1479   : > { %v17457_v35 = vadd.f32 %v8368_v38, %v17185_v48 }
0x147b   : > { %8515 = vadd.xlane.f32.xlu0 %v17457_v35 }
0x149f   : > { %v8372_v17 = vpop.f32.mrf.mxu1 }
0x14a0   : > { %v8373_v63 = vadd.f32 %v17362_v30, %v8372_v17 }
0x14a1   : > { %v8374_v42 = vpop.f32.mrf.mxu1 }
0x14a2   : > { %v17462_v5 = vadd.f32 %v8373_v63, %v17194_v4 }
0x14a3   : > { %v8377_v22 = vpop.f32.mrf.mxu1 }
0x14a4   : > { %v8378_v37 = vadd.f32 %v17362_v30, %v8377_v22  ;;  %8517 = vadd.xlane.f32.xlu1 %v17462_v5 }
0x14a5   : > { %v8379_v27 = vpop.f32.mrf.mxu1 }
0x14a6   : > { %v17467_v56 = vadd.f32 %v8378_v37, %v17200_v53 }
0x14a7   : > { %v8382_v48 = vpop.f32.mrf.mxu1 }
0x14a8   : > { %v8383_v14 = vadd.f32 %v17362_v30, %v8382_v48  ;;  %8519 = vadd.xlane.f32.xlu0 %v17467_v56 }
0x14a9   : > { %v8384_v29 = vpop.f32.mrf.mxu1 }
0x14aa   : > { %v17472_v46 = vadd.f32 %v8383_v14, %v17207_v19 }
0x14ab   : > { %v8387_v4 = vpop.f32.mrf.mxu1 }
0x14ac   : > { %v8388_v24 = vadd.f32 %v17362_v30, %v8387_v4  ;;  %8521 = vadd.xlane.f32.xlu1 %v17472_v46 }
0x14ad   : > { %v8389_v26 = vpop.f32.mrf.mxu1 }
0x14ae   : > { %v17477_v6 = vadd.f32 %v8388_v24, %v17214_v9  ;;  %v8486_v24 = vpop.xlane.xlu1 %8485 }
0x14af   : > { %v8392_v53 = vpop.f32.mrf.mxu1 }
0x14b0   : > { %v8393_v49 = vadd.f32 %v17362_v30, %v8392_v53  ;;  %8523 = vadd.xlane.f32.xlu0 %v17477_v6 }
0x14b1   : > { %v8394_v59 = vpop.f32.mrf.mxu1 }
0x14b2   : > { %v17482_v54 = vadd.f32 %v8393_v49, %v17221_v0  ;;  %v8549_v49 = vmul.f32 0.0078125, %v8486_v24 }
0x14b3   : > { %v8397_v19 = vpop.f32.mrf.mxu1 }
0x14b4   : > { %v8398_v44 = vadd.f32 %v17362_v30, %v8397_v19  ;;  %8525 = vadd.xlane.f32.xlu1 %v17482_v54  ;;  %v8488_v19 = vpop.xlane.xlu0 %8487 }
0x14b5   : > { %v8399_v58 = vpop.f32.mrf.mxu1 }
0x14b6   : > { %v17487_v28 = vadd.f32 %v8398_v44, %v17228_v62  ;;  %v8490_v44 = vpop.xlane.xlu1 %8489 }
0x14b7   : > { %v8402_v9 = vpop.f32.mrf.mxu1 }
0x14b8   : > { %v8403_v47 = vadd.f32 %v17362_v30, %v8402_v9  ;;  %8527 = vadd.xlane.f32.xlu0 %v17487_v28 }
0x14b9   : > { %v8404_v23 = vpop.f32.mrf.mxu1 }
0x14ba   : > { %v17492_v18 = vadd.f32 %v8403_v47, %v17235_v8  ;;  %v8550_v23 = vmul.f32 0.0078125, %v8488_v19 }
0x14bb   : > { %v8407_v0 = vpop.f32.mrf.mxu1 }
0x14bc   : > { %v8408_v52 = vadd.f32 %v17362_v30, %v8407_v0  ;;  %8529 = vadd.xlane.f32.xlu1 %v17492_v18  ;;  %v8551_v0 = vmul.f32 0.0078125, %v8490_v44 }
0x14bd   : > { %v8409_v34 = vpop.f32.mrf.mxu1 }
0x14be   : > { %v17497_v7 = vadd.f32 %v8408_v52, %v17241_v1  ;;  %v8492_v52 = vpop.xlane.xlu0 %8491 }
0x14c0   : > { %8531 = vadd.xlane.f32.xlu0 %v17497_v7 }
0x14df   : > { %v8412_v62 = vpop.f32.mrf.mxu1 }
0x14e0   : > { %v8413_v12 = vadd.f32 %v17362_v30, %v8412_v62  ;;  %v8494_v62 = vpop.xlane.xlu1 %8493 }
0x14e1   : > { %v8414_v32 = vpop.f32.mrf.mxu1 }
0x14e2   : > { %v17502_v38 = vadd.f32 %v8413_v12, %v17263_v13  ;;  %v8552_v32 = vmul.f32 0.0078125, %v8492_v52 }
0x14e3   : > { %v8417_v8 = vpop.f32.mrf.mxu1 }
0x14e4   : > { %v8418_v41 = vadd.f32 %v17362_v30, %v8417_v8  ;;  %8533 = vadd.xlane.f32.xlu1 %v17502_v38 }
0x14e5   : > { %v8419_v17 = vpop.f32.mrf.mxu1 }
0x14e6   : > { %v17507_v63 = vadd.f32 %v8418_v41, %v17272_v61  ;;  %v17545_v17 = vsub.f32 %v17381_v20, %v8551_v0 }
0x14e7   : > { %v8422_v1 = vpop.f32.mrf.mxu1 }
0x14e8   : > { %v8423_v42 = vadd.f32 %v17362_v30, %v8422_v1  ;;  %8535 = vadd.xlane.f32.xlu0 %v17507_v63  ;;  %v8553_v1 = vmul.f32 0.0078125, %v8494_v62  ;;  %v8615_v20 = vmul.f32 %v17545_v17, %v17545_v17 }
0x14e9   : > { %v8424_v22 = vpop.f32.mrf.mxu1 }
0x14ea   : > { %v17512_v37 = vadd.f32 %v8423_v42, %v17281_v16  ;;  %v8498_v22 = vpop.xlane.xlu1 %8497 }
0x14eb   : > { %v8427_v13 = vpop.f32.mrf.mxu1 }
0x14ec   : > { %v8428_v27 = vadd.f32 %v17362_v30, %v8427_v13  ;;  %8537 = vadd.xlane.f32.xlu1 %v17512_v37 }
0x14ed   : > { %v8429_v48 = vpop.f32.mrf.mxu1 }
0x14ee   : > { %v17517_v14 = vadd.f32 %v8428_v27, %v17288_v3  ;;  %v17555_v27 = vsub.f32 %v17395_v31, %v8553_v1 }
0x14ef   : > { %v8432_v61 = vpop.f32.mrf.mxu1 }
0x14f0   : > { %v8433_v29 = vadd.f32 %v17362_v30, %v8432_v61  ;;  %8539 = vadd.xlane.f32.xlu0 %v17517_v14  ;;  %v8502_v61 = vpop.xlane.xlu1 %8501 }
0x14f1   : > { %v8434_v4 = vpop.f32.mrf.mxu1  ;;  %v8557_v24 = vmul.f32 0.0078125, %v8502_v61 }
0x14f2   : > { %v17522_v26 = vadd.f32 %v8433_v29, %v17297_v50  ;;  %v17532_v50 = vsub.f32 %v17367_v40, %v8549_v49  ;;  %v17542_v40 = vsub.f32 %v17374_v15, %v8550_v23  ;;  %v8555_v15 = vmul.f32 0.0078125, %v8498_v22 }
0x14f3   : > { %v8437_v16 = vpop.f32.mrf.mxu1  ;;  %v17577_v44 = vsub.f32 %v17422_v51, %v8557_v24 }
0x14f4   : > { %v8438_v53 = vadd.f32 %v17362_v30, %v8437_v16  ;;  %8541 = vadd.xlane.f32.xlu1 %v17522_v26  ;;  %v8613_v41 = vmul.f32 %v17532_v50, %v17532_v50  ;;  %v17567_v31 = vsub.f32 %v17409_v45, %v8555_v15  ;;  %v8506_v49 = vpop.xlane.xlu1 %8505 }
0x14f5   : > { %v8439_v59 = vpop.f32.mrf.mxu1  ;;  %v8559_v45 = vmul.f32 0.0078125, %v8506_v49  ;;  %v8621_v51 = vmul.f32 %v17577_v44, %v17577_v44 }
0x14f6   : > { %v17527_v3 = vadd.f32 %v8438_v53, %v17306_v57  ;;  %v8617_v53 = vmul.f32 %v17555_v27, %v17555_v27 }
0x14f7   : > { %v8442_v58 = vpop.f32.mrf.mxu1  ;;  %v17585_v52 = vsub.f32 %v17432_v36, %v8559_v45 }
0x14f8   : > { %v8443_v9 = vadd.f32 %v17362_v30, %v8442_v58  ;;  %8543 = vadd.xlane.f32.xlu0 %v17527_v3 }
0x14f9   : > { %v8444_v47 = vpop.f32.mrf.mxu1  ;;  %v8623_v1 = vmul.f32 %v17585_v52, %v17585_v52 }
0x14fa   : > { %v17535_v34 = vadd.f32 %v8443_v9, %v17315_v10  ;;  %v8496_v10 = vpop.xlane.xlu0 %8495  ;;  %v8619_v9 = vmul.f32 %v17567_v31, %v17567_v31  ;;  %v8510_v47 = vpop.xlane.xlu1 %8509 }
0x14fb   : > { %v8447_v12 = vpop.f32.mrf.mxu1  ;;  %v8554_v13 = vmul.f32 0.0078125, %v8496_v10 }
0x14fc   : > { %v8448_v57 = vadd.f32 %v17362_v30, %v8447_v12  ;;  %8545 = vadd.xlane.f32.xlu1 %v17535_v34  ;;  %v17552_v30 = vsub.f32 %v17388_v25, %v8552_v32 }
0x14fd   : > { %v8449_v8 = vpop.f32.mrf.mxu1  ;;  %v17562_v29 = vsub.f32 %v17402_v43, %v8554_v13 }
0x14fe   : > { %v17548_v42 = vadd.f32 %v8448_v57, %v17324_v2  ;;  %v8500_v48 = vpop.xlane.xlu0 %8499  ;;  %v8614_v2 = vmul.f32 %v17542_v40, %v17542_v40  ;;  %v8616_v25 = vmul.f32 %v17552_v30, %v17552_v30 }
0x14ff   : > { %v8556_v4 = vmul.f32 0.0078125, %v8500_v48  ;;  %v8618_v43 = vmul.f32 %v17562_v29, %v17562_v29 }
0x1500   : > { %8645 = vadd.xlane.f32.xlu1 %v8613_v41  ;;  %8547 = vadd.xlane.f32.xlu0 %v17548_v42  ;;  %v8514_v57 = vpop.xlane.xlu1 %8513 }
0x1501   : > { %v17574_v19 = vsub.f32 %v17416_v33, %v8556_v4  ;;  %v8561_v33 = vmul.f32 0.0078125, %v8510_v47  ;;  %v8563_v41 = vmul.f32 0.0078125, %v8514_v57 }
0x1502   : > { %v8504_v16 = vpop.xlane.xlu0 %8503 }
0x1503   : > { %v8558_v59 = vmul.f32 0.0078125, %v8504_v16  ;;  %v8620_v62 = vmul.f32 %v17574_v19, %v17574_v19  ;;  %v17597_v36 = vsub.f32 %v17442_v21, %v8561_v33  ;;  %v17607_v13 = vsub.f32 %v17452_v55, %v8563_v41 }
0x1504   : > { %8649 = vadd.xlane.f32.xlu1 %v8615_v20  ;;  %8647 = vadd.xlane.f32.xlu0 %v8614_v2 }
0x1505   : > { %v17582_v23 = vsub.f32 %v17427_v60, %v8558_v59  ;;  %v8625_v21 = vmul.f32 %v17597_v36, %v17597_v36  ;;  %v8627_v20 = vmul.f32 %v17607_v13, %v17607_v13 }
0x1506   : > { %v8508_v58 = vpop.xlane.xlu0 %8507 }
0x1507   : > { %v8560_v0 = vmul.f32 0.0078125, %v8508_v58  ;;  %v8622_v60 = vmul.f32 %v17582_v23, %v17582_v23 }
0x1508   : > { %8653 = vadd.xlane.f32.xlu1 %v8617_v53  ;;  %8651 = vadd.xlane.f32.xlu0 %v8616_v25 }
0x1509   : > { %v17592_v32 = vsub.f32 %v17437_v39, %v8560_v0 }
0x150a   : > { %v8512_v12 = vpop.xlane.xlu0 %8511 }
0x150b   : > { %v8562_v8 = vmul.f32 0.0078125, %v8512_v12  ;;  %v8624_v22 = vmul.f32 %v17592_v32, %v17592_v32 }
0x150c   : > { %8657 = vadd.xlane.f32.xlu1 %v8619_v9  ;;  %8655 = vadd.xlane.f32.xlu0 %v8618_v43 }
0x150d   : > { %v17604_v39 = vsub.f32 %v17447_v11, %v8562_v8 }
0x150e   : > { %v8516_v10 = vpop.xlane.xlu0 %8515 }
0x150f   : > { %v8564_v15 = vmul.f32 0.0078125, %v8516_v10  ;;  %v8626_v2 = vmul.f32 %v17604_v39, %v17604_v39 }
0x1510   : > { %8661 = vadd.xlane.f32.xlu1 %v8621_v51  ;;  %8659 = vadd.xlane.f32.xlu0 %v8620_v62 }
0x1511   : > { %v17612_v48 = vsub.f32 %v17457_v35, %v8564_v15 }
0x1513   : > { %v8628_v11 = vmul.f32 %v17612_v48, %v17612_v48 }
0x1514   : > { %8665 = vadd.xlane.f32.xlu1 %v8623_v1  ;;  %8663 = vadd.xlane.f32.xlu0 %v8622_v60 }
0x1518   : > { %8669 = vadd.xlane.f32.xlu1 %v8625_v21  ;;  %8667 = vadd.xlane.f32.xlu0 %v8624_v22 }
0x151c   : > { %8673 = vadd.xlane.f32.xlu1 %v8627_v20  ;;  %8671 = vadd.xlane.f32.xlu0 %v8626_v2 }
0x1520   : > { %8675 = vadd.xlane.f32.xlu0 %v8628_v11 }
0x152d   : > { %v8518_v55 = vpop.xlane.xlu1 %8517 }
0x152e   : > { %v8565_v61 = vmul.f32 0.0078125, %v8518_v55 }
0x1530   : > { %v17621_v25 = vsub.f32 %v17462_v5, %v8565_v61 }
0x1531   : > { %v8520_v4 = vpop.xlane.xlu0 %8519 }
0x1532   : > { %v8566_v35 = vmul.f32 0.0078125, %v8520_v4  ;;  %v8629_v24 = vmul.f32 %v17621_v25, %v17621_v25 }
0x1534   : > { %v17626_v16 = vsub.f32 %v17467_v56, %v8566_v35  ;;  %8677 = vadd.xlane.f32.xlu1 %v8629_v24 }
0x1535   : > { %v8522_v53 = vpop.xlane.xlu1 %8521 }
0x1536   : > { %v8567_v49 = vmul.f32 0.0078125, %v8522_v53  ;;  %v8630_v59 = vmul.f32 %v17626_v16, %v17626_v16 }
0x1538   : > { %v17631_v43 = vsub.f32 %v17472_v46, %v8567_v49  ;;  %8679 = vadd.xlane.f32.xlu0 %v8630_v59 }
0x1539   : > { %v8524_v5 = vpop.xlane.xlu0 %8523 }
0x153a   : > { %v8568_v45 = vmul.f32 0.0078125, %v8524_v5  ;;  %v8631_v58 = vmul.f32 %v17631_v43, %v17631_v43 }
0x153c   : > { %v17636_v9 = vsub.f32 %v17477_v6, %v8568_v45  ;;  %8681 = vadd.xlane.f32.xlu1 %v8631_v58 }
0x153d   : > { %v8526_v56 = vpop.xlane.xlu1 %8525 }
0x153e   : > { %v8569_v47 = vmul.f32 0.0078125, %v8526_v56  ;;  %v8632_v0 = vmul.f32 %v17636_v9, %v17636_v9 }
0x1540   : > { %v17641_v33 = vsub.f32 %v17482_v54, %v8569_v47  ;;  %8683 = vadd.xlane.f32.xlu0 %v8632_v0 }
0x1541   : > { %v8528_v46 = vpop.xlane.xlu0 %8527 }
0x1542   : > { %v8570_v51 = vmul.f32 0.0078125, %v8528_v46  ;;  %v8633_v62 = vmul.f32 %v17641_v33, %v17641_v33 }
0x1544   : > { %v17646_v12 = vsub.f32 %v17487_v28, %v8570_v51  ;;  %8685 = vadd.xlane.f32.xlu1 %v8633_v62 }
0x1545   : > { %v8530_v6 = vpop.xlane.xlu1 %8529 }
0x1546   : > { %v8571_v57 = vmul.f32 0.0078125, %v8530_v6  ;;  %v8634_v60 = vmul.f32 %v17646_v12, %v17646_v12 }
0x1548   : > { %v17651_v8 = vsub.f32 %v17492_v18, %v8571_v57  ;;  %8687 = vadd.xlane.f32.xlu0 %v8634_v60 }
0x1549   : > { %v8532_v54 = vpop.xlane.xlu0 %8531 }
0x154a   : > { %v8572_v41 = vmul.f32 0.0078125, %v8532_v54  ;;  %v8635_v1 = vmul.f32 %v17651_v8, %v17651_v8 }
0x154c   : > { %v17656_v10 = vsub.f32 %v17497_v7, %v8572_v41  ;;  %8689 = vadd.xlane.f32.xlu1 %v8635_v1 }
0x154e   : > { %v8636_v28 = vmul.f32 %v17656_v10, %v17656_v10 }
0x1550   : > { %8691 = vadd.xlane.f32.xlu0 %v8636_v28 }
0x156d   : > { %v8534_v22 = vpop.xlane.xlu1 %8533 }
0x156e   : > { %v8573_v15 = vmul.f32 0.0078125, %v8534_v22 }
0x1570   : > { %v17661_v21 = vsub.f32 %v17502_v38, %v8573_v15 }
0x1571   : > { %v8536_v18 = vpop.xlane.xlu0 %8535 }
0x1572   : > { %v8574_v20 = vmul.f32 0.0078125, %v8536_v18  ;;  %v8637_v2 = vmul.f32 %v17661_v21, %v17661_v21 }
0x1574   : > { %v17666_v11 = vsub.f32 %v17507_v63, %v8574_v20  ;;  %8693 = vadd.xlane.f32.xlu1 %v8637_v2 }
0x1575   : > { %v8538_v7 = vpop.xlane.xlu1 %8537 }
0x1576   : > { %v8575_v55 = vmul.f32 0.0078125, %v8538_v7  ;;  %v8638_v61 = vmul.f32 %v17666_v11, %v17666_v11 }
0x1578   : > { %v17671_v4 = vsub.f32 %v17512_v37, %v8575_v55  ;;  %8695 = vadd.xlane.f32.xlu0 %v8638_v61 }
0x1579   : > { %v8540_v38 = vpop.xlane.xlu0 %8539 }
0x157a   : > { %v8576_v35 = vmul.f32 0.0078125, %v8540_v38  ;;  %v8639_v24 = vmul.f32 %v17671_v4, %v17671_v4 }
0x157c   : > { %v17676_v53 = vsub.f32 %v17517_v14, %v8576_v35  ;;  %8697 = vadd.xlane.f32.xlu1 %v8639_v24 }
0x157d   : > { %v8542_v63 = vpop.xlane.xlu1 %8541 }
0x157e   : > { %v8577_v49 = vmul.f32 0.0078125, %v8542_v63  ;;  %v8640_v59 = vmul.f32 %v17676_v53, %v17676_v53 }
0x1580   : > { %v17681_v5 = vsub.f32 %v17522_v26, %v8577_v49  ;;  %8699 = vadd.xlane.f32.xlu0 %v8640_v59 }
0x1581   : > { %v8544_v37 = vpop.xlane.xlu0 %8543 }
0x1582   : > { %v8578_v45 = vmul.f32 0.0078125, %v8544_v37  ;;  %v8641_v58 = vmul.f32 %v17681_v5, %v17681_v5 }
0x1584   : > { %v17686_v56 = vsub.f32 %v17527_v3, %v8578_v45  ;;  %8701 = vadd.xlane.f32.xlu1 %v8641_v58 }
0x1585   : > { %v8546_v14 = vpop.xlane.xlu1 %8545 }
0x1586   : > { %v8579_v47 = vmul.f32 0.0078125, %v8546_v14  ;;  %v8642_v0 = vmul.f32 %v17686_v56, %v17686_v56 }
0x1588   : > { %v17691_v46 = vsub.f32 %v17535_v34, %v8579_v47  ;;  %8703 = vadd.xlane.f32.xlu0 %v8642_v0  ;;  %v17703_v47 = vld [vmem:[%s17903_s12] ss:$0 sm:$0xff] }
0x1589   : > { %v8646_v26 = vpop.xlane.xlu1 %8645  ;;  %v8548_v51 = vpop.xlane.xlu0 %8547 }
0x158a   : > { %v8709_v62 = vmul.f32 0.0078125, %v8646_v26  ;;  %v8580_v6 = vmul.f32 0.0078125, %v8548_v51  ;;  %v8643_v57 = vmul.f32 %v17691_v46, %v17691_v46 }
0x158c   : > { %v8741_v60 = vadd.f32 1e-12, %v8709_v62  ;;  %v17696_v3 = vsub.f32 %v17548_v42, %v8580_v6  ;;  %8705 = vadd.xlane.f32.xlu1 %v8643_v57  ;;  %v17709_v62 = vld [vmem:[%s17904_s13] ss:$0 sm:$0xff] }
0x158d   : > { %v8650_v54 = vpop.xlane.xlu1 %8649  ;;  %v8648_v41 = vpop.xlane.xlu0 %8647 }
0x158e   : > { %12135 = vrsqrt.f32 %v8741_v60  ;;  %v8711_v1 = vmul.f32 0.0078125, %v8650_v54  ;;  %v8710_v28 = vmul.f32 0.0078125, %v8648_v41  ;;  %v8644_v34 = vmul.f32 %v17696_v3, %v17696_v3 }
0x1590   : > { %v8743_v22 = vadd.f32 1e-12, %v8711_v1  ;;  %v8742_v15 = vadd.f32 1e-12, %v8710_v28  ;;  %8707 = vadd.xlane.f32.xlu0 %v8644_v34 }
0x1591   : > { %v8654_v18 = vpop.xlane.xlu1 %8653  ;;  %v8652_v20 = vpop.xlane.xlu0 %8651 }
0x1592   : > { %12137 = vrsqrt.f32 %v8743_v22  ;;  %v8713_v2 = vmul.f32 0.0078125, %v8654_v18  ;;  %v8712_v7 = vmul.f32 0.0078125, %v8652_v20 }
0x1593   : > { %12139 = vrsqrt.f32 %v8742_v15 }
0x1594   : > { %v8745_v42 = vadd.f32 1e-12, %v8713_v2  ;;  %v8744_v55 = vadd.f32 1e-12, %v8712_v7 }
0x1595   : > { %v8658_v61 = vpop.xlane.xlu1 %8657  ;;  %v8656_v38 = vpop.xlane.xlu0 %8655 }
0x1596   : > { %12141 = vrsqrt.f32 %v8745_v42  ;;  %v8715_v35 = vmul.f32 0.0078125, %v8658_v61  ;;  %v8714_v24 = vmul.f32 0.0078125, %v8656_v38 }
0x1597   : > { %12143 = vrsqrt.f32 %v8744_v55 }
0x1598   : > { %v8747_v63 = vadd.f32 1e-12, %v8715_v35  ;;  %v8746_v49 = vadd.f32 1e-12, %v8714_v24 }
0x1599   : > { %v8662_v59 = vpop.xlane.xlu1 %8661  ;;  %v8660_v37 = vpop.xlane.xlu0 %8659 }
0x159a   : > { %12145 = vrsqrt.f32 %v8747_v63  ;;  %v8717_v45 = vmul.f32 0.0078125, %v8662_v59  ;;  %v8716_v58 = vmul.f32 0.0078125, %v8660_v37 }
0x159b   : > { %v12136_v14 = vpop.eup %12135  ;;  %12147 = vrsqrt.f32 %v8746_v49 }
0x159c   : > { %v8805_v0 = vmul.f32 %v12136_v14, %v17532_v50  ;;  %v8749_v26 = vadd.f32 1e-12, %v8717_v45  ;;  %v8748_v51 = vadd.f32 1e-12, %v8716_v58 }
0x159d   : > { %v8666_v6 = vpop.xlane.xlu1 %8665  ;;  %v8664_v57 = vpop.xlane.xlu0 %8663 }
0x159e   : > { %v8843_v60 = vmul.f32 %v17703_v47, %v8805_v0  ;;  %12149 = vrsqrt.f32 %v8749_v26  ;;  %v8719_v54 = vmul.f32 0.0078125, %v8666_v6  ;;  %v8718_v41 = vmul.f32 0.0078125, %v8664_v57 }
0x159f   : > { %v12138_v1 = vpop.eup %12137  ;;  %12151 = vrsqrt.f32 %v8748_v51 }
0x15a0   : > { %v12140_v28 = vpop.eup %12139  ;;  %v8881_v50 = vadd.f32 %v17709_v62, %v8843_v60  ;;  %v8807_v34 = vmul.f32 %v12138_v1, %v17545_v17  ;;  %v8751_v22 = vadd.f32 1e-12, %v8719_v54  ;;  %v8750_v15 = vadd.f32 1e-12, %v8718_v41 }
0x15a1   : > { %v8806_v18 = vmul.f32 %v12140_v28, %v17542_v40  ;;  %v8670_v20 = vpop.xlane.xlu1 %8669  ;;  %v8668_v2 = vpop.xlane.xlu0 %8667 }
0x15a2   : > { %8913 = vst [vmem:[%s17716_s23] sm:$0xff] %v8881_v50  ;;  %v8845_v7 = vmul.f32 %v17703_v47, %v8807_v34  ;;  %12153 = vrsqrt.f32 %v8751_v22  ;;  %v8721_v42 = vmul.f32 0.0078125, %v8670_v20  ;;  %v8720_v55 = vmul.f32 0.0078125, %v8668_v2 }
0x15a3   : > { %v12142_v61 = vpop.eup %12141  ;;  %v8844_v38 = vmul.f32 %v17703_v47, %v8806_v18  ;;  %12155 = vrsqrt.f32 %v8750_v15 }
0x15a4   : > { %v12144_v17 = vpop.eup %12143  ;;  %v8883_v40 = vadd.f32 %v17709_v62, %v8845_v7  ;;  %v8809_v35 = vmul.f32 %v12142_v61, %v17555_v27  ;;  %v8753_v24 = vadd.f32 1e-12, %v8721_v42  ;;  %v8752_v63 = vadd.f32 1e-12, %v8720_v55 }
0x15a5   : > { %v8882_v49 = vadd.f32 %v17709_v62, %v8844_v38  ;;  %v8808_v59 = vmul.f32 %v12144_v17, %v17552_v30  ;;  %v8674_v37 = vpop.xlane.xlu1 %8673  ;;  %v8672_v45 = vpop.xlane.xlu0 %8671 }
0x15a6   : > { %8915 = vst [vmem:[%s17716_s23 + $0x10] sm:$0xff] %v8883_v40  ;;  %v8847_v58 = vmul.f32 %v17703_v47, %v8809_v35  ;;  %12157 = vrsqrt.f32 %v8753_v24  ;;  %v8723_v14 = vmul.f32 0.0078125, %v8674_v37  ;;  %v8722_v0 = vmul.f32 0.0078125, %v8672_v45 }
0x15a7   : > { %v12146_v26 = vpop.eup %12145  ;;  %8914 = vst [vmem:[%s17716_s23 + $0x8] sm:$0xff] %v8882_v49  ;;  %v8846_v27 = vmul.f32 %v17703_v47, %v8808_v59  ;;  %12159 = vrsqrt.f32 %v8752_v63 }
0x15a8   : > { %v12148_v51 = vpop.eup %12147  ;;  %v8885_v6 = vadd.f32 %v17709_v62, %v8847_v58  ;;  %v8811_v30 = vmul.f32 %v12146_v26, %v17567_v31  ;;  %v8755_v57 = vadd.f32 1e-12, %v8723_v14  ;;  %v8754_v60 = vadd.f32 1e-12, %v8722_v0 }
0x15a9   : > { %v8884_v54 = vadd.f32 %v17709_v62, %v8846_v27  ;;  %v8810_v41 = vmul.f32 %v12148_v51, %v17562_v29  ;;  %v8676_v1 = vpop.xlane.xlu0 %8675 }
0x15aa   : > { %8917 = vst [vmem:[%s17716_s23 + $0x20] sm:$0xff] %v8885_v6  ;;  %v8849_v28 = vmul.f32 %v17703_v47, %v8811_v30  ;;  %12161 = vrsqrt.f32 %v8755_v57  ;;  %v8724_v50 = vmul.f32 0.0078125, %v8676_v1 }
0x15ab   : > { %v12150_v34 = vpop.eup %12149  ;;  %8916 = vst [vmem:[%s17716_s23 + $0x18] sm:$0xff] %v8884_v54  ;;  %v8848_v22 = vmul.f32 %v17703_v47, %v8810_v41  ;;  %12163 = vrsqrt.f32 %v8754_v60 }
0x15ac   : > { %v12152_v31 = vpop.eup %12151  ;;  %v8887_v15 = vadd.f32 %v17709_v62, %v8849_v28  ;;  %v8813_v18 = vmul.f32 %v12150_v34, %v17577_v44  ;;  %v8756_v29 = vadd.f32 1e-12, %v8724_v50 }
0x15ad   : > { %v8886_v20 = vadd.f32 %v17709_v62, %v8848_v22  ;;  %v8812_v2 = vmul.f32 %v12152_v31, %v17574_v19 }
0x15ae   : > { %8919 = vst [vmem:[%s17716_s23 + $0x30] sm:$0xff] %v8887_v15  ;;  %v8851_v7 = vmul.f32 %v17703_v47, %v8813_v18  ;;  %12165 = vrsqrt.f32 %v8756_v29 }
0x15af   : > { %v12154_v42 = vpop.eup %12153  ;;  %8918 = vst [vmem:[%s17716_s23 + $0x28] sm:$0xff] %v8886_v20  ;;  %v8850_v55 = vmul.f32 %v17703_v47, %v8812_v2 }
0x15b0   : > { %v12156_v61 = vpop.eup %12155  ;;  %v8889_v38 = vadd.f32 %v17709_v62, %v8851_v7  ;;  %v8815_v44 = vmul.f32 %v12154_v42, %v17585_v52 }
0x15b1   : > { %v8888_v17 = vadd.f32 %v17709_v62, %v8850_v55  ;;  %v8814_v40 = vmul.f32 %v12156_v61, %v17582_v23 }
0x15b2   : > { %8921 = vst [vmem:[%s17716_s23 + $0x40] sm:$0xff] %v8889_v38  ;;  %v8853_v19 = vmul.f32 %v17703_v47, %v8815_v44 }
0x15b3   : > { %v12158_v35 = vpop.eup %12157  ;;  %8920 = vst [vmem:[%s17716_s23 + $0x38] sm:$0xff] %v8888_v17  ;;  %v8852_v24 = vmul.f32 %v17703_v47, %v8814_v40 }
0x15b4   : > { %v12160_v63 = vpop.eup %12159  ;;  %v8891_v49 = vadd.f32 %v17709_v62, %v8853_v19  ;;  %v8817_v59 = vmul.f32 %v12158_v35, %v17597_v36 }
0x15b5   : > { %v8890_v52 = vadd.f32 %v17709_v62, %v8852_v24  ;;  %v8816_v37 = vmul.f32 %v12160_v63, %v17592_v32 }
0x15b6   : > { %8923 = vst [vmem:[%s17716_s23 + $0x50] sm:$0xff] %v8891_v49  ;;  %v8855_v23 = vmul.f32 %v17703_v47, %v8817_v59 }
0x15b7   : > { %v12162_v45 = vpop.eup %12161  ;;  %8922 = vst [vmem:[%s17716_s23 + $0x48] sm:$0xff] %v8890_v52  ;;  %v8854_v58 = vmul.f32 %v17703_v47, %v8816_v37 }
0x15b8   : > { %v12164_v14 = vpop.eup %12163  ;;  %v8893_v0 = vadd.f32 %v17709_v62, %v8855_v23  ;;  %v8819_v26 = vmul.f32 %v12162_v45, %v17607_v13 }
0x15b9   : > { %v8892_v36 = vadd.f32 %v17709_v62, %v8854_v58  ;;  %v8818_v27 = vmul.f32 %v12164_v14, %v17604_v39 }
0x15ba   : > { %8925 = vst [vmem:[%s17716_s23 + $0x60] sm:$0xff] %v8893_v0  ;;  %v8857_v32 = vmul.f32 %v17703_v47, %v8819_v26 }
0x15bb   : > { %v12166_v51 = vpop.eup %12165  ;;  %8924 = vst [vmem:[%s17716_s23 + $0x58] sm:$0xff] %v8892_v36  ;;  %v8856_v6 = vmul.f32 %v17703_v47, %v8818_v27 }
0x15bc   : > { %v8895_v30 = vadd.f32 %v17709_v62, %v8857_v32  ;;  %v8820_v57 = vmul.f32 %v12166_v51, %v17612_v48 }
0x15bd   : > { %v8894_v60 = vadd.f32 %v17709_v62, %v8856_v6  ;;  %v8678_v54 = vpop.xlane.xlu1 %8677 }
0x15be   : > { %8927 = vst [vmem:[%s17716_s23 + $0x70] sm:$0xff] %v8895_v30  ;;  %v8858_v13 = vmul.f32 %v17703_v47, %v8820_v57  ;;  %v8725_v41 = vmul.f32 0.0078125, %v8678_v54 }
0x15bf   : > { %8926 = vst [vmem:[%s17716_s23 + $0x68] sm:$0xff] %v8894_v60 }
0x15c0   : > { %v8896_v39 = vadd.f32 %v17709_v62, %v8858_v13  ;;  %v8757_v1 = vadd.f32 1e-12, %v8725_v41 }
0x15c1   : > { %v8680_v28 = vpop.xlane.xlu0 %8679 }
0x15c2   : > { %8928 = vst [vmem:[%s17716_s23 + $0x78] sm:$0xff] %v8896_v39  ;;  %12167 = vrsqrt.f32 %v8757_v1  ;;  %v8726_v50 = vmul.f32 0.0078125, %v8680_v28 }
0x15c4   : > { %v8758_v34 = vadd.f32 1e-12, %v8726_v50 }
0x15c5   : > { %v8682_v22 = vpop.xlane.xlu1 %8681 }
0x15c6   : > { %12169 = vrsqrt.f32 %v8758_v34  ;;  %v8727_v31 = vmul.f32 0.0078125, %v8682_v22 }
0x15c8   : > { %v8759_v48 = vadd.f32 1e-12, %v8727_v31 }
0x15c9   : > { %v8684_v15 = vpop.xlane.xlu0 %8683 }
0x15ca   : > { %12171 = vrsqrt.f32 %v8759_v48  ;;  %v8728_v18 = vmul.f32 0.0078125, %v8684_v15 }
0x15cc   : > { %v8760_v29 = vadd.f32 1e-12, %v8728_v18 }
0x15cd   : > { %v8686_v20 = vpop.xlane.xlu1 %8685 }
0x15ce   : > { %12173 = vrsqrt.f32 %v8760_v29  ;;  %v8729_v2 = vmul.f32 0.0078125, %v8686_v20 }
0x15cf   : > { %v12168_v7 = vpop.eup %12167 }
0x15d0   : > { %v8821_v42 = vmul.f32 %v12168_v7, %v17621_v25  ;;  %v8761_v55 = vadd.f32 1e-12, %v8729_v2 }
0x15d1   : > { %v8688_v61 = vpop.xlane.xlu0 %8687 }
0x15d2   : > { %v8859_v38 = vmul.f32 %v17703_v47, %v8821_v42  ;;  %12175 = vrsqrt.f32 %v8761_v55  ;;  %v8730_v44 = vmul.f32 0.0078125, %v8688_v61 }
0x15d3   : > { %v12170_v17 = vpop.eup %12169 }
0x15d4   : > { %v8897_v40 = vadd.f32 %v17709_v62, %v8859_v38  ;;  %v8822_v19 = vmul.f32 %v12170_v17, %v17626_v16  ;;  %v8762_v35 = vadd.f32 1e-12, %v8730_v44 }
0x15d5   : > { %v8690_v24 = vpop.xlane.xlu1 %8689 }
0x15d6   : > { %8929 = vst [vmem:[%s17716_s23 + $0x80] sm:$0xff] %v8897_v40  ;;  %v8860_v63 = vmul.f32 %v17703_v47, %v8822_v19  ;;  %12177 = vrsqrt.f32 %v8762_v35  ;;  %v8731_v25 = vmul.f32 0.0078125, %v8690_v24 }
0x15d7   : > { %v12172_v49 = vpop.eup %12171 }
0x15d8   : > { %v8898_v59 = vadd.f32 %v17709_v62, %v8860_v63  ;;  %v8823_v52 = vmul.f32 %v12172_v49, %v17631_v43  ;;  %v8763_v37 = vadd.f32 1e-12, %v8731_v25 }
0x15d9   : > { %v8692_v23 = vpop.xlane.xlu0 %8691 }
0x15da   : > { %8930 = vst [vmem:[%s17716_s23 + $0x88] sm:$0xff] %v8898_v59  ;;  %v8861_v45 = vmul.f32 %v17703_v47, %v8823_v52  ;;  %12179 = vrsqrt.f32 %v8763_v37  ;;  %v8732_v16 = vmul.f32 0.0078125, %v8692_v23 }
0x15db   : > { %v12174_v58 = vpop.eup %12173 }
0x15dc   : > { %v8899_v14 = vadd.f32 %v17709_v62, %v8861_v45  ;;  %v8824_v0 = vmul.f32 %v12174_v58, %v17636_v9  ;;  %v8764_v26 = vadd.f32 1e-12, %v8732_v16 }
0x15de   : > { %8931 = vst [vmem:[%s17716_s23 + $0x90] sm:$0xff] %v8899_v14  ;;  %v8862_v36 = vmul.f32 %v17703_v47, %v8824_v0  ;;  %12181 = vrsqrt.f32 %v8764_v26 }
0x15df   : > { %v12176_v43 = vpop.eup %12175 }
0x15e0   : > { %v8900_v27 = vadd.f32 %v17709_v62, %v8862_v36  ;;  %v8825_v32 = vmul.f32 %v12176_v43, %v17641_v33 }
0x15e2   : > { %8932 = vst [vmem:[%s17716_s23 + $0x98] sm:$0xff] %v8900_v27  ;;  %v8863_v51 = vmul.f32 %v17703_v47, %v8825_v32 }
0x15e3   : > { %v12178_v6 = vpop.eup %12177 }
0x15e4   : > { %v8901_v30 = vadd.f32 %v17709_v62, %v8863_v51  ;;  %v8826_v9 = vmul.f32 %v12178_v6, %v17646_v12 }
0x15e6   : > { %8933 = vst [vmem:[%s17716_s23 + $0xa0] sm:$0xff] %v8901_v30  ;;  %v8864_v57 = vmul.f32 %v17703_v47, %v8826_v9 }
0x15e7   : > { %v12180_v60 = vpop.eup %12179 }
0x15e8   : > { %v8902_v54 = vadd.f32 %v17709_v62, %v8864_v57  ;;  %v8827_v13 = vmul.f32 %v12180_v60, %v17651_v8 }
0x15ea   : > { %8934 = vst [vmem:[%s17716_s23 + $0xa8] sm:$0xff] %v8902_v54  ;;  %v8865_v33 = vmul.f32 %v17703_v47, %v8827_v13 }
0x15eb   : > { %v12182_v41 = vpop.eup %12181 }
0x15ec   : > { %v8903_v39 = vadd.f32 %v17709_v62, %v8865_v33  ;;  %v8828_v1 = vmul.f32 %v12182_v41, %v17656_v10 }
0x15ee   : > { %8935 = vst [vmem:[%s17716_s23 + $0xb0] sm:$0xff] %v8903_v39  ;;  %v8866_v28 = vmul.f32 %v17703_v47, %v8828_v1 }
0x15f0   : > { %v8904_v12 = vadd.f32 %v17709_v62, %v8866_v28 }
0x15f2   : > { %8936 = vst [vmem:[%s17716_s23 + $0xb8] sm:$0xff] %v8904_v12 }
0x15fd   : > { %v8694_v50 = vpop.xlane.xlu1 %8693 }
0x15fe   : > { %v8733_v34 = vmul.f32 0.0078125, %v8694_v50 }
0x1600   : > { %v8765_v22 = vadd.f32 1e-12, %v8733_v34 }
0x1601   : > { %v8696_v31 = vpop.xlane.xlu0 %8695 }
0x1602   : > { %12183 = vrsqrt.f32 %v8765_v22  ;;  %v8734_v8 = vmul.f32 0.0078125, %v8696_v31 }
0x1604   : > { %v8766_v48 = vadd.f32 1e-12, %v8734_v8 }
0x1605   : > { %v8698_v15 = vpop.xlane.xlu1 %8697 }
0x1606   : > { %12185 = vrsqrt.f32 %v8766_v48  ;;  %v8735_v18 = vmul.f32 0.0078125, %v8698_v15 }
0x1608   : > { %v8767_v29 = vadd.f32 1e-12, %v8735_v18 }
0x1609   : > { %v8700_v20 = vpop.xlane.xlu0 %8699 }
0x160a   : > { %12187 = vrsqrt.f32 %v8767_v29  ;;  %v8736_v10 = vmul.f32 0.0078125, %v8700_v20 }
0x160c   : > { %v8768_v2 = vadd.f32 1e-12, %v8736_v10 }
0x160d   : > { %v8702_v7 = vpop.xlane.xlu1 %8701 }
0x160e   : > { %12189 = vrsqrt.f32 %v8768_v2  ;;  %v8737_v42 = vmul.f32 0.0078125, %v8702_v7 }
0x160f   : > { %v12184_v55 = vpop.eup %12183 }
0x1610   : > { %v8829_v61 = vmul.f32 %v12184_v55, %v17661_v21  ;;  %v8769_v38 = vadd.f32 1e-12, %v8737_v42 }
0x1611   : > { %v8704_v44 = vpop.xlane.xlu0 %8703 }
0x1612   : > { %v8867_v17 = vmul.f32 %v17703_v47, %v8829_v61  ;;  %12191 = vrsqrt.f32 %v8769_v38  ;;  %v8738_v40 = vmul.f32 0.0078125, %v8704_v44 }
0x1613   : > { %v12186_v19 = vpop.eup %12185 }
0x1614   : > { %v8905_v35 = vadd.f32 %v17709_v62, %v8867_v17  ;;  %v8830_v24 = vmul.f32 %v12186_v19, %v17666_v11  ;;  %v8770_v63 = vadd.f32 1e-12, %v8738_v40 }
0x1615   : > { %v8706_v25 = vpop.xlane.xlu1 %8705 }
0x1616   : > { %8937 = vst [vmem:[%s17716_s23 + $0xc0] sm:$0xff] %v8905_v35  ;;  %v8868_v49 = vmul.f32 %v17703_v47, %v8830_v24  ;;  %12193 = vrsqrt.f32 %v8770_v63  ;;  %v8739_v21 = vmul.f32 0.0078125, %v8706_v25 }
0x1617   : > { %v12188_v59 = vpop.eup %12187 }
0x1618   : > { %v8906_v52 = vadd.f32 %v17709_v62, %v8868_v49  ;;  %v8831_v37 = vmul.f32 %v12188_v59, %v17671_v4  ;;  %v8771_v23 = vadd.f32 1e-12, %v8739_v21 }
0x1619   : > { %v8708_v45 = vpop.xlane.xlu0 %8707 }
0x161a   : > { %8938 = vst [vmem:[%s17716_s23 + $0xc8] sm:$0xff] %v8906_v52  ;;  %v8869_v16 = vmul.f32 %v17703_v47, %v8831_v37  ;;  %12195 = vrsqrt.f32 %v8771_v23  ;;  %v8740_v11 = vmul.f32 0.0078125, %v8708_v45 }
0x161b   : > { %v12190_v58 = vpop.eup %12189 }
0x161c   : > { %v8907_v14 = vadd.f32 %v17709_v62, %v8869_v16  ;;  %v8832_v0 = vmul.f32 %v12190_v58, %v17676_v53  ;;  %v8772_v26 = vadd.f32 1e-12, %v8740_v11 }
0x161e   : > { %8939 = vst [vmem:[%s17716_s23 + $0xd0] sm:$0xff] %v8907_v14  ;;  %v8870_v36 = vmul.f32 %v17703_v47, %v8832_v0  ;;  %12197 = vrsqrt.f32 %v8772_v26 }
0x161f   : > { %v12192_v4 = vpop.eup %12191 }
0x1620   : > { %v8908_v43 = vadd.f32 %v17709_v62, %v8870_v36  ;;  %v8833_v27 = vmul.f32 %v12192_v4, %v17681_v5 }
0x1622   : > { %8940 = vst [vmem:[%s17716_s23 + $0xd8] sm:$0xff] %v8908_v43  ;;  %v8871_v32 = vmul.f32 %v17703_v47, %v8833_v27 }
0x1623   : > { %v12194_v51 = vpop.eup %12193 }
0x1624   : > { %v8909_v53 = vadd.f32 %v17709_v62, %v8871_v32  ;;  %v8834_v6 = vmul.f32 %v12194_v51, %v17686_v56 }
0x1626   : > { %8941 = vst [vmem:[%s17716_s23 + $0xe0] sm:$0xff] %v8909_v53  ;;  %v8872_v30 = vmul.f32 %v17703_v47, %v8834_v6 }
0x1627   : > { %v12196_v9 = vpop.eup %12195 }
0x1628   : > { %v8910_v57 = vadd.f32 %v17709_v62, %v8872_v30  ;;  %v8835_v5 = vmul.f32 %v12196_v9, %v17691_v46 }
0x162a   : > { %8942 = vst [vmem:[%s17716_s23 + $0xe8] sm:$0xff] %v8910_v57  ;;  %v8873_v60 = vmul.f32 %v17703_v47, %v8835_v5 }
0x162b   : > { %v12198_v54 = vpop.eup %12197 }
0x162c   : > { %v8911_v13 = vadd.f32 %v17709_v62, %v8873_v60  ;;  %v8836_v33 = vmul.f32 %v12198_v54, %v17696_v3 }
0x162e   : > { %8943 = vst [vmem:[%s17716_s23 + $0xf0] sm:$0xff] %v8911_v13  ;;  %v8874_v56 = vmul.f32 %v17703_v47, %v8836_v33 }
0x1630   : > { %v8912_v46 = vadd.f32 %v17709_v62, %v8874_v56 }
0x1632   : > { %8944 = vst [vmem:[%s17716_s23 + $0xf8] sm:$0xff] %v8912_v46 }
0x1633   : > { %12484 = shalt.err (!%p12481_p2)
}
0x1634   : > { %s12485_s21 = scalar_lea.hbm %s17844_s27, 4096  ;;  %s12489_s22 = scalar_lea.hbm %s18833_s8, 8192 }
0x1635   : > { %p12486_p8 = scmp.ne.s32.totalorder %s17844_s27, %s12485_s21  ;;  %p12490_p9 = scmp.lt.s32.totalorder %s17844_s27, %s18833_s8 }
0x1636   : > { %p12491_p13 = scmp.lt.s32.totalorder %s12489_s22, %s12485_s21 }
0x1637   : > { %p12487_p11 = pnand %p12486_p8, %p18834_p1 }
0x1638   : > { %p12492_p5 = por %p12491_p13, %p12490_p9 }
0x1639   : > { %p12488_p3 = pneg %p12487_p11 }
0x163b   : > { %p12493_p10 = pnand %p12492_p5, %p12488_p3 }
0x163d   : > { %12496 = shalt.err (!%p12493_p10)
}
0x163e   : > { %s12570_s26 = smov 128   ;;  %s12571_s29 = smov 8  }
0x163f   : > { %11475 = dma.vmem_to_hbm [thread:$0]  (%p18834_p1), %s17846_s2, 4096, %s17844_s27, %s8946_s20, %s12570_s26, %s12570_s26, %s12571_s29  }
0x1640 PF: > { %s18835_s4 = sld [smem:[#allocation20_spill]]  ;;  %p18838_p12 = scmp.ge.s32.totalorder %s12551_s16, 2 }
0x1641   : > { %s18836_s28 = sld [smem:[#allocation22_spill]] }
0x1646   : > { %s8975_s17 = sand.u32 1, %s18835_s4  }
0x1647   : > { %p18837_p6 = scmp.ne.s32.totalorder %s18836_s28, 0  ;;  %s8976_s10 = scalar_lea.sflag [#allocation4], %s8975_s17 }
0x1649   : > { %p11498_p4 = pnand %p18838_p12, %p18837_p6 }
0x164b   : > { %p11499_p0 = pneg %p11498_p4 }
0x164d   : > { %12534 = dma.done.wait (%p11499_p0), %s8976_s10, 4096  }
0x164e   : > { %12536 = vsyncadd (%p11499_p0), %s8976_s10, 4294963200  ;;  %s18839_s16 = sld [smem:[#allocation23_spill]]  ;;  %s18842_s29 = smov %s12543_s30 }
0x164f   : > { %s18840_s15 = sld [smem:[#allocation21_spill]] }
0x1650   : > { %s18841_s21 = sld [smem:[#allocation25_spill]] }
0x1654   : > { %p32_p7 = scmp.ge.s32.totalorder %s18839_s16, 4  }
0x1655   : > { %s18843_s30 = smov %s18840_s15 }
0x1656   : > { %s18844_s15 = smov %s18841_s21  ;;  %34 = sbr.rel (!%p32_p7) target bundleno = 15 (0xf), region = 153 }
0x165b   :  { %8981 = vsyncpa [#allocation3], 1 }
0x165c   :  { %8983 = vsyncpa [#allocation3 + $0x1], 1 }
0x165d   :  { %8984 = vsyncpa [#allocation6], 1 }
0x165e   :  { %8986 = vsyncpa [#allocation6 + $0x1], 1 }
0x165f   :  { %8987 = vsyncpa [#allocation9], 1 }
0x1660   :  { %8988 = vsyncpa [#allocation12], 1 }
0x1661   :  { %8989 = vsyncpa [#allocation4], 1 }
0x1662   :  { %8991 = vsyncpa [#allocation4 + $0x1], 1 }

</bundles_post_ra>
